<compile_context>
chip_gen: v5e
topology: v5e:2x2
jax: 0.10.0
libtpu: 0.0.40
codegen_flags: <defaults>
</compile_context>

<pallas_src>
import functools
import math

import jax
import jax.numpy as jnp
from jax import lax
from jax.experimental import pallas as pl
from jax.experimental.pallas import tpu as pltpu


# ----------------------------------------------------------------------------
# Generation-dependent scoped-VMEM limit
# ----------------------------------------------------------------------------
@functools.lru_cache(maxsize=None)
def _vmem_limit_bytes():
    default = 32 * 1024 * 1024                      # safe on every generation
    try:
        info = pltpu.get_tpu_info()
        cap = int(getattr(info, "vmem_capacity_bytes", 0))
    except Exception:
        cap = 0
    if cap >= 128 * 1024 * 1024:                    # v5e / v6e: 128 MiB physical
        return 96 * 1024 * 1024
    return default                                  # v7x (64 MiB) / unknown


# ----------------------------------------------------------------------------
# Shared conv helper: 3x3 "same" conv of one sample on the MXU.
# Input is staged once into a kx-major bf16 buffer; taps read free leading-dim
# slices; accumulation stays an SSA f32 value (no VMEM RMW).
# ----------------------------------------------------------------------------
def _conv3x3(x_ref, w_ref, b_ref, packed_ref):
    # x_ref:      (1, H, W, Cin)     bf16 input sample block
    # w_ref:      (9, Cin, Cout)     bf16 taps, tap t = ky*3 + kx
    # b_ref:      (1, Cout)          f32 bias
    # packed_ref: (3, H+2, W, Cin)   bf16 scratch: packed[kx, h, w, :] = x_pad[h, w+kx, :]
    # returns:    (H*W, Cout)        f32 value
    H, W, Cin = x_ref.shape[1], x_ref.shape[2], x_ref.shape[3]
    x = x_ref[0]                                             # (H, W, Cin) bf16

    # Constant zero border only (interior is fully overwritten each step).
    zrow = jnp.zeros((3, 1, W, Cin), jnp.bfloat16)
    zcol = jnp.zeros((H, 1, Cin), jnp.bfloat16)
    packed_ref[:, 0:1, :, :] = zrow                          # top halo row (all kx)
    packed_ref[:, H + 1:H + 2, :, :] = zrow                  # bottom halo row (all kx)
    packed_ref[0, 1:H + 1, 0:1, :] = zcol                    # kx=0 left halo column
    packed_ref[2, 1:H + 1, W - 1:W, :] = zcol                # kx=2 right halo column

    # Three kx-shifted copies, written once, reused across all three ky taps.
    packed_ref[0, 1:H + 1, 1:W, :] = x[:, 0:W - 1, :]        # kx = 0
    packed_ref[1, 1:H + 1, :, :] = x                         # kx = 1
    packed_ref[2, 1:H + 1, 0:W - 1, :] = x[:, 1:W, :]        # kx = 2

    acc = None
    for t in range(9):                                       # static 9-tap unroll
        ky, kx = t // 3, t % 3
        patch = packed_ref[kx, ky:ky + H].reshape(H * W, Cin)    # free view slices
        p = jnp.dot(patch, w_ref[t], preferred_element_type=jnp.float32)
        acc = p if acc is None else acc + p
    return acc + b_ref[...]                                  # bias in the epilogue


# ----------------------------------------------------------------------------
# Fused 3x3 conv + bias + GroupNorm + ReLU (one layer, one sample per grid step)
# ----------------------------------------------------------------------------
def _conv_gn_relu_kernel(x_ref, w_ref, b_ref, gmap_ref, gmapt_ref,
                         gamma_ref, beta_ref, o_ref, packed_ref,
                         *, eps, n_per_group):
    # gmap_ref: (Cout, G) one-hot channel->group; gmapt_ref: (G, Cout)
    # gamma_ref / beta_ref: (1, Cout) f32;  o_ref: (1, H, W, Cout) bf16
    H, W = o_ref.shape[1], o_ref.shape[2]
    Cout = o_ref.shape[3]

    acc = _conv3x3(x_ref, w_ref, b_ref, packed_ref)          # (H*W, Cout) f32 value

    # ---- GroupNorm (two-pass, centered variance) + ReLU, all f32 ----------
    ones_row = jnp.ones((1, H * W), jnp.float32)
    inv_n = 1.0 / n_per_group

    # Per-channel sums on the MXU, folded into per-group means.
    s_c = jnp.dot(ones_row, acc, preferred_element_type=jnp.float32)
    mean_g = jnp.dot(s_c, gmap_ref[...], preferred_element_type=jnp.float32) * inv_n
    mean_c = jnp.dot(mean_g, gmapt_ref[...], preferred_element_type=jnp.float32)

    # Centered value stays in registers (no in-place VMEM write-back).
    d = acc - mean_c
    ss_c = jnp.dot(ones_row, d * d, preferred_element_type=jnp.float32)
    var_g = jnp.dot(ss_c, gmap_ref[...], preferred_element_type=jnp.float32) * inv_n
    inv_g = lax.rsqrt(var_g + eps)
    inv_c = jnp.dot(inv_g, gmapt_ref[...], preferred_element_type=jnp.float32)

    # Fold the affine into one per-channel scale/shift, apply ReLU.
    scale = inv_c * gamma_ref[...]
    y = jnp.maximum(d * scale + beta_ref[...], 0.0)
    o_ref[0] = y.reshape(H, W, Cout).astype(o_ref.dtype)


# ----------------------------------------------------------------------------
# Final 3x3 conv + bias (no norm / activation), lane-dense output channels
# ----------------------------------------------------------------------------
def _conv_bias_kernel(x_ref, w_ref, b_ref, o_ref, packed_ref):
    H, W = o_ref.shape[1], o_ref.shape[2]
    Cout = o_ref.shape[3]
    acc = _conv3x3(x_ref, w_ref, b_ref, packed_ref)
    o_ref[0] = acc.reshape(H, W, Cout).astype(o_ref.dtype)


# ----------------------------------------------------------------------------
# Wrappers
# ----------------------------------------------------------------------------
def conv3x3_gn_relu(x, w, b, gamma, beta, *, num_groups=32, eps=1e-5):
    """x: (B,H,W,Cin) bf16; w: (9,Cin,Cout) bf16; b/gamma/beta: (1,Cout) f32."""
    B, H, W, Cin = x.shape
    Cout = w.shape[2]
    assert Cout % num_groups == 0
    group_id = jnp.arange(Cout) // (Cout // num_groups)
    gmap = jax.nn.one_hot(group_id, num_groups, dtype=jnp.float32)   # (Cout, G)
    gmapt = gmap.T                                                   # (G, Cout)
    n_per_group = float(H * W * (Cout // num_groups))

    kern = functools.partial(_conv_gn_relu_kernel, eps=eps, n_per_group=n_per_group)
    return pl.pallas_call(
        kern,
        out_shape=jax.ShapeDtypeStruct((B, H, W, Cout), jnp.bfloat16),
        grid_spec=pltpu.PrefetchScalarGridSpec(
            num_scalar_prefetch=0,
            grid=(B,),
            in_specs=[
                pl.BlockSpec((1, H, W, Cin), lambda bb: (bb, 0, 0, 0)),
                pl.BlockSpec((9, Cin, Cout), lambda bb: (0, 0, 0)),
                pl.BlockSpec((1, Cout), lambda bb: (0, 0)),
                pl.BlockSpec((Cout, num_groups), lambda bb: (0, 0)),
                pl.BlockSpec((num_groups, Cout), lambda bb: (0, 0)),
                pl.BlockSpec((1, Cout), lambda bb: (0, 0)),
                pl.BlockSpec((1, Cout), lambda bb: (0, 0)),
            ],
            out_specs=pl.BlockSpec((1, H, W, Cout), lambda bb: (bb, 0, 0, 0)),
            scratch_shapes=[
                pltpu.VMEM((3, H + 2, W, Cin), jnp.bfloat16),   # kx-major halo input
            ],
        ),
        compiler_params=pltpu.CompilerParams(
            dimension_semantics=("parallel",),
            vmem_limit_bytes=_vmem_limit_bytes(),
        ),
    )(x, w, b, gmap, gmapt, gamma, beta)


def conv3x3_bias(x, w, b, *, lane_multiple=128):
    """Final conv. Output channels padded up to a multiple of 128 for dense stores.

    Returns (B, H, W, Cout_pad) f32; caller slices off the channel padding."""
    B, H, W, Cin = x.shape
    Cout = w.shape[2]
    Cout_pad = ((Cout + lane_multiple - 1) // lane_multiple) * lane_multiple
    if Cout_pad != Cout:
        w = jnp.pad(w, ((0, 0), (0, 0), (0, Cout_pad - Cout)))
        b = jnp.pad(b, ((0, 0), (0, Cout_pad - Cout)))

    return pl.pallas_call(
        _conv_bias_kernel,
        out_shape=jax.ShapeDtypeStruct((B, H, W, Cout_pad), jnp.float32),
        grid_spec=pltpu.PrefetchScalarGridSpec(
            num_scalar_prefetch=0,
            grid=(B,),
            in_specs=[
                pl.BlockSpec((1, H, W, Cin), lambda bb: (bb, 0, 0, 0)),
                pl.BlockSpec((9, Cin, Cout_pad), lambda bb: (0, 0, 0)),
                pl.BlockSpec((1, Cout_pad), lambda bb: (0, 0)),
            ],
            out_specs=pl.BlockSpec((1, H, W, Cout_pad), lambda bb: (bb, 0, 0, 0)),
            scratch_shapes=[
                pltpu.VMEM((3, H + 2, W, Cin), jnp.bfloat16),
            ],
        ),
        compiler_params=pltpu.CompilerParams(
            dimension_semantics=("parallel",),
            vmem_limit_bytes=_vmem_limit_bytes(),
        ),
    )(x, w, b)


# ----------------------------------------------------------------------------
# Parameter construction (matches PyTorch __init__ shapes / xavier_normal init)
# ----------------------------------------------------------------------------
def _xavier_normal_conv(key, cout, cin):
    std = math.sqrt(2.0 / (cin * 9 + cout * 9))
    return jax.random.normal(key, (cout, cin, 3, 3), jnp.float32) * std


def _to_kernel_weight(w_pt):
    # (Cout, Cin, 3, 3) -> (3, 3, Cin, Cout) -> (9, Cin, Cout), tap t = ky*3 + kx
    cout, cin, _, _ = w_pt.shape
    return jnp.transpose(w_pt, (2, 3, 1, 0)).reshape(9, cin, cout)


def init_params(key, num_features_in, num_anchors, feature_size=256):
    keys = jax.random.split(key, 5)
    dims = [(feature_size, num_features_in),
            (feature_size, feature_size),
            (feature_size, feature_size),
            (feature_size, feature_size),
            (num_anchors * 4, feature_size)]
    params = []
    for k, (cout, cin) in zip(keys, dims):
        w = _to_kernel_weight(_xavier_normal_conv(k, cout, cin)).astype(jnp.bfloat16)
        b = jnp.zeros((1, cout), jnp.float32)
        params.append((w, b))
    gn = [(jnp.ones((1, feature_size), jnp.float32),
           jnp.zeros((1, feature_size), jnp.float32)) for _ in range(4)]
    return params, gn


# ----------------------------------------------------------------------------
# Full forward pass (equivalent to RegressionModel.forward)
# ----------------------------------------------------------------------------
def regression_model_forward(x_nchw, params, gn_params, num_anchors):
    # NCHW (PyTorch) -> NHWC; bf16 activations between layers.
    x = jnp.transpose(x_nchw, (0, 2, 3, 1)).astype(jnp.bfloat16)
    for i in range(4):
        w, b = params[i]
        g, be = gn_params[i]
        x = conv3x3_gn_relu(x, w, b, g, be)
    wo, bo = params[4]
    out = conv3x3_bias(x, wo, bo)                     # (B, H, W, Cout_pad) f32
    B, H, W, _ = out.shape
    out = out[..., :num_anchors * 4]                  # drop lane padding
    # PyTorch: NCHW -> permute(0,2,3,1) -> view(B, -1, 4); NHWC already matches.
    return out.reshape(B, H * W * num_anchors, 4)


# ----------------------------------------------------------------------------
# Pure-JAX reference (mirrors the kernel's bf16 cast points, f32 math)
# ----------------------------------------------------------------------------
def _ref_conv3x3(x, w9, b):
    cin, cout = w9.shape[1], w9.shape[2]
    w_hwio = w9.reshape(3, 3, cin, cout)
    y = lax.conv_general_dilated(x, w_hwio, (1, 1), "SAME",
                                 dimension_numbers=("NHWC", "HWIO", "NHWC"),
                                 preferred_element_type=jnp.float32)
    return y + b.reshape(1, 1, 1, cout)


def _ref_gn(x, gamma, beta, num_groups=32, eps=1e-5):
    B, H, W, C = x.shape
    xg = x.reshape(B, H, W, num_groups, C // num_groups)
    mean = jnp.mean(xg, axis=(1, 2, 4), keepdims=True)
    var = jnp.mean((xg - mean) ** 2, axis=(1, 2, 4), keepdims=True)
    y = ((xg - mean) * lax.rsqrt(var + eps)).reshape(B, H, W, C)
    return y * gamma.reshape(1, 1, 1, C) + beta.reshape(1, 1, 1, C)


def _ref_forward(x_nchw, params, gn_params, num_anchors):
    x = jnp.transpose(x_nchw, (0, 2, 3, 1)).astype(jnp.bfloat16)
    for i in range(4):
        w, b = params[i]
        g, be = gn_params[i]
        y = _ref_gn(_ref_conv3x3(x, w, b), g, be)
        x = jnp.maximum(y, 0.0).astype(jnp.bfloat16)
    wo, bo = params[4]
    out = _ref_conv3x3(x, wo, bo)
    B, H, W, _ = out.shape
    return out.reshape(B, H * W * num_anchors, 4)


if __name__ == "__main__":
    # Small, shape-consistent configuration.
    B, C_IN, HW = 2, 4, 16
    NUM_ANCHORS = 9
    FEATURE_SIZE = 64            # must be divisible by 32 (GroupNorm groups)

    key = jax.random.PRNGKey(0)
    kx, kp = jax.random.split(key)
    x_nchw = jax.random.normal(kx, (B, C_IN, HW, HW), jnp.float32)   # PyTorch NCHW input
    params, gn_params = init_params(kp, C_IN, NUM_ANCHORS, FEATURE_SIZE)

    fwd = jax.jit(functools.partial(regression_model_forward, num_anchors=NUM_ANCHORS))
    out = jax.block_until_ready(fwd(x_nchw, params, gn_params))
    assert out.shape == (B, HW * HW * NUM_ANCHORS, 4), out.shape

    ref = jax.block_until_ready(_ref_forward(x_nchw, params, gn_params, NUM_ANCHORS))
    max_err = float(jnp.max(jnp.abs(out - ref)))
    assert jnp.allclose(out, ref, atol=1e-2, rtol=1e-2), max_err

    print("KERNEL_OK")
</pallas_src>

<mosaic_0001>
module attributes {stable_mosaic.version = 11 : i64} {
  func.func @_conv_gn_relu_kernel(%arg0: i32, %arg1: memref<1x16x16x64xbf16, #tpu.memory_space<vmem>>, %arg2: memref<9x64x64xbf16, #tpu.memory_space<vmem>>, %arg3: memref<1x64xf32, #tpu.memory_space<vmem>>, %arg4: memref<64x32xf32, #tpu.memory_space<vmem>>, %arg5: memref<32x64xf32, #tpu.memory_space<vmem>>, %arg6: memref<1x64xf32, #tpu.memory_space<vmem>>, %arg7: memref<1x64xf32, #tpu.memory_space<vmem>>, %arg8: memref<1x16x16x64xbf16, #tpu.memory_space<vmem>>, %arg9: memref<3x18x16x64xbf16, #tpu.memory_space<vmem>>) attributes {dimension_semantics = [#tpu.dimension_semantics<parallel>], iteration_bounds = array<i64: 2>, scalar_prefetch = 0 : i64, scratch_operands = 1 : i64, tpu.core_type = #tpu.core_type<tc>, window_params = [{transform_indices = @transform_0, window_bounds = array<i64: 1, 16, 16, 64>}, {pipeline_mode = #tpu.pipeline_mode<synchronous>, transform_indices = @transform_1, window_bounds = array<i64: 9, 64, 64>}, {pipeline_mode = #tpu.pipeline_mode<synchronous>, transform_indices = @transform_2, window_bounds = array<i64: 1, 64>}, {pipeline_mode = #tpu.pipeline_mode<synchronous>, transform_indices = @transform_3, window_bounds = array<i64: 64, 32>}, {pipeline_mode = #tpu.pipeline_mode<synchronous>, transform_indices = @transform_4, window_bounds = array<i64: 32, 64>}, {pipeline_mode = #tpu.pipeline_mode<synchronous>, transform_indices = @transform_5, window_bounds = array<i64: 1, 64>}, {pipeline_mode = #tpu.pipeline_mode<synchronous>, transform_indices = @transform_6, window_bounds = array<i64: 1, 64>}, {transform_indices = @transform_7, window_bounds = array<i64: 1, 16, 16, 64>}]} {
    %c0 = arith.constant 0 : index
    %c0_0 = arith.constant 0 : index
    %c0_1 = arith.constant 0 : index
    %c0_2 = arith.constant 0 : index
    %0 = vector.load %arg1[%c0, %c0_0, %c0_1, %c0_2] : memref<1x16x16x64xbf16, #tpu.memory_space<vmem>>, vector<1x16x16x64xbf16>
    %1 = vector.shape_cast %0 : vector<1x16x16x64xbf16> to vector<16x16x64xbf16>
    %cst = arith.constant 0.000000e+00 : bf16
    %2 = vector.broadcast %cst : bf16 to vector<3x1x16x64xbf16>
    %cst_3 = arith.constant 0.000000e+00 : bf16
    %3 = vector.broadcast %cst_3 : bf16 to vector<16x1x64xbf16>
    %c0_4 = arith.constant 0 : index
    %c0_5 = arith.constant 0 : index
    %c0_6 = arith.constant 0 : index
    %c0_7 = arith.constant 0 : index
    %4 = vector.load %arg9[%c0_4, %c0_5, %c0_6, %c0_7] : memref<3x18x16x64xbf16, #tpu.memory_space<vmem>>, vector<3x1x16x64xbf16>
    tpu.vector_store %arg9[%c0_4, %c0_5, %c0_6, %c0_7], %2 {strides = array<i32>} : memref<3x18x16x64xbf16, #tpu.memory_space<vmem>>, vector<3x1x16x64xbf16>,
    %c0_8 = arith.constant 0 : index
    %c17 = arith.constant 17 : index
    %c0_9 = arith.constant 0 : index
    %c0_10 = arith.constant 0 : index
    %5 = vector.load %arg9[%c0_8, %c17, %c0_9, %c0_10] : memref<3x18x16x64xbf16, #tpu.memory_space<vmem>>, vector<3x1x16x64xbf16>
    tpu.vector_store %arg9[%c0_8, %c17, %c0_9, %c0_10], %2 {strides = array<i32>} : memref<3x18x16x64xbf16, #tpu.memory_space<vmem>>, vector<3x1x16x64xbf16>,
    %c0_11 = arith.constant 0 : index
    %c1 = arith.constant 1 : index
    %c0_12 = arith.constant 0 : index
    %c0_13 = arith.constant 0 : index
    %6 = vector.load %arg9[%c0_11, %c1, %c0_12, %c0_13] : memref<3x18x16x64xbf16, #tpu.memory_space<vmem>>, vector<1x16x1x64xbf16>
    %7 = vector.shape_cast %6 : vector<1x16x1x64xbf16> to vector<16x1x64xbf16>
    %8 = vector.shape_cast %3 : vector<16x1x64xbf16> to vector<1x16x1x64xbf16>
    tpu.vector_store %arg9[%c0_11, %c1, %c0_12, %c0_13], %8 {strides = array<i32>} : memref<3x18x16x64xbf16, #tpu.memory_space<vmem>>, vector<1x16x1x64xbf16>,
    %c2 = arith.constant 2 : index
    %c1_14 = arith.constant 1 : index
    %c15 = arith.constant 15 : index
    %c0_15 = arith.constant 0 : index
    %9 = vector.load %arg9[%c2, %c1_14, %c15, %c0_15] : memref<3x18x16x64xbf16, #tpu.memory_space<vmem>>, vector<1x16x1x64xbf16>
    %10 = vector.shape_cast %9 : vector<1x16x1x64xbf16> to vector<16x1x64xbf16>
    %11 = vector.shape_cast %3 : vector<16x1x64xbf16> to vector<1x16x1x64xbf16>
    tpu.vector_store %arg9[%c2, %c1_14, %c15, %c0_15], %11 {strides = array<i32>} : memref<3x18x16x64xbf16, #tpu.memory_space<vmem>>, vector<1x16x1x64xbf16>,
    %12 = vector.extract_strided_slice %1 {offsets = [0, 0, 0], sizes = [16, 15, 64], strides = [1, 1, 1]} : vector<16x16x64xbf16> to vector<16x15x64xbf16>
    %c0_16 = arith.constant 0 : index
    %c1_17 = arith.constant 1 : index
    %c1_18 = arith.constant 1 : index
    %c0_19 = arith.constant 0 : index
    %13 = vector.load %arg9[%c0_16, %c1_17, %c1_18, %c0_19] : memref<3x18x16x64xbf16, #tpu.memory_space<vmem>>, vector<1x16x15x64xbf16>
    %14 = vector.shape_cast %13 : vector<1x16x15x64xbf16> to vector<16x15x64xbf16>
    %15 = vector.shape_cast %12 : vector<16x15x64xbf16> to vector<1x16x15x64xbf16>
    tpu.vector_store %arg9[%c0_16, %c1_17, %c1_18, %c0_19], %15 {strides = array<i32>} : memref<3x18x16x64xbf16, #tpu.memory_space<vmem>>, vector<1x16x15x64xbf16>,
    %c1_20 = arith.constant 1 : index
    %c1_21 = arith.constant 1 : index
    %c0_22 = arith.constant 0 : index
    %c0_23 = arith.constant 0 : index
    %16 = vector.load %arg9[%c1_20, %c1_21, %c0_22, %c0_23] : memref<3x18x16x64xbf16, #tpu.memory_space<vmem>>, vector<1x16x16x64xbf16>
    %17 = vector.shape_cast %16 : vector<1x16x16x64xbf16> to vector<16x16x64xbf16>
    %18 = vector.shape_cast %1 : vector<16x16x64xbf16> to vector<1x16x16x64xbf16>
    tpu.vector_store %arg9[%c1_20, %c1_21, %c0_22, %c0_23], %18 {strides = array<i32>} : memref<3x18x16x64xbf16, #tpu.memory_space<vmem>>, vector<1x16x16x64xbf16>,
    %19 = vector.extract_strided_slice %1 {offsets = [0, 1, 0], sizes = [16, 15, 64], strides = [1, 1, 1]} : vector<16x16x64xbf16> to vector<16x15x64xbf16>
    %c2_24 = arith.constant 2 : index
    %c1_25 = arith.constant 1 : index
    %c0_26 = arith.constant 0 : index
    %c0_27 = arith.constant 0 : index
    %20 = vector.load %arg9[%c2_24, %c1_25, %c0_26, %c0_27] : memref<3x18x16x64xbf16, #tpu.memory_space<vmem>>, vector<1x16x15x64xbf16>
    %21 = vector.shape_cast %20 : vector<1x16x15x64xbf16> to vector<16x15x64xbf16>
    %22 = vector.shape_cast %19 : vector<16x15x64xbf16> to vector<1x16x15x64xbf16>
    tpu.vector_store %arg9[%c2_24, %c1_25, %c0_26, %c0_27], %22 {strides = array<i32>} : memref<3x18x16x64xbf16, #tpu.memory_space<vmem>>, vector<1x16x15x64xbf16>,
    %c0_28 = arith.constant 0 : index
    %c0_29 = arith.constant 0 : index
    %c0_30 = arith.constant 0 : index
    %c0_31 = arith.constant 0 : index
    %23 = vector.load %arg9[%c0_28, %c0_29, %c0_30, %c0_31] : memref<3x18x16x64xbf16, #tpu.memory_space<vmem>>, vector<1x16x16x64xbf16>
    %24 = vector.shape_cast %23 : vector<1x16x16x64xbf16> to vector<16x16x64xbf16>
    %25 = vector.shape_cast %24 : vector<16x16x64xbf16> to vector<256x64xbf16>
    %c0_32 = arith.constant 0 : index
    %c0_33 = arith.constant 0 : index
    %c0_34 = arith.constant 0 : index
    %26 = vector.load %arg2[%c0_32, %c0_33, %c0_34] : memref<9x64x64xbf16, #tpu.memory_space<vmem>>, vector<1x64x64xbf16>
    %27 = vector.shape_cast %26 : vector<1x64x64xbf16> to vector<64x64xbf16>
    %cst_35 = arith.constant dense<0.000000e+00> : vector<256x64xf32>
    %28 = tpu.matmul %25, %27, %cst_35 {dimension_numbers = #tpu.dot_dimension_numbers<[1], [0], [0], [1], [0, 0, 1, 1], [], []>} : vector<256x64xbf16>, vector<64x64xbf16>, vector<256x64xf32> -> vector<256x64xf32>
    %c1_36 = arith.constant 1 : index
    %c0_37 = arith.constant 0 : index
    %c0_38 = arith.constant 0 : index
    %c0_39 = arith.constant 0 : index
    %29 = vector.load %arg9[%c1_36, %c0_37, %c0_38, %c0_39] : memref<3x18x16x64xbf16, #tpu.memory_space<vmem>>, vector<1x16x16x64xbf16>
    %30 = vector.shape_cast %29 : vector<1x16x16x64xbf16> to vector<16x16x64xbf16>
    %31 = vector.shape_cast %30 : vector<16x16x64xbf16> to vector<256x64xbf16>
    %c1_40 = arith.constant 1 : index
    %c0_41 = arith.constant 0 : index
    %c0_42 = arith.constant 0 : index
    %32 = vector.load %arg2[%c1_40, %c0_41, %c0_42] : memref<9x64x64xbf16, #tpu.memory_space<vmem>>, vector<1x64x64xbf16>
    %33 = vector.shape_cast %32 : vector<1x64x64xbf16> to vector<64x64xbf16>
    %cst_43 = arith.constant dense<0.000000e+00> : vector<256x64xf32>
    %34 = tpu.matmul %31, %33, %cst_43 {dimension_numbers = #tpu.dot_dimension_numbers<[1], [0], [0], [1], [0, 0, 1, 1], [], []>} : vector<256x64xbf16>, vector<64x64xbf16>, vector<256x64xf32> -> vector<256x64xf32>
    %35 = arith.addf %28, %34 : vector<256x64xf32>
    %c2_44 = arith.constant 2 : index
    %c0_45 = arith.constant 0 : index
    %c0_46 = arith.constant 0 : index
    %c0_47 = arith.constant 0 : index
    %36 = vector.load %arg9[%c2_44, %c0_45, %c0_46, %c0_47] : memref<3x18x16x64xbf16, #tpu.memory_space<vmem>>, vector<1x16x16x64xbf16>
    %37 = vector.shape_cast %36 : vector<1x16x16x64xbf16> to vector<16x16x64xbf16>
    %38 = vector.shape_cast %37 : vector<16x16x64xbf16> to vector<256x64xbf16>
    %c2_48 = arith.constant 2 : index
    %c0_49 = arith.constant 0 : index
    %c0_50 = arith.constant 0 : index
    %39 = vector.load %arg2[%c2_48, %c0_49, %c0_50] : memref<9x64x64xbf16, #tpu.memory_space<vmem>>, vector<1x64x64xbf16>
    %40 = vector.shape_cast %39 : vector<1x64x64xbf16> to vector<64x64xbf16>
    %cst_51 = arith.constant dense<0.000000e+00> : vector<256x64xf32>
    %41 = tpu.matmul %38, %40, %cst_51 {dimension_numbers = #tpu.dot_dimension_numbers<[1], [0], [0], [1], [0, 0, 1, 1], [], []>} : vector<256x64xbf16>, vector<64x64xbf16>, vector<256x64xf32> -> vector<256x64xf32>
    %42 = arith.addf %35, %41 : vector<256x64xf32>
    %c0_52 = arith.constant 0 : index
    %c1_53 = arith.constant 1 : index
    %c0_54 = arith.constant 0 : index
    %c0_55 = arith.constant 0 : index
    %43 = vector.load %arg9[%c0_52, %c1_53, %c0_54, %c0_55] : memref<3x18x16x64xbf16, #tpu.memory_space<vmem>>, vector<1x16x16x64xbf16>
    %44 = vector.shape_cast %43 : vector<1x16x16x64xbf16> to vector<16x16x64xbf16>
    %45 = vector.shape_cast %44 : vector<16x16x64xbf16> to vector<256x64xbf16>
    %c3 = arith.constant 3 : index
    %c0_56 = arith.constant 0 : index
    %c0_57 = arith.constant 0 : index
    %46 = vector.load %arg2[%c3, %c0_56, %c0_57] : memref<9x64x64xbf16, #tpu.memory_space<vmem>>, vector<1x64x64xbf16>
    %47 = vector.shape_cast %46 : vector<1x64x64xbf16> to vector<64x64xbf16>
    %cst_58 = arith.constant dense<0.000000e+00> : vector<256x64xf32>
    %48 = tpu.matmul %45, %47, %cst_58 {dimension_numbers = #tpu.dot_dimension_numbers<[1], [0], [0], [1], [0, 0, 1, 1], [], []>} : vector<256x64xbf16>, vector<64x64xbf16>, vector<256x64xf32> -> vector<256x64xf32>
    %49 = arith.addf %42, %48 : vector<256x64xf32>
    %c1_59 = arith.constant 1 : index
    %c1_60 = arith.constant 1 : index
    %c0_61 = arith.constant 0 : index
    %c0_62 = arith.constant 0 : index
    %50 = vector.load %arg9[%c1_59, %c1_60, %c0_61, %c0_62] : memref<3x18x16x64xbf16, #tpu.memory_space<vmem>>, vector<1x16x16x64xbf16>
    %51 = vector.shape_cast %50 : vector<1x16x16x64xbf16> to vector<16x16x64xbf16>
    %52 = vector.shape_cast %51 : vector<16x16x64xbf16> to vector<256x64xbf16>
    %c4 = arith.constant 4 : index
    %c0_63 = arith.constant 0 : index
    %c0_64 = arith.constant 0 : index
    %53 = vector.load %arg2[%c4, %c0_63, %c0_64] : memref<9x64x64xbf16, #tpu.memory_space<vmem>>, vector<1x64x64xbf16>
    %54 = vector.shape_cast %53 : vector<1x64x64xbf16> to vector<64x64xbf16>
    %cst_65 = arith.constant dense<0.000000e+00> : vector<256x64xf32>
    %55 = tpu.matmul %52, %54, %cst_65 {dimension_numbers = #tpu.dot_dimension_numbers<[1], [0], [0], [1], [0, 0, 1, 1], [], []>} : vector<256x64xbf16>, vector<64x64xbf16>, vector<256x64xf32> -> vector<256x64xf32>
    %56 = arith.addf %49, %55 : vector<256x64xf32>
    %c2_66 = arith.constant 2 : index
    %c1_67 = arith.constant 1 : index
    %c0_68 = arith.constant 0 : index
    %c0_69 = arith.constant 0 : index
    %57 = vector.load %arg9[%c2_66, %c1_67, %c0_68, %c0_69] : memref<3x18x16x64xbf16, #tpu.memory_space<vmem>>, vector<1x16x16x64xbf16>
    %58 = vector.shape_cast %57 : vector<1x16x16x64xbf16> to vector<16x16x64xbf16>
    %59 = vector.shape_cast %58 : vector<16x16x64xbf16> to vector<256x64xbf16>
    %c5 = arith.constant 5 : index
    %c0_70 = arith.constant 0 : index
    %c0_71 = arith.constant 0 : index
    %60 = vector.load %arg2[%c5, %c0_70, %c0_71] : memref<9x64x64xbf16, #tpu.memory_space<vmem>>, vector<1x64x64xbf16>
    %61 = vector.shape_cast %60 : vector<1x64x64xbf16> to vector<64x64xbf16>
    %cst_72 = arith.constant dense<0.000000e+00> : vector<256x64xf32>
    %62 = tpu.matmul %59, %61, %cst_72 {dimension_numbers = #tpu.dot_dimension_numbers<[1], [0], [0], [1], [0, 0, 1, 1], [], []>} : vector<256x64xbf16>, vector<64x64xbf16>, vector<256x64xf32> -> vector<256x64xf32>
    %63 = arith.addf %56, %62 : vector<256x64xf32>
    %c0_73 = arith.constant 0 : index
    %c2_74 = arith.constant 2 : index
    %c0_75 = arith.constant 0 : index
    %c0_76 = arith.constant 0 : index
    %64 = vector.load %arg9[%c0_73, %c2_74, %c0_75, %c0_76] : memref<3x18x16x64xbf16, #tpu.memory_space<vmem>>, vector<1x16x16x64xbf16>
    %65 = vector.shape_cast %64 : vector<1x16x16x64xbf16> to vector<16x16x64xbf16>
    %66 = vector.shape_cast %65 : vector<16x16x64xbf16> to vector<256x64xbf16>
    %c6 = arith.constant 6 : index
    %c0_77 = arith.constant 0 : index
    %c0_78 = arith.constant 0 : index
    %67 = vector.load %arg2[%c6, %c0_77, %c0_78] : memref<9x64x64xbf16, #tpu.memory_space<vmem>>, vector<1x64x64xbf16>
    %68 = vector.shape_cast %67 : vector<1x64x64xbf16> to vector<64x64xbf16>
    %cst_79 = arith.constant dense<0.000000e+00> : vector<256x64xf32>
    %69 = tpu.matmul %66, %68, %cst_79 {dimension_numbers = #tpu.dot_dimension_numbers<[1], [0], [0], [1], [0, 0, 1, 1], [], []>} : vector<256x64xbf16>, vector<64x64xbf16>, vector<256x64xf32> -> vector<256x64xf32>
    %70 = arith.addf %63, %69 : vector<256x64xf32>
    %c1_80 = arith.constant 1 : index
    %c2_81 = arith.constant 2 : index
    %c0_82 = arith.constant 0 : index
    %c0_83 = arith.constant 0 : index
    %71 = vector.load %arg9[%c1_80, %c2_81, %c0_82, %c0_83] : memref<3x18x16x64xbf16, #tpu.memory_space<vmem>>, vector<1x16x16x64xbf16>
    %72 = vector.shape_cast %71 : vector<1x16x16x64xbf16> to vector<16x16x64xbf16>
    %73 = vector.shape_cast %72 : vector<16x16x64xbf16> to vector<256x64xbf16>
    %c7 = arith.constant 7 : index
    %c0_84 = arith.constant 0 : index
    %c0_85 = arith.constant 0 : index
    %74 = vector.load %arg2[%c7, %c0_84, %c0_85] : memref<9x64x64xbf16, #tpu.memory_space<vmem>>, vector<1x64x64xbf16>
    %75 = vector.shape_cast %74 : vector<1x64x64xbf16> to vector<64x64xbf16>
    %cst_86 = arith.constant dense<0.000000e+00> : vector<256x64xf32>
    %76 = tpu.matmul %73, %75, %cst_86 {dimension_numbers = #tpu.dot_dimension_numbers<[1], [0], [0], [1], [0, 0, 1, 1], [], []>} : vector<256x64xbf16>, vector<64x64xbf16>, vector<256x64xf32> -> vector<256x64xf32>
    %77 = arith.addf %70, %76 : vector<256x64xf32>
    %c2_87 = arith.constant 2 : index
    %c2_88 = arith.constant 2 : index
    %c0_89 = arith.constant 0 : index
    %c0_90 = arith.constant 0 : index
    %78 = vector.load %arg9[%c2_87, %c2_88, %c0_89, %c0_90] : memref<3x18x16x64xbf16, #tpu.memory_space<vmem>>, vector<1x16x16x64xbf16>
    %79 = vector.shape_cast %78 : vector<1x16x16x64xbf16> to vector<16x16x64xbf16>
    %80 = vector.shape_cast %79 : vector<16x16x64xbf16> to vector<256x64xbf16>
    %c8 = arith.constant 8 : index
    %c0_91 = arith.constant 0 : index
    %c0_92 = arith.constant 0 : index
    %81 = vector.load %arg2[%c8, %c0_91, %c0_92] : memref<9x64x64xbf16, #tpu.memory_space<vmem>>, vector<1x64x64xbf16>
    %82 = vector.shape_cast %81 : vector<1x64x64xbf16> to vector<64x64xbf16>
    %cst_93 = arith.constant dense<0.000000e+00> : vector<256x64xf32>
    %83 = tpu.matmul %80, %82, %cst_93 {dimension_numbers = #tpu.dot_dimension_numbers<[1], [0], [0], [1], [0, 0, 1, 1], [], []>} : vector<256x64xbf16>, vector<64x64xbf16>, vector<256x64xf32> -> vector<256x64xf32>
    %84 = arith.addf %77, %83 : vector<256x64xf32>
    %c0_94 = arith.constant 0 : index
    %c0_95 = arith.constant 0 : index
    %85 = vector.load %arg3[%c0_94, %c0_95] : memref<1x64xf32, #tpu.memory_space<vmem>>, vector<1x64xf32>
    %86 = vector.broadcast %85 : vector<1x64xf32> to vector<256x64xf32>
    %87 = arith.addf %84, %86 : vector<256x64xf32>
    %cst_96 = arith.constant 1.000000e+00 : f32
    %88 = vector.broadcast %cst_96 : f32 to vector<1x256xf32>
    %cst_97 = arith.constant dense<0.000000e+00> : vector<1x64xf32>
    %89 = tpu.matmul %88, %87, %cst_97 {dimension_numbers = #tpu.dot_dimension_numbers<[1], [0], [0], [1], [0, 0, 1, 1], [], []>} : vector<1x256xf32>, vector<256x64xf32>, vector<1x64xf32> -> vector<1x64xf32>
    %c0_98 = arith.constant 0 : index
    %c0_99 = arith.constant 0 : index
    %90 = vector.load %arg4[%c0_98, %c0_99] : memref<64x32xf32, #tpu.memory_space<vmem>>, vector<64x32xf32>
    %cst_100 = arith.constant dense<0.000000e+00> : vector<1x32xf32>
    %91 = tpu.matmul %89, %90, %cst_100 {dimension_numbers = #tpu.dot_dimension_numbers<[1], [0], [0], [1], [0, 0, 1, 1], [], []>} : vector<1x64xf32>, vector<64x32xf32>, vector<1x32xf32> -> vector<1x32xf32>
    %cst_101 = arith.constant 0.001953125 : f32
    %92 = vector.broadcast %cst_101 : f32 to vector<1x32xf32>
    %93 = arith.mulf %91, %92 : vector<1x32xf32>
    %c0_102 = arith.constant 0 : index
    %c0_103 = arith.constant 0 : index
    %94 = vector.load %arg5[%c0_102, %c0_103] : memref<32x64xf32, #tpu.memory_space<vmem>>, vector<32x64xf32>
    %cst_104 = arith.constant dense<0.000000e+00> : vector<1x64xf32>
    %95 = tpu.matmul %93, %94, %cst_104 {dimension_numbers = #tpu.dot_dimension_numbers<[1], [0], [0], [1], [0, 0, 1, 1], [], []>} : vector<1x32xf32>, vector<32x64xf32>, vector<1x64xf32> -> vector<1x64xf32>
    %96 = vector.broadcast %95 : vector<1x64xf32> to vector<256x64xf32>
    %97 = arith.subf %87, %96 : vector<256x64xf32>
    %98 = arith.mulf %97, %97 : vector<256x64xf32>
    %cst_105 = arith.constant dense<0.000000e+00> : vector<1x64xf32>
    %99 = tpu.matmul %88, %98, %cst_105 {dimension_numbers = #tpu.dot_dimension_numbers<[1], [0], [0], [1], [0, 0, 1, 1], [], []>} : vector<1x256xf32>, vector<256x64xf32>, vector<1x64xf32> -> vector<1x64xf32>
    %c0_106 = arith.constant 0 : index
    %c0_107 = arith.constant 0 : index
    %100 = vector.load %arg4[%c0_106, %c0_107] : memref<64x32xf32, #tpu.memory_space<vmem>>, vector<64x32xf32>
    %cst_108 = arith.constant dense<0.000000e+00> : vector<1x32xf32>
    %101 = tpu.matmul %99, %100, %cst_108 {dimension_numbers = #tpu.dot_dimension_numbers<[1], [0], [0], [1], [0, 0, 1, 1], [], []>} : vector<1x64xf32>, vector<64x32xf32>, vector<1x32xf32> -> vector<1x32xf32>
    %cst_109 = arith.constant 0.001953125 : f32
    %102 = vector.broadcast %cst_109 : f32 to vector<1x32xf32>
    %103 = arith.mulf %101, %102 : vector<1x32xf32>
    %cst_110 = arith.constant 9.99999974E-6 : f32
    %104 = vector.broadcast %cst_110 : f32 to vector<1x32xf32>
    %105 = arith.addf %103, %104 : vector<1x32xf32>
    %106 = math.rsqrt %105 : vector<1x32xf32>
    %c0_111 = arith.constant 0 : index
    %c0_112 = arith.constant 0 : index
    %107 = vector.load %arg5[%c0_111, %c0_112] : memref<32x64xf32, #tpu.memory_space<vmem>>, vector<32x64xf32>
    %cst_113 = arith.constant dense<0.000000e+00> : vector<1x64xf32>
    %108 = tpu.matmul %106, %107, %cst_113 {dimension_numbers = #tpu.dot_dimension_numbers<[1], [0], [0], [1], [0, 0, 1, 1], [], []>} : vector<1x32xf32>, vector<32x64xf32>, vector<1x64xf32> -> vector<1x64xf32>
    %c0_114 = arith.constant 0 : index
    %c0_115 = arith.constant 0 : index
    %109 = vector.load %arg6[%c0_114, %c0_115] : memref<1x64xf32, #tpu.memory_space<vmem>>, vector<1x64xf32>
    %110 = arith.mulf %108, %109 : vector<1x64xf32>
    %111 = vector.broadcast %110 : vector<1x64xf32> to vector<256x64xf32>
    %112 = arith.mulf %97, %111 : vector<256x64xf32>
    %c0_116 = arith.constant 0 : index
    %c0_117 = arith.constant 0 : index
    %113 = vector.load %arg7[%c0_116, %c0_117] : memref<1x64xf32, #tpu.memory_space<vmem>>, vector<1x64xf32>
    %114 = vector.broadcast %113 : vector<1x64xf32> to vector<256x64xf32>
    %115 = arith.addf %112, %114 : vector<256x64xf32>
    %cst_118 = arith.constant 0.000000e+00 : f32
    %116 = vector.broadcast %cst_118 : f32 to vector<256x64xf32>
    %117 = arith.maximumf %115, %116 : vector<256x64xf32>
    %118 = vector.shape_cast %117 : vector<256x64xf32> to vector<16x16x64xf32>
    %119 = arith.truncf %118 : vector<16x16x64xf32> to vector<16x16x64xbf16>
    %c0_119 = arith.constant 0 : index
    %c0_120 = arith.constant 0 : index
    %c0_121 = arith.constant 0 : index
    %c0_122 = arith.constant 0 : index
    %120 = vector.load %arg8[%c0_119, %c0_120, %c0_121, %c0_122] : memref<1x16x16x64xbf16, #tpu.memory_space<vmem>>, vector<1x16x16x64xbf16>
    %121 = vector.shape_cast %120 : vector<1x16x16x64xbf16> to vector<16x16x64xbf16>
    %122 = vector.shape_cast %119 : vector<16x16x64xbf16> to vector<1x16x16x64xbf16>
    tpu.vector_store %arg8[%c0_119, %c0_120, %c0_121, %c0_122], %122 {strides = array<i32>} : memref<1x16x16x64xbf16, #tpu.memory_space<vmem>>, vector<1x16x16x64xbf16>,
    return
  }
  func.func @transform_0(%arg0: i32) -> (i32, i32, i32, i32) {
    %c0_i32 = arith.constant 0 : i32
    %c0_i32_0 = arith.constant 0 : i32
    %c0_i32_1 = arith.constant 0 : i32
    %c0_i32_2 = arith.constant 0 : i32
    return %arg0, %c0_i32, %c0_i32_0, %c0_i32_1 : i32, i32, i32, i32
  }
  func.func @transform_1(%arg0: i32) -> (i32, i32, i32) {
    %c0_i32 = arith.constant 0 : i32
    %c0_i32_0 = arith.constant 0 : i32
    %c0_i32_1 = arith.constant 0 : i32
    %c0_i32_2 = arith.constant 0 : i32
    return %c0_i32, %c0_i32_0, %c0_i32_1 : i32, i32, i32
  }
  func.func @transform_2(%arg0: i32) -> (i32, i32) {
    %c0_i32 = arith.constant 0 : i32
    %c0_i32_0 = arith.constant 0 : i32
    %c0_i32_1 = arith.constant 0 : i32
    return %c0_i32, %c0_i32_0 : i32, i32
  }
  func.func @transform_3(%arg0: i32) -> (i32, i32) {
    %c0_i32 = arith.constant 0 : i32
    %c0_i32_0 = arith.constant 0 : i32
    %c0_i32_1 = arith.constant 0 : i32
    return %c0_i32, %c0_i32_0 : i32, i32
  }
  func.func @transform_4(%arg0: i32) -> (i32, i32) {
    %c0_i32 = arith.constant 0 : i32
    %c0_i32_0 = arith.constant 0 : i32
    %c0_i32_1 = arith.constant 0 : i32
    return %c0_i32, %c0_i32_0 : i32, i32
  }
  func.func @transform_5(%arg0: i32) -> (i32, i32) {
    %c0_i32 = arith.constant 0 : i32
    %c0_i32_0 = arith.constant 0 : i32
    %c0_i32_1 = arith.constant 0 : i32
    return %c0_i32, %c0_i32_0 : i32, i32
  }
  func.func @transform_6(%arg0: i32) -> (i32, i32) {
    %c0_i32 = arith.constant 0 : i32
    %c0_i32_0 = arith.constant 0 : i32
    %c0_i32_1 = arith.constant 0 : i32
    return %c0_i32, %c0_i32_0 : i32, i32
  }
  func.func @transform_7(%arg0: i32) -> (i32, i32, i32, i32) {
    %c0_i32 = arith.constant 0 : i32
    %c0_i32_0 = arith.constant 0 : i32
    %c0_i32_1 = arith.constant 0 : i32
    %c0_i32_2 = arith.constant 0 : i32
    return %arg0, %c0_i32, %c0_i32_0, %c0_i32_1 : i32, i32, i32, i32
  }
}

module attributes {stable_mosaic.version = 11 : i64} {
  func.func @_conv_gn_relu_kernel(%arg0: i32, %arg1: memref<1x16x16x4xbf16, #tpu.memory_space<vmem>>, %arg2: memref<9x4x64xbf16, #tpu.memory_space<vmem>>, %arg3: memref<1x64xf32, #tpu.memory_space<vmem>>, %arg4: memref<64x32xf32, #tpu.memory_space<vmem>>, %arg5: memref<32x64xf32, #tpu.memory_space<vmem>>, %arg6: memref<1x64xf32, #tpu.memory_space<vmem>>, %arg7: memref<1x64xf32, #tpu.memory_space<vmem>>, %arg8: memref<1x16x16x64xbf16, #tpu.memory_space<vmem>>, %arg9: memref<3x18x16x4xbf16, #tpu.memory_space<vmem>>) attributes {dimension_semantics = [#tpu.dimension_semantics<parallel>], iteration_bounds = array<i64: 2>, scalar_prefetch = 0 : i64, scratch_operands = 1 : i64, tpu.core_type = #tpu.core_type<tc>, window_params = [{transform_indices = @transform_0, window_bounds = array<i64: 1, 16, 16, 4>}, {pipeline_mode = #tpu.pipeline_mode<synchronous>, transform_indices = @transform_1, window_bounds = array<i64: 9, 4, 64>}, {pipeline_mode = #tpu.pipeline_mode<synchronous>, transform_indices = @transform_2, window_bounds = array<i64: 1, 64>}, {pipeline_mode = #tpu.pipeline_mode<synchronous>, transform_indices = @transform_3, window_bounds = array<i64: 64, 32>}, {pipeline_mode = #tpu.pipeline_mode<synchronous>, transform_indices = @transform_4, window_bounds = array<i64: 32, 64>}, {pipeline_mode = #tpu.pipeline_mode<synchronous>, transform_indices = @transform_5, window_bounds = array<i64: 1, 64>}, {pipeline_mode = #tpu.pipeline_mode<synchronous>, transform_indices = @transform_6, window_bounds = array<i64: 1, 64>}, {transform_indices = @transform_7, window_bounds = array<i64: 1, 16, 16, 64>}]} {
    %c0 = arith.constant 0 : index
    %c0_0 = arith.constant 0 : index
    %c0_1 = arith.constant 0 : index
    %c0_2 = arith.constant 0 : index
    %0 = vector.load %arg1[%c0, %c0_0, %c0_1, %c0_2] : memref<1x16x16x4xbf16, #tpu.memory_space<vmem>>, vector<1x16x16x4xbf16>
    %1 = vector.shape_cast %0 : vector<1x16x16x4xbf16> to vector<16x16x4xbf16>
    %cst = arith.constant 0.000000e+00 : bf16
    %2 = vector.broadcast %cst : bf16 to vector<3x1x16x4xbf16>
    %cst_3 = arith.constant 0.000000e+00 : bf16
    %3 = vector.broadcast %cst_3 : bf16 to vector<16x1x4xbf16>
    %c0_4 = arith.constant 0 : index
    %c0_5 = arith.constant 0 : index
    %c0_6 = arith.constant 0 : index
    %c0_7 = arith.constant 0 : index
    %4 = vector.load %arg9[%c0_4, %c0_5, %c0_6, %c0_7] : memref<3x18x16x4xbf16, #tpu.memory_space<vmem>>, vector<3x1x16x4xbf16>
    tpu.vector_store %arg9[%c0_4, %c0_5, %c0_6, %c0_7], %2 {strides = array<i32>} : memref<3x18x16x4xbf16, #tpu.memory_space<vmem>>, vector<3x1x16x4xbf16>,
    %c0_8 = arith.constant 0 : index
    %c17 = arith.constant 17 : index
    %c0_9 = arith.constant 0 : index
    %c0_10 = arith.constant 0 : index
    %5 = vector.load %arg9[%c0_8, %c17, %c0_9, %c0_10] : memref<3x18x16x4xbf16, #tpu.memory_space<vmem>>, vector<3x1x16x4xbf16>
    tpu.vector_store %arg9[%c0_8, %c17, %c0_9, %c0_10], %2 {strides = array<i32>} : memref<3x18x16x4xbf16, #tpu.memory_space<vmem>>, vector<3x1x16x4xbf16>,
    %c0_11 = arith.constant 0 : index
    %c1 = arith.constant 1 : index
    %c0_12 = arith.constant 0 : index
    %c0_13 = arith.constant 0 : index
    %6 = vector.load %arg9[%c0_11, %c1, %c0_12, %c0_13] : memref<3x18x16x4xbf16, #tpu.memory_space<vmem>>, vector<1x16x1x4xbf16>
    %7 = vector.shape_cast %6 : vector<1x16x1x4xbf16> to vector<16x1x4xbf16>
    %8 = vector.shape_cast %3 : vector<16x1x4xbf16> to vector<1x16x1x4xbf16>
    tpu.vector_store %arg9[%c0_11, %c1, %c0_12, %c0_13], %8 {strides = array<i32>} : memref<3x18x16x4xbf16, #tpu.memory_space<vmem>>, vector<1x16x1x4xbf16>,
    %c2 = arith.constant 2 : index
    %c1_14 = arith.constant 1 : index
    %c15 = arith.constant 15 : index
    %c0_15 = arith.constant 0 : index
    %9 = vector.load %arg9[%c2, %c1_14, %c15, %c0_15] : memref<3x18x16x4xbf16, #tpu.memory_space<vmem>>, vector<1x16x1x4xbf16>
    %10 = vector.shape_cast %9 : vector<1x16x1x4xbf16> to vector<16x1x4xbf16>
    %11 = vector.shape_cast %3 : vector<16x1x4xbf16> to vector<1x16x1x4xbf16>
    tpu.vector_store %arg9[%c2, %c1_14, %c15, %c0_15], %11 {strides = array<i32>} : memref<3x18x16x4xbf16, #tpu.memory_space<vmem>>, vector<1x16x1x4xbf16>,
    %12 = vector.extract_strided_slice %1 {offsets = [0, 0, 0], sizes = [16, 15, 4], strides = [1, 1, 1]} : vector<16x16x4xbf16> to vector<16x15x4xbf16>
    %c0_16 = arith.constant 0 : index
    %c1_17 = arith.constant 1 : index
    %c1_18 = arith.constant 1 : index
    %c0_19 = arith.constant 0 : index
    %13 = vector.load %arg9[%c0_16, %c1_17, %c1_18, %c0_19] : memref<3x18x16x4xbf16, #tpu.memory_space<vmem>>, vector<1x16x15x4xbf16>
    %14 = vector.shape_cast %13 : vector<1x16x15x4xbf16> to vector<16x15x4xbf16>
    %15 = vector.shape_cast %12 : vector<16x15x4xbf16> to vector<1x16x15x4xbf16>
    tpu.vector_store %arg9[%c0_16, %c1_17, %c1_18, %c0_19], %15 {strides = array<i32>} : memref<3x18x16x4xbf16, #tpu.memory_space<vmem>>, vector<1x16x15x4xbf16>,
    %c1_20 = arith.constant 1 : index
    %c1_21 = arith.constant 1 : index
    %c0_22 = arith.constant 0 : index
    %c0_23 = arith.constant 0 : index
    %16 = vector.load %arg9[%c1_20, %c1_21, %c0_22, %c0_23] : memref<3x18x16x4xbf16, #tpu.memory_space<vmem>>, vector<1x16x16x4xbf16>
    %17 = vector.shape_cast %16 : vector<1x16x16x4xbf16> to vector<16x16x4xbf16>
    %18 = vector.shape_cast %1 : vector<16x16x4xbf16> to vector<1x16x16x4xbf16>
    tpu.vector_store %arg9[%c1_20, %c1_21, %c0_22, %c0_23], %18 {strides = array<i32>} : memref<3x18x16x4xbf16, #tpu.memory_space<vmem>>, vector<1x16x16x4xbf16>,
    %19 = vector.extract_strided_slice %1 {offsets = [0, 1, 0], sizes = [16, 15, 4], strides = [1, 1, 1]} : vector<16x16x4xbf16> to vector<16x15x4xbf16>
    %c2_24 = arith.constant 2 : index
    %c1_25 = arith.constant 1 : index
    %c0_26 = arith.constant 0 : index
    %c0_27 = arith.constant 0 : index
    %20 = vector.load %arg9[%c2_24, %c1_25, %c0_26, %c0_27] : memref<3x18x16x4xbf16, #tpu.memory_space<vmem>>, vector<1x16x15x4xbf16>
    %21 = vector.shape_cast %20 : vector<1x16x15x4xbf16> to vector<16x15x4xbf16>
    %22 = vector.shape_cast %19 : vector<16x15x4xbf16> to vector<1x16x15x4xbf16>
    tpu.vector_store %arg9[%c2_24, %c1_25, %c0_26, %c0_27], %22 {strides = array<i32>} : memref<3x18x16x4xbf16, #tpu.memory_space<vmem>>, vector<1x16x15x4xbf16>,
    %c0_28 = arith.constant 0 : index
    %c0_29 = arith.constant 0 : index
    %c0_30 = arith.constant 0 : index
    %c0_31 = arith.constant 0 : index
    %23 = vector.load %arg9[%c0_28, %c0_29, %c0_30, %c0_31] : memref<3x18x16x4xbf16, #tpu.memory_space<vmem>>, vector<1x16x16x4xbf16>
    %24 = vector.shape_cast %23 : vector<1x16x16x4xbf16> to vector<16x16x4xbf16>
    %25 = vector.shape_cast %24 : vector<16x16x4xbf16> to vector<256x4xbf16>
    %c0_32 = arith.constant 0 : index
    %c0_33 = arith.constant 0 : index
    %c0_34 = arith.constant 0 : index
    %26 = vector.load %arg2[%c0_32, %c0_33, %c0_34] : memref<9x4x64xbf16, #tpu.memory_space<vmem>>, vector<1x4x64xbf16>
    %27 = vector.shape_cast %26 : vector<1x4x64xbf16> to vector<4x64xbf16>
    %cst_35 = arith.constant dense<0.000000e+00> : vector<256x64xf32>
    %28 = tpu.matmul %25, %27, %cst_35 {dimension_numbers = #tpu.dot_dimension_numbers<[1], [0], [0], [1], [0, 0, 1, 1], [], []>} : vector<256x4xbf16>, vector<4x64xbf16>, vector<256x64xf32> -> vector<256x64xf32>
    %c1_36 = arith.constant 1 : index
    %c0_37 = arith.constant 0 : index
    %c0_38 = arith.constant 0 : index
    %c0_39 = arith.constant 0 : index
    %29 = vector.load %arg9[%c1_36, %c0_37, %c0_38, %c0_39] : memref<3x18x16x4xbf16, #tpu.memory_space<vmem>>, vector<1x16x16x4xbf16>
    %30 = vector.shape_cast %29 : vector<1x16x16x4xbf16> to vector<16x16x4xbf16>
    %31 = vector.shape_cast %30 : vector<16x16x4xbf16> to vector<256x4xbf16>
    %c1_40 = arith.constant 1 : index
    %c0_41 = arith.constant 0 : index
    %c0_42 = arith.constant 0 : index
    %32 = vector.load %arg2[%c1_40, %c0_41, %c0_42] : memref<9x4x64xbf16, #tpu.memory_space<vmem>>, vector<1x4x64xbf16>
    %33 = vector.shape_cast %32 : vector<1x4x64xbf16> to vector<4x64xbf16>
    %cst_43 = arith.constant dense<0.000000e+00> : vector<256x64xf32>
    %34 = tpu.matmul %31, %33, %cst_43 {dimension_numbers = #tpu.dot_dimension_numbers<[1], [0], [0], [1], [0, 0, 1, 1], [], []>} : vector<256x4xbf16>, vector<4x64xbf16>, vector<256x64xf32> -> vector<256x64xf32>
    %35 = arith.addf %28, %34 : vector<256x64xf32>
    %c2_44 = arith.constant 2 : index
    %c0_45 = arith.constant 0 : index
    %c0_46 = arith.constant 0 : index
    %c0_47 = arith.constant 0 : index
    %36 = vector.load %arg9[%c2_44, %c0_45, %c0_46, %c0_47] : memref<3x18x16x4xbf16, #tpu.memory_space<vmem>>, vector<1x16x16x4xbf16>
    %37 = vector.shape_cast %36 : vector<1x16x16x4xbf16> to vector<16x16x4xbf16>
    %38 = vector.shape_cast %37 : vector<16x16x4xbf16> to vector<256x4xbf16>
    %c2_48 = arith.constant 2 : index
    %c0_49 = arith.constant 0 : index
    %c0_50 = arith.constant 0 : index
    %39 = vector.load %arg2[%c2_48, %c0_49, %c0_50] : memref<9x4x64xbf16, #tpu.memory_space<vmem>>, vector<1x4x64xbf16>
    %40 = vector.shape_cast %39 : vector<1x4x64xbf16> to vector<4x64xbf16>
    %cst_51 = arith.constant dense<0.000000e+00> : vector<256x64xf32>
    %41 = tpu.matmul %38, %40, %cst_51 {dimension_numbers = #tpu.dot_dimension_numbers<[1], [0], [0], [1], [0, 0, 1, 1], [], []>} : vector<256x4xbf16>, vector<4x64xbf16>, vector<256x64xf32> -> vector<256x64xf32>
    %42 = arith.addf %35, %41 : vector<256x64xf32>
    %c0_52 = arith.constant 0 : index
    %c1_53 = arith.constant 1 : index
    %c0_54 = arith.constant 0 : index
    %c0_55 = arith.constant 0 : index
    %43 = vector.load %arg9[%c0_52, %c1_53, %c0_54, %c0_55] : memref<3x18x16x4xbf16, #tpu.memory_space<vmem>>, vector<1x16x16x4xbf16>
    %44 = vector.shape_cast %43 : vector<1x16x16x4xbf16> to vector<16x16x4xbf16>
    %45 = vector.shape_cast %44 : vector<16x16x4xbf16> to vector<256x4xbf16>
    %c3 = arith.constant 3 : index
    %c0_56 = arith.constant 0 : index
    %c0_57 = arith.constant 0 : index
    %46 = vector.load %arg2[%c3, %c0_56, %c0_57] : memref<9x4x64xbf16, #tpu.memory_space<vmem>>, vector<1x4x64xbf16>
    %47 = vector.shape_cast %46 : vector<1x4x64xbf16> to vector<4x64xbf16>
    %cst_58 = arith.constant dense<0.000000e+00> : vector<256x64xf32>
    %48 = tpu.matmul %45, %47, %cst_58 {dimension_numbers = #tpu.dot_dimension_numbers<[1], [0], [0], [1], [0, 0, 1, 1], [], []>} : vector<256x4xbf16>, vector<4x64xbf16>, vector<256x64xf32> -> vector<256x64xf32>
    %49 = arith.addf %42, %48 : vector<256x64xf32>
    %c1_59 = arith.constant 1 : index
    %c1_60 = arith.constant 1 : index
    %c0_61 = arith.constant 0 : index
    %c0_62 = arith.constant 0 : index
    %50 = vector.load %arg9[%c1_59, %c1_60, %c0_61, %c0_62] : memref<3x18x16x4xbf16, #tpu.memory_space<vmem>>, vector<1x16x16x4xbf16>
    %51 = vector.shape_cast %50 : vector<1x16x16x4xbf16> to vector<16x16x4xbf16>
    %52 = vector.shape_cast %51 : vector<16x16x4xbf16> to vector<256x4xbf16>
    %c4 = arith.constant 4 : index
    %c0_63 = arith.constant 0 : index
    %c0_64 = arith.constant 0 : index
    %53 = vector.load %arg2[%c4, %c0_63, %c0_64] : memref<9x4x64xbf16, #tpu.memory_space<vmem>>, vector<1x4x64xbf16>
    %54 = vector.shape_cast %53 : vector<1x4x64xbf16> to vector<4x64xbf16>
    %cst_65 = arith.constant dense<0.000000e+00> : vector<256x64xf32>
    %55 = tpu.matmul %52, %54, %cst_65 {dimension_numbers = #tpu.dot_dimension_numbers<[1], [0], [0], [1], [0, 0, 1, 1], [], []>} : vector<256x4xbf16>, vector<4x64xbf16>, vector<256x64xf32> -> vector<256x64xf32>
    %56 = arith.addf %49, %55 : vector<256x64xf32>
    %c2_66 = arith.constant 2 : index
    %c1_67 = arith.constant 1 : index
    %c0_68 = arith.constant 0 : index
    %c0_69 = arith.constant 0 : index
    %57 = vector.load %arg9[%c2_66, %c1_67, %c0_68, %c0_69] : memref<3x18x16x4xbf16, #tpu.memory_space<vmem>>, vector<1x16x16x4xbf16>
    %58 = vector.shape_cast %57 : vector<1x16x16x4xbf16> to vector<16x16x4xbf16>
    %59 = vector.shape_cast %58 : vector<16x16x4xbf16> to vector<256x4xbf16>
    %c5 = arith.constant 5 : index
    %c0_70 = arith.constant 0 : index
    %c0_71 = arith.constant 0 : index
    %60 = vector.load %arg2[%c5, %c0_70, %c0_71] : memref<9x4x64xbf16, #tpu.memory_space<vmem>>, vector<1x4x64xbf16>
    %61 = vector.shape_cast %60 : vector<1x4x64xbf16> to vector<4x64xbf16>
    %cst_72 = arith.constant dense<0.000000e+00> : vector<256x64xf32>
    %62 = tpu.matmul %59, %61, %cst_72 {dimension_numbers = #tpu.dot_dimension_numbers<[1], [0], [0], [1], [0, 0, 1, 1], [], []>} : vector<256x4xbf16>, vector<4x64xbf16>, vector<256x64xf32> -> vector<256x64xf32>
    %63 = arith.addf %56, %62 : vector<256x64xf32>
    %c0_73 = arith.constant 0 : index
    %c2_74 = arith.constant 2 : index
    %c0_75 = arith.constant 0 : index
    %c0_76 = arith.constant 0 : index
    %64 = vector.load %arg9[%c0_73, %c2_74, %c0_75, %c0_76] : memref<3x18x16x4xbf16, #tpu.memory_space<vmem>>, vector<1x16x16x4xbf16>
    %65 = vector.shape_cast %64 : vector<1x16x16x4xbf16> to vector<16x16x4xbf16>
    %66 = vector.shape_cast %65 : vector<16x16x4xbf16> to vector<256x4xbf16>
    %c6 = arith.constant 6 : index
    %c0_77 = arith.constant 0 : index
    %c0_78 = arith.constant 0 : index
    %67 = vector.load %arg2[%c6, %c0_77, %c0_78] : memref<9x4x64xbf16, #tpu.memory_space<vmem>>, vector<1x4x64xbf16>
    %68 = vector.shape_cast %67 : vector<1x4x64xbf16> to vector<4x64xbf16>
    %cst_79 = arith.constant dense<0.000000e+00> : vector<256x64xf32>
    %69 = tpu.matmul %66, %68, %cst_79 {dimension_numbers = #tpu.dot_dimension_numbers<[1], [0], [0], [1], [0, 0, 1, 1], [], []>} : vector<256x4xbf16>, vector<4x64xbf16>, vector<256x64xf32> -> vector<256x64xf32>
    %70 = arith.addf %63, %69 : vector<256x64xf32>
    %c1_80 = arith.constant 1 : index
    %c2_81 = arith.constant 2 : index
    %c0_82 = arith.constant 0 : index
    %c0_83 = arith.constant 0 : index
    %71 = vector.load %arg9[%c1_80, %c2_81, %c0_82, %c0_83] : memref<3x18x16x4xbf16, #tpu.memory_space<vmem>>, vector<1x16x16x4xbf16>
    %72 = vector.shape_cast %71 : vector<1x16x16x4xbf16> to vector<16x16x4xbf16>
    %73 = vector.shape_cast %72 : vector<16x16x4xbf16> to vector<256x4xbf16>
    %c7 = arith.constant 7 : index
    %c0_84 = arith.constant 0 : index
    %c0_85 = arith.constant 0 : index
    %74 = vector.load %arg2[%c7, %c0_84, %c0_85] : memref<9x4x64xbf16, #tpu.memory_space<vmem>>, vector<1x4x64xbf16>
    %75 = vector.shape_cast %74 : vector<1x4x64xbf16> to vector<4x64xbf16>
    %cst_86 = arith.constant dense<0.000000e+00> : vector<256x64xf32>
    %76 = tpu.matmul %73, %75, %cst_86 {dimension_numbers = #tpu.dot_dimension_numbers<[1], [0], [0], [1], [0, 0, 1, 1], [], []>} : vector<256x4xbf16>, vector<4x64xbf16>, vector<256x64xf32> -> vector<256x64xf32>
    %77 = arith.addf %70, %76 : vector<256x64xf32>
    %c2_87 = arith.constant 2 : index
    %c2_88 = arith.constant 2 : index
    %c0_89 = arith.constant 0 : index
    %c0_90 = arith.constant 0 : index
    %78 = vector.load %arg9[%c2_87, %c2_88, %c0_89, %c0_90] : memref<3x18x16x4xbf16, #tpu.memory_space<vmem>>, vector<1x16x16x4xbf16>
    %79 = vector.shape_cast %78 : vector<1x16x16x4xbf16> to vector<16x16x4xbf16>
    %80 = vector.shape_cast %79 : vector<16x16x4xbf16> to vector<256x4xbf16>
    %c8 = arith.constant 8 : index
    %c0_91 = arith.constant 0 : index
    %c0_92 = arith.constant 0 : index
    %81 = vector.load %arg2[%c8, %c0_91, %c0_92] : memref<9x4x64xbf16, #tpu.memory_space<vmem>>, vector<1x4x64xbf16>
    %82 = vector.shape_cast %81 : vector<1x4x64xbf16> to vector<4x64xbf16>
    %cst_93 = arith.constant dense<0.000000e+00> : vector<256x64xf32>
    %83 = tpu.matmul %80, %82, %cst_93 {dimension_numbers = #tpu.dot_dimension_numbers<[1], [0], [0], [1], [0, 0, 1, 1], [], []>} : vector<256x4xbf16>, vector<4x64xbf16>, vector<256x64xf32> -> vector<256x64xf32>
    %84 = arith.addf %77, %83 : vector<256x64xf32>
    %c0_94 = arith.constant 0 : index
    %c0_95 = arith.constant 0 : index
    %85 = vector.load %arg3[%c0_94, %c0_95] : memref<1x64xf32, #tpu.memory_space<vmem>>, vector<1x64xf32>
    %86 = vector.broadcast %85 : vector<1x64xf32> to vector<256x64xf32>
    %87 = arith.addf %84, %86 : vector<256x64xf32>
    %cst_96 = arith.constant 1.000000e+00 : f32
    %88 = vector.broadcast %cst_96 : f32 to vector<1x256xf32>
    %cst_97 = arith.constant dense<0.000000e+00> : vector<1x64xf32>
    %89 = tpu.matmul %88, %87, %cst_97 {dimension_numbers = #tpu.dot_dimension_numbers<[1], [0], [0], [1], [0, 0, 1, 1], [], []>} : vector<1x256xf32>, vector<256x64xf32>, vector<1x64xf32> -> vector<1x64xf32>
    %c0_98 = arith.constant 0 : index
    %c0_99 = arith.constant 0 : index
    %90 = vector.load %arg4[%c0_98, %c0_99] : memref<64x32xf32, #tpu.memory_space<vmem>>, vector<64x32xf32>
    %cst_100 = arith.constant dense<0.000000e+00> : vector<1x32xf32>
    %91 = tpu.matmul %89, %90, %cst_100 {dimension_numbers = #tpu.dot_dimension_numbers<[1], [0], [0], [1], [0, 0, 1, 1], [], []>} : vector<1x64xf32>, vector<64x32xf32>, vector<1x32xf32> -> vector<1x32xf32>
    %cst_101 = arith.constant 0.001953125 : f32
    %92 = vector.broadcast %cst_101 : f32 to vector<1x32xf32>
    %93 = arith.mulf %91, %92 : vector<1x32xf32>
    %c0_102 = arith.constant 0 : index
    %c0_103 = arith.constant 0 : index
    %94 = vector.load %arg5[%c0_102, %c0_103] : memref<32x64xf32, #tpu.memory_space<vmem>>, vector<32x64xf32>
    %cst_104 = arith.constant dense<0.000000e+00> : vector<1x64xf32>
    %95 = tpu.matmul %93, %94, %cst_104 {dimension_numbers = #tpu.dot_dimension_numbers<[1], [0], [0], [1], [0, 0, 1, 1], [], []>} : vector<1x32xf32>, vector<32x64xf32>, vector<1x64xf32> -> vector<1x64xf32>
    %96 = vector.broadcast %95 : vector<1x64xf32> to vector<256x64xf32>
    %97 = arith.subf %87, %96 : vector<256x64xf32>
    %98 = arith.mulf %97, %97 : vector<256x64xf32>
    %cst_105 = arith.constant dense<0.000000e+00> : vector<1x64xf32>
    %99 = tpu.matmul %88, %98, %cst_105 {dimension_numbers = #tpu.dot_dimension_numbers<[1], [0], [0], [1], [0, 0, 1, 1], [], []>} : vector<1x256xf32>, vector<256x64xf32>, vector<1x64xf32> -> vector<1x64xf32>
    %c0_106 = arith.constant 0 : index
    %c0_107 = arith.constant 0 : index
    %100 = vector.load %arg4[%c0_106, %c0_107] : memref<64x32xf32, #tpu.memory_space<vmem>>, vector<64x32xf32>
    %cst_108 = arith.constant dense<0.000000e+00> : vector<1x32xf32>
    %101 = tpu.matmul %99, %100, %cst_108 {dimension_numbers = #tpu.dot_dimension_numbers<[1], [0], [0], [1], [0, 0, 1, 1], [], []>} : vector<1x64xf32>, vector<64x32xf32>, vector<1x32xf32> -> vector<1x32xf32>
    %cst_109 = arith.constant 0.001953125 : f32
    %102 = vector.broadcast %cst_109 : f32 to vector<1x32xf32>
    %103 = arith.mulf %101, %102 : vector<1x32xf32>
    %cst_110 = arith.constant 9.99999974E-6 : f32
    %104 = vector.broadcast %cst_110 : f32 to vector<1x32xf32>
    %105 = arith.addf %103, %104 : vector<1x32xf32>
    %106 = math.rsqrt %105 : vector<1x32xf32>
    %c0_111 = arith.constant 0 : index
    %c0_112 = arith.constant 0 : index
    %107 = vector.load %arg5[%c0_111, %c0_112] : memref<32x64xf32, #tpu.memory_space<vmem>>, vector<32x64xf32>
    %cst_113 = arith.constant dense<0.000000e+00> : vector<1x64xf32>
    %108 = tpu.matmul %106, %107, %cst_113 {dimension_numbers = #tpu.dot_dimension_numbers<[1], [0], [0], [1], [0, 0, 1, 1], [], []>} : vector<1x32xf32>, vector<32x64xf32>, vector<1x64xf32> -> vector<1x64xf32>
    %c0_114 = arith.constant 0 : index
    %c0_115 = arith.constant 0 : index
    %109 = vector.load %arg6[%c0_114, %c0_115] : memref<1x64xf32, #tpu.memory_space<vmem>>, vector<1x64xf32>
    %110 = arith.mulf %108, %109 : vector<1x64xf32>
    %111 = vector.broadcast %110 : vector<1x64xf32> to vector<256x64xf32>
    %112 = arith.mulf %97, %111 : vector<256x64xf32>
    %c0_116 = arith.constant 0 : index
    %c0_117 = arith.constant 0 : index
    %113 = vector.load %arg7[%c0_116, %c0_117] : memref<1x64xf32, #tpu.memory_space<vmem>>, vector<1x64xf32>
    %114 = vector.broadcast %113 : vector<1x64xf32> to vector<256x64xf32>
    %115 = arith.addf %112, %114 : vector<256x64xf32>
    %cst_118 = arith.constant 0.000000e+00 : f32
    %116 = vector.broadcast %cst_118 : f32 to vector<256x64xf32>
    %117 = arith.maximumf %115, %116 : vector<256x64xf32>
    %118 = vector.shape_cast %117 : vector<256x64xf32> to vector<16x16x64xf32>
    %119 = arith.truncf %118 : vector<16x16x64xf32> to vector<16x16x64xbf16>
    %c0_119 = arith.constant 0 : index
    %c0_120 = arith.constant 0 : index
    %c0_121 = arith.constant 0 : index
    %c0_122 = arith.constant 0 : index
    %120 = vector.load %arg8[%c0_119, %c0_120, %c0_121, %c0_122] : memref<1x16x16x64xbf16, #tpu.memory_space<vmem>>, vector<1x16x16x64xbf16>
    %121 = vector.shape_cast %120 : vector<1x16x16x64xbf16> to vector<16x16x64xbf16>
    %122 = vector.shape_cast %119 : vector<16x16x64xbf16> to vector<1x16x16x64xbf16>
    tpu.vector_store %arg8[%c0_119, %c0_120, %c0_121, %c0_122], %122 {strides = array<i32>} : memref<1x16x16x64xbf16, #tpu.memory_space<vmem>>, vector<1x16x16x64xbf16>,
    return
  }
  func.func @transform_0(%arg0: i32) -> (i32, i32, i32, i32) {
    %c0_i32 = arith.constant 0 : i32
    %c0_i32_0 = arith.constant 0 : i32
    %c0_i32_1 = arith.constant 0 : i32
    %c0_i32_2 = arith.constant 0 : i32
    return %arg0, %c0_i32, %c0_i32_0, %c0_i32_1 : i32, i32, i32, i32
  }
  func.func @transform_1(%arg0: i32) -> (i32, i32, i32) {
    %c0_i32 = arith.constant 0 : i32
    %c0_i32_0 = arith.constant 0 : i32
    %c0_i32_1 = arith.constant 0 : i32
    %c0_i32_2 = arith.constant 0 : i32
    return %c0_i32, %c0_i32_0, %c0_i32_1 : i32, i32, i32
  }
  func.func @transform_2(%arg0: i32) -> (i32, i32) {
    %c0_i32 = arith.constant 0 : i32
    %c0_i32_0 = arith.constant 0 : i32
    %c0_i32_1 = arith.constant 0 : i32
    return %c0_i32, %c0_i32_0 : i32, i32
  }
  func.func @transform_3(%arg0: i32) -> (i32, i32) {
    %c0_i32 = arith.constant 0 : i32
    %c0_i32_0 = arith.constant 0 : i32
    %c0_i32_1 = arith.constant 0 : i32
    return %c0_i32, %c0_i32_0 : i32, i32
  }
  func.func @transform_4(%arg0: i32) -> (i32, i32) {
    %c0_i32 = arith.constant 0 : i32
    %c0_i32_0 = arith.constant 0 : i32
    %c0_i32_1 = arith.constant 0 : i32
    return %c0_i32, %c0_i32_0 : i32, i32
  }
  func.func @transform_5(%arg0: i32) -> (i32, i32) {
    %c0_i32 = arith.constant 0 : i32
    %c0_i32_0 = arith.constant 0 : i32
    %c0_i32_1 = arith.constant 0 : i32
    return %c0_i32, %c0_i32_0 : i32, i32
  }
  func.func @transform_6(%arg0: i32) -> (i32, i32) {
    %c0_i32 = arith.constant 0 : i32
    %c0_i32_0 = arith.constant 0 : i32
    %c0_i32_1 = arith.constant 0 : i32
    return %c0_i32, %c0_i32_0 : i32, i32
  }
  func.func @transform_7(%arg0: i32) -> (i32, i32, i32, i32) {
    %c0_i32 = arith.constant 0 : i32
    %c0_i32_0 = arith.constant 0 : i32
    %c0_i32_1 = arith.constant 0 : i32
    %c0_i32_2 = arith.constant 0 : i32
    return %arg0, %c0_i32, %c0_i32_0, %c0_i32_1 : i32, i32, i32, i32
  }
}

module attributes {stable_mosaic.version = 11 : i64} {
  func.func @_conv_bias_kernel(%arg0: i32, %arg1: memref<1x16x16x64xbf16, #tpu.memory_space<vmem>>, %arg2: memref<9x64x128xbf16, #tpu.memory_space<vmem>>, %arg3: memref<1x128xf32, #tpu.memory_space<vmem>>, %arg4: memref<1x16x16x128xf32, #tpu.memory_space<vmem>>, %arg5: memref<3x18x16x64xbf16, #tpu.memory_space<vmem>>) attributes {dimension_semantics = [#tpu.dimension_semantics<parallel>], iteration_bounds = array<i64: 2>, scalar_prefetch = 0 : i64, scratch_operands = 1 : i64, tpu.core_type = #tpu.core_type<tc>, window_params = [{transform_indices = @transform_0, window_bounds = array<i64: 1, 16, 16, 64>}, {pipeline_mode = #tpu.pipeline_mode<synchronous>, transform_indices = @transform_1, window_bounds = array<i64: 9, 64, 128>}, {pipeline_mode = #tpu.pipeline_mode<synchronous>, transform_indices = @transform_2, window_bounds = array<i64: 1, 128>}, {transform_indices = @transform_3, window_bounds = array<i64: 1, 16, 16, 128>}]} {
    %c0 = arith.constant 0 : index
    %c0_0 = arith.constant 0 : index
    %c0_1 = arith.constant 0 : index
    %c0_2 = arith.constant 0 : index
    %0 = vector.load %arg1[%c0, %c0_0, %c0_1, %c0_2] : memref<1x16x16x64xbf16, #tpu.memory_space<vmem>>, vector<1x16x16x64xbf16>
    %1 = vector.shape_cast %0 : vector<1x16x16x64xbf16> to vector<16x16x64xbf16>
    %cst = arith.constant 0.000000e+00 : bf16
    %2 = vector.broadcast %cst : bf16 to vector<3x1x16x64xbf16>
    %cst_3 = arith.constant 0.000000e+00 : bf16
    %3 = vector.broadcast %cst_3 : bf16 to vector<16x1x64xbf16>
    %c0_4 = arith.constant 0 : index
    %c0_5 = arith.constant 0 : index
    %c0_6 = arith.constant 0 : index
    %c0_7 = arith.constant 0 : index
    %4 = vector.load %arg5[%c0_4, %c0_5, %c0_6, %c0_7] : memref<3x18x16x64xbf16, #tpu.memory_space<vmem>>, vector<3x1x16x64xbf16>
    tpu.vector_store %arg5[%c0_4, %c0_5, %c0_6, %c0_7], %2 {strides = array<i32>} : memref<3x18x16x64xbf16, #tpu.memory_space<vmem>>, vector<3x1x16x64xbf16>,
    %c0_8 = arith.constant 0 : index
    %c17 = arith.constant 17 : index
    %c0_9 = arith.constant 0 : index
    %c0_10 = arith.constant 0 : index
    %5 = vector.load %arg5[%c0_8, %c17, %c0_9, %c0_10] : memref<3x18x16x64xbf16, #tpu.memory_space<vmem>>, vector<3x1x16x64xbf16>
    tpu.vector_store %arg5[%c0_8, %c17, %c0_9, %c0_10], %2 {strides = array<i32>} : memref<3x18x16x64xbf16, #tpu.memory_space<vmem>>, vector<3x1x16x64xbf16>,
    %c0_11 = arith.constant 0 : index
    %c1 = arith.constant 1 : index
    %c0_12 = arith.constant 0 : index
    %c0_13 = arith.constant 0 : index
    %6 = vector.load %arg5[%c0_11, %c1, %c0_12, %c0_13] : memref<3x18x16x64xbf16, #tpu.memory_space<vmem>>, vector<1x16x1x64xbf16>
    %7 = vector.shape_cast %6 : vector<1x16x1x64xbf16> to vector<16x1x64xbf16>
    %8 = vector.shape_cast %3 : vector<16x1x64xbf16> to vector<1x16x1x64xbf16>
    tpu.vector_store %arg5[%c0_11, %c1, %c0_12, %c0_13], %8 {strides = array<i32>} : memref<3x18x16x64xbf16, #tpu.memory_space<vmem>>, vector<1x16x1x64xbf16>,
    %c2 = arith.constant 2 : index
    %c1_14 = arith.constant 1 : index
    %c15 = arith.constant 15 : index
    %c0_15 = arith.constant 0 : index
    %9 = vector.load %arg5[%c2, %c1_14, %c15, %c0_15] : memref<3x18x16x64xbf16, #tpu.memory_space<vmem>>, vector<1x16x1x64xbf16>
    %10 = vector.shape_cast %9 : vector<1x16x1x64xbf16> to vector<16x1x64xbf16>
    %11 = vector.shape_cast %3 : vector<16x1x64xbf16> to vector<1x16x1x64xbf16>
    tpu.vector_store %arg5[%c2, %c1_14, %c15, %c0_15], %11 {strides = array<i32>} : memref<3x18x16x64xbf16, #tpu.memory_space<vmem>>, vector<1x16x1x64xbf16>,
    %12 = vector.extract_strided_slice %1 {offsets = [0, 0, 0], sizes = [16, 15, 64], strides = [1, 1, 1]} : vector<16x16x64xbf16> to vector<16x15x64xbf16>
    %c0_16 = arith.constant 0 : index
    %c1_17 = arith.constant 1 : index
    %c1_18 = arith.constant 1 : index
    %c0_19 = arith.constant 0 : index
    %13 = vector.load %arg5[%c0_16, %c1_17, %c1_18, %c0_19] : memref<3x18x16x64xbf16, #tpu.memory_space<vmem>>, vector<1x16x15x64xbf16>
    %14 = vector.shape_cast %13 : vector<1x16x15x64xbf16> to vector<16x15x64xbf16>
    %15 = vector.shape_cast %12 : vector<16x15x64xbf16> to vector<1x16x15x64xbf16>
    tpu.vector_store %arg5[%c0_16, %c1_17, %c1_18, %c0_19], %15 {strides = array<i32>} : memref<3x18x16x64xbf16, #tpu.memory_space<vmem>>, vector<1x16x15x64xbf16>,
    %c1_20 = arith.constant 1 : index
    %c1_21 = arith.constant 1 : index
    %c0_22 = arith.constant 0 : index
    %c0_23 = arith.constant 0 : index
    %16 = vector.load %arg5[%c1_20, %c1_21, %c0_22, %c0_23] : memref<3x18x16x64xbf16, #tpu.memory_space<vmem>>, vector<1x16x16x64xbf16>
    %17 = vector.shape_cast %16 : vector<1x16x16x64xbf16> to vector<16x16x64xbf16>
    %18 = vector.shape_cast %1 : vector<16x16x64xbf16> to vector<1x16x16x64xbf16>
    tpu.vector_store %arg5[%c1_20, %c1_21, %c0_22, %c0_23], %18 {strides = array<i32>} : memref<3x18x16x64xbf16, #tpu.memory_space<vmem>>, vector<1x16x16x64xbf16>,
    %19 = vector.extract_strided_slice %1 {offsets = [0, 1, 0], sizes = [16, 15, 64], strides = [1, 1, 1]} : vector<16x16x64xbf16> to vector<16x15x64xbf16>
    %c2_24 = arith.constant 2 : index
    %c1_25 = arith.constant 1 : index
    %c0_26 = arith.constant 0 : index
    %c0_27 = arith.constant 0 : index
    %20 = vector.load %arg5[%c2_24, %c1_25, %c0_26, %c0_27] : memref<3x18x16x64xbf16, #tpu.memory_space<vmem>>, vector<1x16x15x64xbf16>
    %21 = vector.shape_cast %20 : vector<1x16x15x64xbf16> to vector<16x15x64xbf16>
    %22 = vector.shape_cast %19 : vector<16x15x64xbf16> to vector<1x16x15x64xbf16>
    tpu.vector_store %arg5[%c2_24, %c1_25, %c0_26, %c0_27], %22 {strides = array<i32>} : memref<3x18x16x64xbf16, #tpu.memory_space<vmem>>, vector<1x16x15x64xbf16>,
    %c0_28 = arith.constant 0 : index
    %c0_29 = arith.constant 0 : index
    %c0_30 = arith.constant 0 : index
    %c0_31 = arith.constant 0 : index
    %23 = vector.load %arg5[%c0_28, %c0_29, %c0_30, %c0_31] : memref<3x18x16x64xbf16, #tpu.memory_space<vmem>>, vector<1x16x16x64xbf16>
    %24 = vector.shape_cast %23 : vector<1x16x16x64xbf16> to vector<16x16x64xbf16>
    %25 = vector.shape_cast %24 : vector<16x16x64xbf16> to vector<256x64xbf16>
    %c0_32 = arith.constant 0 : index
    %c0_33 = arith.constant 0 : index
    %c0_34 = arith.constant 0 : index
    %26 = vector.load %arg2[%c0_32, %c0_33, %c0_34] : memref<9x64x128xbf16, #tpu.memory_space<vmem>>, vector<1x64x128xbf16>
    %27 = vector.shape_cast %26 : vector<1x64x128xbf16> to vector<64x128xbf16>
    %cst_35 = arith.constant dense<0.000000e+00> : vector<256x128xf32>
    %28 = tpu.matmul %25, %27, %cst_35 {dimension_numbers = #tpu.dot_dimension_numbers<[1], [0], [0], [1], [0, 0, 1, 1], [], []>} : vector<256x64xbf16>, vector<64x128xbf16>, vector<256x128xf32> -> vector<256x128xf32>
    %c1_36 = arith.constant 1 : index
    %c0_37 = arith.constant 0 : index
    %c0_38 = arith.constant 0 : index
    %c0_39 = arith.constant 0 : index
    %29 = vector.load %arg5[%c1_36, %c0_37, %c0_38, %c0_39] : memref<3x18x16x64xbf16, #tpu.memory_space<vmem>>, vector<1x16x16x64xbf16>
    %30 = vector.shape_cast %29 : vector<1x16x16x64xbf16> to vector<16x16x64xbf16>
    %31 = vector.shape_cast %30 : vector<16x16x64xbf16> to vector<256x64xbf16>
    %c1_40 = arith.constant 1 : index
    %c0_41 = arith.constant 0 : index
    %c0_42 = arith.constant 0 : index
    %32 = vector.load %arg2[%c1_40, %c0_41, %c0_42] : memref<9x64x128xbf16, #tpu.memory_space<vmem>>, vector<1x64x128xbf16>
    %33 = vector.shape_cast %32 : vector<1x64x128xbf16> to vector<64x128xbf16>
    %cst_43 = arith.constant dense<0.000000e+00> : vector<256x128xf32>
    %34 = tpu.matmul %31, %33, %cst_43 {dimension_numbers = #tpu.dot_dimension_numbers<[1], [0], [0], [1], [0, 0, 1, 1], [], []>} : vector<256x64xbf16>, vector<64x128xbf16>, vector<256x128xf32> -> vector<256x128xf32>
    %35 = arith.addf %28, %34 : vector<256x128xf32>
    %c2_44 = arith.constant 2 : index
    %c0_45 = arith.constant 0 : index
    %c0_46 = arith.constant 0 : index
    %c0_47 = arith.constant 0 : index
    %36 = vector.load %arg5[%c2_44, %c0_45, %c0_46, %c0_47] : memref<3x18x16x64xbf16, #tpu.memory_space<vmem>>, vector<1x16x16x64xbf16>
    %37 = vector.shape_cast %36 : vector<1x16x16x64xbf16> to vector<16x16x64xbf16>
    %38 = vector.shape_cast %37 : vector<16x16x64xbf16> to vector<256x64xbf16>
    %c2_48 = arith.constant 2 : index
    %c0_49 = arith.constant 0 : index
    %c0_50 = arith.constant 0 : index
    %39 = vector.load %arg2[%c2_48, %c0_49, %c0_50] : memref<9x64x128xbf16, #tpu.memory_space<vmem>>, vector<1x64x128xbf16>
    %40 = vector.shape_cast %39 : vector<1x64x128xbf16> to vector<64x128xbf16>
    %cst_51 = arith.constant dense<0.000000e+00> : vector<256x128xf32>
    %41 = tpu.matmul %38, %40, %cst_51 {dimension_numbers = #tpu.dot_dimension_numbers<[1], [0], [0], [1], [0, 0, 1, 1], [], []>} : vector<256x64xbf16>, vector<64x128xbf16>, vector<256x128xf32> -> vector<256x128xf32>
    %42 = arith.addf %35, %41 : vector<256x128xf32>
    %c0_52 = arith.constant 0 : index
    %c1_53 = arith.constant 1 : index
    %c0_54 = arith.constant 0 : index
    %c0_55 = arith.constant 0 : index
    %43 = vector.load %arg5[%c0_52, %c1_53, %c0_54, %c0_55] : memref<3x18x16x64xbf16, #tpu.memory_space<vmem>>, vector<1x16x16x64xbf16>
    %44 = vector.shape_cast %43 : vector<1x16x16x64xbf16> to vector<16x16x64xbf16>
    %45 = vector.shape_cast %44 : vector<16x16x64xbf16> to vector<256x64xbf16>
    %c3 = arith.constant 3 : index
    %c0_56 = arith.constant 0 : index
    %c0_57 = arith.constant 0 : index
    %46 = vector.load %arg2[%c3, %c0_56, %c0_57] : memref<9x64x128xbf16, #tpu.memory_space<vmem>>, vector<1x64x128xbf16>
    %47 = vector.shape_cast %46 : vector<1x64x128xbf16> to vector<64x128xbf16>
    %cst_58 = arith.constant dense<0.000000e+00> : vector<256x128xf32>
    %48 = tpu.matmul %45, %47, %cst_58 {dimension_numbers = #tpu.dot_dimension_numbers<[1], [0], [0], [1], [0, 0, 1, 1], [], []>} : vector<256x64xbf16>, vector<64x128xbf16>, vector<256x128xf32> -> vector<256x128xf32>
    %49 = arith.addf %42, %48 : vector<256x128xf32>
    %c1_59 = arith.constant 1 : index
    %c1_60 = arith.constant 1 : index
    %c0_61 = arith.constant 0 : index
    %c0_62 = arith.constant 0 : index
    %50 = vector.load %arg5[%c1_59, %c1_60, %c0_61, %c0_62] : memref<3x18x16x64xbf16, #tpu.memory_space<vmem>>, vector<1x16x16x64xbf16>
    %51 = vector.shape_cast %50 : vector<1x16x16x64xbf16> to vector<16x16x64xbf16>
    %52 = vector.shape_cast %51 : vector<16x16x64xbf16> to vector<256x64xbf16>
    %c4 = arith.constant 4 : index
    %c0_63 = arith.constant 0 : index
    %c0_64 = arith.constant 0 : index
    %53 = vector.load %arg2[%c4, %c0_63, %c0_64] : memref<9x64x128xbf16, #tpu.memory_space<vmem>>, vector<1x64x128xbf16>
    %54 = vector.shape_cast %53 : vector<1x64x128xbf16> to vector<64x128xbf16>
    %cst_65 = arith.constant dense<0.000000e+00> : vector<256x128xf32>
    %55 = tpu.matmul %52, %54, %cst_65 {dimension_numbers = #tpu.dot_dimension_numbers<[1], [0], [0], [1], [0, 0, 1, 1], [], []>} : vector<256x64xbf16>, vector<64x128xbf16>, vector<256x128xf32> -> vector<256x128xf32>
    %56 = arith.addf %49, %55 : vector<256x128xf32>
    %c2_66 = arith.constant 2 : index
    %c1_67 = arith.constant 1 : index
    %c0_68 = arith.constant 0 : index
    %c0_69 = arith.constant 0 : index
    %57 = vector.load %arg5[%c2_66, %c1_67, %c0_68, %c0_69] : memref<3x18x16x64xbf16, #tpu.memory_space<vmem>>, vector<1x16x16x64xbf16>
    %58 = vector.shape_cast %57 : vector<1x16x16x64xbf16> to vector<16x16x64xbf16>
    %59 = vector.shape_cast %58 : vector<16x16x64xbf16> to vector<256x64xbf16>
    %c5 = arith.constant 5 : index
    %c0_70 = arith.constant 0 : index
    %c0_71 = arith.constant 0 : index
    %60 = vector.load %arg2[%c5, %c0_70, %c0_71] : memref<9x64x128xbf16, #tpu.memory_space<vmem>>, vector<1x64x128xbf16>
    %61 = vector.shape_cast %60 : vector<1x64x128xbf16> to vector<64x128xbf16>
    %cst_72 = arith.constant dense<0.000000e+00> : vector<256x128xf32>
    %62 = tpu.matmul %59, %61, %cst_72 {dimension_numbers = #tpu.dot_dimension_numbers<[1], [0], [0], [1], [0, 0, 1, 1], [], []>} : vector<256x64xbf16>, vector<64x128xbf16>, vector<256x128xf32> -> vector<256x128xf32>
    %63 = arith.addf %56, %62 : vector<256x128xf32>
    %c0_73 = arith.constant 0 : index
    %c2_74 = arith.constant 2 : index
    %c0_75 = arith.constant 0 : index
    %c0_76 = arith.constant 0 : index
    %64 = vector.load %arg5[%c0_73, %c2_74, %c0_75, %c0_76] : memref<3x18x16x64xbf16, #tpu.memory_space<vmem>>, vector<1x16x16x64xbf16>
    %65 = vector.shape_cast %64 : vector<1x16x16x64xbf16> to vector<16x16x64xbf16>
    %66 = vector.shape_cast %65 : vector<16x16x64xbf16> to vector<256x64xbf16>
    %c6 = arith.constant 6 : index
    %c0_77 = arith.constant 0 : index
    %c0_78 = arith.constant 0 : index
    %67 = vector.load %arg2[%c6, %c0_77, %c0_78] : memref<9x64x128xbf16, #tpu.memory_space<vmem>>, vector<1x64x128xbf16>
    %68 = vector.shape_cast %67 : vector<1x64x128xbf16> to vector<64x128xbf16>
    %cst_79 = arith.constant dense<0.000000e+00> : vector<256x128xf32>
    %69 = tpu.matmul %66, %68, %cst_79 {dimension_numbers = #tpu.dot_dimension_numbers<[1], [0], [0], [1], [0, 0, 1, 1], [], []>} : vector<256x64xbf16>, vector<64x128xbf16>, vector<256x128xf32> -> vector<256x128xf32>
    %70 = arith.addf %63, %69 : vector<256x128xf32>
    %c1_80 = arith.constant 1 : index
    %c2_81 = arith.constant 2 : index
    %c0_82 = arith.constant 0 : index
    %c0_83 = arith.constant 0 : index
    %71 = vector.load %arg5[%c1_80, %c2_81, %c0_82, %c0_83] : memref<3x18x16x64xbf16, #tpu.memory_space<vmem>>, vector<1x16x16x64xbf16>
    %72 = vector.shape_cast %71 : vector<1x16x16x64xbf16> to vector<16x16x64xbf16>
    %73 = vector.shape_cast %72 : vector<16x16x64xbf16> to vector<256x64xbf16>
    %c7 = arith.constant 7 : index
    %c0_84 = arith.constant 0 : index
    %c0_85 = arith.constant 0 : index
    %74 = vector.load %arg2[%c7, %c0_84, %c0_85] : memref<9x64x128xbf16, #tpu.memory_space<vmem>>, vector<1x64x128xbf16>
    %75 = vector.shape_cast %74 : vector<1x64x128xbf16> to vector<64x128xbf16>
    %cst_86 = arith.constant dense<0.000000e+00> : vector<256x128xf32>
    %76 = tpu.matmul %73, %75, %cst_86 {dimension_numbers = #tpu.dot_dimension_numbers<[1], [0], [0], [1], [0, 0, 1, 1], [], []>} : vector<256x64xbf16>, vector<64x128xbf16>, vector<256x128xf32> -> vector<256x128xf32>
    %77 = arith.addf %70, %76 : vector<256x128xf32>
    %c2_87 = arith.constant 2 : index
    %c2_88 = arith.constant 2 : index
    %c0_89 = arith.constant 0 : index
    %c0_90 = arith.constant 0 : index
    %78 = vector.load %arg5[%c2_87, %c2_88, %c0_89, %c0_90] : memref<3x18x16x64xbf16, #tpu.memory_space<vmem>>, vector<1x16x16x64xbf16>
    %79 = vector.shape_cast %78 : vector<1x16x16x64xbf16> to vector<16x16x64xbf16>
    %80 = vector.shape_cast %79 : vector<16x16x64xbf16> to vector<256x64xbf16>
    %c8 = arith.constant 8 : index
    %c0_91 = arith.constant 0 : index
    %c0_92 = arith.constant 0 : index
    %81 = vector.load %arg2[%c8, %c0_91, %c0_92] : memref<9x64x128xbf16, #tpu.memory_space<vmem>>, vector<1x64x128xbf16>
    %82 = vector.shape_cast %81 : vector<1x64x128xbf16> to vector<64x128xbf16>
    %cst_93 = arith.constant dense<0.000000e+00> : vector<256x128xf32>
    %83 = tpu.matmul %80, %82, %cst_93 {dimension_numbers = #tpu.dot_dimension_numbers<[1], [0], [0], [1], [0, 0, 1, 1], [], []>} : vector<256x64xbf16>, vector<64x128xbf16>, vector<256x128xf32> -> vector<256x128xf32>
    %84 = arith.addf %77, %83 : vector<256x128xf32>
    %c0_94 = arith.constant 0 : index
    %c0_95 = arith.constant 0 : index
    %85 = vector.load %arg3[%c0_94, %c0_95] : memref<1x128xf32, #tpu.memory_space<vmem>>, vector<1x128xf32>
    %86 = vector.broadcast %85 : vector<1x128xf32> to vector<256x128xf32>
    %87 = arith.addf %84, %86 : vector<256x128xf32>
    %88 = vector.shape_cast %87 : vector<256x128xf32> to vector<16x16x128xf32>
    %c0_96 = arith.constant 0 : index
    %c0_97 = arith.constant 0 : index
    %c0_98 = arith.constant 0 : index
    %c0_99 = arith.constant 0 : index
    %89 = vector.load %arg4[%c0_96, %c0_97, %c0_98, %c0_99] : memref<1x16x16x128xf32, #tpu.memory_space<vmem>>, vector<1x16x16x128xf32>
    %90 = vector.shape_cast %89 : vector<1x16x16x128xf32> to vector<16x16x128xf32>
    %91 = vector.shape_cast %88 : vector<16x16x128xf32> to vector<1x16x16x128xf32>
    tpu.vector_store %arg4[%c0_96, %c0_97, %c0_98, %c0_99], %91 {strides = array<i32>} : memref<1x16x16x128xf32, #tpu.memory_space<vmem>>, vector<1x16x16x128xf32>,
    return
  }
  func.func @transform_0(%arg0: i32) -> (i32, i32, i32, i32) {
    %c0_i32 = arith.constant 0 : i32
    %c0_i32_0 = arith.constant 0 : i32
    %c0_i32_1 = arith.constant 0 : i32
    %c0_i32_2 = arith.constant 0 : i32
    return %arg0, %c0_i32, %c0_i32_0, %c0_i32_1 : i32, i32, i32, i32
  }
  func.func @transform_1(%arg0: i32) -> (i32, i32, i32) {
    %c0_i32 = arith.constant 0 : i32
    %c0_i32_0 = arith.constant 0 : i32
    %c0_i32_1 = arith.constant 0 : i32
    %c0_i32_2 = arith.constant 0 : i32
    return %c0_i32, %c0_i32_0, %c0_i32_1 : i32, i32, i32
  }
  func.func @transform_2(%arg0: i32) -> (i32, i32) {
    %c0_i32 = arith.constant 0 : i32
    %c0_i32_0 = arith.constant 0 : i32
    %c0_i32_1 = arith.constant 0 : i32
    return %c0_i32, %c0_i32_0 : i32, i32
  }
  func.func @transform_3(%arg0: i32) -> (i32, i32, i32, i32) {
    %c0_i32 = arith.constant 0 : i32
    %c0_i32_0 = arith.constant 0 : i32
    %c0_i32_1 = arith.constant 0 : i32
    %c0_i32_2 = arith.constant 0 : i32
    return %arg0, %c0_i32, %c0_i32_0, %c0_i32_1 : i32, i32, i32, i32
  }
}

</mosaic_0001>

<bundles_post_ra>
// kernel: regression_model_forward.5
= control target key start
LH: loop header
LB: loop body
LE: loop exit
PB: predicated region body
PF: predicated region fallthrough
CT: control target
= control target key end

     0   :  { %12 = vsyncpa [#allocation4], 0  ;;  %s6954_s0 = inlined_call_operand.vmem [shape: bf16[2,16,16,4], index: 0, kind: input, shape index: {}]   ;;  %s6955_s1 = inlined_call_operand.hbm [shape: bf16[9,4,64], index: 1, kind: input, shape index: {}]   ;;  %s6956_s2 = inlined_call_operand.hbm [shape: f32[1,64], index: 2, kind: input, shape index: {}]   ;;  %s6957_s3 = inlined_call_operand.vmem [shape: f32[64,32], index: 3, kind: input, shape index: {}]   ;;  %s6958_s4 = inlined_call_operand.vmem [shape: f32[32,64], index: 4, kind: input, shape index: {}]   ;;  %s6959_s5 = inlined_call_operand.hbm [shape: f32[1,64], index: 5, kind: input, shape index: {}]   ;;  %s6960_s6 = inlined_call_operand.hbm [shape: f32[1,64], index: 6, kind: input, shape index: {}]   ;;  %s6961_s7 = inlined_call_operand.vmem [shape: bf16[2,16,16,64], index: 7, kind: output, shape index: {}]  }
   0x1   :  { %13 = vsyncpa [#allocation6], 0 }
   0x2   :  { %14 = vsyncpa [#allocation9], 0  ;;  %s5342_s24 = smov 0  }
   0x3 LB: > { %s229_s27 = sshll.u32 %s6956_s2, 4  ;;  %s5351_s28 = sadd.s32 4294967295, %s5292_s24   ;;  %s5292_s24 = sphi %s5342_s24, %s20_s24   ;;  %s230_s27 = int_to_ptr.hbm [resolvable:$true] %s229_s27 }
   0x4   : > { %p4207_p0 = scmp.ge.s32.totalorder %s5292_s24, 1  ;;  %p203_p1 = scmp.lt.s32.totalorder %s5292_s24, 3 }
   0x5   : > { %p5126_p2 = scmp.eq.s32.totalorder %s5351_s28, 0  ;;  %s5294_s30 = smov [#allocation5]  }
   0x6   : > { %p5356_p3 = pnand %p4207_p0, %p203_p1  ;;  %s231_s8 = sshll.u32 %s5294_s30, 4  ;;  %s232_s8 = int_to_ptr.vmem [resolvable:$true] %s231_s8 }
   0x7   : > { %s214_s11 = sshll.u32 %s6955_s1, 4  ;;  %s5295_s13 = smov [#allocation3]   ;;  %s215_s11 = int_to_ptr.hbm [resolvable:$true] %s214_s11 }
   0x8   : > { %p5113_p4 = pneg %p5356_p3  ;;  %s216_s14 = sshll.u32 %s5295_s13, 4  ;;  %s217_s14 = int_to_ptr.vmem [resolvable:$true] %s216_s14 }
   0x9   : > { %s247_s17 = sshll.u32 %s6959_s5, 4  ;;  %s5296_s18 = smov 32   ;;  %s248_s17 = int_to_ptr.hbm [resolvable:$true] %s247_s17 }
   0xa   : > { %p5367_p5 = pnand %p5126_p2, %p5113_p4  ;;  %s5297_s19 = smov 2  }
   0xb   : > { %s5298_s20 = smov [#allocation7]   ;;  %s259_s25 = sshll.u32 %s6960_s6, 4  ;;  %s260_s25 = int_to_ptr.hbm [resolvable:$true] %s259_s25 }
   0xc   : > { %5119 = dma.hbm_to_vmem [thread:$0]  (!%p5367_p5), %s230_s27, 16, %s232_s8, [#allocation6]  }
   0xd   : > { %5116 = dma.hbm_to_vmem [thread:$0]  (!%p5367_p5), %s215_s11, 288, %s217_s14, [#allocation4], %s5296_s18, %s5296_s18, %s5297_s19  }
   0xe   : > { %s249_s21 = sshll.u32 %s5298_s20, 4  ;;  %s5299_s26 = smov [#allocation8]   ;;  %s250_s21 = int_to_ptr.vmem [resolvable:$true] %s249_s21 }
   0xf   : > { %5122 = dma.hbm_to_vmem [thread:$0]  (!%p5367_p5), %s248_s17, 16, %s250_s21, [#allocation6]  }
  0x10   : > { %s261_s30 = sshll.u32 %s5299_s26, 4  ;;  %282 = sbr.rel (%p5356_p3) target bundleno = 1688 (0x698), region = 48  ;;  %s262_s30 = int_to_ptr.vmem [resolvable:$true] %s261_s30 }
  0x11   : > { %5125 = dma.hbm_to_vmem [thread:$0]  (!%p5367_p5), %s260_s25, 16, %s262_s30, [#allocation9]  }
  0x15   : > { %5279 = dma.done.wait (%p5126_p2), [#allocation4], 288  }
  0x16   : > { %5281 = vsyncadd (%p5126_p2), [#allocation4], 4294967008 }
  0x17   : > { %5283 = dma.done.wait (%p5126_p2), [#allocation6], 32  }
  0x18   : > { %5285 = vsyncadd (%p5126_p2), [#allocation6], 4294967264 }
  0x19   : > { %5287 = dma.done.wait (%p5126_p2), [#allocation9], 16  }
  0x1a   : > { %5289 = vsyncadd (%p5126_p2), [#allocation9], 4294967280  ;;  %vm373_vm0 = vcmask 27648   ;;  %v5300_v0 = vmov 0   ;;  %p330_p6 = scmp.lt.s32.totalorder %s5351_s28, 1  ;;  %vm1322_vm1 = vcmask 1041408  }
  0x1b   : > { %376 = vst.msk [vmem:[#allocation2 + $0x90] sm:$0xf] %vm373_vm0, %v5300_v0  ;;  %v1192_v1 = vld [vmem:[#allocation3 + $0x2] sm:$0x3]  ;;  %vm1273_vm2 = vcmask 31744   ;;  %vm388_vm3 = vcmask 24576  }
  0x1c   : > { %377 = vst.msk [vmem:[#allocation2 + $0x94] sm:$0xf] %vm373_vm0, %v5300_v0  ;;  %s7034_s28 = smov (!%p330_p6, %s5351_s28), 1  ;;  %v1324_v2 = vsel %vm1322_vm1, %v1192_v1, 0  ;;  %v1157_v52 = vld [vmem:[#allocation3] sm:$0x3] }
  0x1d   : > { %374 = vst.msk [vmem:[#allocation2] sm:$0xf] %vm373_vm0, %v5300_v0  ;;  %s4948_s27 = sshll.u32 %s7034_s28, 7  ;;  %1333 = vmatpush.bf16.msra.mxu0 %v1324_v2  ;;  %5094 = vmatpush.bf16.msra.mxu1 %v1324_v2  ;;  %v1669_v55 = vld [vmem:[#allocation3 + $0x4] sm:$0x3]  ;;  %v1544_v61 = vsel %vm1322_vm1, %v1157_v52, 0 }
  0x1e   : > { %375 = vst.msk [vmem:[#allocation2 + $0x4] sm:$0xf] %vm373_vm0, %v5300_v0  ;;  %s5416_s9 = scalar_lea.vmem %s6954_s0, %s4948_s27  ;;  %5095 = vmatpush.bf16.msra.mxu2 %v1324_v2  ;;  %5096 = vmatpush.bf16.msra.mxu3 %v1324_v2  ;;  %v1955_v56 = vld [vmem:[#allocation3 + $0x6] sm:$0x3]  ;;  %v1799_v63 = vsel %vm1322_vm1, %v1669_v55, 0  ;;  %vm440_vm9 = vcmask 27651   ;;  %s6826_s16 = scalar_lea.vmem %s6961_s7, %s4948_s27 }
  0x1f   : > { %378 = vst.msk [vmem:[#allocation2 + $0x120] sm:$0xf] %vm373_vm0, %v5300_v0  ;;  %v5423_v4 = vld [vmem:[%s5416_s9 + $0x28] sm:$0xf]  ;;  %v5427_v5 = vld [vmem:[%s5416_s9 + $0x2c] sm:$0xf] }
  0x20   : > { %379 = vst.msk [vmem:[#allocation2 + $0x124] sm:$0xf] %vm373_vm0, %v5300_v0  ;;  %v5432_v6 = vld [vmem:[%s5416_s9 + $0x48] sm:$0xf]  ;;  %v5437_v7 = vld [vmem:[%s5416_s9 + $0x4c] sm:$0xf] }
  0x21   : > { %381 = vst.msk [vmem:[#allocation2 + $0x88] sm:$0xf] %vm373_vm0, %v5300_v0  ;;  %v5442_v8 = vld [vmem:[%s5416_s9] sm:$0xf]  ;;  %v5449_v9 = vld [vmem:[%s5416_s9 + $0x4] sm:$0xf]  ;;  %1553 = vmatpush.bf16.msrb.mxu1 %v1544_v61 }
  0x22   : > { %382 = vst.msk [vmem:[#allocation2 + $0x8c] sm:$0xf] %vm373_vm0, %v5300_v0  ;;  %v5454_v10 = vld [vmem:[%s5416_s9 + $0x30] sm:$0xf]  ;;  %v5459_v11 = vld [vmem:[%s5416_s9 + $0x34] sm:$0xf]  ;;  %1808 = vmatpush.bf16.msrb.mxu2 %v1799_v63 }
  0x23   : > { %v4966_v3 = vld [vmem:[#allocation2 + $0x90] sm:$0xff]  ;;  %383 = vst.msk [vmem:[#allocation2 + $0x118] sm:$0xf] %vm373_vm0, %v5300_v0  ;;  %v5475_v16 = vld [vmem:[%s5416_s9 + $0x8] sm:$0xf]  ;;  %v494_v37 = vshrl.u32 %v5442_v8, 16 }
  0x24   : > { %384 = vst.msk [vmem:[#allocation2 + $0x11c] sm:$0xf] %vm373_vm0, %v5300_v0  ;;  %4286 = vmatmul.msk.bf16.vlgmr.msra.gmra.mxu0 %vm1273_vm2, %v4966_v3  ;;  %v5466_v13 = vld [vmem:[%s5416_s9 + $0x50] sm:$0xf]  ;;  %v5469_v14 = vld [vmem:[%s5416_s9 + $0x54] sm:$0xf] }
  0x25   : > { %385 = vst.msk [vmem:[#allocation2 + $0x1a8] sm:$0xf] %vm373_vm0, %v5300_v0  ;;  %v5481_v18 = vld [vmem:[%s5416_s9 + $0xc] sm:$0xf]  ;;  %v5489_v19 = vld [vmem:[%s5416_s9 + $0x38] sm:$0xf] }
  0x26   : > { %386 = vst.msk [vmem:[#allocation2 + $0x1ac] sm:$0xf] %vm373_vm0, %v5300_v0  ;;  %v5492_v20 = vld [vmem:[%s5416_s9 + $0x3c] sm:$0xf]  ;;  %v5499_v21 = vld [vmem:[%s5416_s9 + $0x58] sm:$0xf] }
  0x27   : > { %859 = vst.msk [vmem:[#allocation2 + $0xc0] sm:$0xf] %vm373_vm0, %v5423_v4  ;;  %v5502_v22 = vld [vmem:[%s5416_s9 + $0x5c] sm:$0xf]  ;;  %v5509_v24 = vld [vmem:[%s5416_s9 + $0x68] sm:$0xf] }
  0x28   : > { %860 = vst.msk [vmem:[#allocation2 + $0xc4] sm:$0xf] %vm373_vm0, %v5427_v5  ;;  %v5512_v25 = vld [vmem:[%s5416_s9 + $0x6c] sm:$0xf]  ;;  %v5520_v27 = vld [vmem:[%s5416_s9 + $0x10] sm:$0xf] }
  0x29   : > { %867 = vst.msk [vmem:[#allocation2 + $0xe0] sm:$0xf] %vm373_vm0, %v5432_v6  ;;  %v5523_v29 = vld [vmem:[%s5416_s9 + $0x14] sm:$0xf]  ;;  %v5532_v30 = vld [vmem:[%s5416_s9 + $0x40] sm:$0xf] }
  0x2a   : > { %868 = vst.msk [vmem:[#allocation2 + $0xe4] sm:$0xf] %vm373_vm0, %v5437_v7  ;;  %v5535_v31 = vld [vmem:[%s5416_s9 + $0x44] sm:$0xf]  ;;  %v5543_v33 = vld [vmem:[%s5416_s9 + $0x60] sm:$0xf] }
  0x2b   : > { %849 = vst.msk [vmem:[#allocation2 + $0x98] sm:$0xf] %vm373_vm0, %v5442_v8  ;;  %v5546_v34 = vld [vmem:[%s5416_s9 + $0x64] sm:$0xf]  ;;  %v5553_v36 = vld [vmem:[%s5416_s9 + $0x70] sm:$0xf] }
  0x2c   : > { %850 = vst.msk [vmem:[#allocation2 + $0x9c] sm:$0xf] %vm373_vm0, %v5449_v9  ;;  %v5557_v39 = vld [vmem:[%s5416_s9 + $0x74] sm:$0xf]  ;;  %v502_v40 = vshrl.u32 %v5449_v9, 16  ;;  %v505_v41 = vshll.u32 %v5449_v9, 16 }
  0x2d   : > { %861 = vst.msk [vmem:[#allocation2 + $0xc8] sm:$0xf] %vm373_vm0, %v5454_v10  ;;  %v5567_v43 = vld [vmem:[%s5416_s9 + $0x18] sm:$0xf]  ;;  %v5569_v44 = vrot.slane %v494_v37, 7  ;;  %v497_v49 = vshll.u32 %v5442_v8, 16 }
  0x2e   : > { %862 = vst.msk [vmem:[#allocation2 + $0xcc] sm:$0xf] %vm373_vm0, %v5459_v11  ;;  %v5571_v45 = vrot.slane %v505_v41, 5  ;;  %v890_v46 = vrot.slane %v502_v40, 4  ;;  %v5575_v47 = vld [vmem:[%s5416_s9 + $0x1c] sm:$0xf] }
  0x2f   : > { %v4972_v12 = vld [vmem:[#allocation2 + $0xc0] sm:$0xff]  ;;  %869 = vst.msk [vmem:[#allocation2 + $0xe8] sm:$0xf] %vm373_vm0, %v5466_v13  ;;  %v504_v48 = vrot.slane %v502_v40, 7  ;;  %v500_v50 = vrot.slane %v5569_v44, 4  ;;  %v510_v53 = vshrl.u32 %v5475_v16, 16 }
  0x30   : > { %4292 = vmatmul.msk.bf16.vlgmr.msra.gmra.mxu1 %vm1273_vm2, %v4972_v12  ;;  %870 = vst.msk [vmem:[#allocation2 + $0xec] sm:$0xf] %vm373_vm0, %v5469_v14  ;;  %v891_v51 = vor.u32 %v890_v46, %v5571_v45  ;;  %v518_v54 = vshrl.u32 %v5481_v18, 16  ;;  %v884_v58 = vrot.slane %v494_v37, 4  ;;  %v885_v59 = vrot.slane %v497_v49, 5 }
  0x31   : > { %v4976_v15 = vld [vmem:[#allocation2 + $0xe0] sm:$0xff]  ;;  %851 = vst.msk [vmem:[#allocation2 + $0xa0] sm:$0xf] %vm373_vm0, %v5475_v16  ;;  %v507_v57 = vor.u32 %v505_v41, %v504_v48  ;;  %v513_v62 = vshll.u32 %v5475_v16, 16  ;;  %v2085_v0 = vsel %vm1322_vm1, %v1955_v56, 0  ;;  %v521_v3 = vshll.u32 %v5481_v18, 16 }
  0x32   : > { %4296 = vmatmul.msk.bf16.vlgmr.msra.gmra.mxu2 %vm1273_vm2, %v4976_v15  ;;  %852 = vst.msk [vmem:[#allocation2 + $0xa4] sm:$0xf] %vm373_vm0, %v5481_v18  ;;  %v391_v1 = vld [vmem:[#allocation2 + $0x8] sm:$0x1]  ;;  %v5591_v2 = vrot.slane %v891_v51, 4  ;;  %v5595_v8 = vrot.slane %v510_v53, 7  ;;  %2094 = vmatpush.bf16.msrb.mxu3 %v2085_v0  ;;  %v886_v46 = vor.u32 %v885_v59, %v884_v58 }
  0x33   : > { %v4967_v17 = vld [vmem:[#allocation2 + $0x98] sm:$0xff]  ;;  %863 = vst.msk [vmem:[#allocation2 + $0xd0] sm:$0xf] %vm373_vm0, %v5489_v19  ;;  %vm389_vm4 = vsmask.f32 256  ;;  %v520_v9 = vrot.slane %v518_v54, 7 }
  0x34   : > { %4287 = vmatmul.msk.bf16.gmra.mxu0 %vm1273_vm2, %v4967_v17  ;;  %864 = vst.msk [vmem:[#allocation2 + $0xd4] sm:$0xf] %vm373_vm0, %v5492_v20  ;;  %vm491_vm5 = vsmask.f32 4368  ;;  %v893_v12 = vrot.slane %v510_v53, 4  ;;  %v894_v15 = vrot.slane %v513_v62, 5  ;;  %vm5601_vm6 = vmand %vm388_vm3, %vm389_vm4  ;;  %v499_v53 = vor.u32 %v497_v49, %v5569_v44 }
  0x35   : > { %871 = vst.msk [vmem:[#allocation2 + $0xf0] sm:$0xf] %vm373_vm0, %v5499_v21  ;;  %v4973_v23 = vld [vmem:[#allocation2 + $0xc8] sm:$0xff]  ;;  %vm5610_vm7 = vmor %vm389_vm4, %vm491_vm5  ;;  %v5615_v37 = vld [vmem:[%s5416_s9 + $0x20] sm:$0xf]  ;;  %v537_v40 = vshll.u32 %v5523_v29, 16  ;;  %v523_v51 = vor.u32 %v521_v3, %v520_v9 }
  0x36   : > { %872 = vst.msk [vmem:[#allocation2 + $0xf4] sm:$0xf] %vm373_vm0, %v5502_v22  ;;  %v508_v41 = vsel %vm5610_vm7, %v500_v50, %v507_v57  ;;  %vm782_vm8 = vsmask.f32 7938  ;;  %vm441_vm10 = vsmask.f32 7950 }
  0x37   : > { %v4977_v26 = vld [vmem:[#allocation2 + $0xe8] sm:$0xff]  ;;  %875 = vst.msk [vmem:[#allocation2 + $0x100] sm:$0xf] %vm373_vm0, %v5509_v24  ;;  %vm5630_vm11 = vmand %vm440_vm9, %vm441_vm10  ;;  %vm881_vm12 = vsmask.f32 3328  ;;  %v887_v58 = vrot.slane %v886_v46, 4 }
  0x38   : > { %876 = vst.msk [vmem:[#allocation2 + $0x104] sm:$0xf] %vm373_vm0, %v5512_v25  ;;  %v443_v52 = vld [vmem:[#allocation2 + $0x12c] sm:$0x8]  ;;  %vm882_vm13 = vsmask.f32 7440  ;;  %vm5648_vm15 = vmand %vm373_vm0, %vm782_vm8 }
  0x39   : > { %v4968_v28 = vld [vmem:[#allocation2 + $0xa0] sm:$0xff]  ;;  %853 = vst.msk [vmem:[#allocation2 + $0xa8] sm:$0xf] %vm373_vm0, %v5520_v27  ;;  %v444_v56 = vsel %vm5630_vm11, 0, %v443_v52  ;;  %vm5638_vm14 = vmor %vm881_vm12, %vm882_vm13  ;;  %v394_v59 = vld [vmem:[#allocation2 + $0x10] sm:$0x1] }
  0x3a   : > { %854 = vst.msk [vmem:[#allocation2 + $0xac] sm:$0xf] %vm373_vm0, %v5523_v29  ;;  %v395_v49 = vsel %vm5601_vm6, 0, %v394_v59  ;;  %v2241_v63 = vld [vmem:[#allocation3 + $0x8] sm:$0x3]  ;;  %v899_v0 = vrot.slane %v518_v54, 4  ;;  %v895_v54 = vor.u32 %v894_v15, %v893_v12  ;;  %v515_v12 = vor.u32 %v513_v62, %v5595_v8  ;;  %vm5681_vm3 = vmand %vm373_vm0, %vm881_vm12 }
  0x3b   : > { %865 = vst.msk [vmem:[#allocation2 + $0xd8] sm:$0xf] %vm373_vm0, %v5532_v30  ;;  %v4974_v35 = vld [vmem:[#allocation2 + $0xd0] sm:$0xff]  ;;  %v2371_v9 = vsel %vm1322_vm1, %v2241_v63, 0  ;;  %v397_v46 = vld [vmem:[#allocation2 + $0x18] sm:$0x1] }
  0x3c   : > { %866 = vst.msk [vmem:[#allocation2 + $0xdc] sm:$0xf] %vm373_vm0, %v5535_v31  ;;  %2380 = vmatpush.bf16.msrb.mxu0 %v2371_v9  ;;  %v398_v52 = vsel %vm5601_vm6, 0, %v397_v46  ;;  %v906_v63 = vrot.slane %v537_v40, 5 }
  0x3d   : > { %873 = vst.msk [vmem:[#allocation2 + $0xf8] sm:$0xf] %vm373_vm0, %v5543_v33  ;;  %v4978_v38 = vld [vmem:[#allocation2 + $0xf0] sm:$0xff] }
  0x3e   : > { %874 = vst.msk [vmem:[#allocation2 + $0xfc] sm:$0xf] %vm373_vm0, %v5546_v34 }
  0x3f   : > { %v4980_v32 = vld [vmem:[#allocation2 + $0x100] sm:$0xff]  ;;  %877 = vst.msk [vmem:[#allocation2 + $0x108] sm:$0xf] %vm373_vm0, %v5553_v36 }
  0x40   : > { %4293 = vmatmul.msk.bf16.gmra.mxu1 %vm1273_vm2, %v4973_v23  ;;  %4300 = vmatmul.msk.bf16.vlgmr.msra.gmra.mxu3 %vm1273_vm2, %v4980_v32  ;;  %878 = vst.msk [vmem:[#allocation2 + $0x10c] sm:$0xf] %vm373_vm0, %v5557_v39  ;;  %v5605_v23 = vrot.slane %v521_v3, 5  ;;  %v392_v32 = vsel %vm5601_vm6, 0, %v391_v1  ;;  %v889_v1 = vsel %vm5638_vm14, %v887_v58, %v5571_v45 }
  0x41   : > { %v4969_v42 = vld [vmem:[#allocation2 + $0xa8] sm:$0xff]  ;;  %855 = vst.msk [vmem:[#allocation2 + $0xb0] sm:$0xf] %vm373_vm0, %v5567_v43 }
  0x42   : > { %4297 = vmatmul.msk.bf16.gmra.mxu2 %vm1273_vm2, %v4977_v26  ;;  %856 = vst.msk [vmem:[#allocation2 + $0xb4] sm:$0xf] %vm373_vm0, %v5575_v47  ;;  %v526_v26 = vshrl.u32 %v5520_v27, 16  ;;  %v900_v15 = vor.u32 %v899_v0, %v5605_v23 }
  0x43   : > { %393 = vst [vmem:[#allocation2 + $0x8] sm:$0x1] %v392_v32 }
  0x44   : > { %4288 = vmatmul.msk.bf16.gmra.mxu0 %vm1273_vm2, %v4968_v28  ;;  %v4975_v28 = vld [vmem:[#allocation2 + $0xd8] sm:$0xff]  ;;  %787 = vst.msk [vmem:[#allocation2 + $0xc] sm:$0xf] %vm373_vm0, %v508_v41  ;;  %v528_v32 = vrot.slane %v526_v26, 7 }
  0x45   : > { %v4979_v48 = vld [vmem:[#allocation2 + $0xf8] sm:$0xff]  ;;  %857 = vst.msk [vmem:[#allocation2 + $0xb8] sm:$0xf] %vm373_vm0, %v5615_v37 }
  0x46   : > { %445 = vst [vmem:[#allocation2 + $0x12c] sm:$0x8] %v444_v56  ;;  %v532_v58 = vrot.slane %v528_v32, 4 }
  0x47   : > { %v4981_v60 = vld [vmem:[#allocation2 + $0x108] sm:$0xff]  ;;  %396 = vst [vmem:[#allocation2 + $0x10] sm:$0x1] %v395_v49 }
  0x48   : > { %1060 = vst.msk [vmem:[#allocation2 + $0x128] sm:$0xf] %vm373_vm0, %v889_v1 }
  0x49   : > { %v4970_v55 = vld [vmem:[#allocation2 + $0xb0] sm:$0xff]  ;;  %399 = vst [vmem:[#allocation2 + $0x18] sm:$0x1] %v398_v52 }
  0x4a   : > { %v784_v41 = vld [vmem:[#allocation2 + $0x8] sm:$0xf] }
  0x4b   : > { %v785_v45 = vsel %vm5648_vm15, %v499_v53, %v784_v41  ;;  %v542_v41 = vshrl.u32 %v5567_v43, 16 }
  0x4c   : > { %786 = vst [vmem:[#allocation2 + $0x8] sm:$0xf] %v785_v45  ;;  %v400_v45 = vld [vmem:[#allocation2 + $0x20] sm:$0x1] }
  0x4d   : > { %v1062_v59 = vld [vmem:[#allocation2 + $0x12c] sm:$0xf] }
  0x4e   : > { %v1063_v16 = vsel %vm5681_vm3, %v5591_v2, %v1062_v59  ;;  %v788_v62 = vld [vmem:[#allocation2 + $0x10] sm:$0xf]  ;;  %v550_v2 = vshrl.u32 %v5575_v47, 16 }
  0x4f   : > { %1064 = vst [vmem:[#allocation2 + $0x12c] sm:$0xf] %v1063_v16 }
  0x50   : > { %4294 = vmatmul.msk.bf16.gmra.mxu1 %vm1273_vm2, %v4974_v35  ;;  %4301 = vmatmul.msk.bf16.gmra.mxu3 %vm1273_vm2, %v4981_v60  ;;  %v516_v60 = vrot.slane %v5595_v8, 4  ;;  %v552_v52 = vrot.slane %v550_v2, 7 }
  0x52   : > { %4298 = vmatmul.msk.bf16.gmra.mxu2 %vm1273_vm2, %v4978_v38  ;;  %v534_v38 = vshrl.u32 %v5523_v29, 16  ;;  %v524_v3 = vsel %vm5610_vm7, %v516_v60, %v523_v51  ;;  %v896_v51 = vrot.slane %v895_v54, 4  ;;  %v901_v60 = vrot.slane %v900_v15, 4 }
  0x53   : > { %791 = vst.msk [vmem:[#allocation2 + $0x14] sm:$0xf] %vm373_vm0, %v524_v3  ;;  %v4998_v1 = vld [vmem:[#allocation2 + $0x8] sm:$0xff]  ;;  %v4982_v3 = vld [vmem:[#allocation2 + $0x120] sm:$0xff] }
  0x54   : > { %4289 = vmatmul.msk.bf16.gmra.mxu0 %vm1273_vm2, %v4969_v42  ;;  %v5622_v42 = vld [vmem:[%s5416_s9 + $0x24] sm:$0xf]  ;;  %v536_v61 = vrot.slane %v534_v38, 7  ;;  %v898_v56 = vsel %vm5638_vm14, %v896_v51, %v5605_v23  ;;  %v908_v0 = vrot.slane %v534_v38, 4  ;;  %v902_v38 = vrot.slane %v526_v26, 4 }
  0x55   : > { %858 = vst.msk [vmem:[#allocation2 + $0xbc] sm:$0xf] %vm373_vm0, %v5622_v42  ;;  %v4950_v23 = vld [vmem:[#allocation2] sm:$0xff]  ;;  %v545_v26 = vshll.u32 %v5567_v43, 16 }
  0x56   : > { %1065 = vst.msk [vmem:[#allocation2 + $0x130] sm:$0xf] %vm373_vm0, %v898_v56  ;;  %v909_v51 = vor.u32 %v908_v0, %v906_v63  ;;  %v917_v0 = vrot.slane %v550_v2, 4  ;;  %v403_v2 = vld [vmem:[#allocation2 + $0x28] sm:$0x1] }
  0x5c   : > { %v4971_v46 = vld [vmem:[#allocation2 + $0xb8] sm:$0xff] }
  0x60   : > { %4295 = vmatmul.msk.bf16.gmra.mxu1 %vm1273_vm2, %v4975_v28  ;;  %v446_v28 = vld [vmem:[#allocation2 + $0x134] sm:$0x8]  ;;  %4526 = vmatmul.msk.bf16.vlgmr.msrb.gmra.mxu3 %vm1273_vm2, %v4998_v1  ;;  %v4951_v1 = vld [vmem:[#allocation2 + $0x8] sm:$0xff] }
  0x61   : > { %v447_v18 = vsel %vm5630_vm11, 0, %v446_v28  ;;  %v449_v28 = vld [vmem:[#allocation2 + $0x13c] sm:$0x8] }
  0x62   : > { %4299 = vmatmul.msk.bf16.gmra.mxu2 %vm1273_vm2, %v4979_v48  ;;  %v539_v48 = vor.u32 %v537_v40, %v536_v61  ;;  %448 = vst [vmem:[#allocation2 + $0x134] sm:$0x8] %v447_v18  ;;  %v789_v61 = vsel %vm5648_vm15, %v515_v12, %v788_v62  ;;  %v792_v18 = vld [vmem:[#allocation2 + $0x18] sm:$0xf]  ;;  %v450_v29 = vsel %vm5630_vm11, 0, %v449_v28  ;;  %v553_v12 = vshll.u32 %v5575_v47, 16 }
  0x63   : > { %790 = vst [vmem:[#allocation2 + $0x10] sm:$0xf] %v789_v61  ;;  %v452_v28 = vld [vmem:[#allocation2 + $0x144] sm:$0x8] }
  0x64   : > { %4290 = vmatmul.msk.bf16.gmra.mxu0 %vm1273_vm2, %v4970_v55  ;;  %v529_v55 = vshll.u32 %v5520_v27, 16  ;;  %v540_v8 = vsel %vm5610_vm7, %v532_v58, %v539_v48  ;;  %v401_v48 = vsel %vm5601_vm6, 0, %v400_v45  ;;  %451 = vst [vmem:[#allocation2 + $0x13c] sm:$0x8] %v450_v29  ;;  %v544_v27 = vrot.slane %v542_v41, 7 }
  0x65   : > { %795 = vst.msk [vmem:[#allocation2 + $0x1c] sm:$0xf] %vm373_vm0, %v540_v8  ;;  %v555_v56 = vor.u32 %v553_v12, %v552_v52  ;;  %v912_v29 = vrot.slane %v545_v26, 5 }
  0x66   : > { %v531_v49 = vor.u32 %v529_v55, %v528_v32  ;;  %v903_v40 = vrot.slane %v529_v55, 5  ;;  %402 = vst [vmem:[#allocation2 + $0x20] sm:$0x1] %v401_v48  ;;  %v910_v55 = vrot.slane %v909_v51, 4  ;;  %v547_v59 = vor.u32 %v545_v26, %v544_v27 }
  0x67   : > { %v548_v62 = vrot.slane %v544_v27, 4  ;;  %v569_v51 = vshll.u32 %v5622_v42, 16 }
  0x68   : > { %v793_v54 = vsel %vm5648_vm15, %v531_v49, %v792_v18  ;;  %v904_v15 = vor.u32 %v903_v40, %v902_v38  ;;  %v911_v18 = vrot.slane %v542_v41, 4  ;;  %v5014_v40 = vld [vmem:[#allocation2 + $0x98] sm:$0xff] }
  0x69   : > { %v1066_v9 = vld [vmem:[#allocation2 + $0x134] sm:$0xf]  ;;  %794 = vst [vmem:[#allocation2 + $0x18] sm:$0xf] %v793_v54  ;;  %v556_v43 = vsel %vm5610_vm7, %v548_v62, %v555_v56  ;;  %v404_v54 = vsel %vm5601_vm6, 0, %v403_v2  ;;  %v924_v62 = vrot.slane %v569_v51, 5 }
  0x6a   : > { %v1067_v32 = vsel %vm5681_vm3, %v901_v60, %v1066_v9  ;;  %v905_v58 = vrot.slane %v904_v15, 4  ;;  %v4999_v61 = vld [vmem:[#allocation2 + $0x10] sm:$0xff]  ;;  %799 = vst.msk [vmem:[#allocation2 + $0x24] sm:$0xf] %vm373_vm0, %v556_v43  ;;  %v4983_v9 = vld [vmem:[#allocation2 + $0x128] sm:$0xff]  ;;  %v913_v52 = vor.u32 %v912_v29, %v911_v18  ;;  %v574_v43 = vshrl.u32 %v5423_v4, 16 }
  0x6b   : > { %1068 = vst [vmem:[#allocation2 + $0x134] sm:$0xf] %v1067_v32  ;;  %v1070_v47 = vld [vmem:[#allocation2 + $0x13c] sm:$0xf]  ;;  %v453_v32 = vsel %vm5630_vm11, 0, %v452_v28  ;;  %v5015_v28 = vld [vmem:[#allocation2 + $0xa0] sm:$0xff] }
  0x6c   : > { %v907_v16 = vsel %vm5638_vm14, %v905_v58, %v906_v63  ;;  %v1071_v8 = vsel %vm5681_vm3, %v910_v55, %v1070_v47  ;;  %v558_v63 = vshrl.u32 %v5615_v37, 16  ;;  %454 = vst [vmem:[#allocation2 + $0x144] sm:$0x8] %v453_v32  ;;  %v914_v26 = vrot.slane %v913_v52, 4 }
  0x6d   : > { %1069 = vst.msk [vmem:[#allocation2 + $0x138] sm:$0xf] %vm373_vm0, %v907_v16  ;;  %v796_v60 = vld [vmem:[#allocation2 + $0x20] sm:$0xf]  ;;  %v576_v18 = vrot.slane %v574_v43, 7  ;;  %v577_v29 = vshll.u32 %v5423_v4, 16 }
  0x6e   : > { %1072 = vst [vmem:[#allocation2 + $0x13c] sm:$0xf] %v1071_v8  ;;  %v797_v49 = vsel %vm5648_vm15, %v547_v59, %v796_v60  ;;  %v560_v45 = vrot.slane %v558_v63, 7  ;;  %v4952_v8 = vld [vmem:[#allocation2 + $0x10] sm:$0xff]  ;;  %v582_v60 = vshrl.u32 %v5427_v5, 16  ;;  %v585_v2 = vshll.u32 %v5427_v5, 16 }
  0x6f   : > { %798 = vst [vmem:[#allocation2 + $0x20] sm:$0xf] %v797_v49  ;;  %v455_v49 = vld [vmem:[#allocation2 + $0x14c] sm:$0x8] }
  0x70   : > { %4366 = vmatmul.msk.bf16.vlgmr.msrb.gmra.mxu1 %vm1273_vm2, %v4950_v23  ;;  %v915_v23 = vrot.slane %v553_v12, 5  ;;  %4527 = vmatmul.msk.bf16.gmra.mxu3 %vm1273_vm2, %v4999_v61  ;;  %405 = vst [vmem:[#allocation2 + $0x28] sm:$0x1] %v404_v54  ;;  %v564_v56 = vrot.slane %v560_v45, 4  ;;  %v5000_v16 = vld [vmem:[#allocation2 + $0x18] sm:$0xff]  ;;  %v579_v54 = vor.u32 %v577_v29, %v576_v18 }
  0x72   : > { %4446 = vmatmul.msk.bf16.vlgmr.msrb.gmra.mxu2 %vm1273_vm2, %v4982_v3  ;;  %v566_v3 = vshrl.u32 %v5622_v42, 16  ;;  %v918_v38 = vor.u32 %v917_v0, %v915_v23  ;;  %v916_v55 = vsel %vm5638_vm14, %v914_v26, %v915_v23  ;;  %v4984_v61 = vld [vmem:[#allocation2 + $0x130] sm:$0xff]  ;;  %v456_v23 = vsel %vm5630_vm11, 0, %v455_v49 }
  0x73   : > { %v1074_v15 = vld [vmem:[#allocation2 + $0x144] sm:$0xf]  ;;  %1073 = vst.msk [vmem:[#allocation2 + $0x140] sm:$0xf] %vm373_vm0, %v916_v55  ;;  %v920_v0 = vrot.slane %v558_v63, 4  ;;  %v933_v26 = vrot.slane %v585_v2, 5 }
  0x74   : > { %4291 = vmatmul.msk.bf16.gmra.mxu0 %vm1273_vm2, %v4971_v46  ;;  %v561_v46 = vshll.u32 %v5615_v37, 16  ;;  %v568_v48 = vrot.slane %v566_v3, 7  ;;  %v919_v41 = vrot.slane %v918_v38, 4  ;;  %v926_v47 = vrot.slane %v566_v3, 4  ;;  %457 = vst [vmem:[#allocation2 + $0x14c] sm:$0x8] %v456_v23 }
  0x75   : > { %v406_v3 = vld [vmem:[#allocation2 + $0x30] sm:$0x1]  ;;  %v584_v38 = vrot.slane %v582_v60, 7  ;;  %v4953_v55 = vld [vmem:[#allocation2 + $0x18] sm:$0xff]  ;;  %v593_v23 = vshll.u32 %v5454_v10, 16 }
  0x76   : > { %v563_v12 = vor.u32 %v561_v46, %v560_v45  ;;  %v571_v27 = vor.u32 %v569_v51, %v568_v48  ;;  %v1075_v37 = vsel %vm5681_vm3, %v919_v41, %v1074_v15  ;;  %v407_v32 = vsel %vm5601_vm6, 0, %v406_v3 }
  0x77   : > { %v800_v42 = vld [vmem:[#allocation2 + $0x28] sm:$0xf]  ;;  %1076 = vst [vmem:[#allocation2 + $0x144] sm:$0xf] %v1075_v37  ;;  %v587_v45 = vor.u32 %v585_v2, %v584_v38  ;;  %v580_v41 = vrot.slane %v576_v18, 4  ;;  %v935_v15 = vrot.slane %v582_v60, 4 }
  0x78   : > { %v572_v58 = vsel %vm5610_vm7, %v564_v56, %v571_v27  ;;  %v801_v59 = vsel %vm5648_vm15, %v563_v12, %v800_v42  ;;  %408 = vst [vmem:[#allocation2 + $0x30] sm:$0x1] %v407_v32  ;;  %v5001_v27 = vld [vmem:[#allocation2 + $0x20] sm:$0xff]  ;;  %v590_v37 = vshrl.u32 %v5454_v10, 16  ;;  %v598_v56 = vshrl.u32 %v5459_v11, 16  ;;  %v4985_v42 = vld [vmem:[#allocation2 + $0x138] sm:$0xff] }
  0x79   : > { %802 = vst [vmem:[#allocation2 + $0x28] sm:$0xf] %v801_v59  ;;  %v588_v52 = vsel %vm5610_vm7, %v580_v41, %v587_v45  ;;  %v5016_v60 = vld [vmem:[#allocation2 + $0xa8] sm:$0xff]  ;;  %v606_v41 = vshrl.u32 %v5489_v19, 16 }
  0x7a   : > { %803 = vst.msk [vmem:[#allocation2 + $0x2c] sm:$0xf] %vm373_vm0, %v572_v58  ;;  %v458_v58 = vld [vmem:[#allocation2 + $0x154] sm:$0x8]  ;;  %v592_v49 = vrot.slane %v590_v37, 7 }
  0x7b   : > { %v1078_v48 = vld [vmem:[#allocation2 + $0x14c] sm:$0xf]  ;;  %807 = vst.msk [vmem:[#allocation2 + $0x34] sm:$0xf] %vm373_vm0, %v588_v52  ;;  %v459_v59 = vsel %vm5630_vm11, 0, %v458_v58 }
  0x7c   : > { %460 = vst [vmem:[#allocation2 + $0x154] sm:$0x8] %v459_v59  ;;  %v608_v59 = vrot.slane %v606_v41, 7 }
  0x7e   : > { %v4986_v52 = vld [vmem:[#allocation2 + $0x140] sm:$0xff] }
  0x7f   : > { %v804_v5 = vld [vmem:[#allocation2 + $0x30] sm:$0xf] }
  0x80   : > { %4367 = vmatmul.msk.bf16.gmra.mxu1 %vm1273_vm2, %v4951_v1  ;;  %4528 = vmatmul.msk.bf16.gmra.mxu3 %vm1273_vm2, %v5000_v16  ;;  %v921_v1 = vrot.slane %v561_v46, 5  ;;  %v805_v12 = vsel %vm5648_vm15, %v579_v54, %v804_v5  ;;  %v929_v16 = vrot.slane %v574_v43, 4  ;;  %v614_v5 = vshrl.u32 %v5492_v20, 16 }
  0x81   : > { %806 = vst [vmem:[#allocation2 + $0x30] sm:$0xf] %v805_v12  ;;  %v5002_v45 = vld [vmem:[#allocation2 + $0x28] sm:$0xff]  ;;  %v461_v12 = vld [vmem:[#allocation2 + $0x15c] sm:$0x8] }
  0x82   : > { %4447 = vmatmul.msk.bf16.gmra.mxu2 %vm1273_vm2, %v4983_v9  ;;  %v927_v9 = vor.u32 %v926_v47, %v924_v62  ;;  %v936_v47 = vor.u32 %v935_v15, %v933_v26  ;;  %v939_v15 = vrot.slane %v593_v23, 5 }
  0x84   : > { %4606 = vmatmul.msk.bf16.vlgmr.msrb.gmra.mxu0 %vm1273_vm2, %v5014_v40  ;;  %v928_v63 = vrot.slane %v927_v9, 4  ;;  %v922_v40 = vor.u32 %v921_v1, %v920_v0  ;;  %v600_v0 = vrot.slane %v598_v56, 7  ;;  %v601_v1 = vshll.u32 %v5459_v11, 16 }
  0x85   : > { %v937_v43 = vrot.slane %v936_v47, 4  ;;  %v596_v11 = vrot.slane %v592_v49, 4  ;;  %v617_v47 = vshll.u32 %v5492_v20, 16 }
  0x86   : > { %v923_v46 = vrot.slane %v922_v40, 4  ;;  %v1079_v4 = vsel %vm5681_vm3, %v928_v63, %v1078_v48  ;;  %v603_v32 = vor.u32 %v601_v1, %v600_v0  ;;  %v944_v48 = vrot.slane %v598_v56, 4  ;;  %v412_v56 = vld [vmem:[#allocation2 + $0x40] sm:$0x1] }
  0x87   : > { %1080 = vst [vmem:[#allocation2 + $0x14c] sm:$0xf] %v1079_v4  ;;  %v413_v58 = vsel %vm5601_vm6, 0, %v412_v56 }
  0x88   : > { %v925_v51 = vsel %vm5638_vm14, %v923_v46, %v924_v62  ;;  %v930_v62 = vrot.slane %v577_v29, 5  ;;  %v1082_v29 = vld [vmem:[#allocation2 + $0x154] sm:$0xf]  ;;  %v604_v40 = vsel %vm5610_vm7, %v596_v11, %v603_v32  ;;  %v942_v46 = vrot.slane %v601_v1, 5  ;;  %414 = vst [vmem:[#allocation2 + $0x40] sm:$0x1] %v413_v58 }
  0x89   : > { %1077 = vst.msk [vmem:[#allocation2 + $0x148] sm:$0xf] %vm373_vm0, %v925_v51  ;;  %v1083_v10 = vsel %vm5681_vm3, %v937_v43, %v1082_v29  ;;  %v4954_v51 = vld [vmem:[#allocation2 + $0x20] sm:$0xff] }
  0x8a   : > { %v931_v3 = vor.u32 %v930_v62, %v929_v16  ;;  %1084 = vst [vmem:[#allocation2 + $0x154] sm:$0xf] %v1083_v10  ;;  %v609_v16 = vshll.u32 %v5489_v19, 16  ;;  %v616_v62 = vrot.slane %v614_v5, 7  ;;  %v5003_v10 = vld [vmem:[#allocation2 + $0x30] sm:$0xff] }
  0x8b   : > { %811 = vst.msk [vmem:[#allocation2 + $0x3c] sm:$0xf] %vm373_vm0, %v604_v40  ;;  %v953_v40 = vrot.slane %v614_v5, 4 }
  0x8c   : > { %v932_v18 = vrot.slane %v931_v3, 4  ;;  %v619_v0 = vor.u32 %v617_v47, %v616_v62  ;;  %v612_v3 = vrot.slane %v608_v59, 4  ;;  %v948_v11 = vrot.slane %v609_v16, 5 }
  0x8e   : > { %v934_v38 = vsel %vm5638_vm14, %v932_v18, %v933_v26  ;;  %v938_v26 = vrot.slane %v590_v37, 4  ;;  %v620_v18 = vsel %vm5610_vm7, %v612_v3, %v619_v0 }
  0x8f   : > { %1081 = vst.msk [vmem:[#allocation2 + $0x150] sm:$0xf] %vm373_vm0, %v934_v38  ;;  %v947_v38 = vrot.slane %v606_v41, 4 }
  0x90   : > { %4368 = vmatmul.msk.bf16.gmra.mxu1 %vm1273_vm2, %v4952_v8  ;;  %4529 = vmatmul.msk.bf16.gmra.mxu3 %vm1273_vm2, %v5001_v27  ;;  %v409_v8 = vld [vmem:[#allocation2 + $0x38] sm:$0x1]  ;;  %v462_v27 = vsel %vm5630_vm11, 0, %v461_v12  ;;  %815 = vst.msk [vmem:[#allocation2 + $0x44] sm:$0xf] %vm373_vm0, %v620_v18 }
  0x91   : > { %463 = vst [vmem:[#allocation2 + $0x15c] sm:$0x8] %v462_v27  ;;  %v464_v12 = vld [vmem:[#allocation2 + $0x164] sm:$0x8]  ;;  %v949_v27 = vor.u32 %v948_v11, %v947_v38 }
  0x92   : > { %4448 = vmatmul.msk.bf16.gmra.mxu2 %vm1273_vm2, %v4984_v61  ;;  %v410_v61 = vsel %vm5601_vm6, 0, %v409_v8  ;;  %v465_v41 = vsel %vm5630_vm11, 0, %v464_v12  ;;  %v638_v12 = vshrl.u32 %v5432_v6, 16 }
  0x93   : > { %411 = vst [vmem:[#allocation2 + $0x38] sm:$0x1] %v410_v61  ;;  %v950_v62 = vrot.slane %v949_v27, 4 }
  0x94   : > { %4607 = vmatmul.msk.bf16.gmra.mxu0 %vm1273_vm2, %v5015_v28  ;;  %v595_v28 = vor.u32 %v593_v23, %v592_v49  ;;  %v611_v23 = vor.u32 %v609_v16, %v608_v59  ;;  %466 = vst [vmem:[#allocation2 + $0x164] sm:$0x8] %v465_v41  ;;  %v633_v59 = vshll.u32 %v5535_v31, 16  ;;  %v646_v41 = vshrl.u32 %v5437_v7, 16 }
  0x96   : > { %v4988_v27 = vld [vmem:[#allocation2 + $0x150] sm:$0xff] }
  0x98   : > { %v1086_v19 = vld [vmem:[#allocation2 + $0x15c] sm:$0xf] }
  0x9a   : > { %v808_v2 = vld [vmem:[#allocation2 + $0x38] sm:$0xf] }
  0x9b   : > { %v809_v54 = vsel %vm5648_vm15, %v595_v28, %v808_v2  ;;  %v812_v28 = vld [vmem:[#allocation2 + $0x40] sm:$0xf]  ;;  %v951_v2 = vrot.slane %v617_v47, 5 }
  0x9c   : > { %810 = vst [vmem:[#allocation2 + $0x38] sm:$0xf] %v809_v54  ;;  %v813_v29 = vsel %vm5648_vm15, %v611_v23, %v812_v28  ;;  %v4955_v54 = vld [vmem:[#allocation2 + $0x28] sm:$0xff] }
  0x9d   : > { %814 = vst [vmem:[#allocation2 + $0x40] sm:$0xf] %v813_v29  ;;  %v954_v5 = vor.u32 %v953_v40, %v951_v2 }
  0x9f   : > { %v955_v47 = vrot.slane %v954_v5, 4 }
  0xa0   : > { %4369 = vmatmul.msk.bf16.gmra.mxu1 %vm1273_vm2, %v4953_v55  ;;  %4530 = vmatmul.msk.bf16.gmra.mxu3 %vm1273_vm2, %v5002_v45  ;;  %v945_v55 = vor.u32 %v944_v48, %v942_v46  ;;  %v622_v48 = vshrl.u32 %v5532_v30, 16 }
  0xa1   : > { %v5785_v9 = vpop.f32.mrf.mxu0 }
  0xa2   : > { %4449 = vmatmul.msk.bf16.gmra.mxu2 %vm1273_vm2, %v4985_v42  ;;  %v5017_v42 = vld [vmem:[#allocation2 + $0xb0] sm:$0xff]  ;;  %v946_v37 = vrot.slane %v945_v55, 4  ;;  %v624_v56 = vrot.slane %v622_v48, 7  ;;  %v956_v18 = vrot.slane %v622_v48, 4  ;;  %v467_v48 = vld [vmem:[#allocation2 + $0x16c] sm:$0x8] }
  0xa3   : > { %v5004_v29 = vld [vmem:[#allocation2 + $0x38] sm:$0xff] }
  0xa4   : > { %4608 = vmatmul.msk.bf16.gmra.mxu0 %vm1273_vm2, %v5016_v60  ;;  %v940_v60 = vor.u32 %v939_v15, %v938_v26  ;;  %v1087_v43 = vsel %vm5681_vm3, %v946_v37, %v1086_v19  ;;  %v415_v26 = vld [vmem:[#allocation2 + $0x48] sm:$0x1]  ;;  %v5018_v15 = vld [vmem:[#allocation2 + $0xb8] sm:$0xff]  ;;  %v628_v19 = vrot.slane %v624_v56, 4 }
  0xa5   : > { %1088 = vst [vmem:[#allocation2 + $0x15c] sm:$0xf] %v1087_v43  ;;  %v416_v55 = vsel %vm5601_vm6, 0, %v415_v26 }
  0xa6   : > { %v941_v1 = vrot.slane %v940_v60, 4  ;;  %417 = vst [vmem:[#allocation2 + $0x48] sm:$0x1] %v416_v55  ;;  %v5019_v55 = vld [vmem:[#allocation2 + $0xc0] sm:$0xff] }
  0xa8   : > { %v943_v20 = vsel %vm5638_vm14, %v941_v1, %v942_v46  ;;  %v1090_v1 = vld [vmem:[#allocation2 + $0x164] sm:$0xf] }
  0xa9   : > { %v5793_v63 = vpop.f32.mrf.mxu0  ;;  %1085 = vst.msk [vmem:[#allocation2 + $0x158] sm:$0xf] %vm373_vm0, %v943_v20 }
  0xad   : > { %v5800_v4 = vpop.f32.mrf.mxu1  ;;  %v816_v20 = vld [vmem:[#allocation2 + $0x48] sm:$0xf] }
  0xb0   : > { %4370 = vmatmul.msk.bf16.gmra.mxu1 %vm1273_vm2, %v4954_v51  ;;  %v630_v51 = vshrl.u32 %v5535_v31, 16  ;;  %4531 = vmatmul.msk.bf16.gmra.mxu3 %vm1273_vm2, %v5003_v10  ;;  %v1091_v31 = vsel %vm5681_vm3, %v955_v47, %v1090_v1  ;;  %v960_v10 = vrot.slane %v633_v59, 5 }
  0xb1   : > { %v5813_v8 = vpop.f32.mrf.mxu0  ;;  %1092 = vst [vmem:[#allocation2 + $0x164] sm:$0xf] %v1091_v31 }
  0xb2   : > { %4450 = vmatmul.msk.bf16.gmra.mxu2 %vm1273_vm2, %v4986_v52  ;;  %v4987_v52 = vld [vmem:[#allocation2 + $0x148] sm:$0xff]  ;;  %v632_v58 = vrot.slane %v630_v51, 7  ;;  %v962_v11 = vrot.slane %v630_v51, 4  ;;  %v468_v51 = vsel %vm5630_vm11, 0, %v467_v48 }
  0xb3   : > { %469 = vst [vmem:[#allocation2 + $0x16c] sm:$0x8] %v468_v51  ;;  %v971_v51 = vrot.slane %v646_v41, 4 }
  0xb4   : > { %4609 = vmatmul.msk.bf16.gmra.mxu0 %vm1273_vm2, %v5017_v42  ;;  %v625_v42 = vshll.u32 %v5532_v30, 16  ;;  %v635_v0 = vor.u32 %v633_v59, %v632_v58  ;;  %v952_v30 = vsel %vm5638_vm14, %v950_v62, %v951_v2  ;;  %v4956_v2 = vld [vmem:[#allocation2 + $0x30] sm:$0xff]  ;;  %v963_v26 = vor.u32 %v962_v11, %v960_v10 }
  0xb5   : > { %v5815_v61 = vpop.f32.mrf.mxu2  ;;  %v5817_v49 = vpop.f32.mrf.mxu1  ;;  %1089 = vst.msk [vmem:[#allocation2 + $0x160] sm:$0xf] %vm373_vm0, %v952_v30  ;;  %v641_v58 = vshll.u32 %v5432_v6, 16  ;;  %v648_v59 = vrot.slane %v646_v41, 7  ;;  %v649_v62 = vshll.u32 %v5437_v7, 16 }
  0xb6   : > { %v627_v23 = vor.u32 %v625_v42, %v624_v56  ;;  %v636_v3 = vsel %vm5610_vm7, %v628_v19, %v635_v0  ;;  %v957_v38 = vrot.slane %v625_v42, 5  ;;  %v640_v42 = vrot.slane %v638_v12, 7 }
  0xb7   : > { %819 = vst.msk [vmem:[#allocation2 + $0x4c] sm:$0xf] %vm373_vm0, %v636_v3  ;;  %v964_v0 = vrot.slane %v963_v26, 4  ;;  %v651_v6 = vor.u32 %v649_v62, %v648_v59  ;;  %v969_v48 = vrot.slane %v649_v62, 5 }
  0xb8   : > { %v817_v28 = vsel %vm5648_vm15, %v627_v23, %v816_v20  ;;  %v958_v5 = vor.u32 %v957_v38, %v956_v18  ;;  %v643_v19 = vor.u32 %v641_v58, %v640_v42 }
  0xb9   : > { %v5825_v32 = vpop.f32.mrf.mxu0  ;;  %818 = vst [vmem:[#allocation2 + $0x48] sm:$0xf] %v817_v28  ;;  %v644_v28 = vrot.slane %v640_v42, 4  ;;  %v4989_v42 = vld [vmem:[#allocation2 + $0x158] sm:$0xff]  ;;  %v972_v62 = vor.u32 %v971_v51, %v969_v48 }
  0xba   : > { %v959_v23 = vrot.slane %v958_v5, 4  ;;  %v1094_v20 = vld [vmem:[#allocation2 + $0x16c] sm:$0xf]  ;;  %v4957_v5 = vld [vmem:[#allocation2 + $0x38] sm:$0xff] }
  0xbb   : > { %v1095_v3 = vsel %vm5681_vm3, %v964_v0, %v1094_v20  ;;  %v652_v38 = vsel %vm5610_vm7, %v644_v28, %v651_v6  ;;  %v5020_v0 = vld [vmem:[#allocation2 + $0xc8] sm:$0xff]  ;;  %v657_v20 = vshll.u32 %v5466_v13, 16 }
  0xbc   : > { %v961_v7 = vsel %vm5638_vm14, %v959_v23, %v960_v10  ;;  %1096 = vst [vmem:[#allocation2 + $0x16c] sm:$0xf] %v1095_v3  ;;  %v966_v10 = vrot.slane %v641_v58, 5  ;;  %v421_v23 = vld [vmem:[#allocation2 + $0x58] sm:$0x1]  ;;  %v665_v3 = vshll.u32 %v5469_v14, 16 }
  0xbd   : > { %v5832_v45 = vpop.f32.mrf.mxu2  ;;  %v5834_v46 = vpop.f32.mrf.mxu1  ;;  %1093 = vst.msk [vmem:[#allocation2 + $0x168] sm:$0xf] %vm373_vm0, %v961_v7 }
  0xbe   : > { %823 = vst.msk [vmem:[#allocation2 + $0x54] sm:$0xf] %vm373_vm0, %v652_v38  ;;  %v973_v38 = vrot.slane %v972_v62, 4 }
  0xc0   : > { %4371 = vmatmul.msk.bf16.gmra.mxu1 %vm1273_vm2, %v4955_v54  ;;  %4532 = vmatmul.msk.bf16.gmra.mxu3 %vm1273_vm2, %v5004_v29 }
  0xc1   : > { %v5847_v16 = vpop.f32.mrf.mxu0 }
  0xc2   : > { %4451 = vmatmul.msk.bf16.gmra.mxu2 %vm1273_vm2, %v4987_v52 }
  0xc3   : > { %v5865_v40 = vpop.f32.mrf.mxu3 }
  0xc4   : > { %4610 = vmatmul.msk.bf16.gmra.mxu0 %vm1273_vm2, %v5018_v15  ;;  %6985 = vst [vmem:[#allocation13_spill] sm:$0xff] %v5865_v40  ;;  %v418_v15 = vld [vmem:[#allocation2 + $0x50] sm:$0x1] }
  0xc5   : > { %v5849_v37 = vpop.f32.mrf.mxu2  ;;  %v5851_v60 = vpop.f32.mrf.mxu1  ;;  %v419_v56 = vsel %vm5601_vm6, 0, %v418_v15 }
  0xc6   : > { %420 = vst [vmem:[#allocation2 + $0x50] sm:$0x1] %v419_v56  ;;  %v662_v56 = vshrl.u32 %v5469_v14, 16 }
  0xc8   : > { %v664_v7 = vrot.slane %v662_v56, 7 }
  0xc9   : > { %v5859_v43 = vpop.f32.mrf.mxu0 }
  0xca   : > { %v667_v51 = vor.u32 %v665_v3, %v664_v7  ;;  %v4958_v7 = vld [vmem:[#allocation2 + $0x40] sm:$0xff] }
  0xcb   : > { %v5885_v1 = vpop.f32.mrf.mxu3 }
  0xcc   : > { %6986 = vst [vmem:[#allocation14_spill] sm:$0xff] %v5885_v1 }
  0xcd   : > { %v5868_v54 = vpop.f32.mrf.mxu2  ;;  %v5870_v52 = vpop.f32.mrf.mxu1  ;;  %v820_v18 = vld [vmem:[#allocation2 + $0x50] sm:$0xf] }
  0xce   : > { %v821_v11 = vsel %vm5648_vm15, %v643_v19, %v820_v18  ;;  %v422_v19 = vsel %vm5601_vm6, 0, %v421_v23 }
  0xcf   : > { %822 = vst [vmem:[#allocation2 + $0x50] sm:$0xf] %v821_v11 }
  0xd0   : > { %4372 = vmatmul.msk.bf16.gmra.mxu1 %vm1273_vm2, %v4956_v2  ;;  %v965_v2 = vrot.slane %v638_v12, 4  ;;  %v470_v12 = vld [vmem:[#allocation2 + $0x174] sm:$0x8]  ;;  %423 = vst [vmem:[#allocation2 + $0x58] sm:$0x1] %v422_v19  ;;  %v975_v19 = vrot.slane %v657_v20, 5 }
  0xd1   : > { %v5883_v47 = vpop.f32.mrf.mxu0  ;;  %v471_v41 = vsel %vm5630_vm11, 0, %v470_v12 }
  0xd2   : > { %4452 = vmatmul.msk.bf16.gmra.mxu2 %vm1273_vm2, %v4988_v27  ;;  %v5005_v27 = vld [vmem:[#allocation2 + $0x40] sm:$0xff]  ;;  %v967_v58 = vor.u32 %v966_v10, %v965_v2  ;;  %472 = vst [vmem:[#allocation2 + $0x174] sm:$0x8] %v471_v41 }
  0xd3   : > { %v5910_v59 = vpop.f32.mrf.mxu3  ;;  %4533 = vmatmul.msk.bf16.gmra.mxu3 %vm1273_vm2, %v5005_v27 }
  0xd4   : > { %4611 = vmatmul.msk.bf16.gmra.mxu0 %vm1273_vm2, %v5019_v55  ;;  %v654_v55 = vshrl.u32 %v5466_v13, 16  ;;  %6987 = vst [vmem:[#allocation15_spill] sm:$0xff] %v5910_v59  ;;  %v968_v18 = vrot.slane %v967_v58, 4 }
  0xd5   : > { %v5887_v30 = vpop.f32.mrf.mxu2  ;;  %v5889_v31 = vpop.f32.mrf.mxu1 }
  0xd6   : > { %v656_v6 = vrot.slane %v654_v55, 7  ;;  %v970_v14 = vsel %vm5638_vm14, %v968_v18, %v969_v48  ;;  %v974_v23 = vrot.slane %v654_v55, 4  ;;  %v978_v48 = vrot.slane %v665_v3, 5 }
  0xd7   : > { %1097 = vst.msk [vmem:[#allocation2 + $0x170] sm:$0xf] %vm373_vm0, %v970_v14  ;;  %v824_v12 = vld [vmem:[#allocation2 + $0x58] sm:$0xf]  ;;  %v678_v14 = vshrl.u32 %v5502_v22, 16 }
  0xd8   : > { %v659_v27 = vor.u32 %v657_v20, %v656_v6  ;;  %v660_v10 = vrot.slane %v656_v6, 4  ;;  %v980_v6 = vrot.slane %v662_v56, 4  ;;  %v976_v20 = vor.u32 %v975_v19, %v974_v23  ;;  %v424_v56 = vld [vmem:[#allocation2 + $0x60] sm:$0x1] }
  0xd9   : > { %v5897_v29 = vpop.f32.mrf.mxu0  ;;  %v1098_v13 = vld [vmem:[#allocation2 + $0x174] sm:$0xf] }
  0xda   : > { %v668_v58 = vsel %vm5610_vm7, %v660_v10, %v667_v51  ;;  %v825_v62 = vsel %vm5648_vm15, %v659_v27, %v824_v12  ;;  %v4990_v10 = vld [vmem:[#allocation2 + $0x160] sm:$0xff]  ;;  %v473_v51 = vld [vmem:[#allocation2 + $0x17c] sm:$0x8]  ;;  %v981_v3 = vor.u32 %v980_v6, %v978_v48  ;;  %v5021_v27 = vld [vmem:[#allocation2 + $0xd0] sm:$0xff]  ;;  %v977_v23 = vrot.slane %v976_v20, 4 }
  0xdb   : > { %826 = vst [vmem:[#allocation2 + $0x58] sm:$0xf] %v825_v62  ;;  %v474_v55 = vsel %vm5630_vm11, 0, %v473_v51  ;;  %v680_v62 = vrot.slane %v678_v14, 7 }
  0xdc   : > { %827 = vst.msk [vmem:[#allocation2 + $0x5c] sm:$0xf] %vm373_vm0, %v668_v58  ;;  %v673_v58 = vshll.u32 %v5499_v21, 16  ;;  %v982_v19 = vrot.slane %v981_v3, 4 }
  0xdd   : > { %v5904_v26 = vpop.f32.mrf.mxu2  ;;  %v5906_v15 = vpop.f32.mrf.mxu1  ;;  %475 = vst [vmem:[#allocation2 + $0x17c] sm:$0x8] %v474_v55 }
  0xe0   : > { %4373 = vmatmul.msk.bf16.gmra.mxu1 %vm1273_vm2, %v4957_v5  ;;  %v5928_v5 = vpop.f32.mrf.mxu3 }
  0xe1   : > { %v5921_v28 = vpop.f32.mrf.mxu0  ;;  %6988 = vst [vmem:[#allocation16_spill] sm:$0xff] %v5928_v5  ;;  %v681_v5 = vshll.u32 %v5502_v22, 16 }
  0xe2   : > { %4453 = vmatmul.msk.bf16.gmra.mxu2 %vm1273_vm2, %v4989_v42  ;;  %v1099_v42 = vsel %vm5681_vm3, %v973_v38, %v1098_v13  ;;  %v670_v13 = vshrl.u32 %v5499_v21, 16 }
  0xe3   : > { %1100 = vst [vmem:[#allocation2 + $0x174] sm:$0xf] %v1099_v42  ;;  %v425_v42 = vsel %vm5601_vm6, 0, %v424_v56  ;;  %v683_v21 = vor.u32 %v681_v5, %v680_v62  ;;  %v987_v62 = vrot.slane %v681_v5, 5 }
  0xe4   : > { %4612 = vmatmul.msk.bf16.gmra.mxu0 %vm1273_vm2, %v5020_v0  ;;  %v5006_v0 = vld [vmem:[#allocation2 + $0x48] sm:$0xff]  ;;  %v672_v12 = vrot.slane %v670_v13, 7  ;;  %426 = vst [vmem:[#allocation2 + $0x60] sm:$0x1] %v425_v42  ;;  %v1102_v40 = vld [vmem:[#allocation2 + $0x17c] sm:$0xf] }
  0xe5   : > { %v5923_v11 = vpop.f32.mrf.mxu2  ;;  %v5925_v2 = vpop.f32.mrf.mxu1  ;;  %4534 = vmatmul.msk.bf16.gmra.mxu3 %vm1273_vm2, %v5006_v0  ;;  %v1103_v42 = vsel %vm5681_vm3, %v982_v19, %v1102_v40 }
  0xe6   : > { %v675_v56 = vor.u32 %v673_v58, %v672_v12  ;;  %v676_v59 = vrot.slane %v672_v12, 4  ;;  %1104 = vst [vmem:[#allocation2 + $0x17c] sm:$0xf] %v1103_v42  ;;  %v5007_v12 = vld [vmem:[#allocation2 + $0x50] sm:$0xff] }
  0xe8   : > { %v2096_v0 = vpop.f32.mrf.mxu3  ;;  %v684_v3 = vsel %vm5610_vm7, %v676_v59, %v683_v21  ;;  %v694_v59 = vshrl.u32 %v5546_v34, 16 }
  0xe9   : > { %v5935_v41 = vpop.f32.mrf.mxu0  ;;  %831 = vst.msk [vmem:[#allocation2 + $0x64] sm:$0xf] %vm373_vm0, %v684_v3  ;;  %v689_v3 = vshll.u32 %v5543_v33, 16 }
  0xeb   : > { %v828_v20 = vld [vmem:[#allocation2 + $0x60] sm:$0xf] }
  0xed   : > { %v5942_v18 = vpop.f32.mrf.mxu2  ;;  %v1555_v38 = vpop.f32.mrf.mxu1 }
  0xee   : > { %6989 = vst [vmem:[#allocation17_spill] sm:$0xff] %v5942_v18  ;;  %v1556_v6 = vadd.f32 %v1555_v38, %v5785_v9 }
  0xf0   : > { %4374 = vmatmul.msk.bf16.gmra.mxu1 %vm1273_vm2, %v4958_v7  ;;  %v2098_v9 = vpop.f32.mrf.mxu3 }
  0xf1   : > { %v5955_v51 = vpop.f32.mrf.mxu0 }
  0xf2   : > { %4454 = vmatmul.msk.bf16.gmra.mxu2 %vm1273_vm2, %v4990_v10  ;;  %v979_v10 = vsel %vm5638_vm14, %v977_v23, %v978_v48  ;;  %v984_v48 = vrot.slane %v673_v58, 5  ;;  %v4959_v23 = vld [vmem:[#allocation2 + $0x48] sm:$0xff] }
  0xf3   : > { %1101 = vst.msk [vmem:[#allocation2 + $0x178] sm:$0xf] %vm373_vm0, %v979_v10  ;;  %v4991_v10 = vld [vmem:[#allocation2 + $0x168] sm:$0xff] }
  0xf4   : > { %4613 = vmatmul.msk.bf16.gmra.mxu0 %vm1273_vm2, %v5021_v27  ;;  %v829_v27 = vsel %vm5648_vm15, %v675_v56, %v828_v20  ;;  %v476_v56 = vld [vmem:[#allocation2 + $0x184] sm:$0x8]  ;;  %v427_v58 = vld [vmem:[#allocation2 + $0x68] sm:$0x1] }
  0xf5   : > { %v1810_v7 = vpop.f32.mrf.mxu2  ;;  %v1557_v55 = vpop.f32.mrf.mxu1  ;;  %830 = vst [vmem:[#allocation2 + $0x60] sm:$0xf] %v829_v27  ;;  %4535 = vmatmul.msk.bf16.gmra.mxu3 %vm1273_vm2, %v5007_v12  ;;  %v477_v5 = vsel %vm5630_vm11, 0, %v476_v56  ;;  %v428_v42 = vsel %vm5601_vm6, 0, %v427_v58  ;;  %v696_v27 = vrot.slane %v694_v59, 7  ;;  %v697_v12 = vshll.u32 %v5546_v34, 16 }
  0xf6   : > { %v1890_v1 = vadd.f32 %v1810_v7, %v1556_v6  ;;  %v1558_v40 = vadd.f32 %v1557_v55, %v5793_v63  ;;  %v686_v7 = vshrl.u32 %v5543_v33, 16  ;;  %478 = vst [vmem:[#allocation2 + $0x184] sm:$0x8] %v477_v5  ;;  %v5022_v55 = vld [vmem:[#allocation2 + $0xd8] sm:$0xff] }
  0xf7   : > { %429 = vst [vmem:[#allocation2 + $0x68] sm:$0x1] %v428_v42  ;;  %v699_v5 = vor.u32 %v697_v12, %v696_v27  ;;  %v5008_v27 = vld [vmem:[#allocation2 + $0x58] sm:$0xff] }
  0xf8   : > { %v2176_v22 = vadd.f32 %v2096_v0, %v1890_v1  ;;  %v983_v1 = vrot.slane %v670_v13, 4  ;;  %v989_v0 = vrot.slane %v678_v14, 4  ;;  %v688_v20 = vrot.slane %v686_v7, 7 }
  0xf9   : > { %v5964_v38 = vpop.f32.mrf.mxu0  ;;  %v992_v42 = vrot.slane %v686_v7, 4  ;;  %v4992_v7 = vld [vmem:[#allocation2 + $0x170] sm:$0xff] }
  0xfa   : > { %v985_v13 = vor.u32 %v984_v48, %v983_v1  ;;  %v990_v14 = vor.u32 %v989_v0, %v987_v62  ;;  %v691_v56 = vor.u32 %v689_v3, %v688_v20  ;;  %v692_v33 = vrot.slane %v688_v20, 4 }
  0xfc   : > { %v986_v48 = vrot.slane %v985_v13, 4  ;;  %v991_v0 = vrot.slane %v990_v14, 4  ;;  %v700_v14 = vsel %vm5610_vm7, %v692_v33, %v699_v5  ;;  %v702_v33 = vshrl.u32 %v5509_v24, 16 }
  0xfd   : > { %v1812_v19 = vpop.f32.mrf.mxu2  ;;  %v1560_v6 = vpop.f32.mrf.mxu1  ;;  %v1106_v34 = vld [vmem:[#allocation2 + $0x184] sm:$0xf]  ;;  %835 = vst.msk [vmem:[#allocation2 + $0x6c] sm:$0xf] %vm373_vm0, %v700_v14  ;;  %v710_v5 = vshrl.u32 %v5512_v25, 16 }
  0xfe   : > { %v1891_v21 = vadd.f32 %v1812_v19, %v1558_v40  ;;  %v2101_v40 = vpop.f32.mrf.mxu3  ;;  %v832_v13 = vld [vmem:[#allocation2 + $0x68] sm:$0xf] }
 0x100   : > { %v2177_v63 = vadd.f32 %v2098_v9, %v1891_v21  ;;  %4375 = vmatmul.msk.bf16.gmra.mxu1 %vm1273_vm2, %v4959_v23  ;;  %v1561_v23 = vadd.f32 %v1560_v6, %v5813_v8 }
 0x101   : > { %v2382_v1 = vpop.f32.mrf.mxu0 }
 0x102   : > { %4455 = vmatmul.msk.bf16.gmra.mxu2 %vm1273_vm2, %v4991_v10  ;;  %v5983_v9 = vadd.f32 %v2382_v1, %v2176_v22  ;;  %v988_v10 = vsel %vm5638_vm14, %v986_v48, %v987_v62  ;;  %v1107_v22 = vsel %vm5681_vm3, %v991_v0, %v1106_v34  ;;  %v993_v62 = vrot.slane %v689_v3, 5  ;;  %v4960_v0 = vld [vmem:[#allocation2 + $0x50] sm:$0xff] }
 0x103   : > { %1105 = vst.msk [vmem:[#allocation2 + $0x180] sm:$0xf] %vm373_vm0, %v988_v10  ;;  %v998_v1 = vrot.slane %v694_v59, 4  ;;  %v704_v10 = vrot.slane %v702_v33, 7 }
 0x104   : > { %4614 = vmatmul.msk.bf16.gmra.mxu0 %vm1273_vm2, %v5022_v55  ;;  %1108 = vst [vmem:[#allocation2 + $0x184] sm:$0xf] %v1107_v22  ;;  %v833_v55 = vsel %vm5648_vm15, %v691_v56, %v832_v13  ;;  %v994_v59 = vor.u32 %v993_v62, %v992_v42  ;;  %v705_v22 = vshll.u32 %v5509_v24, 16  ;;  %v712_v13 = vrot.slane %v710_v5, 7 }
 0x105   : > { %v1815_v19 = vpop.f32.mrf.mxu2  ;;  %v1562_v21 = vpop.f32.mrf.mxu1  ;;  %834 = vst [vmem:[#allocation2 + $0x68] sm:$0xf] %v833_v55  ;;  %4536 = vmatmul.msk.bf16.gmra.mxu3 %vm1273_vm2, %v5008_v27  ;;  %v708_v24 = vrot.slane %v704_v10, 4 }
 0x106   : > { %v1892_v58 = vadd.f32 %v1815_v19, %v1561_v23  ;;  %v2103_v8 = vpop.f32.mrf.mxu3  ;;  %v1563_v48 = vadd.f32 %v1562_v21, %v5825_v32  ;;  %v430_v21 = vld [vmem:[#allocation2 + $0x70] sm:$0x1]  ;;  %v995_v42 = vrot.slane %v994_v59, 4 }
 0x107   : > { %v431_v34 = vsel %vm5601_vm6, 0, %v430_v21  ;;  %v1001_v21 = vrot.slane %v702_v33, 4  ;;  %v4993_v33 = vld [vmem:[#allocation2 + $0x178] sm:$0xff] }
 0x108   : > { %v2178_v18 = vadd.f32 %v2101_v40, %v1892_v58  ;;  %v996_v40 = vrot.slane %v697_v12, 5  ;;  %v5023_v58 = vld [vmem:[#allocation2 + $0xe0] sm:$0xff]  ;;  %432 = vst [vmem:[#allocation2 + $0x70] sm:$0x1] %v431_v34 }
 0x109   : > { %v2384_v6 = vpop.f32.mrf.mxu0  ;;  %v5009_v34 = vld [vmem:[#allocation2 + $0x60] sm:$0xff] }
 0x10a   : > { %v5996_v20 = vadd.f32 %v2384_v6, %v2177_v63  ;;  %v479_v63 = vld [vmem:[#allocation2 + $0x18c] sm:$0x8]  ;;  %v999_v12 = vor.u32 %v998_v1, %v996_v40  ;;  %v713_v6 = vshll.u32 %v5512_v25, 16 }
 0x10b   : > { %v480_v3 = vsel %vm5630_vm11, 0, %v479_v63 }
 0x10c   : > { %481 = vst [vmem:[#allocation2 + $0x18c] sm:$0x8] %v480_v3  ;;  %v1000_v27 = vrot.slane %v999_v12, 4 }
 0x10d   : > { %v1817_v23 = vpop.f32.mrf.mxu2  ;;  %v1565_v19 = vpop.f32.mrf.mxu1 }
 0x10e   : > { %v1893_v56 = vadd.f32 %v1817_v23, %v1563_v48  ;;  %v2106_v14 = vpop.f32.mrf.mxu3  ;;  %v1566_v62 = vadd.f32 %v1565_v19, %v5847_v16  ;;  %v715_v23 = vor.u32 %v713_v6, %v712_v13  ;;  %v1007_v13 = vrot.slane %v710_v5, 4 }
 0x10f   : > { %v836_v3 = vld [vmem:[#allocation2 + $0x70] sm:$0xf] }
 0x110   : > { %v2179_v32 = vadd.f32 %v2103_v8, %v1893_v56  ;;  %4376 = vmatmul.msk.bf16.gmra.mxu1 %vm1273_vm2, %v4960_v0  ;;  %v707_v0 = vor.u32 %v705_v22, %v704_v10  ;;  %v716_v59 = vsel %vm5610_vm7, %v708_v24, %v715_v23  ;;  %v1005_v10 = vrot.slane %v713_v6, 5  ;;  %v5024_v24 = vld [vmem:[#allocation2 + $0xe8] sm:$0xff] }
 0x111   : > { %v2387_v55 = vpop.f32.mrf.mxu0  ;;  %839 = vst.msk [vmem:[#allocation2 + $0x74] sm:$0xf] %vm373_vm0, %v716_v59 }
 0x112   : > { %4456 = vmatmul.msk.bf16.gmra.mxu2 %vm1273_vm2, %v4992_v7  ;;  %v6011_v8 = vadd.f32 %v2387_v55, %v2178_v18  ;;  %v997_v7 = vsel %vm5638_vm14, %v995_v42, %v996_v40  ;;  %v837_v12 = vsel %vm5648_vm15, %v707_v0, %v836_v3  ;;  %v1002_v40 = vrot.slane %v705_v22, 5  ;;  %v4961_v55 = vld [vmem:[#allocation2 + $0x58] sm:$0xff] }
 0x113   : > { %v1110_v25 = vld [vmem:[#allocation2 + $0x18c] sm:$0xf]  ;;  %1109 = vst.msk [vmem:[#allocation2 + $0x188] sm:$0xf] %vm373_vm0, %v997_v7  ;;  %v1008_v6 = vor.u32 %v1007_v13, %v1005_v10 }
 0x114   : > { %4615 = vmatmul.msk.bf16.gmra.mxu0 %vm1273_vm2, %v5023_v58  ;;  %v1111_v18 = vsel %vm5681_vm3, %v1000_v27, %v1110_v25  ;;  %838 = vst [vmem:[#allocation2 + $0x70] sm:$0xf] %v837_v12  ;;  %v1003_v5 = vor.u32 %v1002_v40, %v1001_v21  ;;  %v721_v25 = vshll.u32 %v5553_v36, 16 }
 0x115   : > { %v1820_v1 = vpop.f32.mrf.mxu2  ;;  %v1567_v48 = vpop.f32.mrf.mxu1  ;;  %1112 = vst [vmem:[#allocation2 + $0x18c] sm:$0xf] %v1111_v18  ;;  %4537 = vmatmul.msk.bf16.gmra.mxu3 %vm1273_vm2, %v5009_v34  ;;  %v729_v18 = vshll.u32 %v5557_v39, 16  ;;  %v1009_v12 = vrot.slane %v1008_v6, 4 }
 0x116   : > { %v1894_v56 = vadd.f32 %v1820_v1, %v1566_v62  ;;  %v2108_v16 = vpop.f32.mrf.mxu3  ;;  %v718_v62 = vshrl.u32 %v5553_v36, 16  ;;  %v726_v1 = vshrl.u32 %v5557_v39, 16  ;;  %v1004_v59 = vrot.slane %v1003_v5, 4 }
 0x117   : > { %v1011_v6 = vrot.slane %v721_v25, 5 }
 0x118   : > { %v2180_v63 = vadd.f32 %v2106_v14, %v1894_v56  ;;  %v1568_v14 = vadd.f32 %v1567_v48, %v5859_v43  ;;  %v433_v48 = vld [vmem:[#allocation2 + $0x78] sm:$0x1]  ;;  %v720_v56 = vrot.slane %v718_v62, 7  ;;  %v728_v7 = vrot.slane %v726_v1, 7 }
 0x119   : > { %v2389_v19 = vpop.f32.mrf.mxu0  ;;  %v434_v23 = vsel %vm5601_vm6, 0, %v433_v48  ;;  %v1010_v5 = vrot.slane %v718_v62, 4 }
 0x11a   : > { %v6024_v58 = vadd.f32 %v2389_v19, %v2179_v32  ;;  %v482_v32 = vld [vmem:[#allocation2 + $0x194] sm:$0x8]  ;;  %435 = vst [vmem:[#allocation2 + $0x78] sm:$0x1] %v434_v23  ;;  %v723_v13 = vor.u32 %v721_v25, %v720_v56  ;;  %v724_v36 = vrot.slane %v720_v56, 4  ;;  %v1016_v23 = vrot.slane %v726_v1, 4 }
 0x11b   : > { %v483_v22 = vsel %vm5630_vm11, 0, %v482_v32  ;;  %v5025_v25 = vld [vmem:[#allocation2 + $0xf0] sm:$0xff] }
 0x11c   : > { %484 = vst [vmem:[#allocation2 + $0x194] sm:$0x8] %v483_v22 }
 0x11d   : > { %v1822_v42 = vpop.f32.mrf.mxu2  ;;  %v1570_v27 = vpop.f32.mrf.mxu1 }
 0x11e   : > { %v1895_v0 = vadd.f32 %v1822_v42, %v1568_v14  ;;  %v2111_v3 = vpop.f32.mrf.mxu3  ;;  %v1571_v21 = vadd.f32 %v1570_v27, %v5883_v47  ;;  %v731_v14 = vor.u32 %v729_v18, %v728_v7  ;;  %v4962_v7 = vld [vmem:[#allocation2 + $0x60] sm:$0xff] }
 0x120   : > { %v2181_v43 = vadd.f32 %v2108_v16, %v1895_v0  ;;  %4377 = vmatmul.msk.bf16.gmra.mxu1 %vm1273_vm2, %v4961_v55  ;;  %v1006_v0 = vsel %vm5638_vm14, %v1004_v59, %v1005_v10  ;;  %v732_v32 = vsel %vm5610_vm7, %v724_v36, %v731_v14  ;;  %v5010_v10 = vld [vmem:[#allocation2 + $0x68] sm:$0xff] }
 0x121   : > { %v2392_v19 = vpop.f32.mrf.mxu0  ;;  %1113 = vst.msk [vmem:[#allocation2 + $0x190] sm:$0xf] %vm373_vm0, %v1006_v0 }
 0x122   : > { %4457 = vmatmul.msk.bf16.gmra.mxu2 %vm1273_vm2, %v4993_v33  ;;  %v6039_v16 = vadd.f32 %v2392_v19, %v2180_v63  ;;  %v840_v33 = vld [vmem:[#allocation2 + $0x78] sm:$0xf]  ;;  %843 = vst.msk [vmem:[#allocation2 + $0x7c] sm:$0xf] %vm373_vm0, %v732_v32 }
 0x123   : > { %v1114_v39 = vld [vmem:[#allocation2 + $0x194] sm:$0xf]  ;;  %v841_v22 = vsel %vm5648_vm15, %v723_v13, %v840_v33 }
 0x124   : > { %4616 = vmatmul.msk.bf16.gmra.mxu0 %vm1273_vm2, %v5024_v24  ;;  %v1115_v63 = vsel %vm5681_vm3, %v1009_v12, %v1114_v39  ;;  %842 = vst [vmem:[#allocation2 + $0x78] sm:$0xf] %v841_v22  ;;  %v1014_v24 = vrot.slane %v729_v18, 5  ;;  %v4994_v12 = vld [vmem:[#allocation2 + $0x180] sm:$0xff]  ;;  %v6069_v39 = vld [vmem:[%s5416_s9 + $0x7c] sm:$0xf] }
 0x125   : > { %v1825_v34 = vpop.f32.mrf.mxu2  ;;  %v1572_v40 = vpop.f32.mrf.mxu1  ;;  %1116 = vst [vmem:[#allocation2 + $0x194] sm:$0xf] %v1115_v63  ;;  %4538 = vmatmul.msk.bf16.gmra.mxu3 %vm1273_vm2, %v5010_v10  ;;  %v742_v17 = vshrl.u32 %v6069_v39, 16 }
 0x126   : > { %v1896_v55 = vadd.f32 %v1825_v34, %v1571_v21  ;;  %v2113_v47 = vpop.f32.mrf.mxu3  ;;  %v1573_v56 = vadd.f32 %v1572_v40, %v5897_v29  ;;  %v485_v21 = vld [vmem:[#allocation2 + $0x19c] sm:$0x8]  ;;  %v1012_v34 = vor.u32 %v1011_v6, %v1010_v5  ;;  %v436_v29 = vld [vmem:[#allocation2 + $0x80] sm:$0x1]  ;;  %880 = vst.msk [vmem:[#allocation2 + $0x114] sm:$0xf] %vm373_vm0, %v6069_v39 }
 0x127   : > { %v486_v62 = vsel %vm5630_vm11, 0, %v485_v21  ;;  %v437_v18 = vsel %vm5601_vm6, 0, %v436_v29  ;;  %v744_v5 = vrot.slane %v742_v17, 7  ;;  %v745_v6 = vshll.u32 %v6069_v39, 16 }
 0x128   : > { %v2182_v42 = vadd.f32 %v2111_v3, %v1896_v55  ;;  %487 = vst [vmem:[#allocation2 + $0x19c] sm:$0x8] %v486_v62  ;;  %v1013_v36 = vrot.slane %v1012_v34, 4  ;;  %v6066_v55 = vld [vmem:[%s5416_s9 + $0x78] sm:$0xf]  ;;  %v5011_v62 = vld [vmem:[#allocation2 + $0x70] sm:$0xff] }
 0x129   : > { %v2394_v27 = vpop.f32.mrf.mxu0  ;;  %438 = vst [vmem:[#allocation2 + $0x80] sm:$0x1] %v437_v18  ;;  %v734_v33 = vshrl.u32 %v6066_v55, 16  ;;  %v1025_v50 = vrot.slane %v742_v17, 4  ;;  %vm4076_vm6 = vcmask 519168  }
 0x12a   : > { %v6052_v48 = vadd.f32 %v2394_v27, %v2181_v43  ;;  %v1017_v43 = vor.u32 %v1016_v23, %v1014_v24  ;;  %879 = vst.msk [vmem:[#allocation2 + $0x110] sm:$0xf] %vm373_vm0, %v6066_v55  ;;  %v1015_v23 = vsel %vm5638_vm14, %v1013_v36, %v1014_v24  ;;  %v4995_v36 = vld [vmem:[#allocation2 + $0x188] sm:$0xff] }
 0x12b   : > { %v736_v32 = vrot.slane %v734_v33, 7  ;;  %1117 = vst.msk [vmem:[#allocation2 + $0x198] sm:$0xf] %vm373_vm0, %v1015_v23 }
 0x12c   : > { %v1018_v0 = vrot.slane %v1017_v43, 4 }
 0x12d   : > { %v1827_v3 = vpop.f32.mrf.mxu2  ;;  %v1575_v19 = vpop.f32.mrf.mxu1 }
 0x12e   : > { %v1897_v59 = vadd.f32 %v1827_v3, %v1573_v56  ;;  %v2116_v40 = vpop.f32.mrf.mxu3  ;;  %v1576_v63 = vadd.f32 %v1575_v19, %v5921_v28  ;;  %v737_v28 = vshll.u32 %v6066_v55, 16  ;;  %v740_v3 = vrot.slane %v736_v32, 4 }
 0x12f   : > { %v1118_v22 = vld [vmem:[#allocation2 + $0x19c] sm:$0xf]  ;;  %v747_v19 = vor.u32 %v745_v6, %v744_v5 }
 0x130   : > { %v2183_v1 = vadd.f32 %v2113_v47, %v1897_v59  ;;  %4378 = vmatmul.msk.bf16.gmra.mxu1 %vm1273_vm2, %v4962_v7  ;;  %v1119_v56 = vsel %vm5681_vm3, %v1018_v0, %v1118_v22  ;;  %v739_v7 = vor.u32 %v737_v28, %v736_v32  ;;  %v844_v59 = vld [vmem:[#allocation2 + $0x80] sm:$0xf]  ;;  %v3101_v5 = vld [vmem:[#allocation3 + $0xe] sm:$0x3] }
 0x131   : > { %v2397_v13 = vpop.f32.mrf.mxu0  ;;  %1120 = vst [vmem:[#allocation2 + $0x19c] sm:$0xf] %v1119_v56  ;;  %v748_v43 = vsel %vm5610_vm7, %v740_v3, %v747_v19  ;;  %v3231_v23 = vsel %vm1322_vm1, %v3101_v5, 0 }
 0x132   : > { %4458 = vmatmul.msk.bf16.gmra.mxu2 %vm1273_vm2, %v4994_v12  ;;  %v6063_v14 = vadd.f32 %v2397_v13, %v2182_v42  ;;  %v845_v34 = vsel %vm5648_vm15, %v739_v7, %v844_v59  ;;  %847 = vst.msk [vmem:[#allocation2 + $0x84] sm:$0xf] %vm373_vm0, %v748_v43  ;;  %3240 = vmatpush.bf16.msra.mxu3 %v3231_v23  ;;  %v2527_v7 = vld [vmem:[#allocation3 + $0xa] sm:$0x3] }
 0x133   : > { %846 = vst [vmem:[#allocation2 + $0x80] sm:$0xf] %v845_v34  ;;  %v2657_v3 = vsel %vm1322_vm1, %v2527_v7, 0  ;;  %v4965_v23 = vld [vmem:[#allocation2 + $0x78] sm:$0xff] }
 0x134   : > { %4617 = vmatmul.msk.bf16.gmra.mxu0 %vm1273_vm2, %v5025_v25  ;;  %v4963_v25 = vld [vmem:[#allocation2 + $0x68] sm:$0xff]  ;;  %2666 = vmatpush.bf16.msra.mxu1 %v2657_v3 }
 0x135   : > { %v1830_v47 = vpop.f32.mrf.mxu2  ;;  %v1577_v27 = vpop.f32.mrf.mxu1  ;;  %4539 = vmatmul.msk.bf16.gmra.mxu3 %vm1273_vm2, %v5011_v62 }
 0x136   : > { %v1898_v42 = vadd.f32 %v1830_v47, %v1576_v63  ;;  %v2118_v12 = vpop.f32.mrf.mxu3  ;;  %v1578_v29 = vadd.f32 %v1577_v27, %v5935_v41  ;;  %v2814_v63 = vld [vmem:[#allocation3 + $0xc] sm:$0x3] }
 0x137   : > { %v2944_v41 = vsel %vm1322_vm1, %v2814_v63, 0 }
 0x138   : > { %v2184_v10 = vadd.f32 %v2116_v40, %v1898_v42  ;;  %2953 = vmatpush.bf16.msra.mxu2 %v2944_v41 }
 0x139   : > { %v2399_v21 = vpop.f32.mrf.mxu0 }
 0x13a   : > { %v6096_v24 = vadd.f32 %v2399_v21, %v2183_v1  ;;  %v5026_v1 = vld [vmem:[#allocation2 + $0xf8] sm:$0xff]  ;;  %v4964_v21 = vld [vmem:[#allocation2 + $0x70] sm:$0xff] }
 0x13d   : > { %v1832_v18 = vpop.f32.mrf.mxu2  ;;  %v1580_v40 = vpop.f32.mrf.mxu1 }
 0x13e   : > { %v1899_v13 = vadd.f32 %v1832_v18, %v1578_v29  ;;  %v2121_v35 = vpop.f32.mrf.mxu3  ;;  %v1581_v27 = vadd.f32 %v1580_v40, %v5955_v51  ;;  %v5012_v51 = vld [vmem:[#allocation2 + $0x78] sm:$0xff]  ;;  %v4996_v29 = vld [vmem:[#allocation2 + $0x190] sm:$0xff] }
 0x140   : > { %v2185_v44 = vadd.f32 %v2118_v12, %v1899_v13  ;;  %4379 = vmatmul.msk.bf16.gmra.mxu1 %vm1273_vm2, %v4963_v25  ;;  %v3388_v25 = vld [vmem:[#allocation3 + $0x10] sm:$0x3] }
 0x141   : > { %v2402_v0 = vpop.f32.mrf.mxu0  ;;  %v3518_v18 = vsel %vm1322_vm1, %v3388_v25, 0  ;;  %v5027_v13 = vld [vmem:[#allocation2 + $0x100] sm:$0xff]  ;;  %vm3754_vm1 = vcmask 261120  }
 0x142   : > { %4459 = vmatmul.msk.bf16.gmra.mxu2 %vm1273_vm2, %v4995_v36  ;;  %v6105_v47 = vadd.f32 %v2402_v0, %v2184_v10  ;;  %3527 = vmatpush.bf16.msra.mxu0 %v3518_v18 }
 0x144   : > { %4618 = vmatmul.msk.bf16.gmra.mxu0 %vm1273_vm2, %v5026_v1 }
 0x145   : > { %v1835_v42 = vpop.f32.mrf.mxu2  ;;  %v1582_v32 = vpop.f32.mrf.mxu1  ;;  %4540 = vmatmul.msk.bf16.gmra.mxu3 %vm1273_vm2, %v5012_v51 }
 0x146   : > { %v1900_v22 = vadd.f32 %v1835_v42, %v1581_v27  ;;  %v2123_v10 = vpop.f32.mrf.mxu3  ;;  %v1583_v12 = vadd.f32 %v1582_v32, %v5964_v38 }
 0x148   : > { %v2186_v56 = vadd.f32 %v2121_v35, %v1900_v22  ;;  %v5013_v22 = vld [vmem:[#allocation2 + $0x80] sm:$0xff] }
 0x149   : > { %v2404_v19 = vpop.f32.mrf.mxu0 }
 0x14a   : > { %v6112_v59 = vadd.f32 %v2404_v19, %v2185_v44  ;;  %v5028_v19 = vld [vmem:[#allocation2 + $0x108] sm:$0xff] }
 0x14d   : > { %v1837_v34 = vpop.f32.mrf.mxu2  ;;  %v1585_v62 = vpop.f32.mrf.mxu1 }
 0x14e   : > { %v1901_v43 = vadd.f32 %v1837_v34, %v1583_v12  ;;  %v2126_v36 = vpop.f32.mrf.mxu3  ;;  %v1586_v1 = vadd.f32 %v1585_v62, %v5800_v4 }
 0x150   : > { %v2187_v40 = vadd.f32 %v2123_v10, %v1901_v43  ;;  %4380 = vmatmul.msk.bf16.gmra.mxu1 %vm1273_vm2, %v4964_v21  ;;  %v4997_v10 = vld [vmem:[#allocation2 + $0x198] sm:$0xff] }
 0x151   : > { %v2407_v44 = vpop.f32.mrf.mxu0 }
 0x152   : > { %4460 = vmatmul.msk.bf16.gmra.mxu2 %vm1273_vm2, %v4996_v29  ;;  %v6119_v38 = vadd.f32 %v2407_v44, %v2186_v56  ;;  %v5030_v44 = vld [vmem:[#allocation2 + $0x128] sm:$0xff] }
 0x154   : > { %4619 = vmatmul.msk.bf16.gmra.mxu0 %vm1273_vm2, %v5027_v13  ;;  %v5062_v13 = vld [vmem:[#allocation2 + $0xa0] sm:$0xff] }
 0x155   : > { %v1840_v35 = vpop.f32.mrf.mxu2  ;;  %v1587_v0 = vpop.f32.mrf.mxu1  ;;  %4541 = vmatmul.msk.bf16.gmra.mxu3 %vm1273_vm2, %v5013_v22 }
 0x156   : > { %v1902_v63 = vadd.f32 %v1840_v35, %v1586_v1  ;;  %v2128_v27 = vpop.f32.mrf.mxu3  ;;  %v1588_v5 = vadd.f32 %v1587_v0, %v5817_v49 }
 0x158   : > { %v2188_v41 = vadd.f32 %v2126_v36, %v1902_v63  ;;  %v5046_v63 = vld [vmem:[#allocation2 + $0x10] sm:$0xff] }
 0x159   : > { %v2409_v42 = vpop.f32.mrf.mxu0 }
 0x15a   : > { %v6123_v32 = vadd.f32 %v2409_v42, %v2187_v40 }
 0x15d   : > { %v1842_v7 = vpop.f32.mrf.mxu2  ;;  %v1590_v3 = vpop.f32.mrf.mxu1 }
 0x15e   : > { %v1903_v56 = vadd.f32 %v1842_v7, %v1588_v5  ;;  %v2131_v51 = vpop.f32.mrf.mxu3  ;;  %v1591_v34 = vadd.f32 %v1590_v3, %v5834_v46 }
 0x160   : > { %v2189_v4 = vadd.f32 %v2128_v27, %v1903_v56  ;;  %4381 = vmatmul.msk.bf16.gmra.mxu1 %vm1273_vm2, %v4965_v23 }
 0x161   : > { %v2412_v12 = vpop.f32.mrf.mxu0 }
 0x162   : > { %4461 = vmatmul.msk.bf16.gmra.mxu2 %vm1273_vm2, %v4997_v10  ;;  %v6129_v21 = vadd.f32 %v2412_v12, %v2188_v41  ;;  %v5029_v41 = vld [vmem:[#allocation2 + $0x110] sm:$0xff] }
 0x163   : > { %v5031_v12 = vld [vmem:[#allocation2 + $0x130] sm:$0xff] }
 0x164   : > { %4620 = vmatmul.msk.bf16.gmra.mxu0 %vm1273_vm2, %v5028_v19  ;;  %v5063_v19 = vld [vmem:[#allocation2 + $0xa8] sm:$0xff] }
 0x165   : > { %v1845_v49 = vpop.f32.mrf.mxu2  ;;  %v1592_v62 = vpop.f32.mrf.mxu1  ;;  %4846 = vmatmul.msk.bf16.vlgmr.msra.gmra.mxu3 %vm1273_vm2, %v5062_v13 }
 0x166   : > { %v1904_v43 = vadd.f32 %v1845_v49, %v1591_v34  ;;  %v2133_v25 = vpop.f32.mrf.mxu3  ;;  %v1593_v36 = vadd.f32 %v1592_v62, %v5851_v60 }
 0x168   : > { %v2190_v29 = vadd.f32 %v2131_v51, %v1904_v43  ;;  %v5047_v43 = vld [vmem:[#allocation2 + $0x18] sm:$0xff] }
 0x169   : > { %v2414_v18 = vpop.f32.mrf.mxu0 }
 0x16a   : > { %v6133_v40 = vadd.f32 %v2414_v18, %v2189_v4 }
 0x16d   : > { %v1847_v1 = vpop.f32.mrf.mxu2  ;;  %v1595_v35 = vpop.f32.mrf.mxu1 }
 0x16e   : > { %v1905_v0 = vadd.f32 %v1847_v1, %v1593_v36  ;;  %v2136_v27 = vpop.f32.mrf.mxu3  ;;  %v1596_v5 = vadd.f32 %v1595_v35, %v5870_v52 }
 0x170   : > { %v2191_v46 = vadd.f32 %v2133_v25, %v1905_v0  ;;  %4686 = vmatmul.msk.bf16.vlgmr.msra.gmra.mxu1 %vm1273_vm2, %v5030_v44 }
 0x171   : > { %v2417_v42 = vpop.f32.mrf.mxu0 }
 0x172   : > { %4766 = vmatmul.msk.bf16.vlgmr.msra.gmra.mxu2 %vm1273_vm2, %v5046_v63  ;;  %v6139_v22 = vadd.f32 %v2417_v42, %v2190_v29  ;;  %v5078_v29 = vld [vmem:[#allocation2 + $0x130] sm:$0xff]  ;;  %v5032_v42 = vld [vmem:[#allocation2 + $0x138] sm:$0xff] }
 0x174   : > { %4621 = vmatmul.msk.bf16.gmra.mxu0 %vm1273_vm2, %v5029_v41  ;;  %v5064_v41 = vld [vmem:[#allocation2 + $0xb0] sm:$0xff] }
 0x175   : > { %v1850_v60 = vpop.f32.mrf.mxu2  ;;  %v1597_v23 = vpop.f32.mrf.mxu1  ;;  %4847 = vmatmul.msk.bf16.gmra.mxu3 %vm1273_vm2, %v5063_v19 }
 0x176   : > { %v1906_v7 = vadd.f32 %v1850_v60, %v1596_v5  ;;  %v2138_v56 = vpop.f32.mrf.mxu3  ;;  %v1598_v51 = vadd.f32 %v1597_v23, %v5889_v31 }
 0x178   : > { %v2192_v3 = vadd.f32 %v2136_v27, %v1906_v7  ;;  %v5048_v7 = vld [vmem:[#allocation2 + $0x20] sm:$0xff] }
 0x179   : > { %v2419_v10 = vpop.f32.mrf.mxu0 }
 0x17a   : > { %v6143_v4 = vadd.f32 %v2419_v10, %v2191_v46 }
 0x17d   : > { %v1852_v34 = vpop.f32.mrf.mxu2  ;;  %v1600_v49 = vpop.f32.mrf.mxu1 }
 0x17e   : > { %v1907_v62 = vadd.f32 %v1852_v34, %v1598_v51  ;;  %v2141_v25 = vpop.f32.mrf.mxu3  ;;  %v1601_v36 = vadd.f32 %v1600_v49, %v5906_v15 }
 0x180   : > { %v2193_v52 = vadd.f32 %v2138_v56, %v1907_v62  ;;  %4687 = vmatmul.msk.bf16.gmra.mxu1 %vm1273_vm2, %v5031_v12 }
 0x181   : > { %v2422_v18 = vpop.f32.mrf.mxu0 }
 0x182   : > { %4767 = vmatmul.msk.bf16.gmra.mxu2 %vm1273_vm2, %v5047_v43  ;;  %v6149_v13 = vadd.f32 %v2422_v18, %v2192_v3  ;;  %v5079_v3 = vld [vmem:[#allocation2 + $0x138] sm:$0xff]  ;;  %v5033_v18 = vld [vmem:[#allocation2 + $0x140] sm:$0xff] }
 0x184   : > { %4926 = vmatmul.msk.bf16.vlgmr.msra.gmra.mxu0 %vm1273_vm2, %v5078_v29  ;;  %v5065_v29 = vld [vmem:[#allocation2 + $0xb8] sm:$0xff] }
 0x185   : > { %v1855_v31 = vpop.f32.mrf.mxu2  ;;  %v1602_v44 = vpop.f32.mrf.mxu1  ;;  %4848 = vmatmul.msk.bf16.gmra.mxu3 %vm1273_vm2, %v5064_v41 }
 0x186   : > { %v1908_v1 = vadd.f32 %v1855_v31, %v1601_v36  ;;  %v2143_v0 = vpop.f32.mrf.mxu3  ;;  %v1603_v27 = vadd.f32 %v1602_v44, %v5925_v2 }
 0x188   : > { %v2194_v35 = vadd.f32 %v2141_v25, %v1908_v1  ;;  %v5049_v1 = vld [vmem:[#allocation2 + $0x28] sm:$0xff] }
 0x189   : > { %v2424_v63 = vpop.f32.mrf.mxu0 }
 0x18a   : > { %v6153_v46 = vadd.f32 %v2424_v63, %v2193_v52 }
 0x18d   : > { %v1857_v5 = vpop.f32.mrf.mxu2  ;;  %v1605_v60 = vpop.f32.mrf.mxu1 }
 0x18e   : > { %v1909_v23 = vadd.f32 %v1857_v5, %v1603_v27  ;;  %v2146_v56 = vpop.f32.mrf.mxu3  ;;  %v1606_v51 = vadd.f32 %v1605_v60, %v5815_v61 }
 0x190   : > { %v2195_v15 = vadd.f32 %v2143_v0, %v1909_v23  ;;  %4688 = vmatmul.msk.bf16.gmra.mxu1 %vm1273_vm2, %v5032_v42 }
 0x191   : > { %v2427_v10 = vpop.f32.mrf.mxu0 }
 0x192   : > { %4768 = vmatmul.msk.bf16.gmra.mxu2 %vm1273_vm2, %v5048_v7  ;;  %v6159_v19 = vadd.f32 %v2427_v10, %v2194_v35  ;;  %v5080_v35 = vld [vmem:[#allocation2 + $0x140] sm:$0xff]  ;;  %v5034_v10 = vld [vmem:[#allocation2 + $0x148] sm:$0xff] }
 0x194   : > { %4927 = vmatmul.msk.bf16.gmra.mxu0 %vm1273_vm2, %v5079_v3  ;;  %v5066_v3 = vld [vmem:[#allocation2 + $0xc0] sm:$0xff] }
 0x195   : > { %v1860_v2 = vpop.f32.mrf.mxu2  ;;  %v1607_v12 = vpop.f32.mrf.mxu1  ;;  %4849 = vmatmul.msk.bf16.gmra.mxu3 %vm1273_vm2, %v5065_v29 }
 0x196   : > { %v1910_v34 = vadd.f32 %v1860_v2, %v1606_v51  ;;  %v2148_v62 = vpop.f32.mrf.mxu3  ;;  %v1608_v25 = vadd.f32 %v1607_v12, %v5832_v45 }
 0x198   : > { %v2196_v49 = vadd.f32 %v2146_v56, %v1910_v34  ;;  %v5050_v34 = vld [vmem:[#allocation2 + $0x30] sm:$0xff] }
 0x199   : > { %v2429_v43 = vpop.f32.mrf.mxu0 }
 0x19a   : > { %v6163_v52 = vadd.f32 %v2429_v43, %v2195_v15 }
 0x19d   : > { %v1862_v36 = vpop.f32.mrf.mxu2  ;;  %v1610_v31 = vpop.f32.mrf.mxu1 }
 0x19e   : > { %v1911_v44 = vadd.f32 %v1862_v36, %v1608_v25  ;;  %v2151_v0 = vpop.f32.mrf.mxu3  ;;  %v1611_v27 = vadd.f32 %v1610_v31, %v5849_v37 }
 0x1a0   : > { %v2197_v61 = vadd.f32 %v2148_v62, %v1911_v44  ;;  %4689 = vmatmul.msk.bf16.gmra.mxu1 %vm1273_vm2, %v5033_v18 }
 0x1a1   : > { %v2432_v63 = vpop.f32.mrf.mxu0 }
 0x1a2   : > { %4769 = vmatmul.msk.bf16.gmra.mxu2 %vm1273_vm2, %v5049_v1  ;;  %v6169_v41 = vadd.f32 %v2432_v63, %v2196_v49  ;;  %v5081_v49 = vld [vmem:[#allocation2 + $0x148] sm:$0xff]  ;;  %v5035_v63 = vld [vmem:[#allocation2 + $0x150] sm:$0xff] }
 0x1a4   : > { %4928 = vmatmul.msk.bf16.gmra.mxu0 %vm1273_vm2, %v5080_v35  ;;  %v5067_v35 = vld [vmem:[#allocation2 + $0xc8] sm:$0xff] }
 0x1a5   : > { %v1865_v45 = vpop.f32.mrf.mxu2  ;;  %v1612_v42 = vpop.f32.mrf.mxu1  ;;  %4850 = vmatmul.msk.bf16.gmra.mxu3 %vm1273_vm2, %v5066_v3 }
 0x1a6   : > { %v1912_v5 = vadd.f32 %v1865_v45, %v1611_v27  ;;  %v2153_v23 = vpop.f32.mrf.mxu3  ;;  %v1613_v56 = vadd.f32 %v1612_v42, %v5868_v54 }
 0x1a8   : > { %v2198_v60 = vadd.f32 %v2151_v0, %v1912_v5  ;;  %v5051_v5 = vld [vmem:[#allocation2 + $0x38] sm:$0xff] }
 0x1a9   : > { %v2434_v7 = vpop.f32.mrf.mxu0 }
 0x1aa   : > { %v6173_v15 = vadd.f32 %v2434_v7, %v2197_v61 }
 0x1ad   : > { %v1867_v51 = vpop.f32.mrf.mxu2  ;;  %v1615_v2 = vpop.f32.mrf.mxu1 }
 0x1ae   : > { %v1913_v12 = vadd.f32 %v1867_v51, %v1613_v56  ;;  %v2156_v62 = vpop.f32.mrf.mxu3  ;;  %v1616_v25 = vadd.f32 %v1615_v2, %v5887_v30 }
 0x1b0   : > { %v2199_v37 = vadd.f32 %v2153_v23, %v1913_v12  ;;  %4690 = vmatmul.msk.bf16.gmra.mxu1 %vm1273_vm2, %v5034_v10 }
 0x1b1   : > { %v2437_v43 = vpop.f32.mrf.mxu0 }
 0x1b2   : > { %4770 = vmatmul.msk.bf16.gmra.mxu2 %vm1273_vm2, %v5050_v34  ;;  %v6179_v29 = vadd.f32 %v2437_v43, %v2198_v60  ;;  %v5082_v60 = vld [vmem:[#allocation2 + $0x150] sm:$0xff] }
 0x1b4   : > { %6990 = vst [vmem:[#allocation18_spill] sm:$0xff] %v6179_v29  ;;  %4929 = vmatmul.msk.bf16.gmra.mxu0 %vm1273_vm2, %v5081_v49  ;;  %v5068_v49 = vld [vmem:[#allocation2 + $0xd0] sm:$0xff] }
 0x1b5   : > { %v1870_v54 = vpop.f32.mrf.mxu2  ;;  %v1617_v18 = vpop.f32.mrf.mxu1  ;;  %4851 = vmatmul.msk.bf16.gmra.mxu3 %vm1273_vm2, %v5067_v35 }
 0x1b6   : > { %v1914_v36 = vadd.f32 %v1870_v54, %v1616_v25  ;;  %v2158_v44 = vpop.f32.mrf.mxu3  ;;  %v1618_v0 = vadd.f32 %v1617_v18, %v5904_v26  ;;  %v5036_v25 = vld [vmem:[#allocation2 + $0x158] sm:$0xff] }
 0x1b8   : > { %v2200_v31 = vadd.f32 %v2156_v62, %v1914_v36  ;;  %v6994_v62 = vld [vmem:[#allocation17_spill] sm:$0xff] }
 0x1b9   : > { %v2439_v1 = vpop.f32.mrf.mxu0 }
 0x1ba   : > { %v6183_v61 = vadd.f32 %v2439_v1, %v2199_v37 }
 0x1bc   : > { %6991 = vst [vmem:[#allocation19_spill] sm:$0xff] %v6183_v61 }
 0x1bd   : > { %v1872_v27 = vpop.f32.mrf.mxu2  ;;  %v1620_v45 = vpop.f32.mrf.mxu1 }
 0x1be   : > { %v1915_v42 = vadd.f32 %v1872_v27, %v1618_v0  ;;  %v2161_v23 = vpop.f32.mrf.mxu3  ;;  %v1621_v56 = vadd.f32 %v1620_v45, %v5923_v11 }
 0x1c0   : > { %v2201_v30 = vadd.f32 %v2158_v44, %v1915_v42  ;;  %4691 = vmatmul.msk.bf16.gmra.mxu1 %vm1273_vm2, %v5035_v63  ;;  %v5083_v44 = vld [vmem:[#allocation2 + $0x158] sm:$0xff]  ;;  %v6996_v63 = vld [vmem:[#allocation13_spill] sm:$0xff] }
 0x1c1   : > { %v2442_v7 = vpop.f32.mrf.mxu0 }
 0x1c2   : > { %4771 = vmatmul.msk.bf16.gmra.mxu2 %vm1273_vm2, %v5051_v5  ;;  %v6189_v3 = vadd.f32 %v2442_v7, %v2200_v31  ;;  %v5052_v31 = vld [vmem:[#allocation2 + $0x40] sm:$0xff] }
 0x1c4   : > { %6992 = vst [vmem:[#allocation20_spill] sm:$0xff] %v6189_v3  ;;  %4930 = vmatmul.msk.bf16.gmra.mxu0 %vm1273_vm2, %v5082_v60 }
 0x1c5   : > { %v1875_v26 = vpop.f32.mrf.mxu2  ;;  %v1622_v10 = vpop.f32.mrf.mxu1  ;;  %4852 = vmatmul.msk.bf16.gmra.mxu3 %vm1273_vm2, %v5068_v49  ;;  %v5053_v49 = vld [vmem:[#allocation2 + $0x48] sm:$0xff] }
 0x1c6   : > { %v1916_v51 = vadd.f32 %v1875_v26, %v1621_v56  ;;  %v2163_v12 = vpop.f32.mrf.mxu3  ;;  %v1623_v43 = vadd.f32 %v1622_v10, %v6994_v62  ;;  %v5069_v56 = vld [vmem:[#allocation2 + $0xd8] sm:$0xff]  ;;  %v6998_v26 = vld [vmem:[#allocation14_spill] sm:$0xff] }
 0x1c8   : > { %v2202_v2 = vadd.f32 %v2161_v23, %v1916_v51  ;;  %v5037_v51 = vld [vmem:[#allocation2 + $0x160] sm:$0xff] }
 0x1c9   : > { %v2444_v34 = vpop.f32.mrf.mxu0 }
 0x1ca   : > { %v6193_v37 = vadd.f32 %v2444_v34, %v2201_v30 }
 0x1cc   : > { %6993 = vst [vmem:[#allocation21_spill] sm:$0xff] %v6193_v37  ;;  %v5093_v37 = vld [vmem:[#allocation2 + $0x1a8] sm:$0xff] }
 0x1cd   : > { %v1877_v54 = vpop.f32.mrf.mxu2  ;;  %v1625_v18 = vpop.f32.mrf.mxu1 }
 0x1ce   : > { %v1917_v36 = vadd.f32 %v1877_v54, %v1623_v43  ;;  %v2166_v1 = vpop.f32.mrf.mxu3  ;;  %v1626_v27 = vadd.f32 %v1625_v18, %v6996_v63  ;;  %v5084_v43 = vld [vmem:[#allocation2 + $0x160] sm:$0xff] }
 0x1d0   : > { %v2203_v11 = vadd.f32 %v2163_v12, %v1917_v36  ;;  %4692 = vmatmul.msk.bf16.gmra.mxu1 %vm1273_vm2, %v5036_v25  ;;  %v7000_v36 = vld [vmem:[#allocation15_spill] sm:$0xff] }
 0x1d1   : > { %v2447_v35 = vpop.f32.mrf.mxu0 }
 0x1d2   : > { %4772 = vmatmul.msk.bf16.gmra.mxu2 %vm1273_vm2, %v5052_v31  ;;  %v6199_v0 = vadd.f32 %v2447_v35, %v2202_v2 }
 0x1d4   : > { %6995 = vst [vmem:[#allocation17_spill] sm:$0xff] %v6199_v0  ;;  %4931 = vmatmul.msk.bf16.gmra.mxu0 %vm1273_vm2, %v5083_v44 }
 0x1d5   : > { %v1880_v45 = vpop.f32.mrf.mxu2  ;;  %v1627_v42 = vpop.f32.mrf.mxu1  ;;  %4853 = vmatmul.msk.bf16.gmra.mxu3 %vm1273_vm2, %v5069_v56 }
 0x1d6   : > { %v1918_v5 = vadd.f32 %v1880_v45, %v1626_v27  ;;  %v2168_v60 = vpop.f32.mrf.mxu3  ;;  %v1628_v10 = vadd.f32 %v1627_v42, %v6998_v26  ;;  %v5070_v42 = vld [vmem:[#allocation2 + $0xe0] sm:$0xff] }
 0x1d8   : > { %v2204_v30 = vadd.f32 %v2166_v1, %v1918_v5  ;;  %v7002_v5 = vld [vmem:[#allocation16_spill] sm:$0xff] }
 0x1d9   : > { %v2449_v23 = vpop.f32.mrf.mxu0 }
 0x1da   : > { %v6203_v7 = vadd.f32 %v2449_v23, %v2203_v11  ;;  %v5038_v23 = vld [vmem:[#allocation2 + $0x168] sm:$0xff] }
 0x1dc   : > { %6997 = vst [vmem:[#allocation13_spill] sm:$0xff] %v6203_v7 }
 0x1dd   : > { %v1882_v12 = vpop.f32.mrf.mxu2  ;;  %v1630_v34 = vpop.f32.mrf.mxu1 }
 0x1de   : > { %v1919_v2 = vadd.f32 %v1882_v12, %v1628_v10  ;;  %v2171_v25 = vpop.f32.mrf.mxu3  ;;  %v1631_v31 = vadd.f32 %v1630_v34, %v7000_v36  ;;  %v5085_v34 = vld [vmem:[#allocation2 + $0x168] sm:$0xff] }
 0x1e0   : > { %v2205_v62 = vadd.f32 %v2168_v60, %v1919_v2  ;;  %4693 = vmatmul.msk.bf16.gmra.mxu1 %vm1273_vm2, %v5037_v51  ;;  %v5054_v51 = vld [vmem:[#allocation2 + $0x50] sm:$0xff] }
 0x1e1   : > { %v2452_v54 = vpop.f32.mrf.mxu0 }
 0x1e2   : > { %4773 = vmatmul.msk.bf16.gmra.mxu2 %vm1273_vm2, %v5053_v49  ;;  %v6209_v18 = vadd.f32 %v2452_v54, %v2204_v30 }
 0x1e4   : > { %6999 = vst [vmem:[#allocation14_spill] sm:$0xff] %v6209_v18  ;;  %4932 = vmatmul.msk.bf16.gmra.mxu0 %vm1273_vm2, %v5084_v43 }
 0x1e5   : > { %v1885_v11 = vpop.f32.mrf.mxu2  ;;  %v1632_v44 = vpop.f32.mrf.mxu1  ;;  %4854 = vmatmul.msk.bf16.gmra.mxu3 %vm1273_vm2, %v5070_v42 }
 0x1e6   : > { %v1920_v1 = vadd.f32 %v1885_v11, %v1631_v31  ;;  %v2173_v63 = vpop.f32.mrf.mxu3  ;;  %v1633_v60 = vadd.f32 %v1632_v44, %v7002_v5 }
 0x1e8   : > { %v2206_v35 = vadd.f32 %v2171_v25, %v1920_v1  ;;  %v5071_v1 = vld [vmem:[#allocation2 + $0xe8] sm:$0xff] }
 0x1e9   : > { %v2454_v27 = vpop.f32.mrf.mxu0 }
 0x1ea   : > { %v6213_v45 = vadd.f32 %v2454_v27, %v2205_v62 }
 0x1ec   : > { %7001 = vst [vmem:[#allocation15_spill] sm:$0xff] %v6213_v45 }
 0x1ed   : > { %v1887_v56 = vpop.f32.mrf.mxu2  ;;  %v2668_v26 = vpop.f32.mrf.mxu1 }
 0x1ee   : > { %v1921_v30 = vadd.f32 %v1887_v56, %v1633_v60  ;;  %v2748_v10 = vadd.f32 %v2668_v26, %v5983_v9  ;;  %v3242_v2 = vpop.f32.mrf.mxu3  ;;  %v5055_v60 = vld [vmem:[#allocation2 + $0x58] sm:$0xff]  ;;  %v5086_v56 = vld [vmem:[#allocation2 + $0x170] sm:$0xff] }
 0x1f0   : > { %v2207_v12 = vadd.f32 %v2173_v63, %v1921_v30  ;;  %4694 = vmatmul.msk.bf16.gmra.mxu1 %vm1273_vm2, %v5038_v23  ;;  %v5039_v63 = vld [vmem:[#allocation2 + $0x170] sm:$0xff] }
 0x1f1   : > { %v2457_v49 = vpop.f32.mrf.mxu0 }
 0x1f2   : > { %4774 = vmatmul.msk.bf16.gmra.mxu2 %vm1273_vm2, %v5054_v51  ;;  %v6220_v62 = vadd.f32 %v2457_v49, %v2206_v35 }
 0x1f4   : > { %7003 = vst [vmem:[#allocation16_spill] sm:$0xff] %v6220_v62  ;;  %4933 = vmatmul.msk.bf16.gmra.mxu0 %vm1273_vm2, %v5085_v34 }
 0x1f5   : > { %v2955_v43 = vpop.f32.mrf.mxu2  ;;  %v2670_v25 = vpop.f32.mrf.mxu1  ;;  %4855 = vmatmul.msk.bf16.gmra.mxu3 %vm1273_vm2, %v5071_v1  ;;  %v5056_v1 = vld [vmem:[#allocation2 + $0x60] sm:$0xff] }
 0x1f6   : > { %v3035_v54 = vadd.f32 %v2955_v43, %v2748_v10  ;;  %v2749_v9 = vadd.f32 %v2670_v25, %v5996_v20  ;;  %v3244_v31 = vpop.f32.mrf.mxu3  ;;  %v5072_v25 = vld [vmem:[#allocation2 + $0xf0] sm:$0xff] }
 0x1f8   : > { %v3322_v36 = vadd.f32 %v3242_v2, %v3035_v54  ;;  %v5040_v54 = vld [vmem:[#allocation2 + $0x178] sm:$0xff] }
 0x1f9   : > { %v2459_v11 = vpop.f32.mrf.mxu0 }
 0x1fa   : > { %v6224_v44 = vadd.f32 %v2459_v11, %v2207_v12 }
 0x1fc   : > { %7004 = vst [vmem:[#allocation22_spill] sm:$0xff] %v6224_v44 }
 0x1fd   : > { %v2957_v27 = vpop.f32.mrf.mxu2  ;;  %v2673_v42 = vpop.f32.mrf.mxu1 }
 0x1fe   : > { %v3036_v5 = vadd.f32 %v2957_v27, %v2749_v9  ;;  %v2750_v35 = vadd.f32 %v2673_v42, %v6011_v8  ;;  %v3247_v20 = vpop.f32.mrf.mxu3  ;;  %v5087_v27 = vld [vmem:[#allocation2 + $0x178] sm:$0xff] }
 0x200   : > { %v3323_v23 = vadd.f32 %v3244_v31, %v3036_v5  ;;  %4695 = vmatmul.msk.bf16.gmra.mxu1 %vm1273_vm2, %v5039_v63 }
 0x201   : > { %v3529_v26 = vpop.f32.mrf.mxu0 }
 0x202   : > { %4775 = vmatmul.msk.bf16.gmra.mxu2 %vm1273_vm2, %v5055_v60  ;;  %v6230_v30 = vadd.f32 %v3529_v26, %v3322_v36 }
 0x204   : > { %4934 = vmatmul.msk.bf16.gmra.mxu0 %vm1273_vm2, %v5086_v56 }
 0x205   : > { %v2960_v10 = vpop.f32.mrf.mxu2  ;;  %v2675_v51 = vpop.f32.mrf.mxu1  ;;  %4856 = vmatmul.msk.bf16.gmra.mxu3 %vm1273_vm2, %v5072_v25  ;;  %v5057_v25 = vld [vmem:[#allocation2 + $0x68] sm:$0xff] }
 0x206   : > { %v3037_v12 = vadd.f32 %v2960_v10, %v2750_v35  ;;  %v2751_v8 = vadd.f32 %v2675_v51, %v6024_v58  ;;  %v3249_v2 = vpop.f32.mrf.mxu3  ;;  %v5073_v51 = vld [vmem:[#allocation2 + $0xf8] sm:$0xff] }
 0x208   : > { %v3324_v34 = vadd.f32 %v3247_v20, %v3037_v12  ;;  %v5041_v12 = vld [vmem:[#allocation2 + $0x180] sm:$0xff] }
 0x209   : > { %v3531_v49 = vpop.f32.mrf.mxu0 }
 0x20a   : > { %v6234_v43 = vadd.f32 %v3531_v49, %v3323_v23 }
 0x20d   : > { %v2962_v9 = vpop.f32.mrf.mxu2  ;;  %v2678_v31 = vpop.f32.mrf.mxu1 }
 0x20e   : > { %v3038_v11 = vadd.f32 %v2962_v9, %v2751_v8  ;;  %v2752_v36 = vadd.f32 %v2678_v31, %v6039_v16  ;;  %v3252_v58 = vpop.f32.mrf.mxu3  ;;  %v5088_v9 = vld [vmem:[#allocation2 + $0x180] sm:$0xff] }
 0x210   : > { %v3325_v63 = vadd.f32 %v3249_v2, %v3038_v11  ;;  %4696 = vmatmul.msk.bf16.gmra.mxu1 %vm1273_vm2, %v5040_v54 }
 0x211   : > { %v3534_v42 = vpop.f32.mrf.mxu0 }
 0x212   : > { %4776 = vmatmul.msk.bf16.gmra.mxu2 %vm1273_vm2, %v5056_v1  ;;  %v6240_v5 = vadd.f32 %v3534_v42, %v3324_v34 }
 0x214   : > { %4935 = vmatmul.msk.bf16.gmra.mxu0 %vm1273_vm2, %v5087_v27 }
 0x215   : > { %v2965_v35 = vpop.f32.mrf.mxu2  ;;  %v2680_v60 = vpop.f32.mrf.mxu1  ;;  %4857 = vmatmul.msk.bf16.gmra.mxu3 %vm1273_vm2, %v5073_v51  ;;  %v5058_v51 = vld [vmem:[#allocation2 + $0x70] sm:$0xff] }
 0x216   : > { %v3039_v23 = vadd.f32 %v2965_v35, %v2752_v36  ;;  %v2753_v16 = vadd.f32 %v2680_v60, %v6052_v48  ;;  %v3254_v20 = vpop.f32.mrf.mxu3  ;;  %v5074_v60 = vld [vmem:[#allocation2 + $0x100] sm:$0xff] }
 0x218   : > { %v3326_v56 = vadd.f32 %v3252_v58, %v3039_v23  ;;  %v5042_v23 = vld [vmem:[#allocation2 + $0x188] sm:$0xff] }
 0x219   : > { %v3536_v26 = vpop.f32.mrf.mxu0 }
 0x21a   : > { %v6244_v10 = vadd.f32 %v3536_v26, %v3325_v63 }
 0x21d   : > { %v2967_v8 = vpop.f32.mrf.mxu2  ;;  %v2683_v2 = vpop.f32.mrf.mxu1 }
 0x21e   : > { %v3040_v49 = vadd.f32 %v2967_v8, %v2753_v16  ;;  %v2754_v34 = vadd.f32 %v2683_v2, %v6063_v14  ;;  %v3257_v48 = vpop.f32.mrf.mxu3 }
 0x220   : > { %v3327_v54 = vadd.f32 %v3254_v20, %v3040_v49  ;;  %4697 = vmatmul.msk.bf16.gmra.mxu1 %vm1273_vm2, %v5041_v12 }
 0x221   : > { %v3539_v31 = vpop.f32.mrf.mxu0 }
 0x222   : > { %4777 = vmatmul.msk.bf16.gmra.mxu2 %vm1273_vm2, %v5057_v25  ;;  %v6250_v11 = vadd.f32 %v3539_v31, %v3326_v56  ;;  %v488_v56 = vld [vmem:[#allocation2 + $0x1a4] sm:$0x8]  ;;  %v1020_v25 = vrot.slane %v737_v28, 5 }
 0x223   : > { %v489_v12 = vsel %vm5630_vm11, 0, %v488_v56 }
 0x224   : > { %4936 = vmatmul.msk.bf16.gmra.mxu0 %vm1273_vm2, %v5088_v9  ;;  %490 = vst [vmem:[#allocation2 + $0x1a4] sm:$0x8] %v489_v12 }
 0x225   : > { %v2970_v36 = vpop.f32.mrf.mxu2  ;;  %v2685_v1 = vpop.f32.mrf.mxu1  ;;  %4858 = vmatmul.msk.bf16.gmra.mxu3 %vm1273_vm2, %v5074_v60 }
 0x226   : > { %v3041_v63 = vadd.f32 %v2970_v36, %v2754_v34  ;;  %v2755_v14 = vadd.f32 %v2685_v1, %v6096_v24  ;;  %v3259_v58 = vpop.f32.mrf.mxu3  ;;  %v5089_v24 = vld [vmem:[#allocation2 + $0x188] sm:$0xff]  ;;  %v1019_v34 = vrot.slane %v734_v33, 4 }
 0x228   : > { %v3328_v27 = vadd.f32 %v3257_v48, %v3041_v63  ;;  %v1021_v48 = vor.u32 %v1020_v25, %v1019_v34  ;;  %v5044_v34 = vld [vmem:[#allocation2 + $0x198] sm:$0xff] }
 0x229   : > { %v3541_v42 = vpop.f32.mrf.mxu0 }
 0x22a   : > { %v6254_v35 = vadd.f32 %v3541_v42, %v3327_v54  ;;  %v1023_v54 = vrot.slane %v745_v6, 5  ;;  %v1022_v63 = vrot.slane %v1021_v48, 4  ;;  %v5043_v42 = vld [vmem:[#allocation2 + $0x190] sm:$0xff] }
 0x22c   : > { %v1026_v31 = vor.u32 %v1025_v50, %v1023_v54  ;;  %v1024_v55 = vsel %vm5638_vm14, %v1022_v63, %v1023_v54  ;;  %v5060_v54 = vld [vmem:[#allocation2 + $0x80] sm:$0xff]  ;;  %v5091_v50 = vld [vmem:[#allocation2 + $0x198] sm:$0xff] }
 0x22d   : > { %v2972_v16 = vpop.f32.mrf.mxu2  ;;  %v2688_v20 = vpop.f32.mrf.mxu1  ;;  %1121 = vst.msk [vmem:[#allocation2 + $0x1a0] sm:$0xf] %vm373_vm0, %v1024_v55  ;;  %v5077_v55 = vld [vmem:[#allocation2 + $0x118] sm:$0xff]  ;;  %vm3725_vm0 = vcmask 523264  }
 0x22e   : > { %v3042_v26 = vadd.f32 %v2972_v16, %v2755_v14  ;;  %v3262_v2 = vpop.f32.mrf.mxu3  ;;  %v1027_v33 = vrot.slane %v1026_v31, 4  ;;  %v1122_v14 = vld [vmem:[#allocation2 + $0x1a4] sm:$0xf]  ;;  %v2756_v6 = vadd.f32 %v2688_v20, %v6105_v47  ;;  %v5059_v16 = vld [vmem:[#allocation2 + $0x78] sm:$0xff] }
 0x230   : > { %v3329_v8 = vadd.f32 %v3259_v58, %v3042_v26  ;;  %4698 = vmatmul.msk.bf16.gmra.mxu1 %vm1273_vm2, %v5042_v23  ;;  %v1123_v28 = vsel %vm5681_vm3, %v1027_v33, %v1122_v14  ;;  %v5075_v58 = vld [vmem:[#allocation2 + $0x108] sm:$0xff]  ;;  %v5090_v26 = vld [vmem:[#allocation2 + $0x190] sm:$0xff] }
 0x231   : > { %v3544_v49 = vpop.f32.mrf.mxu0  ;;  %1124 = vst [vmem:[#allocation2 + $0x1a4] sm:$0xf] %v1123_v28 }
 0x232   : > { %4778 = vmatmul.msk.bf16.gmra.mxu2 %vm1273_vm2, %v5058_v51  ;;  %v6269_v9 = vadd.f32 %v3544_v49, %v3328_v27  ;;  %v5076_v49 = vld [vmem:[#allocation2 + $0x110] sm:$0xff] }
 0x234   : > { %4937 = vmatmul.msk.bf16.gmra.mxu0 %vm1273_vm2, %v5089_v24 }
 0x235   : > { %v2975_v36 = vpop.f32.mrf.mxu2  ;;  %v6271_v1 = vpop.f32.mrf.mxu1  ;;  %4859 = vmatmul.msk.bf16.gmra.mxu3 %vm1273_vm2, %v5075_v58  ;;  %v5061_v58 = vld [vmem:[#allocation2 + $0x88] sm:$0xff] }
 0x236   : > { %v6279_v39 = vpop.f32.mrf.mxu3  ;;  %v3043_v60 = vadd.f32 %v2975_v36, %v2756_v6 }
 0x238   : > { %v3330_v53 = vadd.f32 %v3262_v2, %v3043_v60  ;;  %v5045_v28 = vld [vmem:[#allocation2 + $0x1a0] sm:$0xff] }
 0x239   : > { %v3546_v17 = vpop.f32.mrf.mxu0 }
 0x23a   : > { %v6282_v27 = vadd.f32 %v3546_v17, %v3329_v8 }
 0x23d   : > { %v6284_v23 = vpop.f32.mrf.mxu2  ;;  %v6286_v57 = vpop.f32.mrf.mxu1 }
 0x23e   : > { %v6291_v51 = vpop.f32.mrf.mxu3 }
 0x240   : > { %4699 = vmatmul.msk.bf16.gmra.mxu1 %vm1273_vm2, %v5043_v42  ;;  %v5092_v42 = vld [vmem:[#allocation2 + $0x1a0] sm:$0xff] }
 0x241   : > { %v3549_v47 = vpop.f32.mrf.mxu0 }
 0x242   : > { %4779 = vmatmul.msk.bf16.gmra.mxu2 %vm1273_vm2, %v5059_v16  ;;  %v6293_v20 = vadd.f32 %v3549_v47, %v3330_v53 }
 0x244   : > { %4938 = vmatmul.msk.bf16.gmra.mxu0 %vm1273_vm2, %v5090_v26 }
 0x245   : > { %v6295_v56 = vpop.f32.mrf.mxu2  ;;  %v2695_v12 = vpop.f32.mrf.mxu1  ;;  %4860 = vmatmul.msk.bf16.gmra.mxu3 %vm1273_vm2, %v5076_v49 }
 0x246   : > { %v6298_v8 = vpop.f32.mrf.mxu3  ;;  %v2759_v29 = vadd.f32 %v2695_v12, %v6123_v32 }
 0x249   : > { %v6300_v24 = vpop.f32.mrf.mxu0 }
 0x24d   : > { %v2982_v2 = vpop.f32.mrf.mxu2  ;;  %v2698_v25 = vpop.f32.mrf.mxu1 }
 0x24e   : > { %v3272_v48 = vpop.f32.mrf.mxu3 }
 0x250   : > { %4700 = vmatmul.msk.bf16.gmra.mxu1 %vm1273_vm2, %v5044_v34 }
 0x251   : > { %v6305_v31 = vpop.f32.mrf.mxu0 }
 0x252   : > { %4780 = vmatmul.msk.bf16.gmra.mxu2 %vm1273_vm2, %v5060_v54 }
 0x254   : > { %4939 = vmatmul.msk.bf16.gmra.mxu0 %vm1273_vm2, %v5091_v50 }
 0x255   : > { %v2985_v36 = vpop.f32.mrf.mxu2  ;;  %v2700_v63 = vpop.f32.mrf.mxu1  ;;  %4861 = vmatmul.msk.bf16.gmra.mxu3 %vm1273_vm2, %v5077_v55 }
 0x256   : > { %v3274_v33 = vpop.f32.mrf.mxu3 }
 0x259   : > { %v6308_v14 = vpop.f32.mrf.mxu0 }
 0x25d   : > { %v2987_v17 = vpop.f32.mrf.mxu2  ;;  %v2703_v6 = vpop.f32.mrf.mxu1 }
 0x25e   : > { %v3277_v60 = vpop.f32.mrf.mxu3 }
 0x260   : > { %4701 = vmatmul.msk.bf16.gmra.mxu1 %vm1273_vm2, %v5045_v28  ;;  %v2762_v28 = vadd.f32 %v2703_v6, %v6139_v22 }
 0x261   : > { %v3559_v16 = vpop.f32.mrf.mxu0 }
 0x262   : > { %4781 = vmatmul.msk.bf16.gmra.mxu2 %vm1273_vm2, %v5061_v58  ;;  %v2761_v58 = vadd.f32 %v2700_v63, %v6133_v40  ;;  %v2758_v40 = vadd.f32 %v6286_v57, %v6119_v38 }
 0x264   : > { %4940 = vmatmul.msk.bf16.gmra.mxu0 %vm1273_vm2, %v5092_v42 }
 0x265   : > { %v2990_v53 = vpop.f32.mrf.mxu2  ;;  %v2705_v26 = vpop.f32.mrf.mxu1 }
 0x266   : > { %v3279_v47 = vpop.f32.mrf.mxu3  ;;  %v2763_v7 = vadd.f32 %v2705_v26, %v6143_v4  ;;  %v3049_v18 = vadd.f32 %v2990_v53, %v2762_v28  ;;  %v6324_v53 = vld [vmem:[#allocation5] ss:$0 sm:$0xff] }
 0x268   : > { %v3336_v6 = vadd.f32 %v3277_v60, %v3049_v18 }
 0x269   : > { %v3561_v49 = vpop.f32.mrf.mxu0 }
 0x26d   : > { %v2992_v34 = vpop.f32.mrf.mxu2  ;;  %v2708_v54 = vpop.f32.mrf.mxu1 }
 0x26e   : > { %v2764_v50 = vadd.f32 %v2708_v54, %v6149_v13  ;;  %v3282_v0 = vpop.f32.mrf.mxu3  ;;  %v3050_v45 = vadd.f32 %v2992_v34, %v2763_v7  ;;  %v2760_v13 = vadd.f32 %v2698_v25, %v6129_v21  ;;  %v3048_v54 = vadd.f32 %v2987_v17, %v2761_v58 }
 0x26f   : > { %v2757_v21 = vadd.f32 %v6271_v1, %v6112_v59 }
 0x270   : > { %v3047_v22 = vadd.f32 %v2985_v36, %v2760_v13  ;;  %v3337_v4 = vadd.f32 %v3279_v47, %v3050_v45 }
 0x271   : > { %v3564_v55 = vpop.f32.mrf.mxu0 }
 0x272   : > { %v3623_v26 = vadd.f32 %v3564_v55, %v3336_v6  ;;  %v3334_v32 = vadd.f32 %v3272_v48, %v3047_v22  ;;  %v6387_v22 = vadd.f32 %v6324_v53, %v6254_v35 }
 0x274   : > { %4941 = vmatmul.msk.bf16.gmra.mxu0 %vm1273_vm2, %v5093_v37  ;;  %v3046_v37 = vadd.f32 %v2982_v2, %v2759_v29  ;;  %v3044_v29 = vadd.f32 %v6284_v23, %v2757_v21  ;;  %v3621_v25 = vadd.f32 %v3559_v16, %v3334_v32  ;;  %v6336_v36 = vadd.f32 %v6324_v53, %v3623_v26  ;;  %v7014_v32 = vld [vmem:[#allocation18_spill] sm:$0xff] }
 0x275   : > { %v2995_v44 = vpop.f32.mrf.mxu2  ;;  %v2710_v62 = vpop.f32.mrf.mxu1  ;;  %7008 = vst [vmem:[#allocation26_spill] sm:$0xff] %v6387_v22 }
 0x276   : > { %v3051_v42 = vadd.f32 %v2995_v44, %v2764_v50  ;;  %v2765_v3 = vadd.f32 %v2710_v62, %v6153_v46  ;;  %v3284_v7 = vpop.f32.mrf.mxu3  ;;  %v3335_v44 = vadd.f32 %v3274_v33, %v3048_v54  ;;  %v3333_v2 = vadd.f32 %v6298_v8, %v3046_v37 }
 0x277   : > { %v3331_v23 = vadd.f32 %v6279_v39, %v3044_v29  ;;  %v6348_v33 = vadd.f32 %v6324_v53, %v3621_v25  ;;  %v6369_v50 = vadd.f32 %v6324_v53, %v6293_v20  ;;  %v6382_v54 = vadd.f32 %v6324_v53, %v6269_v9 }
 0x278   : > { %v3338_v61 = vadd.f32 %v3282_v0, %v3051_v42  ;;  %v3045_v0 = vadd.f32 %v6295_v56, %v2758_v40  ;;  %v3622_v62 = vadd.f32 %v3561_v49, %v3335_v44  ;;  %v3620_v56 = vadd.f32 %v6308_v14, %v3333_v2  ;;  %v7015_v2 = vld [vmem:[#allocation19_spill] sm:$0xff] }
 0x279   : > { %v3566_v63 = vpop.f32.mrf.mxu0  ;;  %7005 = vst [vmem:[#allocation23_spill] sm:$0xff] %v6369_v50  ;;  %v6399_v9 = vadd.f32 %v6324_v53, %v6244_v10  ;;  %v6405_v37 = vadd.f32 %v6324_v53, %v6240_v5  ;;  %v6410_v44 = vadd.f32 %v6324_v53, %v6234_v43 }
 0x27a   : > { %v3624_v46 = vadd.f32 %v3566_v63, %v3337_v4  ;;  %v3332_v1 = vadd.f32 %v6291_v51, %v3045_v0  ;;  %v6342_v48 = vadd.f32 %v6324_v53, %v3622_v62  ;;  %v3618_v51 = vadd.f32 %v6300_v24, %v3331_v23  ;;  %7007 = vst [vmem:[#allocation25_spill] sm:$0xff] %v6382_v54 }
 0x27b   : > { %v6355_v14 = vadd.f32 %v6324_v53, %v3620_v56  ;;  %v6392_v4 = vadd.f32 %v6324_v53, %v6250_v11  ;;  %7010 = vst [vmem:[#allocation28_spill] sm:$0xff] %v6399_v9 }
 0x27c   : > { %v6330_v12 = vadd.f32 %v6324_v53, %v3624_v46  ;;  %v3619_v8 = vadd.f32 %v6305_v31, %v3332_v1  ;;  %v6364_v49 = vadd.f32 %v6324_v53, %v3618_v51  ;;  %7011 = vst [vmem:[#allocation29_spill] sm:$0xff] %v6405_v37  ;;  %v6415_v46 = vadd.f32 %v6324_v53, %v6230_v30  ;;  %v7016_v51 = vld [vmem:[#allocation20_spill] sm:$0xff] }
 0x27d   : > { %v2997_v18 = vpop.f32.mrf.mxu2  ;;  %v2713_v45 = vpop.f32.mrf.mxu1  ;;  %7009 = vst [vmem:[#allocation27_spill] sm:$0xff] %v6392_v4 }
 0x27e   : > { %v3052_v38 = vadd.f32 %v2997_v18, %v2765_v3  ;;  %v2766_v57 = vadd.f32 %v2713_v45, %v6159_v19  ;;  %3677 = vmatpush.msrb.mxu1 %v6330_v12  ;;  %v3287_v19 = vpop.f32.mrf.mxu3  ;;  %v6360_v31 = vadd.f32 %v6324_v53, %v3619_v8  ;;  %7012 = vst [vmem:[#allocation30_spill] sm:$0xff] %v6410_v44 }
 0x27f   : > { %7013 = vst [vmem:[#allocation31_spill] sm:$0xff] %v6415_v46 }
 0x280   : > { %v3339_v59 = vadd.f32 %v3284_v7, %v3052_v38  ;;  %3678 = vmatpush.msrb.mxu1 %v6336_v36 }
 0x281   : > { %v3569_v3 = vpop.f32.mrf.mxu0 }
 0x282   : > { %v6350_v17 = vadd.f32 %v3569_v3, %v3338_v61  ;;  %3679 = vmatpush.msrb.mxu1 %v6342_v48 }
 0x284   : > { %3680 = vmatpush.msrb.mxu1 %v6348_v33 }
 0x285   : > { %v3000_v60 = vpop.f32.mrf.mxu2  ;;  %v2715_v16 = vpop.f32.mrf.mxu1 }
 0x286   : > { %v3053_v47 = vadd.f32 %v3000_v60, %v2766_v57  ;;  %v2767_v39 = vadd.f32 %v2715_v16, %v6163_v52  ;;  %3681 = vmatpush.msrb.mxu1 %v6355_v14  ;;  %v3289_v24 = vpop.f32.mrf.mxu3  ;;  %v6376_v52 = vadd.f32 %v6324_v53, %v6282_v27 }
 0x288   : > { %v3340_v61 = vadd.f32 %v3287_v19, %v3053_v47  ;;  %3682 = vmatpush.msrb.mxu1 %v6360_v31  ;;  %7006 = vst [vmem:[#allocation24_spill] sm:$0xff] %v6376_v52 }
 0x289   : > { %v3571_v34 = vpop.f32.mrf.mxu0 }
 0x28a   : > { %v6371_v55 = vadd.f32 %v3571_v34, %v3339_v59  ;;  %3683 = vmatpush.msrb.mxu1 %v6364_v49 }
 0x28c   : > { %3684 = vmatpush.msrb.mxu1 %v6369_v50 }
 0x28d   : > { %v3002_v28 = vpop.f32.mrf.mxu2  ;;  %v2718_v58 = vpop.f32.mrf.mxu1 }
 0x28e   : > { %v3054_v42 = vadd.f32 %v3002_v28, %v2767_v39  ;;  %v2768_v13 = vadd.f32 %v2718_v58, %v6169_v41  ;;  %3685 = vmatpush.msrb.mxu1 %v6376_v52  ;;  %v3292_v27 = vpop.f32.mrf.mxu3 }
 0x290   : > { %v3341_v20 = vadd.f32 %v3289_v24, %v3054_v42  ;;  %3686 = vmatpush.msrb.mxu1 %v6382_v54 }
 0x291   : > { %v3574_v6 = vpop.f32.mrf.mxu0 }
 0x292   : > { %v6394_v41 = vadd.f32 %v3574_v6, %v3340_v61  ;;  %3687 = vmatpush.msrb.mxu1 %v6387_v22  ;;  %v7022_v22 = vld [vmem:[#allocation17_spill] sm:$0xff] }
 0x294   : > { %3688 = vmatpush.msrb.mxu1 %v6392_v4 }
 0x295   : > { %v3005_v40 = vpop.f32.mrf.mxu2  ;;  %v2720_v7 = vpop.f32.mrf.mxu1 }
 0x296   : > { %v3055_v35 = vadd.f32 %v3005_v40, %v2768_v13  ;;  %v2769_v63 = vadd.f32 %v2720_v7, %v6173_v15  ;;  %3689 = vmatpush.msrb.mxu1 %v6399_v9  ;;  %v3294_v10 = vpop.f32.mrf.mxu3 }
 0x298   : > { %v3342_v11 = vadd.f32 %v3292_v27, %v3055_v35  ;;  %3690 = vmatpush.msrb.mxu1 %v6405_v37 }
 0x299   : > { %v3576_v26 = vpop.f32.mrf.mxu0 }
 0x29a   : > { %v6417_v15 = vadd.f32 %v3576_v26, %v3341_v20  ;;  %3691 = vmatpush.msrb.mxu1 %v6410_v44 }
 0x29c   : > { %3692 = vmatpush.msrb.mxu1 %v6415_v46  ;;  %v7021_v46 = vld [vmem:[#allocation13_spill] sm:$0xff] }
 0x29d   : > { %v3007_v5 = vpop.f32.mrf.mxu2  ;;  %v2723_v21 = vpop.f32.mrf.mxu1 }
 0x29e   : > { %v3056_v0 = vadd.f32 %v3007_v5, %v2769_v63  ;;  %v2770_v43 = vadd.f32 %v2723_v21, %v7014_v32  ;;  %v3297_v18 = vpop.f32.mrf.mxu3 }
 0x2a0   : > { %v3343_v62 = vadd.f32 %v3294_v10, %v3056_v0 }
 0x2a1   : > { %v3579_v45 = vpop.f32.mrf.mxu0 }
 0x2a2   : > { %v6422_v38 = vadd.f32 %v3579_v45, %v3342_v11 }
 0x2a5   : > { %v3010_v57 = vpop.f32.mrf.mxu2  ;;  %v2725_v29 = vpop.f32.mrf.mxu1 }
 0x2a6   : > { %v3057_v30 = vadd.f32 %v3010_v57, %v2770_v43  ;;  %v2771_v25 = vadd.f32 %v2725_v29, %v7015_v2  ;;  %v3299_v1 = vpop.f32.mrf.mxu3 }
 0x2a8   : > { %v3344_v59 = vadd.f32 %v3297_v18, %v3057_v30 }
 0x2a9   : > { %v3581_v56 = vpop.f32.mrf.mxu0 }
 0x2aa   : > { %v6425_v19 = vadd.f32 %v3581_v56, %v3343_v62 }
 0x2ad   : > { %v3012_v3 = vpop.f32.mrf.mxu2  ;;  %v2728_v23 = vpop.f32.mrf.mxu1 }
 0x2ae   : > { %v3058_v8 = vadd.f32 %v3012_v3, %v2771_v25  ;;  %v2772_v60 = vadd.f32 %v2728_v23, %v7016_v51  ;;  %v3302_v47 = vpop.f32.mrf.mxu3  ;;  %v7017_v23 = vld [vmem:[#allocation16_spill] sm:$0xff]  ;;  %v7018_v51 = vld [vmem:[#allocation22_spill] sm:$0xff] }
 0x2b0   : > { %v3345_v16 = vadd.f32 %v3299_v1, %v3058_v8 }
 0x2b1   : > { %v3584_v39 = vpop.f32.mrf.mxu0 }
 0x2b2   : > { %v6428_v61 = vadd.f32 %v3584_v39, %v3344_v59 }
 0x2b5   : > { %v3015_v24 = vpop.f32.mrf.mxu2  ;;  %v2730_v34 = vpop.f32.mrf.mxu1 }
 0x2b6   : > { %v3059_v28 = vadd.f32 %v3015_v24, %v2772_v60  ;;  %v6430_v42 = vpop.f32.mrf.mxu3 }
 0x2b8   : > { %v3346_v58 = vadd.f32 %v3302_v47, %v3059_v28 }
 0x2b9   : > { %v3586_v13 = vpop.f32.mrf.mxu0 }
 0x2ba   : > { %v6432_v20 = vadd.f32 %v3586_v13, %v3345_v16  ;;  %v7019_v16 = vld [vmem:[#allocation15_spill] sm:$0xff] }
 0x2bd   : > { %v3017_v27 = vpop.f32.mrf.mxu2  ;;  %v2733_v6 = vpop.f32.mrf.mxu1 }
 0x2be   : > { %v3307_v35 = vpop.f32.mrf.mxu3  ;;  %v2774_v54 = vadd.f32 %v2733_v6, %v7022_v22  ;;  %v6452_v22 = vld [vmem:[%s6957_s3 + $0x38] sm:$0xff] }
 0x2bf   : > { %3737 = vmatpush.msrb.mxu3 %v6452_v22 }
 0x2c1   : > { %v3589_v40 = vpop.f32.mrf.mxu0 }
 0x2c2   : > { %v6434_v7 = vadd.f32 %v3589_v40, %v3346_v58  ;;  %v7020_v58 = vld [vmem:[#allocation14_spill] sm:$0xff] }
 0x2c5   : > { %v3020_v63 = vpop.f32.mrf.mxu2  ;;  %v2735_v11 = vpop.f32.mrf.mxu1 }
 0x2c6   : > { %v3309_v5 = vpop.f32.mrf.mxu3  ;;  %v2775_v44 = vadd.f32 %v2735_v11, %v7021_v46  ;;  %v5301_v46 = vmov 1.0  }
 0x2c7   : > { %3693 = vmatmul.f32.vlgmr.msrb.gmra.mxu1 %v5301_v46 }
 0x2c9   : > { %v6436_v10 = vpop.f32.mrf.mxu0 }
 0x2cd   : > { %v3022_v26 = vpop.f32.mrf.mxu2  ;;  %v2738_v21 = vpop.f32.mrf.mxu1 }
 0x2ce   : > { %v3312_v43 = vpop.f32.mrf.mxu3  ;;  %v2776_v13 = vadd.f32 %v2738_v21, %v7020_v58  ;;  %v3062_v50 = vadd.f32 %v3022_v26, %v2775_v44 }
 0x2d1   : > { %v3594_v0 = vpop.f32.mrf.mxu0 }
 0x2d5   : > { %v3025_v32 = vpop.f32.mrf.mxu2  ;;  %v2740_v18 = vpop.f32.mrf.mxu1 }
 0x2d6   : > { %v3314_v57 = vpop.f32.mrf.mxu3  ;;  %v2777_v47 = vadd.f32 %v2740_v18, %v7019_v16  ;;  %v3063_v37 = vadd.f32 %v3025_v32, %v2776_v13  ;;  %v6513_v32 = vadd.f32 %v6324_v53, %v6434_v7  ;;  %v6533_v7 = vadd.f32 %v6324_v53, %v6422_v38 }
 0x2d7   : > { %v6553_v38 = vadd.f32 %v6324_v53, %v6350_v17  ;;  %v3752_v17 = vld [vmem:[%s6958_s4 + $0x10] sm:$0xff] }
 0x2d9   : > { %v3596_v62 = vpop.f32.mrf.mxu0 }
 0x2dd   : > { %v3027_v45 = vpop.f32.mrf.mxu2  ;;  %v2743_v30 = vpop.f32.mrf.mxu1 }
 0x2de   : > { %v3317_v59 = vpop.f32.mrf.mxu3  ;;  %v2778_v8 = vadd.f32 %v2743_v30, %v7017_v23  ;;  %v3064_v40 = vadd.f32 %v3027_v45, %v2777_v47 }
 0x2e0   : > { %v3351_v30 = vadd.f32 %v3314_v57, %v3064_v40  ;;  %v6528_v57 = vadd.f32 %v6324_v53, %v6425_v19  ;;  %v6548_v19 = vadd.f32 %v6324_v53, %v6371_v55  ;;  %v6566_v55 = vld [vmem:[%s6957_s3] sm:$0xff] }
 0x2e1   : > { %v3599_v29 = vpop.f32.mrf.mxu0 }
 0x2e5   : > { %v3030_v2 = vpop.f32.mrf.mxu2  ;;  %v2745_v1 = vpop.f32.mrf.mxu1 }
 0x2e6   : > { %v2779_v60 = vadd.f32 %v2745_v1, %v7018_v51  ;;  %v3065_v39 = vadd.f32 %v3030_v2, %v2778_v8  ;;  %v3319_v28 = vpop.f32.mrf.mxu3  ;;  %v7023_v51 = vld [vmem:[#allocation21_spill] sm:$0xff]  ;;  %v3061_v2 = vadd.f32 %v3020_v63, %v2774_v54  ;;  %v3349_v54 = vadd.f32 %v3309_v5, %v3062_v50  ;;  %v6477_v50 = vld [vmem:[%s6957_s3 + $0x20] sm:$0xff] }
 0x2e7   : > { %v2773_v18 = vadd.f32 %v2730_v34, %v7023_v51 }
 0x2e8   : > { %v3352_v9 = vadd.f32 %v3317_v59, %v3065_v39  ;;  %v3348_v44 = vadd.f32 %v3307_v35, %v3061_v2  ;;  %v3636_v34 = vadd.f32 %v3596_v62, %v3349_v54  ;;  %v6488_v35 = vld [vmem:[%s6957_s3 + $0x18] sm:$0xff]  ;;  %v6523_v62 = vadd.f32 %v6324_v53, %v6428_v61  ;;  %v3751_v59 = vld [vmem:[%s6958_s4 + $0x8] sm:$0xff] }
 0x2e9   : > { %v3601_v25 = vpop.f32.mrf.mxu0  ;;  %v3060_v45 = vadd.f32 %v3017_v27, %v2773_v18  ;;  %v6543_v61 = vadd.f32 %v6324_v53, %v6394_v41  ;;  %v6561_v41 = vld [vmem:[%s6957_s3 + $0x8] sm:$0xff] }
 0x2ea   : > { %v3638_v8 = vadd.f32 %v3601_v25, %v3351_v30  ;;  %v3635_v63 = vadd.f32 %v3594_v0, %v3348_v44  ;;  %v6492_v5 = vadd.f32 %v6324_v53, %v3636_v34  ;;  %v7024_v44 = vld [vmem:[#allocation23_spill] sm:$0xff] }
 0x2eb   : > { %v3347_v6 = vadd.f32 %v6430_v42, %v3060_v45  ;;  %v6499_v42 = vld [vmem:[%s6957_s3 + $0x10] sm:$0xff] }
 0x2ec   : > { %v6470_v27 = vadd.f32 %v6324_v53, %v3638_v8  ;;  %v6502_v0 = vadd.f32 %v6324_v53, %v3635_v63  ;;  %v7025_v63 = vld [vmem:[#allocation24_spill] sm:$0xff] }
 0x2ed   : > { %v3032_v56 = vpop.f32.mrf.mxu2  ;;  %v3634_v26 = vadd.f32 %v6436_v10, %v3347_v6 }
 0x2ee   : > { %v3066_v24 = vadd.f32 %v3032_v56, %v2779_v60  ;;  %v3350_v56 = vadd.f32 %v3312_v43, %v3063_v37  ;;  %v6467_v37 = vld [vmem:[%s6957_s3 + $0x28] sm:$0xff]  ;;  %v6518_v43 = vadd.f32 %v6324_v53, %v6432_v20  ;;  %v6538_v20 = vadd.f32 %v6324_v53, %v6417_v15 }
 0x2ef   : > { %v6507_v10 = vadd.f32 %v6324_v53, %v3634_v26 }
 0x2f0   : > { %v3353_v4 = vadd.f32 %v3319_v28, %v3066_v24 }
 0x2f1   : > { %v3604_v3 = vpop.f32.mrf.mxu0 }
 0x2f2   : > { %v3639_v23 = vadd.f32 %v3604_v3, %v3352_v9  ;;  %v3750_v3 = vld [vmem:[%s6958_s4] sm:$0xff] }
 0x2f4   : > { %v6460_v9 = vadd.f32 %v6324_v53, %v3639_v23 }
 0x2f9   : > { %v3606_v52 = vpop.f32.mrf.mxu0 }
 0x2fa   : > { %v3640_v1 = vadd.f32 %v3606_v52, %v3353_v4  ;;  %v6457_v52 = vld [vmem:[%s6957_s3 + $0x30] sm:$0xff]  ;;  %v3637_v4 = vadd.f32 %v3599_v29, %v3350_v56 }
 0x2fb   : > { %3738 = vmatpush.msrb.mxu3 %v6457_v52 }
 0x2fc   : > { %v6446_v21 = vadd.f32 %v6324_v53, %v3640_v1  ;;  %v6481_v11 = vadd.f32 %v6324_v53, %v3637_v4  ;;  %v3753_v53 = vld [vmem:[%s6958_s4 + $0x18] sm:$0xff] }
 0x2fd   : > { %3739 = vmatpush.msrb.mxu3 %v6467_v37  ;;  %3770 = vmatpush.msra.mxu1 %v3753_v53 }
 0x2fe   : > { %3697 = vmatpush.msrb.mxu2 %v6446_v21 }
 0x2ff   : > { %3740 = vmatpush.msrb.mxu3 %v6477_v50  ;;  %3771 = vmatpush.msra.mxu1 %v3752_v17 }
 0x300   : > { %3698 = vmatpush.msrb.mxu2 %v6460_v9 }
 0x301   : > { %3741 = vmatpush.msrb.mxu3 %v6488_v35  ;;  %3772 = vmatpush.msra.mxu1 %v3751_v59 }
 0x302   : > { %3699 = vmatpush.msrb.mxu2 %v6470_v27 }
 0x303   : > { %3742 = vmatpush.msrb.mxu3 %v6499_v42  ;;  %3773 = vmatpush.msra.mxu1 %v3750_v3 }
 0x304   : > { %3700 = vmatpush.msrb.mxu2 %v6481_v11 }
 0x305   : > { %3743 = vmatpush.msrb.mxu3 %v6561_v41  ;;  %3933 = vmatpush.msrb.mxu1 %v3753_v53 }
 0x306   : > { %3701 = vmatpush.msrb.mxu2 %v6492_v5 }
 0x307   : > { %3744 = vmatpush.msrb.mxu3 %v6566_v55  ;;  %3934 = vmatpush.msrb.mxu1 %v3752_v17 }
 0x308   : > { %3702 = vmatpush.msrb.mxu2 %v6502_v0 }
 0x309   : > { %3935 = vmatpush.msrb.mxu1 %v3751_v59 }
 0x30a   : > { %3703 = vmatpush.msrb.mxu2 %v6507_v10 }
 0x30b   : > { %3936 = vmatpush.msrb.mxu1 %v3750_v3  ;;  %v7028_v3 = vld [vmem:[#allocation27_spill] sm:$0xff] }
 0x30c   : > { %3704 = vmatpush.msrb.mxu2 %v6513_v32 }
 0x30e   : > { %3705 = vmatpush.msrb.mxu2 %v6518_v43 }
 0x310   : > { %3706 = vmatpush.msrb.mxu2 %v6523_v62 }
 0x312   : > { %3707 = vmatpush.msrb.mxu2 %v6528_v57 }
 0x314   : > { %3708 = vmatpush.msrb.mxu2 %v6533_v7 }
 0x316   : > { %3709 = vmatpush.msrb.mxu2 %v6538_v20 }
 0x318   : > { %3710 = vmatpush.msrb.mxu2 %v6543_v61 }
 0x31a   : > { %3711 = vmatpush.msrb.mxu2 %v6548_v19 }
 0x31c   : > { %3712 = vmatpush.msrb.mxu2 %v6553_v38 }
 0x31d   : > { %3713 = vmatmul.f32.vlgmr.msrb.gmra.mxu2 %v5301_v46 }
 0x344   : > { %v3694_v15 = vpop.f32.mrf.mxu1 }
 0x3a0   : > { %v3714_v29 = vpop.f32.mrf.mxu2 }
 0x3a1   : > { %v3715_v25 = vadd.f32 %v3714_v29, %v3694_v15  ;;  %v7027_v15 = vld [vmem:[#allocation26_spill] sm:$0xff] }
 0x3a3   : > { %4942 = vmatmul.msk.f32.vlgmr.msrb.gmra.mxu3 %vm3725_vm0, %v3715_v25 }
 0x426   : > { %v3746_v60 = vpop.f32.mrf.mxu3 }
 0x427   : > { %v3749_v16 = vmul.f32 0.001953125, %v3746_v60 }
 0x429   : > { %4943 = vmatmul.msk.f32.vlgmr.msra.gmra.mxu1 %vm3754_vm1, %v3749_v16 }
 0x4a6   : > { %v3775_v47 = vpop.f32.mrf.mxu1 }
 0x4a7   : > { %v6584_v39 = vperm.slane %v3775_v47, 0 }
 0x4a9   : > { %v6588_v24 = vsub.f32 %v6330_v12, %v6584_v39  ;;  %v6592_v28 = vsub.f32 %v6336_v36, %v6584_v39  ;;  %v6596_v58 = vsub.f32 %v6460_v9, %v6584_v39  ;;  %v6600_v13 = vsub.f32 %v6446_v21, %v6584_v39 }
 0x4aa   : > { %v6604_v40 = vsub.f32 %v6342_v48, %v6584_v39  ;;  %v6610_v30 = vsub.f32 %v6470_v27, %v6584_v39  ;;  %v6616_v23 = vsub.f32 %v6348_v33, %v6584_v39  ;;  %v6622_v48 = vsub.f32 %v6481_v11, %v6584_v39 }
 0x4ab   : > { %v3826_v12 = vmul.f32 %v6588_v24, %v6588_v24  ;;  %v3842_v36 = vmul.f32 %v6600_v13, %v6600_v13  ;;  %v3825_v1 = vmul.f32 %v6592_v28, %v6592_v28  ;;  %v3841_v51 = vmul.f32 %v6596_v58, %v6596_v58 }
 0x4ac   : > { %v6628_v18 = vsub.f32 %v6355_v14, %v6584_v39  ;;  %v3824_v33 = vmul.f32 %v6604_v40, %v6604_v40  ;;  %v6634_v2 = vsub.f32 %v6492_v5, %v6584_v39  ;;  %v3840_v56 = vmul.f32 %v6610_v30, %v6610_v30 }
 0x4ad   : > { %3843 = vmatpush.msra.mxu2 %v3826_v12  ;;  %3863 = vmatpush.msra.mxu3 %v3842_v36  ;;  %v6640_v8 = vsub.f32 %v6360_v31, %v6584_v39  ;;  %v3823_v14 = vmul.f32 %v6616_v23, %v6616_v23  ;;  %v6646_v21 = vsub.f32 %v6502_v0, %v6584_v39  ;;  %v7029_v12 = vld [vmem:[#allocation28_spill] sm:$0xff] }
 0x4ae   : > { %v3839_v45 = vmul.f32 %v6622_v48, %v6622_v48  ;;  %v6652_v54 = vsub.f32 %v6364_v49, %v6584_v39  ;;  %v3822_v31 = vmul.f32 %v6628_v18, %v6628_v18  ;;  %v6658_v4 = vsub.f32 %v6507_v10, %v6584_v39  ;;  %v7026_v10 = vld [vmem:[#allocation25_spill] sm:$0xff] }
 0x4af   : > { %3844 = vmatpush.msra.mxu2 %v3825_v1  ;;  %3864 = vmatpush.msra.mxu3 %v3841_v51  ;;  %v3838_v9 = vmul.f32 %v6634_v2, %v6634_v2  ;;  %v6664_v34 = vsub.f32 %v7024_v44, %v6584_v39  ;;  %v3821_v49 = vmul.f32 %v6640_v8, %v6640_v8 }
 0x4b0   : > { %v6670_v27 = vsub.f32 %v6513_v32, %v6584_v39  ;;  %v3837_v6 = vmul.f32 %v6646_v21, %v6646_v21  ;;  %v6676_v11 = vsub.f32 %v7025_v63, %v6584_v39  ;;  %v3820_v26 = vmul.f32 %v6652_v54, %v6652_v54 }
 0x4b1   : > { %3845 = vmatpush.msra.mxu2 %v3824_v33  ;;  %3865 = vmatpush.msra.mxu3 %v3840_v56  ;;  %v6682_v5 = vsub.f32 %v6518_v43, %v6584_v39  ;;  %v3836_v0 = vmul.f32 %v6658_v4, %v6658_v4  ;;  %v6688_v32 = vsub.f32 %v7026_v10, %v6584_v39  ;;  %v7030_v33 = vld [vmem:[#allocation29_spill] sm:$0xff] }
 0x4b2   : > { %v3819_v53 = vmul.f32 %v6664_v34, %v6664_v34  ;;  %v6694_v17 = vsub.f32 %v6523_v62, %v6584_v39  ;;  %v3835_v43 = vmul.f32 %v6670_v27, %v6670_v27  ;;  %v6700_v29 = vsub.f32 %v7027_v15, %v6584_v39 }
 0x4b3   : > { %3846 = vmatpush.msra.mxu2 %v3823_v14  ;;  %3866 = vmatpush.msra.mxu3 %v3839_v45  ;;  %v3818_v25 = vmul.f32 %v6676_v11, %v6676_v11  ;;  %v6706_v59 = vsub.f32 %v6528_v57, %v6584_v39  ;;  %v3834_v62 = vmul.f32 %v6682_v5, %v6682_v5 }
 0x4b4   : > { %v6712_v60 = vsub.f32 %v7028_v3, %v6584_v39  ;;  %v3817_v16 = vmul.f32 %v6688_v32, %v6688_v32  ;;  %v6718_v47 = vsub.f32 %v6533_v7, %v6584_v39  ;;  %v3833_v57 = vmul.f32 %v6694_v17, %v6694_v17 }
 0x4b5   : > { %3847 = vmatpush.msra.mxu2 %v3822_v31  ;;  %3867 = vmatpush.msra.mxu3 %v3838_v9  ;;  %v6724_v36 = vsub.f32 %v7029_v12, %v6584_v39  ;;  %v3816_v1 = vmul.f32 %v6700_v29, %v6700_v29  ;;  %v6730_v51 = vsub.f32 %v6538_v20, %v6584_v39  ;;  %v7031_v31 = vld [vmem:[#allocation30_spill] sm:$0xff] }
 0x4b6   : > { %v3832_v7 = vmul.f32 %v6706_v59, %v6706_v59  ;;  %v6736_v56 = vsub.f32 %v7030_v33, %v6584_v39  ;;  %v3815_v14 = vmul.f32 %v6712_v60, %v6712_v60  ;;  %v6742_v45 = vsub.f32 %v6543_v61, %v6584_v39 }
 0x4b7   : > { %3848 = vmatpush.msra.mxu2 %v3821_v49  ;;  %3868 = vmatpush.msra.mxu3 %v3837_v6  ;;  %v3831_v20 = vmul.f32 %v6718_v47, %v6718_v47  ;;  %v3780_v9 = vsub.f32 %v7031_v31, %v6584_v39  ;;  %v3814_v44 = vmul.f32 %v6724_v36, %v6724_v36  ;;  %v7032_v6 = vld [vmem:[#allocation31_spill] sm:$0xff] }
 0x4b8   : > { %v6752_v49 = vsub.f32 %v6548_v19, %v6584_v39  ;;  %v3830_v61 = vmul.f32 %v6730_v51, %v6730_v51  ;;  %v3779_v63 = vsub.f32 %v7032_v6, %v6584_v39  ;;  %v3829_v19 = vmul.f32 %v6742_v45, %v6742_v45 }
 0x4b9   : > { %3849 = vmatpush.msra.mxu2 %v3820_v26  ;;  %3869 = vmatpush.msra.mxu3 %v3836_v0  ;;  %v3813_v26 = vmul.f32 %v6736_v56, %v6736_v56  ;;  %v6762_v0 = vsub.f32 %v6553_v38, %v6584_v39  ;;  %v3812_v10 = vmul.f32 %v3780_v9, %v3780_v9 }
 0x4bb   : > { %3850 = vmatpush.msra.mxu2 %v3819_v53  ;;  %3870 = vmatpush.msra.mxu3 %v3835_v43  ;;  %v3828_v53 = vmul.f32 %v6752_v49, %v6752_v49  ;;  %v3811_v43 = vmul.f32 %v3779_v63, %v3779_v63  ;;  %v3827_v15 = vmul.f32 %v6762_v0, %v6762_v0 }
 0x4bd   : > { %3851 = vmatpush.msra.mxu2 %v3818_v25  ;;  %3871 = vmatpush.msra.mxu3 %v3834_v62 }
 0x4bf   : > { %3852 = vmatpush.msra.mxu2 %v3817_v16  ;;  %3872 = vmatpush.msra.mxu3 %v3833_v57  ;;  %v3941_v16 = vld [vmem:[#allocation7] sm:$0x1] }
 0x4c1   : > { %3853 = vmatpush.msra.mxu2 %v3816_v1  ;;  %3873 = vmatpush.msra.mxu3 %v3832_v7 }
 0x4c3   : > { %3854 = vmatpush.msra.mxu2 %v3815_v14  ;;  %3874 = vmatpush.msra.mxu3 %v3831_v20  ;;  %v6788_v14 = vld [vmem:[#allocation8] ss:$0 sm:$0xff] }
 0x4c5   : > { %3855 = vmatpush.msra.mxu2 %v3814_v44  ;;  %3875 = vmatpush.msra.mxu3 %v3830_v61 }
 0x4c7   : > { %3856 = vmatpush.msra.mxu2 %v3813_v26  ;;  %3876 = vmatpush.msra.mxu3 %v3829_v19 }
 0x4c9   : > { %3857 = vmatpush.msra.mxu2 %v3812_v10  ;;  %3877 = vmatpush.msra.mxu3 %v3828_v53 }
 0x4cb   : > { %3858 = vmatpush.msra.mxu2 %v3811_v43  ;;  %3878 = vmatpush.msra.mxu3 %v3827_v15 }
 0x4cc   : > { %3859 = vmatmul.f32.vlgmr.msra.gmra.mxu2 %v5301_v46  ;;  %3879 = vmatmul.f32.vlgmr.msra.gmra.mxu3 %v5301_v46 }
 0x4cd   : > { %3894 = vmatpush.msrb.mxu3 %v6452_v22 }
 0x4cf   : > { %3895 = vmatpush.msrb.mxu3 %v6457_v52 }
 0x4d1   : > { %3896 = vmatpush.msrb.mxu3 %v6467_v37 }
 0x4d3   : > { %3897 = vmatpush.msrb.mxu3 %v6477_v50 }
 0x4d5   : > { %3898 = vmatpush.msrb.mxu3 %v6488_v35 }
 0x4d7   : > { %3899 = vmatpush.msrb.mxu3 %v6499_v42 }
 0x4d9   : > { %3900 = vmatpush.msrb.mxu3 %v6561_v41 }
 0x4db   : > { %3901 = vmatpush.msrb.mxu3 %v6566_v55 }
 0x54f   : > { %v3860_v38 = vpop.f32.mrf.mxu2  ;;  %v3880_v39 = vpop.f32.mrf.mxu3 }
 0x550   : > { %v3881_v25 = vadd.f32 %v3880_v39, %v3860_v38 }
 0x552   : > { %4944 = vmatmul.msk.f32.vlgmr.msrb.gmra.mxu3 %vm3725_vm0, %v3881_v25 }
 0x5d5   : > { %v3903_v46 = vpop.f32.mrf.mxu3 }
 0x5d6   : > { %v3906_v22 = vmul.f32 0.001953125, %v3903_v46 }
 0x5d8   : > { %v3907_v52 = vadd.f32 1e-05, %v3906_v22 }
 0x5da   : > { %5152 = vrsqrt.f32 %v3907_v52  ;;  %vm3914_vm4 = vweird.f32 %v3907_v52 }
 0x5e0   : > { %v5153_v37 = vpop.eup %5152 }
 0x5e1   : > { %v3909_v62 = vmul.f32 %v5153_v37, %v3907_v52  ;;  %vm3915_vm2 = vweird.f32 %v5153_v37 }
 0x5e2   : > { %vm3916_vm5 = vmor %vm3914_vm4, %vm3915_vm2 }
 0x5e3   : > { %v3910_v50 = vmul.f32 %v5153_v37, %v3909_v62 }
 0x5e5   : > { %v3911_v3 = vmul.f32 0.5, %v3910_v50 }
 0x5e7   : > { %v3912_v35 = vsub.f32 1.5, %v3911_v3 }
 0x5e9   : > { %v3913_v42 = vmul.f32 %v5153_v37, %v3912_v35 }
 0x5eb   : > { %v3917_v41 = vsel %vm3916_vm5, %v5153_v37, %v3913_v42 }
 0x5ec   : > { %4945 = vmatmul.msk.f32.vlgmr.msrb.gmra.mxu1 %vm3754_vm1, %v3917_v41 }
 0x669   : > { %v3938_v55 = vpop.f32.mrf.mxu1 }
 0x66a   : > { %v3942_v57 = vmul.f32 %v3941_v16, %v3938_v55 }
 0x66c   : > { %v6782_v12 = vperm.slane %v3942_v57, 0 }
 0x66e   : > { %v3944_v1 = vmul.f32 %v6782_v12, %v3779_v63  ;;  %v3945_v7 = vmul.f32 %v6782_v12, %v3780_v9  ;;  %v3946_v33 = vmul.f32 %v6782_v12, %v6736_v56  ;;  %v3947_v20 = vmul.f32 %v6782_v12, %v6724_v36 }
 0x66f   : > { %v3948_v31 = vmul.f32 %v6782_v12, %v6712_v60  ;;  %v3949_v44 = vmul.f32 %v6782_v12, %v6700_v29  ;;  %v3950_v61 = vmul.f32 %v6782_v12, %v6688_v32  ;;  %v3951_v63 = vmul.f32 %v6782_v12, %v6676_v11 }
 0x670   : > { %v3980_v6 = vadd.f32 %v6788_v14, %v3944_v1  ;;  %v3981_v9 = vadd.f32 %v6788_v14, %v3945_v7  ;;  %v3982_v56 = vadd.f32 %v6788_v14, %v3946_v33  ;;  %v3983_v36 = vadd.f32 %v6788_v14, %v3947_v20 }
 0x671   : > { %v3952_v60 = vmul.f32 %v6782_v12, %v6664_v34  ;;  %v3984_v26 = vadd.f32 %v6788_v14, %v3948_v31  ;;  %v3953_v32 = vmul.f32 %v6782_v12, %v6652_v54  ;;  %v3954_v29 = vmul.f32 %v6782_v12, %v6640_v8 }
 0x672   : > { %v3985_v19 = vadd.f32 %v6788_v14, %v3949_v44  ;;  %v3986_v10 = vadd.f32 %v6788_v14, %v3950_v61  ;;  %v4012_v53 = vmax.f32 %v3980_v6, 0.0  ;;  %v4013_v11 = vmax.f32 %v3981_v9, 0.0 }
 0x673   : > { %v4014_v43 = vmax.f32 %v3982_v56, 0.0  ;;  %v3955_v15 = vmul.f32 %v6782_v12, %v6628_v18  ;;  %v3987_v34 = vadd.f32 %v6788_v14, %v3951_v63  ;;  %v4015_v38 = vmax.f32 %v3983_v36, 0.0 }
 0x674   : > { %v3956_v54 = vmul.f32 %v6782_v12, %v6616_v23  ;;  %v3957_v8 = vmul.f32 %v6782_v12, %v6604_v40  ;;  %v3988_v39 = vadd.f32 %v6788_v14, %v3952_v60  ;;  %v4016_v25 = vmax.f32 %v3984_v26, 0.0 }
 0x675   : > { %v3958_v18 = vmul.f32 %v6782_v12, %v6592_v28  ;;  %v3989_v46 = vadd.f32 %v6788_v14, %v3953_v32  ;;  %v3990_v23 = vadd.f32 %v6788_v14, %v3954_v29  ;;  %v4017_v22 = vmax.f32 %v3985_v19, 0.0 }
 0x676   : > { %v4018_v52 = vmax.f32 %v3986_v10, 0.0  ;;  %v4044_v40 = vpack.c.bf16 %v4012_v53, %v4012_v53  ;;  %v4045_v37 = vpack.c.bf16 %v4013_v11, %v4013_v11  ;;  %v4046_v62 = vpack.c.bf16 %v4014_v43, %v4014_v43 }
 0x677   : > { %v3959_v50 = vmul.f32 %v6782_v12, %v6588_v24  ;;  %v3991_v3 = vadd.f32 %v6788_v14, %v3955_v15  ;;  %v4019_v35 = vmax.f32 %v3987_v34, 0.0  ;;  %v4047_v42 = vpack.c.bf16 %v4015_v38, %v4015_v38 }
 0x678   : > { %v3960_v28 = vmul.f32 %v6782_v12, %v6762_v0  ;;  %v3992_v41 = vadd.f32 %v6788_v14, %v3956_v54  ;;  %v4020_v55 = vmax.f32 %v3988_v39, 0.0  ;;  %v4048_v16 = vpack.c.bf16 %v4016_v25, %v4016_v25  ;;  %4077 = vst.msk [vmem:[%s6826_s16] sm:$0xf] %vm4076_vm6, %v4044_v40 }
 0x679   : > { %v3961_v57 = vmul.f32 %v6782_v12, %v6752_v49  ;;  %v3993_v24 = vadd.f32 %v6788_v14, %v3957_v8  ;;  %v4021_v1 = vmax.f32 %v3989_v46, 0.0  ;;  %v4049_v7 = vpack.c.bf16 %v4017_v22, %v4017_v22  ;;  %4078 = vst.msk [vmem:[%s6826_s16 + $0x4] sm:$0xf] %vm4076_vm6, %v4045_v37 }
 0x67a   : > { %v3962_v0 = vmul.f32 %v6782_v12, %v6742_v45  ;;  %v3994_v33 = vadd.f32 %v6788_v14, %v3958_v18  ;;  %v4022_v20 = vmax.f32 %v3990_v23, 0.0  ;;  %v4050_v31 = vpack.c.bf16 %v4018_v52, %v4018_v52  ;;  %4079 = vst.msk [vmem:[%s6826_s16 + $0x8] sm:$0xf] %vm4076_vm6, %v4046_v62 }
 0x67b   : > { %v3963_v49 = vmul.f32 %v6782_v12, %v6730_v51  ;;  %v3995_v44 = vadd.f32 %v6788_v14, %v3959_v50  ;;  %v4023_v61 = vmax.f32 %v3991_v3, 0.0  ;;  %v4051_v6 = vpack.c.bf16 %v4019_v35, %v4019_v35  ;;  %4080 = vst.msk [vmem:[%s6826_s16 + $0xc] sm:$0xf] %vm4076_vm6, %v4047_v42 }
 0x67c   : > { %v3964_v45 = vmul.f32 %v6782_v12, %v6718_v47  ;;  %v3996_v9 = vadd.f32 %v6788_v14, %v3960_v28  ;;  %v4024_v56 = vmax.f32 %v3992_v41, 0.0  ;;  %v4052_v63 = vpack.c.bf16 %v4020_v55, %v4020_v55  ;;  %4081 = vst.msk [vmem:[%s6826_s16 + $0x10] sm:$0xf] %vm4076_vm6, %v4048_v16 }
 0x67d   : > { %v3965_v51 = vmul.f32 %v6782_v12, %v6706_v59  ;;  %v3997_v36 = vadd.f32 %v6788_v14, %v3961_v57  ;;  %v4025_v60 = vmax.f32 %v3993_v24, 0.0  ;;  %v4053_v26 = vpack.c.bf16 %v4021_v1, %v4021_v1  ;;  %4082 = vst.msk [vmem:[%s6826_s16 + $0x14] sm:$0xf] %vm4076_vm6, %v4049_v7 }
 0x67e   : > { %v3966_v47 = vmul.f32 %v6782_v12, %v6694_v17  ;;  %v3998_v32 = vadd.f32 %v6788_v14, %v3962_v0  ;;  %v4026_v29 = vmax.f32 %v3994_v33, 0.0  ;;  %v4054_v19 = vpack.c.bf16 %v4022_v20, %v4022_v20  ;;  %4083 = vst.msk [vmem:[%s6826_s16 + $0x18] sm:$0xf] %vm4076_vm6, %v4050_v31 }
 0x67f   : > { %v3967_v59 = vmul.f32 %v6782_v12, %v6682_v5  ;;  %v3999_v10 = vadd.f32 %v6788_v14, %v3963_v49  ;;  %v4027_v53 = vmax.f32 %v3995_v44, 0.0  ;;  %v4055_v11 = vpack.c.bf16 %v4023_v61, %v4023_v61  ;;  %4084 = vst.msk [vmem:[%s6826_s16 + $0x1c] sm:$0xf] %vm4076_vm6, %v4051_v6 }
 0x680   : > { %v3968_v17 = vmul.f32 %v6782_v12, %v6670_v27  ;;  %v4000_v43 = vadd.f32 %v6788_v14, %v3964_v45  ;;  %v4028_v15 = vmax.f32 %v3996_v9, 0.0  ;;  %v4056_v34 = vpack.c.bf16 %v4024_v56, %v4024_v56  ;;  %4085 = vst.msk [vmem:[%s6826_s16 + $0x20] sm:$0xf] %vm4076_vm6, %v4052_v63 }
 0x681   : > { %v3969_v5 = vmul.f32 %v6782_v12, %v6658_v4  ;;  %v4001_v38 = vadd.f32 %v6788_v14, %v3965_v51  ;;  %v4029_v54 = vmax.f32 %v3997_v36, 0.0  ;;  %v4057_v8 = vpack.c.bf16 %v4025_v60, %v4025_v60  ;;  %4086 = vst.msk [vmem:[%s6826_s16 + $0x24] sm:$0xf] %vm4076_vm6, %v4053_v26 }
 0x682   : > { %v3970_v27 = vmul.f32 %v6782_v12, %v6646_v21  ;;  %v4002_v39 = vadd.f32 %v6788_v14, %v3966_v47  ;;  %v4030_v25 = vmax.f32 %v3998_v32, 0.0  ;;  %v4058_v18 = vpack.c.bf16 %v4026_v29, %v4026_v29  ;;  %4087 = vst.msk [vmem:[%s6826_s16 + $0x28] sm:$0xf] %vm4076_vm6, %v4054_v19 }
 0x683   : > { %v3971_v4 = vmul.f32 %v6782_v12, %v6634_v2  ;;  %v4003_v46 = vadd.f32 %v6788_v14, %v3967_v59  ;;  %v4031_v23 = vmax.f32 %v3999_v10, 0.0  ;;  %v4059_v22 = vpack.c.bf16 %v4027_v53, %v4027_v53  ;;  %4088 = vst.msk [vmem:[%s6826_s16 + $0x2c] sm:$0xf] %vm4076_vm6, %v4055_v11 }
 0x684   : > { %v3972_v21 = vmul.f32 %v6782_v12, %v6622_v48  ;;  %v4004_v52 = vadd.f32 %v6788_v14, %v3968_v17  ;;  %v4032_v40 = vmax.f32 %v4000_v43, 0.0  ;;  %v4060_v37 = vpack.c.bf16 %v4028_v15, %v4028_v15  ;;  %4089 = vst.msk [vmem:[%s6826_s16 + $0x30] sm:$0xf] %vm4076_vm6, %v4056_v34 }
 0x685   : > { %v3973_v2 = vmul.f32 %v6782_v12, %v6610_v30  ;;  %v4005_v62 = vadd.f32 %v6788_v14, %v3969_v5  ;;  %v4033_v50 = vmax.f32 %v4001_v38, 0.0  ;;  %v4061_v3 = vpack.c.bf16 %v4029_v54, %v4029_v54  ;;  %4090 = vst.msk [vmem:[%s6826_s16 + $0x34] sm:$0xf] %vm4076_vm6, %v4057_v8 }
 0x686   : > { %v3974_v48 = vmul.f32 %v6782_v12, %v6596_v58  ;;  %v4006_v35 = vadd.f32 %v6788_v14, %v3970_v27  ;;  %v4034_v42 = vmax.f32 %v4002_v39, 0.0  ;;  %v4062_v28 = vpack.c.bf16 %v4030_v25, %v4030_v25  ;;  %4091 = vst.msk [vmem:[%s6826_s16 + $0x38] sm:$0xf] %vm4076_vm6, %v4058_v18 }
 0x687   : > { %v3975_v30 = vmul.f32 %v6782_v12, %v6600_v13  ;;  %v4007_v41 = vadd.f32 %v6788_v14, %v3971_v4  ;;  %v4035_v55 = vmax.f32 %v4003_v46, 0.0  ;;  %v4063_v16 = vpack.c.bf16 %v4031_v23, %v4031_v23  ;;  %4092 = vst.msk [vmem:[%s6826_s16 + $0x3c] sm:$0xf] %vm4076_vm6, %v4059_v22 }
 0x688   : > { %v4008_v58 = vadd.f32 %v6788_v14, %v3972_v21  ;;  %v4036_v57 = vmax.f32 %v4004_v52, 0.0  ;;  %v4064_v24 = vpack.c.bf16 %v4032_v40, %v4032_v40  ;;  %4093 = vst.msk [vmem:[%s6826_s16 + $0x40] sm:$0xf] %vm4076_vm6, %v4060_v37  ;;  %v4009_v1 = vadd.f32 %v6788_v14, %v3973_v2 }
 0x689   : > { %v4037_v7 = vmax.f32 %v4005_v62, 0.0  ;;  %v4065_v13 = vpack.c.bf16 %v4033_v50, %v4033_v50  ;;  %4094 = vst.msk [vmem:[%s6826_s16 + $0x44] sm:$0xf] %vm4076_vm6, %v4061_v3  ;;  %v4010_v12 = vadd.f32 %v6788_v14, %v3974_v48  ;;  %v4038_v0 = vmax.f32 %v4006_v35, 0.0 }
 0x68a   : > { %v4066_v33 = vpack.c.bf16 %v4034_v42, %v4034_v42  ;;  %4095 = vst.msk [vmem:[%s6826_s16 + $0x48] sm:$0xf] %vm4076_vm6, %v4062_v28  ;;  %v4011_v20 = vadd.f32 %v6788_v14, %v3975_v30  ;;  %v4039_v31 = vmax.f32 %v4007_v41, 0.0  ;;  %v4067_v49 = vpack.c.bf16 %v4035_v55, %v4035_v55 }
 0x68b   : > { %4096 = vst.msk [vmem:[%s6826_s16 + $0x4c] sm:$0xf] %vm4076_vm6, %v4063_v16  ;;  %v4040_v44 = vmax.f32 %v4008_v58, 0.0  ;;  %v4068_v61 = vpack.c.bf16 %v4036_v57, %v4036_v57  ;;  %v4041_v6 = vmax.f32 %v4009_v1, 0.0  ;;  %v4069_v45 = vpack.c.bf16 %v4037_v7, %v4037_v7 }
 0x68c   : > { %4097 = vst.msk [vmem:[%s6826_s16 + $0x50] sm:$0xf] %vm4076_vm6, %v4064_v24  ;;  %v4042_v9 = vmax.f32 %v4010_v12, 0.0  ;;  %v4070_v14 = vpack.c.bf16 %v4038_v0, %v4038_v0  ;;  %v4043_v56 = vmax.f32 %v4011_v20, 0.0  ;;  %v4071_v63 = vpack.c.bf16 %v4039_v31, %v4039_v31 }
 0x68d   : > { %4098 = vst.msk [vmem:[%s6826_s16 + $0x54] sm:$0xf] %vm4076_vm6, %v4065_v13  ;;  %v4072_v51 = vpack.c.bf16 %v4040_v44, %v4040_v44  ;;  %v4073_v36 = vpack.c.bf16 %v4041_v6, %v4041_v6 }
 0x68e   : > { %4099 = vst.msk [vmem:[%s6826_s16 + $0x58] sm:$0xf] %vm4076_vm6, %v4066_v33  ;;  %v4074_v60 = vpack.c.bf16 %v4042_v9, %v4042_v9  ;;  %v4075_v26 = vpack.c.bf16 %v4043_v56, %v4043_v56 }
 0x68f   : > { %4100 = vst.msk [vmem:[%s6826_s16 + $0x5c] sm:$0xf] %vm4076_vm6, %v4067_v49 }
 0x690   : > { %4101 = vst.msk [vmem:[%s6826_s16 + $0x60] sm:$0xf] %vm4076_vm6, %v4068_v61 }
 0x691   : > { %4102 = vst.msk [vmem:[%s6826_s16 + $0x64] sm:$0xf] %vm4076_vm6, %v4069_v45 }
 0x692   : > { %4103 = vst.msk [vmem:[%s6826_s16 + $0x68] sm:$0xf] %vm4076_vm6, %v4070_v14 }
 0x693   : > { %4104 = vst.msk [vmem:[%s6826_s16 + $0x6c] sm:$0xf] %vm4076_vm6, %v4071_v63 }
 0x694   : > { %4105 = vst.msk [vmem:[%s6826_s16 + $0x70] sm:$0xf] %vm4076_vm6, %v4072_v51 }
 0x695   : > { %4106 = vst.msk [vmem:[%s6826_s16 + $0x74] sm:$0xf] %vm4076_vm6, %v4073_v36 }
 0x696   : > { %4107 = vst.msk [vmem:[%s6826_s16 + $0x78] sm:$0xf] %vm4076_vm6, %v4074_v60 }
 0x697   : > { %4108 = vst.msk [vmem:[%s6826_s16 + $0x7c] sm:$0xf] %vm4076_vm6, %v4075_v26 }
 0x698 PF: > { %s20_s24 = sadd.s32 1, %s5292_s24  }
 0x699   : > { %p17_p7 = scmp.ge.s32.totalorder %s20_s24, 4  }
 0x69b   :  { %19 = sbr.rel (!%p17_p7) target bundleno = 3 (0x3), region = 112 }
 0x6a0   :  { %4130 = vsyncpa [#allocation4], 1 }
 0x6a1   :  { %4132 = vsyncpa [#allocation4 + $0x1], 1 }
 0x6a2   :  { %4133 = vsyncpa [#allocation6], 1 }
 0x6a3   :  { %4134 = vsyncpa [#allocation9], 1 }

// kernel: regression_model_forward.6
= control target key start
LH: loop header
LB: loop body
LE: loop exit
PB: predicated region body
PF: predicated region fallthrough
CT: control target
= control target key end

     0   :  { %12 = vsyncpa [#allocation4], 0  ;;  %s7392_s0 = inlined_call_operand.vmem [shape: bf16[2,16,16,64], index: 0, kind: input, shape index: {}]   ;;  %s7393_s1 = inlined_call_operand.hbm [shape: bf16[9,64,64], index: 1, kind: input, shape index: {}]   ;;  %s7394_s2 = inlined_call_operand.hbm [shape: f32[1,64], index: 2, kind: input, shape index: {}]   ;;  %s7395_s3 = inlined_call_operand.vmem [shape: f32[64,32], index: 3, kind: input, shape index: {}]   ;;  %s7396_s4 = inlined_call_operand.vmem [shape: f32[32,64], index: 4, kind: input, shape index: {}]   ;;  %s7397_s5 = inlined_call_operand.hbm [shape: f32[1,64], index: 5, kind: input, shape index: {}]   ;;  %s7398_s6 = inlined_call_operand.hbm [shape: f32[1,64], index: 6, kind: input, shape index: {}]   ;;  %s7399_s7 = inlined_call_operand.vmem [shape: bf16[2,16,16,64], index: 7, kind: output, shape index: {}]  }
   0x1   :  { %13 = vsyncpa [#allocation6], 0 }
   0x2   :  { %14 = vsyncpa [#allocation9], 0  ;;  %s5780_s24 = smov 0  }
   0x3 LB: > { %s229_s27 = sshll.u32 %s7394_s2, 4  ;;  %s5789_s28 = sadd.s32 4294967295, %s5730_s24   ;;  %s5730_s24 = sphi %s5780_s24, %s20_s24   ;;  %s230_s27 = int_to_ptr.hbm [resolvable:$true] %s229_s27 }
   0x4   : > { %p4456_p0 = scmp.ge.s32.totalorder %s5730_s24, 1  ;;  %p203_p1 = scmp.lt.s32.totalorder %s5730_s24, 3 }
   0x5   : > { %p5564_p2 = scmp.eq.s32.totalorder %s5789_s28, 0  ;;  %s5732_s30 = smov [#allocation5]  }
   0x6   : > { %p5794_p3 = pnand %p4456_p0, %p203_p1  ;;  %s231_s8 = sshll.u32 %s5732_s30, 4  ;;  %s232_s8 = int_to_ptr.vmem [resolvable:$true] %s231_s8 }
   0x7   : > { %s214_s11 = sshll.u32 %s7393_s1, 4  ;;  %s5733_s13 = smov [#allocation3]   ;;  %s215_s11 = int_to_ptr.hbm [resolvable:$true] %s214_s11 }
   0x8   : > { %p5551_p4 = pneg %p5794_p3  ;;  %s216_s14 = sshll.u32 %s5733_s13, 4  ;;  %s217_s14 = int_to_ptr.vmem [resolvable:$true] %s216_s14 }
   0x9   : > { %s247_s17 = sshll.u32 %s7397_s5, 4  ;;  %s5734_s18 = smov 64   ;;  %s248_s17 = int_to_ptr.hbm [resolvable:$true] %s247_s17 }
   0xa   : > { %p5805_p5 = pnand %p5564_p2, %p5551_p4  ;;  %s5735_s19 = smov 4  }
   0xb   : > { %s5736_s20 = smov [#allocation7]   ;;  %s259_s25 = sshll.u32 %s7398_s6, 4  ;;  %s260_s25 = int_to_ptr.hbm [resolvable:$true] %s259_s25 }
   0xc   : > { %5557 = dma.hbm_to_vmem [thread:$0]  (!%p5805_p5), %s230_s27, 16, %s232_s8, [#allocation6]  }
   0xd   : > { %5554 = dma.hbm_to_vmem [thread:$0]  (!%p5805_p5), %s215_s11, 4608, %s217_s14, [#allocation4], %s5734_s18, %s5734_s18, %s5735_s19  }
   0xe   : > { %s249_s21 = sshll.u32 %s5736_s20, 4  ;;  %s5737_s26 = smov [#allocation8]   ;;  %s250_s21 = int_to_ptr.vmem [resolvable:$true] %s249_s21 }
   0xf   : > { %5560 = dma.hbm_to_vmem [thread:$0]  (!%p5805_p5), %s248_s17, 16, %s250_s21, [#allocation6]  }
  0x10   : > { %s261_s30 = sshll.u32 %s5737_s26, 4  ;;  %282 = sbr.rel (%p5794_p3) target bundleno = 1695 (0x69f), region = 48  ;;  %s262_s30 = int_to_ptr.vmem [resolvable:$true] %s261_s30 }
  0x11   : > { %5563 = dma.hbm_to_vmem [thread:$0]  (!%p5805_p5), %s260_s25, 16, %s262_s30, [#allocation9]  }
  0x15   : > { %5717 = dma.done.wait (%p5564_p2), [#allocation4], 4608  }
  0x16   : > { %5719 = vsyncadd (%p5564_p2), [#allocation4], 4294962688 }
  0x17   : > { %5721 = dma.done.wait (%p5564_p2), [#allocation6], 32  }
  0x18   : > { %5723 = vsyncadd (%p5564_p2), [#allocation6], 4294967264 }
  0x19   : > { %5725 = dma.done.wait (%p5564_p2), [#allocation9], 16  }
  0x1a   : > { %5727 = vsyncadd (%p5564_p2), [#allocation9], 4294967280  ;;  %vm373_vm0 = vcmask 519168   ;;  %p330_p6 = scmp.lt.s32.totalorder %s5789_s28, 1  ;;  %v5738_v0 = vmov 0   ;;  %v5382_v1 = vld [vmem:[#allocation3 + $0x38] sm:$0xff] }
  0x1b   : > { %376 = vst.msk [vmem:[#allocation2 + $0x90] sm:$0xf] %vm373_vm0, %v5738_v0  ;;  %1364 = vmatpush.bf16.msra.mxu0 %v5382_v1  ;;  %5523 = vmatpush.bf16.msra.mxu1 %v5382_v1  ;;  %v5381_v2 = vld [vmem:[#allocation3 + $0x30] sm:$0xff]  ;;  %v5380_v6 = vld [vmem:[#allocation3 + $0x28] sm:$0xff]  ;;  %v5379_v9 = vld [vmem:[#allocation3 + $0x20] sm:$0xff]  ;;  %vm1311_vm1 = vcmask 523264  }
  0x1c   : > { %377 = vst.msk [vmem:[#allocation2 + $0x94] sm:$0xf] %vm373_vm0, %v5738_v0  ;;  %s7468_s28 = smov (!%p330_p6, %s5789_s28), 1  ;;  %5524 = vmatpush.bf16.msra.mxu2 %v5382_v1  ;;  %5525 = vmatpush.bf16.msra.mxu3 %v5382_v1  ;;  %v5362_v30 = vld [vmem:[#allocation3 + $0x18] sm:$0xff]  ;;  %v5361_v34 = vld [vmem:[#allocation3 + $0x10] sm:$0xff]  ;;  %v5360_v42 = vld [vmem:[#allocation3 + $0x8] sm:$0xff] }
  0x1d   : > { %374 = vst.msk [vmem:[#allocation2] sm:$0xf] %vm373_vm0, %v5738_v0  ;;  %s5341_s27 = sshll.u32 %s7468_s28, 7  ;;  %v5402_v32 = vld [vmem:[#allocation3 + $0x58] sm:$0xff]  ;;  %v5401_v37 = vld [vmem:[#allocation3 + $0x50] sm:$0xff]  ;;  %v5400_v44 = vld [vmem:[#allocation3 + $0x48] sm:$0xff] }
  0x1e   : > { %375 = vst.msk [vmem:[#allocation2 + $0x4] sm:$0xf] %vm373_vm0, %v5738_v0  ;;  %s5854_s9 = scalar_lea.vmem %s7392_s0, %s5341_s27  ;;  %v5422_v33 = vld [vmem:[#allocation3 + $0x78] sm:$0xff]  ;;  %v5421_v40 = vld [vmem:[#allocation3 + $0x70] sm:$0xff]  ;;  %v5420_v47 = vld [vmem:[#allocation3 + $0x68] sm:$0xff]  ;;  %vm388_vm2 = vcmask 516096   ;;  %s7264_s16 = scalar_lea.vmem %s7399_s7, %s5341_s27 }
  0x1f   : > { %378 = vst.msk [vmem:[#allocation2 + $0x120] sm:$0xf] %vm373_vm0, %v5738_v0  ;;  %v5860_v3 = vld [vmem:[%s5854_s9 + $0x28] sm:$0xf]  ;;  %v5864_v4 = vld [vmem:[%s5854_s9 + $0x2c] sm:$0xf]  ;;  %1365 = vmatpush.bf16.msra.mxu0 %v5381_v2  ;;  %5526 = vmatpush.bf16.msra.mxu1 %v5381_v2 }
  0x20   : > { %379 = vst.msk [vmem:[#allocation2 + $0x124] sm:$0xf] %vm373_vm0, %v5738_v0  ;;  %v5868_v5 = vld [vmem:[%s5854_s9 + $0x48] sm:$0xf]  ;;  %v5873_v7 = vld [vmem:[%s5854_s9 + $0x4c] sm:$0xf]  ;;  %5527 = vmatpush.bf16.msra.mxu2 %v5381_v2  ;;  %5528 = vmatpush.bf16.msra.mxu3 %v5381_v2 }
  0x21   : > { %381 = vst.msk [vmem:[#allocation2 + $0x88] sm:$0xf] %vm373_vm0, %v5738_v0  ;;  %v5878_v8 = vld [vmem:[%s5854_s9] sm:$0xf]  ;;  %v5885_v10 = vld [vmem:[%s5854_s9 + $0x4] sm:$0xf] }
  0x22   : > { %382 = vst.msk [vmem:[#allocation2 + $0x8c] sm:$0xf] %vm373_vm0, %v5738_v0  ;;  %v5892_v11 = vld [vmem:[%s5854_s9 + $0x30] sm:$0xf]  ;;  %v5895_v12 = vld [vmem:[%s5854_s9 + $0x34] sm:$0xf] }
  0x23   : > { %383 = vst.msk [vmem:[#allocation2 + $0x118] sm:$0xf] %vm373_vm0, %v5738_v0  ;;  %1366 = vmatpush.bf16.msra.mxu0 %v5380_v6  ;;  %5529 = vmatpush.bf16.msra.mxu1 %v5380_v6  ;;  %v5363_v13 = vld [vmem:[#allocation2 + $0x90] sm:$0xff]  ;;  %v5915_v18 = vld [vmem:[%s5854_s9 + $0x8] sm:$0xf]  ;;  %v494_v51 = vshrl.u32 %v5878_v8, 16 }
  0x24   : > { %384 = vst.msk [vmem:[#allocation2 + $0x11c] sm:$0xf] %vm373_vm0, %v5738_v0  ;;  %5530 = vmatpush.bf16.msra.mxu2 %v5380_v6  ;;  %5531 = vmatpush.bf16.msra.mxu3 %v5380_v6  ;;  %v5902_v15 = vld [vmem:[%s5854_s9 + $0x50] sm:$0xf]  ;;  %v5905_v17 = vld [vmem:[%s5854_s9 + $0x54] sm:$0xf] }
  0x25   : > { %385 = vst.msk [vmem:[#allocation2 + $0x1a8] sm:$0xf] %vm373_vm0, %v5738_v0  ;;  %v5918_v19 = vld [vmem:[%s5854_s9 + $0xc] sm:$0xf]  ;;  %v5925_v20 = vld [vmem:[%s5854_s9 + $0x38] sm:$0xf] }
  0x26   : > { %386 = vst.msk [vmem:[#allocation2 + $0x1ac] sm:$0xf] %vm373_vm0, %v5738_v0  ;;  %v5928_v21 = vld [vmem:[%s5854_s9 + $0x3c] sm:$0xf]  ;;  %v5935_v22 = vld [vmem:[%s5854_s9 + $0x58] sm:$0xf] }
  0x27   : > { %859 = vst.msk [vmem:[#allocation2 + $0xc0] sm:$0xf] %vm373_vm0, %v5860_v3  ;;  %1367 = vmatpush.bf16.msra.mxu0 %v5379_v9  ;;  %5532 = vmatpush.bf16.msra.mxu1 %v5379_v9  ;;  %v5938_v23 = vld [vmem:[%s5854_s9 + $0x5c] sm:$0xf]  ;;  %v5945_v27 = vld [vmem:[%s5854_s9 + $0x68] sm:$0xf] }
  0x28   : > { %860 = vst.msk [vmem:[#allocation2 + $0xc4] sm:$0xf] %vm373_vm0, %v5864_v4  ;;  %5533 = vmatpush.bf16.msra.mxu2 %v5379_v9  ;;  %5534 = vmatpush.bf16.msra.mxu3 %v5379_v9  ;;  %v5948_v28 = vld [vmem:[%s5854_s9 + $0x6c] sm:$0xf]  ;;  %v5957_v29 = vld [vmem:[%s5854_s9 + $0x10] sm:$0xf] }
  0x29   : > { %867 = vst.msk [vmem:[#allocation2 + $0xe0] sm:$0xf] %vm373_vm0, %v5868_v5  ;;  %v5961_v31 = vld [vmem:[%s5854_s9 + $0x14] sm:$0xf]  ;;  %v5968_v35 = vld [vmem:[%s5854_s9 + $0x40] sm:$0xf] }
  0x2a   : > { %868 = vst.msk [vmem:[#allocation2 + $0xe4] sm:$0xf] %vm373_vm0, %v5873_v7  ;;  %4551 = vmatmul.msk.bf16.vlgmr.msra.gmra.mxu0 %vm1311_vm1, %v5363_v13  ;;  %v5971_v36 = vld [vmem:[%s5854_s9 + $0x44] sm:$0xf]  ;;  %v5979_v39 = vld [vmem:[%s5854_s9 + $0x60] sm:$0xf] }
  0x2b   : > { %849 = vst.msk [vmem:[#allocation2 + $0x98] sm:$0xf] %vm373_vm0, %v5878_v8  ;;  %1605 = vmatpush.bf16.msrb.mxu1 %v5362_v30  ;;  %v5982_v41 = vld [vmem:[%s5854_s9 + $0x64] sm:$0xf]  ;;  %v5989_v46 = vld [vmem:[%s5854_s9 + $0x70] sm:$0xf] }
  0x2c   : > { %850 = vst.msk [vmem:[#allocation2 + $0x9c] sm:$0xf] %vm373_vm0, %v5885_v10  ;;  %1888 = vmatpush.bf16.msrb.mxu2 %v5402_v32  ;;  %2202 = vmatpush.bf16.msrb.mxu3 %v5422_v33  ;;  %v5992_v49 = vld [vmem:[%s5854_s9 + $0x74] sm:$0xf]  ;;  %v502_v52 = vshrl.u32 %v5885_v10, 16  ;;  %v496_v57 = vrot.slane %v494_v51, 7 }
  0x2d   : > { %861 = vst.msk [vmem:[#allocation2 + $0xc8] sm:$0xf] %vm373_vm0, %v5892_v11  ;;  %v5359_v50 = vld [vmem:[#allocation3] sm:$0xff]  ;;  %v6004_v55 = vld [vmem:[%s5854_s9 + $0x18] sm:$0xf]  ;;  %v505_v59 = vshll.u32 %v5885_v10, 16 }
  0x2e   : > { %862 = vst.msk [vmem:[#allocation2 + $0xcc] sm:$0xf] %vm373_vm0, %v5895_v12  ;;  %v5399_v53 = vld [vmem:[#allocation3 + $0x40] sm:$0xff]  ;;  %v6007_v56 = vld [vmem:[%s5854_s9 + $0x1c] sm:$0xf]  ;;  %v504_v58 = vrot.slane %v502_v52, 7 }
  0x2f   : > { %v5369_v14 = vld [vmem:[#allocation2 + $0xc0] sm:$0xff]  ;;  %869 = vst.msk [vmem:[#allocation2 + $0xe8] sm:$0xf] %vm373_vm0, %v5902_v15  ;;  %1606 = vmatpush.bf16.msrb.mxu1 %v5361_v34  ;;  %v5419_v54 = vld [vmem:[#allocation3 + $0x60] sm:$0xff]  ;;  %v518_v60 = vshrl.u32 %v5918_v19, 16  ;;  %v497_v61 = vshll.u32 %v5878_v8, 16 }
  0x30   : > { %4557 = vmatmul.msk.bf16.vlgmr.msra.gmra.mxu1 %vm1311_vm1, %v5369_v14  ;;  %870 = vst.msk [vmem:[#allocation2 + $0xec] sm:$0xf] %vm373_vm0, %v5905_v17  ;;  %1889 = vmatpush.bf16.msrb.mxu2 %v5401_v37  ;;  %v510_v62 = vshrl.u32 %v5915_v18, 16  ;;  %v6018_v0 = vld [vmem:[%s5854_s9 + $0x20] sm:$0xf]  ;;  %v500_v1 = vrot.slane %v496_v57, 4  ;;  %v507_v9 = vor.u32 %v505_v59, %v504_v58 }
  0x31   : > { %v5373_v16 = vld [vmem:[#allocation2 + $0xe0] sm:$0xff]  ;;  %851 = vst.msk [vmem:[#allocation2 + $0xa0] sm:$0xf] %vm373_vm0, %v5915_v18  ;;  %2203 = vmatpush.bf16.msrb.mxu3 %v5421_v40  ;;  %v884_v2 = vrot.slane %v494_v51, 4  ;;  %v513_v10 = vshll.u32 %v5915_v18, 16  ;;  %v520_v8 = vrot.slane %v518_v60, 7 }
  0x32   : > { %4561 = vmatmul.msk.bf16.vlgmr.msra.gmra.mxu2 %vm1311_vm1, %v5373_v16  ;;  %852 = vst.msk [vmem:[#allocation2 + $0xa4] sm:$0xf] %vm373_vm0, %v5918_v19  ;;  %v6021_v6 = vld [vmem:[%s5854_s9 + $0x24] sm:$0xf]  ;;  %v391_v13 = vld [vmem:[#allocation2 + $0x8] sm:$0x1] }
  0x33   : > { %863 = vst.msk [vmem:[#allocation2 + $0xd0] sm:$0xf] %vm373_vm0, %v5925_v20  ;;  %v5364_v24 = vld [vmem:[#allocation2 + $0x98] sm:$0xff]  ;;  %1607 = vmatpush.bf16.msrb.mxu1 %v5360_v42  ;;  %v521_v14 = vshll.u32 %v5918_v19, 16  ;;  %vm389_vm3 = vsmask.f32 256 }
  0x34   : > { %864 = vst.msk [vmem:[#allocation2 + $0xd4] sm:$0xf] %vm373_vm0, %v5928_v21  ;;  %1890 = vmatpush.bf16.msrb.mxu2 %v5400_v44  ;;  %vm491_vm4 = vsmask.f32 4368  ;;  %v885_v16 = vrot.slane %v497_v61, 5  ;;  %vm6030_vm5 = vmand %vm388_vm2, %vm389_vm3  ;;  %v893_v32 = vrot.slane %v510_v62, 4 }
  0x35   : > { %871 = vst.msk [vmem:[#allocation2 + $0xf0] sm:$0xf] %vm373_vm0, %v5935_v22  ;;  %v5370_v25 = vld [vmem:[#allocation2 + $0xc8] sm:$0xff]  ;;  %2204 = vmatpush.bf16.msrb.mxu3 %v5420_v47  ;;  %v894_v33 = vrot.slane %v513_v10, 5  ;;  %v526_v34 = vshrl.u32 %v5957_v29, 16  ;;  %v392_v37 = vsel %vm6030_vm5, 0, %v391_v13  ;;  %vm6039_vm6 = vmor %vm389_vm3, %vm491_vm4 }
  0x36   : > { %872 = vst.msk [vmem:[#allocation2 + $0xf4] sm:$0xf] %vm373_vm0, %v5938_v23  ;;  %v508_v44 = vsel %vm6039_vm6, %v500_v1, %v507_v9  ;;  %vm782_vm7 = vsmask.f32 7938  ;;  %v443_v47 = vld [vmem:[#allocation2 + $0x12c] sm:$0x8] }
  0x37   : > { %v5374_v26 = vld [vmem:[#allocation2 + $0xe8] sm:$0xff]  ;;  %875 = vst.msk [vmem:[#allocation2 + $0x100] sm:$0xf] %vm373_vm0, %v5945_v27  ;;  %1608 = vmatpush.bf16.msrb.mxu1 %v5359_v50  ;;  %vm440_vm8 = vcmask 519171   ;;  %vm441_vm9 = vsmask.f32 7950  ;;  %v499_v50 = vor.u32 %v497_v61, %v496_v57  ;;  %vm6068_vm14 = vmand %vm373_vm0, %vm782_vm7 }
  0x38   : > { %876 = vst.msk [vmem:[#allocation2 + $0x104] sm:$0xf] %vm373_vm0, %v5948_v28  ;;  %1891 = vmatpush.bf16.msrb.mxu2 %v5399_v53  ;;  %vm881_vm10 = vsmask.f32 3328  ;;  %v897_v51 = vrot.slane %v521_v14, 5  ;;  %vm6047_vm11 = vmand %vm440_vm8, %vm441_vm9  ;;  %v5442_v61 = vld [vmem:[#allocation3 + $0x98] sm:$0xff] }
  0x39   : > { %853 = vst.msk [vmem:[#allocation2 + $0xa8] sm:$0xf] %vm373_vm0, %v5957_v29  ;;  %v5365_v43 = vld [vmem:[#allocation2 + $0xa0] sm:$0xff]  ;;  %2205 = vmatpush.bf16.msrb.mxu3 %v5419_v54  ;;  %vm882_vm12 = vsmask.f32 7440  ;;  %v537_v13 = vshll.u32 %v5961_v31, 16  ;;  %2516 = vmatpush.bf16.msrb.mxu0 %v5442_v61  ;;  %vm6090_vm15 = vmand %vm373_vm0, %vm881_vm10 }
  0x3a   : > { %4552 = vmatmul.msk.bf16.gmra.mxu0 %vm1311_vm1, %v5364_v24  ;;  %854 = vst.msk [vmem:[#allocation2 + $0xac] sm:$0xf] %vm373_vm0, %v5961_v31  ;;  %v888_v24 = vrot.slane %v505_v59, 5  ;;  %v394_v53 = vld [vmem:[#allocation2 + $0x10] sm:$0x1]  ;;  %v444_v59 = vsel %vm6047_vm11, 0, %v443_v47  ;;  %vm6056_vm13 = vmor %vm881_vm10, %vm882_vm12 }
  0x3b   : > { %865 = vst.msk [vmem:[#allocation2 + $0xd8] sm:$0xf] %vm373_vm0, %v5968_v35  ;;  %v5371_v45 = vld [vmem:[#allocation2 + $0xd0] sm:$0xff]  ;;  %v5462_v19 = vld [vmem:[#allocation3 + $0xb8] sm:$0xff]  ;;  %vm4004_vm2 = vcmask 261120  }
  0x3c   : > { %866 = vst.msk [vmem:[#allocation2 + $0xdc] sm:$0xf] %vm373_vm0, %v5971_v36  ;;  %v446_v1 = vld [vmem:[#allocation2 + $0x134] sm:$0x8]  ;;  %2830 = vmatpush.bf16.msra.mxu1 %v5462_v19 }
  0x3d   : > { %873 = vst.msk [vmem:[#allocation2 + $0xf8] sm:$0xf] %vm373_vm0, %v5979_v39  ;;  %v5375_v48 = vld [vmem:[#allocation2 + $0xf0] sm:$0xff] }
  0x3e   : > { %874 = vst.msk [vmem:[#allocation2 + $0xfc] sm:$0xf] %vm373_vm0, %v5982_v41 }
  0x3f   : > { %v5377_v38 = vld [vmem:[#allocation2 + $0x100] sm:$0xff]  ;;  %877 = vst.msk [vmem:[#allocation2 + $0x108] sm:$0xf] %vm373_vm0, %v5989_v46 }
  0x40   : > { %4558 = vmatmul.msk.bf16.gmra.mxu1 %vm1311_vm1, %v5370_v25  ;;  %4565 = vmatmul.msk.bf16.vlgmr.msra.gmra.mxu3 %vm1311_vm1, %v5377_v38  ;;  %878 = vst.msk [vmem:[#allocation2 + $0x10c] sm:$0xf] %vm373_vm0, %v5992_v49  ;;  %v890_v25 = vrot.slane %v502_v52, 4  ;;  %v534_v38 = vshrl.u32 %v5961_v31, 16 }
  0x41   : > { %855 = vst.msk [vmem:[#allocation2 + $0xb0] sm:$0xf] %vm373_vm0, %v6004_v55  ;;  %v5366_v40 = vld [vmem:[#allocation2 + $0xa8] sm:$0xff] }
  0x42   : > { %4562 = vmatmul.msk.bf16.gmra.mxu2 %vm1311_vm1, %v5374_v26  ;;  %856 = vst.msk [vmem:[#allocation2 + $0xb4] sm:$0xf] %vm373_vm0, %v6007_v56  ;;  %v512_v26 = vrot.slane %v510_v62, 7  ;;  %v891_v58 = vor.u32 %v890_v25, %v888_v24  ;;  %v536_v9 = vrot.slane %v534_v38, 7  ;;  %v5441_v25 = vld [vmem:[#allocation3 + $0x90] sm:$0xff] }
  0x43   : > { %857 = vst.msk [vmem:[#allocation2 + $0xb8] sm:$0xf] %vm373_vm0, %v6018_v0  ;;  %v5372_v42 = vld [vmem:[#allocation2 + $0xd8] sm:$0xff]  ;;  %2517 = vmatpush.bf16.msrb.mxu0 %v5441_v25 }
  0x44   : > { %858 = vst.msk [vmem:[#allocation2 + $0xbc] sm:$0xf] %vm373_vm0, %v6021_v6  ;;  %v516_v54 = vrot.slane %v512_v26, 4  ;;  %v539_v47 = vor.u32 %v537_v13, %v536_v9  ;;  %v908_v9 = vrot.slane %v534_v38, 4 }
  0x45   : > { %393 = vst [vmem:[#allocation2 + $0x8] sm:$0x1] %v392_v37  ;;  %v397_v37 = vld [vmem:[#allocation2 + $0x18] sm:$0x1] }
  0x46   : > { %787 = vst.msk [vmem:[#allocation2 + $0xc] sm:$0xf] %vm373_vm0, %v508_v44  ;;  %v398_v44 = vsel %vm6030_vm5, 0, %v397_v37  ;;  %v550_v37 = vshrl.u32 %v6007_v56, 16 }
  0x47   : > { %v5378_v63 = vld [vmem:[#allocation2 + $0x108] sm:$0xff]  ;;  %445 = vst [vmem:[#allocation2 + $0x12c] sm:$0x8] %v444_v59 }
  0x48   : > { %399 = vst [vmem:[#allocation2 + $0x18] sm:$0x1] %v398_v44  ;;  %v542_v44 = vshrl.u32 %v6004_v55, 16 }
  0x4a   : > { %4553 = vmatmul.msk.bf16.gmra.mxu0 %vm1311_vm1, %v5365_v43  ;;  %v5376_v43 = vld [vmem:[#allocation2 + $0xf8] sm:$0xff] }
  0x4f   : > { %v792_v31 = vld [vmem:[#allocation2 + $0x18] sm:$0xf] }
  0x50   : > { %4559 = vmatmul.msk.bf16.gmra.mxu1 %vm1311_vm1, %v5371_v45  ;;  %4566 = vmatmul.msk.bf16.gmra.mxu3 %vm1311_vm1, %v5378_v63  ;;  %v523_v45 = vor.u32 %v521_v14, %v520_v8  ;;  %v395_v63 = vsel %vm6030_vm5, 0, %v394_v53  ;;  %v515_v53 = vor.u32 %v513_v10, %v512_v26 }
  0x51   : > { %396 = vst [vmem:[#allocation2 + $0x10] sm:$0x1] %v395_v63 }
  0x52   : > { %4563 = vmatmul.msk.bf16.gmra.mxu2 %vm1311_vm1, %v5375_v48  ;;  %v886_v48 = vor.u32 %v885_v16, %v884_v2  ;;  %v899_v2 = vrot.slane %v518_v60, 4  ;;  %v524_v14 = vsel %vm6039_vm6, %v516_v54, %v523_v45  ;;  %v528_v60 = vrot.slane %v526_v34, 7 }
  0x53   : > { %791 = vst.msk [vmem:[#allocation2 + $0x14] sm:$0xf] %vm373_vm0, %v524_v14  ;;  %v5367_v14 = vld [vmem:[#allocation2 + $0xb0] sm:$0xff] }
  0x54   : > { %v887_v57 = vrot.slane %v886_v48, 4  ;;  %v900_v54 = vor.u32 %v899_v2, %v897_v51  ;;  %v532_v59 = vrot.slane %v528_v60, 4  ;;  %v906_v2 = vrot.slane %v537_v13, 5 }
  0x56   : > { %v889_v16 = vsel %vm6056_vm13, %v887_v57, %v888_v24  ;;  %v892_v24 = vrot.slane %v891_v58, 4  ;;  %v1062_v57 = vld [vmem:[#allocation2 + $0x12c] sm:$0xf]  ;;  %v540_v26 = vsel %vm6039_vm6, %v532_v59, %v539_v47  ;;  %v901_v61 = vrot.slane %v900_v54, 4  ;;  %v400_v47 = vld [vmem:[#allocation2 + $0x20] sm:$0x1] }
  0x57   : > { %1060 = vst.msk [vmem:[#allocation2 + $0x128] sm:$0xf] %vm373_vm0, %v889_v16  ;;  %v5343_v16 = vld [vmem:[#allocation2] sm:$0xff]  ;;  %v552_v54 = vrot.slane %v550_v37, 7 }
  0x58   : > { %v1063_v18 = vsel %vm6090_vm15, %v892_v24, %v1062_v57  ;;  %v788_v10 = vld [vmem:[#allocation2 + $0x10] sm:$0xf]  ;;  %795 = vst.msk [vmem:[#allocation2 + $0x1c] sm:$0xf] %vm373_vm0, %v540_v26 }
  0x59   : > { %1064 = vst [vmem:[#allocation2 + $0x12c] sm:$0xf] %v1063_v18  ;;  %v789_v63 = vsel %vm6068_vm14, %v515_v53, %v788_v10  ;;  %v909_v53 = vor.u32 %v908_v9, %v906_v2 }
  0x5a   : > { %4554 = vmatmul.msk.bf16.gmra.mxu0 %vm1311_vm1, %v5366_v40  ;;  %v784_v40 = vld [vmem:[#allocation2 + $0x8] sm:$0xf]  ;;  %790 = vst [vmem:[#allocation2 + $0x10] sm:$0xf] %v789_v63 }
  0x5b   : > { %v785_v45 = vsel %vm6068_vm14, %v499_v50, %v784_v40  ;;  %v529_v50 = vshll.u32 %v5957_v29, 16  ;;  %v5383_v40 = vld [vmem:[#allocation2 + $0x120] sm:$0xff]  ;;  %v544_v29 = vrot.slane %v542_v44, 7 }
  0x5c   : > { %786 = vst [vmem:[#allocation2 + $0x8] sm:$0xf] %v785_v45 }
  0x5d   : > { %v903_v45 = vrot.slane %v529_v50, 5  ;;  %v548_v26 = vrot.slane %v544_v29, 4 }
  0x60   : > { %4560 = vmatmul.msk.bf16.gmra.mxu1 %vm1311_vm1, %v5372_v42  ;;  %v447_v42 = vsel %vm6047_vm11, 0, %v446_v1  ;;  %v5439_v1 = vld [vmem:[#allocation3 + $0x80] sm:$0xff] }
  0x61   : > { %448 = vst [vmem:[#allocation2 + $0x134] sm:$0x8] %v447_v42 }
  0x62   : > { %4564 = vmatmul.msk.bf16.gmra.mxu2 %vm1311_vm1, %v5376_v43  ;;  %v895_v43 = vor.u32 %v894_v33, %v893_v32  ;;  %v5440_v33 = vld [vmem:[#allocation3 + $0x88] sm:$0xff] }
  0x63   : > { %2518 = vmatpush.bf16.msrb.mxu0 %v5440_v33  ;;  %v5403_v25 = vld [vmem:[#allocation2 + $0x8] sm:$0xff]  ;;  %v553_v33 = vshll.u32 %v6007_v56, 16 }
  0x64   : > { %v896_v48 = vrot.slane %v895_v43, 4  ;;  %v449_v43 = vld [vmem:[#allocation2 + $0x13c] sm:$0x8]  ;;  %4839 = vmatmul.msk.bf16.vlgmr.msrb.gmra.mxu3 %vm1311_vm1, %v5403_v25  ;;  %v558_v25 = vshrl.u32 %v6018_v0, 16 }
  0x65   : > { %v450_v38 = vsel %vm6047_vm11, 0, %v449_v43  ;;  %v555_v59 = vor.u32 %v553_v33, %v552_v54  ;;  %v915_v9 = vrot.slane %v553_v33, 5  ;;  %v452_v43 = vld [vmem:[#allocation2 + $0x144] sm:$0x8] }
  0x66   : > { %v898_v58 = vsel %vm6056_vm13, %v896_v48, %v897_v51  ;;  %v531_v51 = vor.u32 %v529_v50, %v528_v60  ;;  %v902_v60 = vrot.slane %v526_v34, 4  ;;  %v401_v48 = vsel %vm6030_vm5, 0, %v400_v47  ;;  %451 = vst [vmem:[#allocation2 + $0x13c] sm:$0x8] %v450_v38 }
  0x67   : > { %1065 = vst.msk [vmem:[#allocation2 + $0x130] sm:$0xf] %vm373_vm0, %v898_v58  ;;  %2519 = vmatpush.bf16.msrb.mxu0 %v5439_v1  ;;  %v545_v34 = vshll.u32 %v6004_v55, 16  ;;  %v910_v58 = vrot.slane %v909_v53, 4  ;;  %v556_v63 = vsel %vm6039_vm6, %v548_v26, %v555_v59  ;;  %v5404_v1 = vld [vmem:[#allocation2 + $0x10] sm:$0xff]  ;;  %v561_v47 = vshll.u32 %v6018_v0, 16 }
  0x68   : > { %v1066_v42 = vld [vmem:[#allocation2 + $0x134] sm:$0xf]  ;;  %v793_v24 = vsel %vm6068_vm14, %v531_v51, %v792_v31  ;;  %402 = vst [vmem:[#allocation2 + $0x20] sm:$0x1] %v401_v48  ;;  %v904_v50 = vor.u32 %v903_v45, %v902_v60  ;;  %v911_v31 = vrot.slane %v542_v44, 4  ;;  %v569_v53 = vshll.u32 %v6021_v6, 16 }
  0x69   : > { %v1067_v13 = vsel %vm6090_vm15, %v901_v61, %v1066_v42  ;;  %794 = vst [vmem:[#allocation2 + $0x18] sm:$0xf] %v793_v24  ;;  %v547_v18 = vor.u32 %v545_v34, %v544_v29  ;;  %v5384_v42 = vld [vmem:[#allocation2 + $0x128] sm:$0xff]  ;;  %v912_v38 = vrot.slane %v545_v34, 5  ;;  %v560_v24 = vrot.slane %v558_v25, 7 }
  0x6a   : > { %1068 = vst [vmem:[#allocation2 + $0x134] sm:$0xf] %v1067_v13  ;;  %4555 = vmatmul.msk.bf16.gmra.mxu0 %vm1311_vm1, %v5367_v14  ;;  %v905_v57 = vrot.slane %v904_v50, 4  ;;  %v917_v14 = vrot.slane %v550_v37, 4  ;;  %v453_v13 = vsel %vm6047_vm11, 0, %v452_v43  ;;  %v924_v26 = vrot.slane %v569_v53, 5 }
  0x6b   : > { %799 = vst.msk [vmem:[#allocation2 + $0x24] sm:$0xf] %vm373_vm0, %v556_v63  ;;  %v403_v37 = vld [vmem:[#allocation2 + $0x28] sm:$0x1]  ;;  %v913_v54 = vor.u32 %v912_v38, %v911_v31  ;;  %v563_v33 = vor.u32 %v561_v47, %v560_v24  ;;  %v5423_v63 = vld [vmem:[#allocation2 + $0x98] sm:$0xff]  ;;  %v577_v31 = vshll.u32 %v5860_v3, 16 }
  0x6c   : > { %v907_v10 = vsel %vm6056_vm13, %v905_v57, %v906_v2  ;;  %v5368_v2 = vld [vmem:[#allocation2 + $0xb8] sm:$0xff]  ;;  %v918_v60 = vor.u32 %v917_v14, %v915_v9  ;;  %454 = vst [vmem:[#allocation2 + $0x144] sm:$0x8] %v453_v13  ;;  %v404_v45 = vsel %vm6030_vm5, 0, %v403_v37  ;;  %v564_v57 = vrot.slane %v560_v24, 4 }
  0x6d   : > { %1069 = vst.msk [vmem:[#allocation2 + $0x138] sm:$0xf] %vm373_vm0, %v907_v10  ;;  %v1070_v61 = vld [vmem:[#allocation2 + $0x13c] sm:$0xf]  ;;  %v914_v34 = vrot.slane %v913_v54, 4 }
  0x6e   : > { %v1071_v56 = vsel %vm6090_vm15, %v910_v58, %v1070_v61  ;;  %405 = vst [vmem:[#allocation2 + $0x28] sm:$0x1] %v404_v45  ;;  %v919_v44 = vrot.slane %v918_v60, 4  ;;  %v585_v60 = vshll.u32 %v5864_v4, 16 }
  0x6f   : > { %v796_v55 = vld [vmem:[#allocation2 + $0x20] sm:$0xf]  ;;  %1072 = vst [vmem:[#allocation2 + $0x13c] sm:$0xf] %v1071_v56  ;;  %v916_v58 = vsel %vm6056_vm13, %v914_v34, %v915_v9  ;;  %v5345_v56 = vld [vmem:[#allocation2 + $0x10] sm:$0xff] }
  0x70   : > { %4647 = vmatmul.msk.bf16.vlgmr.msrb.gmra.mxu1 %vm1311_vm1, %v5343_v16  ;;  %v797_v51 = vsel %vm6068_vm14, %v547_v18, %v796_v55  ;;  %v5344_v16 = vld [vmem:[#allocation2 + $0x8] sm:$0xff]  ;;  %1073 = vst.msk [vmem:[#allocation2 + $0x140] sm:$0xf] %vm373_vm0, %v916_v58  ;;  %v5405_v10 = vld [vmem:[#allocation2 + $0x18] sm:$0xff]  ;;  %v574_v55 = vshrl.u32 %v5860_v3, 16  ;;  %v933_v34 = vrot.slane %v585_v60, 5 }
  0x71   : > { %798 = vst [vmem:[#allocation2 + $0x20] sm:$0xf] %v797_v51  ;;  %v5385_v51 = vld [vmem:[#allocation2 + $0x130] sm:$0xff]  ;;  %v455_v9 = vld [vmem:[#allocation2 + $0x14c] sm:$0x8]  ;;  %v5346_v58 = vld [vmem:[#allocation2 + $0x18] sm:$0xff] }
  0x72   : > { %4743 = vmatmul.msk.bf16.vlgmr.msrb.gmra.mxu2 %vm1311_vm1, %v5383_v40  ;;  %v566_v40 = vshrl.u32 %v6021_v6, 16  ;;  %v456_v14 = vsel %vm6047_vm11, 0, %v455_v9  ;;  %v576_v13 = vrot.slane %v574_v55, 7  ;;  %v593_v9 = vshll.u32 %v5892_v11, 16 }
  0x73   : > { %v1074_v50 = vld [vmem:[#allocation2 + $0x144] sm:$0xf]  ;;  %457 = vst [vmem:[#allocation2 + $0x14c] sm:$0x8] %v456_v14 }
  0x74   : > { %4840 = vmatmul.msk.bf16.gmra.mxu3 %vm1311_vm1, %v5404_v1  ;;  %v568_v48 = vrot.slane %v566_v40, 7  ;;  %v1075_v59 = vsel %vm6090_vm15, %v919_v44, %v1074_v50  ;;  %v926_v61 = vrot.slane %v566_v40, 4  ;;  %v582_v1 = vshrl.u32 %v5864_v4, 16  ;;  %v406_v40 = vld [vmem:[#allocation2 + $0x30] sm:$0x1] }
  0x75   : > { %v800_v0 = vld [vmem:[#allocation2 + $0x28] sm:$0xf]  ;;  %1076 = vst [vmem:[#allocation2 + $0x144] sm:$0xf] %v1075_v59  ;;  %v407_v43 = vsel %vm6030_vm5, 0, %v406_v40  ;;  %v579_v45 = vor.u32 %v577_v31, %v576_v13  ;;  %v580_v54 = vrot.slane %v576_v13, 4 }
  0x76   : > { %v571_v29 = vor.u32 %v569_v53, %v568_v48  ;;  %v801_v18 = vsel %vm6068_vm14, %v563_v33, %v800_v0  ;;  %v584_v38 = vrot.slane %v582_v1, 7  ;;  %408 = vst [vmem:[#allocation2 + $0x30] sm:$0x1] %v407_v43  ;;  %v935_v50 = vrot.slane %v582_v1, 4  ;;  %v5424_v59 = vld [vmem:[#allocation2 + $0xa0] sm:$0xff] }
  0x77   : > { %802 = vst [vmem:[#allocation2 + $0x28] sm:$0xf] %v801_v18  ;;  %v598_v0 = vshrl.u32 %v5895_v12, 16  ;;  %v458_v18 = vld [vmem:[#allocation2 + $0x154] sm:$0x8] }
  0x78   : > { %v572_v6 = vsel %vm6039_vm6, %v564_v57, %v571_v29  ;;  %v587_v24 = vor.u32 %v585_v60, %v584_v38  ;;  %v5406_v29 = vld [vmem:[#allocation2 + $0x20] sm:$0xff]  ;;  %v590_v57 = vshrl.u32 %v5892_v11, 16 }
  0x79   : > { %803 = vst.msk [vmem:[#allocation2 + $0x2c] sm:$0xf] %vm373_vm0, %v572_v6  ;;  %v5386_v6 = vld [vmem:[#allocation2 + $0x138] sm:$0xff]  ;;  %v600_v14 = vrot.slane %v598_v0, 7 }
  0x7a   : > { %4556 = vmatmul.msk.bf16.gmra.mxu0 %vm1311_vm1, %v5368_v2  ;;  %v920_v2 = vrot.slane %v558_v25, 4  ;;  %v1078_v48 = vld [vmem:[#allocation2 + $0x14c] sm:$0xf]  ;;  %v588_v4 = vsel %vm6039_vm6, %v580_v54, %v587_v24  ;;  %v944_v24 = vrot.slane %v598_v0, 4 }
  0x7b   : > { %807 = vst.msk [vmem:[#allocation2 + $0x34] sm:$0xf] %vm373_vm0, %v588_v4 }
  0x7c   : > { %v5387_v4 = vld [vmem:[#allocation2 + $0x140] sm:$0xff] }
  0x7d   : > { %v804_v3 = vld [vmem:[#allocation2 + $0x30] sm:$0xf] }
  0x7e   : > { %v805_v33 = vsel %vm6068_vm14, %v579_v45, %v804_v3 }
  0x7f   : > { %806 = vst [vmem:[#allocation2 + $0x30] sm:$0xf] %v805_v33  ;;  %v461_v33 = vld [vmem:[#allocation2 + $0x15c] sm:$0x8] }
  0x80   : > { %4648 = vmatmul.msk.bf16.gmra.mxu1 %vm1311_vm1, %v5344_v16  ;;  %v921_v16 = vrot.slane %v561_v47, 5 }
  0x82   : > { %4744 = vmatmul.msk.bf16.gmra.mxu2 %vm1311_vm1, %v5384_v42  ;;  %v927_v42 = vor.u32 %v926_v61, %v924_v26  ;;  %v922_v37 = vor.u32 %v921_v16, %v920_v2  ;;  %v930_v61 = vrot.slane %v577_v31, 5  ;;  %v601_v2 = vshll.u32 %v5895_v12, 16 }
  0x84   : > { %4841 = vmatmul.msk.bf16.gmra.mxu3 %vm1311_vm1, %v5405_v10  ;;  %v928_v25 = vrot.slane %v927_v42, 4  ;;  %v923_v47 = vrot.slane %v922_v37, 4  ;;  %v459_v10 = vsel %vm6047_vm11, 0, %v458_v18  ;;  %v603_v40 = vor.u32 %v601_v2, %v600_v14  ;;  %v5407_v37 = vld [vmem:[#allocation2 + $0x28] sm:$0xff] }
  0x85   : > { %460 = vst [vmem:[#allocation2 + $0x154] sm:$0x8] %v459_v10  ;;  %v942_v45 = vrot.slane %v601_v2, 5  ;;  %v609_v18 = vshll.u32 %v5925_v20, 16 }
  0x86   : > { %v925_v53 = vsel %vm6056_vm13, %v923_v47, %v924_v26  ;;  %v1079_v44 = vsel %vm6090_vm15, %v928_v25, %v1078_v48  ;;  %v929_v26 = vrot.slane %v574_v55, 4  ;;  %v5347_v47 = vld [vmem:[#allocation2 + $0x20] sm:$0xff]  ;;  %v5425_v48 = vld [vmem:[#allocation2 + $0xa8] sm:$0xff] }
  0x87   : > { %1077 = vst.msk [vmem:[#allocation2 + $0x148] sm:$0xf] %vm373_vm0, %v925_v53  ;;  %v606_v53 = vshrl.u32 %v5925_v20, 16 }
  0x88   : > { %1080 = vst [vmem:[#allocation2 + $0x14c] sm:$0xf] %v1079_v44  ;;  %v931_v16 = vor.u32 %v930_v61, %v929_v26  ;;  %v614_v44 = vshrl.u32 %v5928_v21, 16  ;;  %v617_v26 = vshll.u32 %v5928_v21, 16 }
  0x8a   : > { %4935 = vmatmul.msk.bf16.vlgmr.msrb.gmra.mxu0 %vm1311_vm1, %v5423_v63  ;;  %v409_v63 = vld [vmem:[#allocation2 + $0x38] sm:$0x1]  ;;  %v932_v43 = vrot.slane %v931_v16, 4  ;;  %v616_v10 = vrot.slane %v614_v44, 7 }
  0x8b   : > { %v410_v1 = vsel %vm6030_vm5, 0, %v409_v63 }
  0x8c   : > { %411 = vst [vmem:[#allocation2 + $0x38] sm:$0x1] %v410_v1  ;;  %v1082_v13 = vld [vmem:[#allocation2 + $0x154] sm:$0xf]  ;;  %v934_v31 = vsel %vm6056_vm13, %v932_v43, %v933_v34  ;;  %v619_v1 = vor.u32 %v617_v26, %v616_v10 }
  0x8d   : > { %1081 = vst.msk [vmem:[#allocation2 + $0x150] sm:$0xf] %vm373_vm0, %v934_v31  ;;  %v5408_v43 = vld [vmem:[#allocation2 + $0x30] sm:$0xff]  ;;  %v948_v31 = vrot.slane %v609_v18, 5 }
  0x90   : > { %4649 = vmatmul.msk.bf16.gmra.mxu1 %vm1311_vm1, %v5345_v56  ;;  %v936_v56 = vor.u32 %v935_v50, %v933_v34  ;;  %v938_v34 = vrot.slane %v590_v57, 4  ;;  %v939_v50 = vrot.slane %v593_v9, 5 }
  0x92   : > { %4745 = vmatmul.msk.bf16.gmra.mxu2 %vm1311_vm1, %v5385_v51  ;;  %v592_v51 = vrot.slane %v590_v57, 7  ;;  %v937_v55 = vrot.slane %v936_v56, 4  ;;  %v940_v61 = vor.u32 %v939_v50, %v938_v34 }
  0x93   : > { %v808_v11 = vld [vmem:[#allocation2 + $0x38] sm:$0xf] }
  0x94   : > { %4842 = vmatmul.msk.bf16.gmra.mxu3 %vm1311_vm1, %v5406_v29  ;;  %v595_v42 = vor.u32 %v593_v9, %v592_v51  ;;  %v1083_v38 = vsel %vm6090_vm15, %v937_v55, %v1082_v13  ;;  %v596_v60 = vrot.slane %v592_v51, 4  ;;  %v462_v29 = vsel %vm6047_vm11, 0, %v461_v33 }
  0x95   : > { %1084 = vst [vmem:[#allocation2 + $0x154] sm:$0xf] %v1083_v38  ;;  %v941_v14 = vrot.slane %v940_v61, 4  ;;  %v947_v13 = vrot.slane %v606_v53, 4  ;;  %v951_v38 = vrot.slane %v617_v26, 5 }
  0x96   : > { %v604_v12 = vsel %vm6039_vm6, %v596_v60, %v603_v40  ;;  %v809_v25 = vsel %vm6068_vm14, %v595_v42, %v808_v11  ;;  %463 = vst [vmem:[#allocation2 + $0x15c] sm:$0x8] %v462_v29  ;;  %v953_v60 = vrot.slane %v614_v44, 4  ;;  %v415_v29 = vld [vmem:[#allocation2 + $0x48] sm:$0x1] }
  0x97   : > { %810 = vst [vmem:[#allocation2 + $0x38] sm:$0xf] %v809_v25  ;;  %v943_v20 = vsel %vm6056_vm13, %v941_v14, %v942_v45  ;;  %v5426_v25 = vld [vmem:[#allocation2 + $0xb0] sm:$0xff]  ;;  %v949_v44 = vor.u32 %v948_v31, %v947_v13  ;;  %v416_v34 = vsel %vm6030_vm5, 0, %v415_v29 }
  0x98   : > { %811 = vst.msk [vmem:[#allocation2 + $0x3c] sm:$0xf] %vm373_vm0, %v604_v12  ;;  %v5348_v12 = vld [vmem:[#allocation2 + $0x28] sm:$0xff]  ;;  %v954_v33 = vor.u32 %v953_v60, %v951_v38  ;;  %v5427_v60 = vld [vmem:[#allocation2 + $0xb8] sm:$0xff]  ;;  %v418_v29 = vld [vmem:[#allocation2 + $0x50] sm:$0x1] }
  0x99   : > { %1085 = vst.msk [vmem:[#allocation2 + $0x158] sm:$0xf] %vm373_vm0, %v943_v20 }
  0x9a   : > { %4936 = vmatmul.msk.bf16.gmra.mxu0 %vm1311_vm1, %v5424_v59  ;;  %v412_v59 = vld [vmem:[#allocation2 + $0x40] sm:$0x1]  ;;  %417 = vst [vmem:[#allocation2 + $0x48] sm:$0x1] %v416_v34  ;;  %v419_v34 = vsel %vm6030_vm5, 0, %v418_v29  ;;  %v662_v29 = vshrl.u32 %v5905_v17, 16 }
  0x9b   : > { %v413_v0 = vsel %vm6030_vm5, 0, %v412_v59  ;;  %420 = vst [vmem:[#allocation2 + $0x50] sm:$0x1] %v419_v34 }
  0x9c   : > { %414 = vst [vmem:[#allocation2 + $0x40] sm:$0x1] %v413_v0  ;;  %v633_v0 = vshll.u32 %v5971_v36, 16 }
  0x9d   : > { %v1086_v2 = vld [vmem:[#allocation2 + $0x15c] sm:$0xf] }
  0xa0   : > { %4650 = vmatmul.msk.bf16.gmra.mxu1 %vm1311_vm1, %v5346_v58  ;;  %v945_v58 = vor.u32 %v944_v24, %v942_v45  ;;  %v630_v45 = vshrl.u32 %v5971_v36, 16 }
  0xa2   : > { %4746 = vmatmul.msk.bf16.gmra.mxu2 %vm1311_vm1, %v5386_v6  ;;  %v608_v6 = vrot.slane %v606_v53, 7  ;;  %v946_v57 = vrot.slane %v945_v58, 4  ;;  %v625_v58 = vshll.u32 %v5968_v35, 16  ;;  %v632_v59 = vrot.slane %v630_v45, 7 }
  0xa3   : > { %v812_v16 = vld [vmem:[#allocation2 + $0x40] sm:$0xf] }
  0xa4   : > { %4843 = vmatmul.msk.bf16.gmra.mxu3 %vm1311_vm1, %v5407_v37  ;;  %v611_v63 = vor.u32 %v609_v18, %v608_v6  ;;  %v1087_v21 = vsel %vm6090_vm15, %v946_v57, %v1086_v2  ;;  %v612_v55 = vrot.slane %v608_v6, 4  ;;  %v622_v37 = vshrl.u32 %v5968_v35, 16  ;;  %v816_v2 = vld [vmem:[#allocation2 + $0x48] sm:$0xf] }
  0xa5   : > { %1088 = vst [vmem:[#allocation2 + $0x15c] sm:$0xf] %v1087_v21  ;;  %v950_v6 = vrot.slane %v949_v44, 4  ;;  %v955_v18 = vrot.slane %v954_v33, 4  ;;  %v635_v57 = vor.u32 %v633_v0, %v632_v59 }
  0xa6   : > { %v620_v42 = vsel %vm6039_vm6, %v612_v55, %v619_v1  ;;  %v813_v40 = vsel %vm6068_vm14, %v611_v63, %v812_v16  ;;  %v624_v50 = vrot.slane %v622_v37, 7  ;;  %v5409_v55 = vld [vmem:[#allocation2 + $0x38] sm:$0xff]  ;;  %v956_v16 = vrot.slane %v622_v37, 4  ;;  %v5389_v37 = vld [vmem:[#allocation2 + $0x150] sm:$0xff] }
  0xa7   : > { %v6203_v54 = vpop.f32.mrf.mxu0  ;;  %814 = vst [vmem:[#allocation2 + $0x40] sm:$0xf] %v813_v40  ;;  %v952_v35 = vsel %vm6056_vm13, %v950_v6, %v951_v38  ;;  %v960_v40 = vrot.slane %v633_v0, 5  ;;  %v5349_v38 = vld [vmem:[#allocation2 + $0x30] sm:$0xff]  ;;  %v649_v0 = vshll.u32 %v5873_v7, 16 }
  0xa8   : > { %815 = vst.msk [vmem:[#allocation2 + $0x44] sm:$0xf] %vm373_vm0, %v620_v42  ;;  %v627_v26 = vor.u32 %v625_v58, %v624_v50  ;;  %v628_v14 = vrot.slane %v624_v50, 4  ;;  %v957_v42 = vrot.slane %v625_v58, 5  ;;  %v641_v58 = vshll.u32 %v5868_v5, 16 }
  0xa9   : > { %1089 = vst.msk [vmem:[#allocation2 + $0x160] sm:$0xf] %vm373_vm0, %v952_v35 }
  0xaa   : > { %4937 = vmatmul.msk.bf16.gmra.mxu0 %vm1311_vm1, %v5425_v48  ;;  %v5388_v48 = vld [vmem:[#allocation2 + $0x148] sm:$0xff]  ;;  %v636_v20 = vsel %vm6039_vm6, %v628_v14, %v635_v57  ;;  %v817_v21 = vsel %vm6068_vm14, %v627_v26, %v816_v2  ;;  %v958_v44 = vor.u32 %v957_v42, %v956_v16 }
  0xab   : > { %818 = vst [vmem:[#allocation2 + $0x48] sm:$0xf] %v817_v21  ;;  %v820_v21 = vld [vmem:[#allocation2 + $0x50] sm:$0xf] }
  0xac   : > { %819 = vst.msk [vmem:[#allocation2 + $0x4c] sm:$0xf] %vm373_vm0, %v636_v20  ;;  %v959_v6 = vrot.slane %v958_v44, 4 }
  0xad   : > { %v6205_v3 = vpop.f32.mrf.mxu1 }
  0xaf   : > { %v6219_v51 = vpop.f32.mrf.mxu0  ;;  %v5410_v42 = vld [vmem:[#allocation2 + $0x40] sm:$0xff] }
  0xb0   : > { %4651 = vmatmul.msk.bf16.gmra.mxu1 %vm1311_vm1, %v5347_v47 }
  0xb2   : > { %4747 = vmatmul.msk.bf16.gmra.mxu2 %vm1311_vm1, %v5387_v4  ;;  %v464_v4 = vld [vmem:[#allocation2 + $0x164] sm:$0x8] }
  0xb3   : > { %v465_v53 = vsel %vm6047_vm11, 0, %v464_v4 }
  0xb4   : > { %4844 = vmatmul.msk.bf16.gmra.mxu3 %vm1311_vm1, %v5408_v43  ;;  %466 = vst [vmem:[#allocation2 + $0x164] sm:$0x8] %v465_v53  ;;  %v962_v43 = vrot.slane %v630_v45, 4  ;;  %v467_v53 = vld [vmem:[#allocation2 + $0x16c] sm:$0x8] }
  0xb5   : > { %v6217_v56 = vpop.f32.mrf.mxu2  ;;  %v6221_v9 = vpop.f32.mrf.mxu1  ;;  %v468_v45 = vsel %vm6047_vm11, 0, %v467_v53  ;;  %v5350_v53 = vld [vmem:[#allocation2 + $0x38] sm:$0xff] }
  0xb6   : > { %v963_v33 = vor.u32 %v962_v43, %v960_v40  ;;  %469 = vst [vmem:[#allocation2 + $0x16c] sm:$0x8] %v468_v45  ;;  %v5428_v45 = vld [vmem:[#allocation2 + $0xc0] sm:$0xff] }
  0xb7   : > { %v6237_v24 = vpop.f32.mrf.mxu0 }
  0xba   : > { %4938 = vmatmul.msk.bf16.gmra.mxu0 %vm1311_vm1, %v5426_v25  ;;  %v646_v25 = vshrl.u32 %v5873_v7, 16 }
  0xbb   : > { %v1090_v1 = vld [vmem:[#allocation2 + $0x164] sm:$0xf] }
  0xbc   : > { %v1091_v36 = vsel %vm6090_vm15, %v955_v18, %v1090_v1  ;;  %v648_v59 = vrot.slane %v646_v25, 7  ;;  %v964_v18 = vrot.slane %v963_v33, 4  ;;  %v654_v33 = vshrl.u32 %v5902_v15, 16 }
  0xbd   : > { %v6233_v11 = vpop.f32.mrf.mxu2  ;;  %v6239_v47 = vpop.f32.mrf.mxu1  ;;  %1092 = vst [vmem:[#allocation2 + $0x164] sm:$0xf] %v1091_v36  ;;  %v1094_v2 = vld [vmem:[#allocation2 + $0x16c] sm:$0xf] }
  0xbe   : > { %v651_v35 = vor.u32 %v649_v0, %v648_v59  ;;  %v1095_v7 = vsel %vm6090_vm15, %v964_v18, %v1094_v2  ;;  %v664_v2 = vrot.slane %v662_v29, 7 }
  0xbf   : > { %v6253_v61 = vpop.f32.mrf.mxu0  ;;  %1096 = vst [vmem:[#allocation2 + $0x16c] sm:$0xf] %v1095_v7 }
  0xc0   : > { %4652 = vmatmul.msk.bf16.gmra.mxu1 %vm1311_vm1, %v5348_v12  ;;  %v638_v12 = vshrl.u32 %v5868_v5, 16  ;;  %v961_v5 = vsel %vm6056_vm13, %v959_v6, %v960_v40  ;;  %v971_v40 = vrot.slane %v646_v25, 4  ;;  %v421_v6 = vld [vmem:[#allocation2 + $0x58] sm:$0x1] }
  0xc1   : > { %1093 = vst.msk [vmem:[#allocation2 + $0x168] sm:$0xf] %vm373_vm0, %v961_v5  ;;  %v422_v18 = vsel %vm6030_vm5, 0, %v421_v6  ;;  %v665_v5 = vshll.u32 %v5905_v17, 16 }
  0xc2   : > { %4748 = vmatmul.msk.bf16.gmra.mxu2 %vm1311_vm1, %v5388_v48  ;;  %v640_v50 = vrot.slane %v638_v12, 7  ;;  %v965_v43 = vrot.slane %v638_v12, 4  ;;  %v5390_v12 = vld [vmem:[#allocation2 + $0x158] sm:$0xff]  ;;  %423 = vst [vmem:[#allocation2 + $0x58] sm:$0x1] %v422_v18  ;;  %v980_v18 = vrot.slane %v662_v29, 4 }
  0xc3   : > { %v6266_v13 = vpop.f32.mrf.mxu3  ;;  %v978_v6 = vrot.slane %v665_v5, 5 }
  0xc4   : > { %4845 = vmatmul.msk.bf16.gmra.mxu3 %vm1311_vm1, %v5409_v55  ;;  %v643_v1 = vor.u32 %v641_v58, %v640_v50  ;;  %v644_v20 = vrot.slane %v640_v50, 4 }
  0xc5   : > { %v6251_v10 = vpop.f32.mrf.mxu2  ;;  %v6255_v63 = vpop.f32.mrf.mxu1 }
  0xc6   : > { %v652_v55 = vsel %vm6039_vm6, %v644_v20, %v651_v35  ;;  %v821_v16 = vsel %vm6068_vm14, %v643_v1, %v820_v21  ;;  %v656_v1 = vrot.slane %v654_v33, 7  ;;  %v657_v35 = vshll.u32 %v5902_v15, 16 }
  0xc7   : > { %v6273_v48 = vpop.f32.mrf.mxu0  ;;  %822 = vst [vmem:[#allocation2 + $0x50] sm:$0xf] %v821_v16 }
  0xc8   : > { %823 = vst.msk [vmem:[#allocation2 + $0x54] sm:$0xf] %vm373_vm0, %v652_v55  ;;  %v659_v55 = vor.u32 %v657_v35, %v656_v1  ;;  %v660_v16 = vrot.slane %v656_v1, 4  ;;  %v5351_v1 = vld [vmem:[#allocation2 + $0x40] sm:$0xff] }
  0xca   : > { %4939 = vmatmul.msk.bf16.gmra.mxu0 %vm1311_vm1, %v5427_v60  ;;  %v969_v60 = vrot.slane %v649_v0, 5 }
  0xcb   : > { %v6287_v26 = vpop.f32.mrf.mxu3 }
  0xcc   : > { %v972_v0 = vor.u32 %v971_v40, %v969_v60 }
  0xcd   : > { %v6269_v31 = vpop.f32.mrf.mxu2  ;;  %v6275_v4 = vpop.f32.mrf.mxu1 }
  0xce   : > { %v973_v20 = vrot.slane %v972_v0, 4  ;;  %v975_v0 = vrot.slane %v657_v35, 5 }
  0xcf   : > { %v6291_v36 = vpop.f32.mrf.mxu0 }
  0xd0   : > { %4653 = vmatmul.msk.bf16.gmra.mxu1 %vm1311_vm1, %v5349_v38  ;;  %v966_v38 = vrot.slane %v641_v58, 5  ;;  %v470_v58 = vld [vmem:[#allocation2 + $0x174] sm:$0x8] }
  0xd1   : > { %v471_v25 = vsel %vm6047_vm11, 0, %v470_v58 }
  0xd2   : > { %4749 = vmatmul.msk.bf16.gmra.mxu2 %vm1311_vm1, %v5389_v37  ;;  %v967_v59 = vor.u32 %v966_v38, %v965_v43  ;;  %472 = vst [vmem:[#allocation2 + $0x174] sm:$0x8] %v471_v25  ;;  %v5411_v25 = vld [vmem:[#allocation2 + $0x48] sm:$0xff] }
  0xd3   : > { %v6307_v44 = vpop.f32.mrf.mxu3 }
  0xd4   : > { %7423 = vst [vmem:[#allocation13_spill] sm:$0xff] %v6307_v44  ;;  %4846 = vmatmul.msk.bf16.gmra.mxu3 %vm1311_vm1, %v5410_v42  ;;  %v968_v7 = vrot.slane %v967_v59, 4  ;;  %v667_v42 = vor.u32 %v665_v5, %v664_v2  ;;  %v974_v59 = vrot.slane %v654_v33, 4  ;;  %v5429_v2 = vld [vmem:[#allocation2 + $0xc8] sm:$0xff]  ;;  %v981_v5 = vor.u32 %v980_v18, %v978_v6 }
  0xd5   : > { %v6289_v57 = vpop.f32.mrf.mxu2  ;;  %v6293_v14 = vpop.f32.mrf.mxu1 }
  0xd6   : > { %v970_v15 = vsel %vm6056_vm13, %v968_v7, %v969_v60  ;;  %v670_v7 = vshrl.u32 %v5935_v22, 16  ;;  %v976_v35 = vor.u32 %v975_v0, %v974_v59  ;;  %v982_v0 = vrot.slane %v981_v5, 4 }
  0xd7   : > { %v6311_v34 = vpop.f32.mrf.mxu0  ;;  %1097 = vst.msk [vmem:[#allocation2 + $0x170] sm:$0xf] %vm373_vm0, %v970_v15  ;;  %v424_v15 = vld [vmem:[#allocation2 + $0x60] sm:$0x1] }
  0xd8   : > { %v977_v59 = vrot.slane %v976_v35, 4 }
  0xd9   : > { %v1098_v40 = vld [vmem:[#allocation2 + $0x174] sm:$0xf] }
  0xda   : > { %4940 = vmatmul.msk.bf16.gmra.mxu0 %vm1311_vm1, %v5428_v45  ;;  %v1099_v17 = vsel %vm6090_vm15, %v973_v20, %v1098_v40  ;;  %v824_v45 = vld [vmem:[#allocation2 + $0x58] sm:$0xf]  ;;  %v678_v20 = vshrl.u32 %v5938_v23, 16  ;;  %v473_v40 = vld [vmem:[#allocation2 + $0x17c] sm:$0x8] }
  0xdb   : > { %1100 = vst [vmem:[#allocation2 + $0x174] sm:$0xf] %v1099_v17  ;;  %v825_v58 = vsel %vm6068_vm14, %v659_v55, %v824_v45  ;;  %v5391_v55 = vld [vmem:[#allocation2 + $0x160] sm:$0xff]  ;;  %v474_v29 = vsel %vm6047_vm11, 0, %v473_v40  ;;  %v425_v17 = vsel %vm6030_vm5, 0, %v424_v15  ;;  %v672_v45 = vrot.slane %v670_v7, 7 }
  0xdc   : > { %826 = vst [vmem:[#allocation2 + $0x58] sm:$0xf] %v825_v58  ;;  %v681_v58 = vshll.u32 %v5938_v23, 16  ;;  %v979_v23 = vsel %vm6056_vm13, %v977_v59, %v978_v6  ;;  %v989_v6 = vrot.slane %v678_v20, 4 }
  0xdd   : > { %v6305_v37 = vpop.f32.mrf.mxu2  ;;  %v6313_v50 = vpop.f32.mrf.mxu1  ;;  %475 = vst [vmem:[#allocation2 + $0x17c] sm:$0x8] %v474_v29 }
  0xde   : > { %426 = vst [vmem:[#allocation2 + $0x60] sm:$0x1] %v425_v17  ;;  %v5412_v17 = vld [vmem:[#allocation2 + $0x50] sm:$0xff] }
  0xdf   : > { %v6327_v43 = vpop.f32.mrf.mxu0  ;;  %1101 = vst.msk [vmem:[#allocation2 + $0x178] sm:$0xf] %vm373_vm0, %v979_v23  ;;  %v476_v23 = vld [vmem:[#allocation2 + $0x184] sm:$0x8] }
  0xe0   : > { %4654 = vmatmul.msk.bf16.gmra.mxu1 %vm1311_vm1, %v5350_v53  ;;  %v6331_v53 = vpop.f32.mrf.mxu3 }
  0xe1   : > { %7424 = vst [vmem:[#allocation14_spill] sm:$0xff] %v6331_v53 }
  0xe2   : > { %4750 = vmatmul.msk.bf16.gmra.mxu2 %vm1311_vm1, %v5390_v12  ;;  %v668_v12 = vsel %vm6039_vm6, %v660_v16, %v667_v42 }
  0xe3   : > { %827 = vst.msk [vmem:[#allocation2 + $0x5c] sm:$0xf] %vm373_vm0, %v668_v12  ;;  %v673_v12 = vshll.u32 %v5935_v22, 16 }
  0xe4   : > { %4847 = vmatmul.msk.bf16.gmra.mxu3 %vm1311_vm1, %v5411_v25  ;;  %v1102_v22 = vld [vmem:[#allocation2 + $0x17c] sm:$0xf] }
  0xe5   : > { %v6325_v21 = vpop.f32.mrf.mxu2  ;;  %v6329_v38 = vpop.f32.mrf.mxu1  ;;  %v828_v35 = vld [vmem:[#allocation2 + $0x60] sm:$0xf] }
  0xe7   : > { %v6347_v16 = vpop.f32.mrf.mxu0 }
  0xe8   : > { %v2207_v25 = vpop.f32.mrf.mxu3 }
  0xea   : > { %4941 = vmatmul.msk.bf16.gmra.mxu0 %vm1311_vm1, %v5429_v2 }
  0xed   : > { %v6343_v60 = vpop.f32.mrf.mxu2  ;;  %v1610_v42 = vpop.f32.mrf.mxu1 }
  0xee   : > { %v1611_v33 = vadd.f32 %v1610_v42, %v6203_v54  ;;  %v680_v54 = vrot.slane %v678_v20, 7  ;;  %v675_v42 = vor.u32 %v673_v12, %v672_v45  ;;  %v477_v20 = vsel %vm6047_vm11, 0, %v476_v23 }
  0xef   : > { %v6360_v29 = vpop.f32.mrf.mxu0  ;;  %478 = vst [vmem:[#allocation2 + $0x184] sm:$0x8] %v477_v20 }
  0xf0   : > { %4655 = vmatmul.msk.bf16.gmra.mxu1 %vm1311_vm1, %v5351_v1  ;;  %v676_v1 = vrot.slane %v672_v45, 4  ;;  %v683_v40 = vor.u32 %v681_v58, %v680_v54  ;;  %v2209_v5 = vpop.f32.mrf.mxu3  ;;  %v983_v45 = vrot.slane %v670_v7, 4  ;;  %v984_v54 = vrot.slane %v673_v12, 5 }
  0xf2   : > { %4751 = vmatmul.msk.bf16.gmra.mxu2 %vm1311_vm1, %v5391_v55  ;;  %v1103_v55 = vsel %vm6090_vm15, %v982_v0, %v1102_v22  ;;  %v5352_v0 = vld [vmem:[#allocation2 + $0x48] sm:$0xff]  ;;  %v985_v12 = vor.u32 %v984_v54, %v983_v45 }
  0xf3   : > { %1104 = vst [vmem:[#allocation2 + $0x17c] sm:$0xf] %v1103_v55 }
  0xf4   : > { %4848 = vmatmul.msk.bf16.gmra.mxu3 %vm1311_vm1, %v5412_v17  ;;  %v697_v17 = vshll.u32 %v5982_v41, 16 }
  0xf5   : > { %v1893_v18 = vpop.f32.mrf.mxu2  ;;  %v1612_v15 = vpop.f32.mrf.mxu1 }
  0xf6   : > { %v1973_v2 = vadd.f32 %v1893_v18, %v1611_v33  ;;  %v1613_v53 = vadd.f32 %v1612_v15, %v6219_v51  ;;  %v684_v33 = vsel %vm6039_vm6, %v676_v1, %v683_v40  ;;  %v829_v51 = vsel %vm6068_vm14, %v675_v42, %v828_v35  ;;  %v5430_v18 = vld [vmem:[#allocation2 + $0xd0] sm:$0xff]  ;;  %v5392_v42 = vld [vmem:[#allocation2 + $0x168] sm:$0xff] }
  0xf7   : > { %830 = vst [vmem:[#allocation2 + $0x60] sm:$0xf] %v829_v51  ;;  %v694_v15 = vshrl.u32 %v5982_v41, 16  ;;  %v6377_v1 = vpop.f32.mrf.mxu0  ;;  %v427_v35 = vld [vmem:[#allocation2 + $0x68] sm:$0x1] }
  0xf8   : > { %v6363_v44 = vadd.f32 %v2207_v25, %v1973_v2  ;;  %v987_v25 = vrot.slane %v681_v58, 5  ;;  %831 = vst.msk [vmem:[#allocation2 + $0x64] sm:$0xf] %vm373_vm0, %v684_v33  ;;  %v686_v2 = vshrl.u32 %v5979_v39, 16  ;;  %v2212_v45 = vpop.f32.mrf.mxu3 }
  0xf9   : > { %v696_v51 = vrot.slane %v694_v15, 7 }
  0xfa   : > { %v990_v58 = vor.u32 %v989_v6, %v987_v25  ;;  %4942 = vmatmul.msk.bf16.gmra.mxu0 %vm1311_vm1, %v5430_v18  ;;  %v688_v33 = vrot.slane %v686_v2, 7 }
  0xfc   : > { %v991_v54 = vrot.slane %v990_v58, 4 }
  0xfd   : > { %v1895_v59 = vpop.f32.mrf.mxu2  ;;  %v1615_v40 = vpop.f32.mrf.mxu1 }
  0xfe   : > { %v1974_v22 = vadd.f32 %v1895_v59, %v1613_v53  ;;  %v1616_v7 = vadd.f32 %v1615_v40, %v6237_v24  ;;  %v428_v53 = vsel %vm6030_vm5, 0, %v427_v35  ;;  %v689_v24 = vshll.u32 %v5979_v39, 16  ;;  %v1106_v39 = vld [vmem:[#allocation2 + $0x184] sm:$0xf] }
  0xff   : > { %429 = vst [vmem:[#allocation2 + $0x68] sm:$0x1] %v428_v53  ;;  %v6392_v40 = vpop.f32.mrf.mxu0  ;;  %v5413_v53 = vld [vmem:[#allocation2 + $0x58] sm:$0xff] }
 0x100   : > { %v6383_v55 = vadd.f32 %v2209_v5, %v1974_v22  ;;  %4656 = vmatmul.msk.bf16.gmra.mxu1 %vm1311_vm1, %v5352_v0  ;;  %v986_v5 = vrot.slane %v985_v12, 4  ;;  %v691_v59 = vor.u32 %v689_v24, %v688_v33  ;;  %v692_v0 = vrot.slane %v688_v33, 4  ;;  %v2214_v58 = vpop.f32.mrf.mxu3 }
 0x101   : > { %v699_v22 = vor.u32 %v697_v17, %v696_v51  ;;  %v992_v33 = vrot.slane %v686_v2, 4  ;;  %v993_v51 = vrot.slane %v689_v24, 5 }
 0x102   : > { %4752 = vmatmul.msk.bf16.gmra.mxu2 %vm1311_vm1, %v5392_v42  ;;  %v988_v41 = vsel %vm6056_vm13, %v986_v5, %v987_v25  ;;  %v1107_v42 = vsel %vm6090_vm15, %v991_v54, %v1106_v39  ;;  %v998_v25 = vrot.slane %v694_v15, 4  ;;  %v5353_v54 = vld [vmem:[#allocation2 + $0x50] sm:$0xff] }
 0x103   : > { %1105 = vst.msk [vmem:[#allocation2 + $0x180] sm:$0xf] %vm373_vm0, %v988_v41  ;;  %v5393_v41 = vld [vmem:[#allocation2 + $0x170] sm:$0xff]  ;;  %v994_v24 = vor.u32 %v993_v51, %v992_v33 }
 0x104   : > { %1108 = vst [vmem:[#allocation2 + $0x184] sm:$0xf] %v1107_v42  ;;  %4849 = vmatmul.msk.bf16.gmra.mxu3 %vm1311_vm1, %v5413_v53  ;;  %v713_v53 = vshll.u32 %v5948_v28, 16 }
 0x105   : > { %v1898_v6 = vpop.f32.mrf.mxu2  ;;  %v1617_v23 = vpop.f32.mrf.mxu1 }
 0x106   : > { %v1975_v18 = vadd.f32 %v1898_v6, %v1616_v7  ;;  %v1618_v20 = vadd.f32 %v1617_v23, %v6253_v61  ;;  %v832_v12 = vld [vmem:[#allocation2 + $0x68] sm:$0xf]  ;;  %v700_v7 = vsel %vm6039_vm6, %v692_v0, %v699_v22  ;;  %v5431_v6 = vld [vmem:[#allocation2 + $0xd8] sm:$0xff]  ;;  %v710_v23 = vshrl.u32 %v5948_v28, 16 }
 0x107   : > { %v833_v61 = vsel %vm6068_vm14, %v691_v59, %v832_v12  ;;  %835 = vst.msk [vmem:[#allocation2 + $0x6c] sm:$0xf] %vm373_vm0, %v700_v7  ;;  %v2521_v22 = vpop.f32.mrf.mxu0  ;;  %v479_v59 = vld [vmem:[#allocation2 + $0x18c] sm:$0x8]  ;;  %v705_v7 = vshll.u32 %v5945_v27, 16 }
 0x108   : > { %v6395_v35 = vadd.f32 %v2212_v45, %v1975_v18  ;;  %834 = vst [vmem:[#allocation2 + $0x68] sm:$0xf] %v833_v61  ;;  %v996_v45 = vrot.slane %v697_v17, 5  ;;  %v702_v18 = vshrl.u32 %v5945_v27, 16  ;;  %v6411_v2 = vadd.f32 %v2521_v22, %v6363_v44  ;;  %v2217_v33 = vpop.f32.mrf.mxu3 }
 0x109   : > { %v480_v15 = vsel %vm6047_vm11, 0, %v479_v59  ;;  %v712_v61 = vrot.slane %v710_v23, 7 }
 0x10a   : > { %v999_v17 = vor.u32 %v998_v25, %v996_v45  ;;  %481 = vst [vmem:[#allocation2 + $0x18c] sm:$0x8] %v480_v15  ;;  %4943 = vmatmul.msk.bf16.gmra.mxu0 %vm1311_vm1, %v5431_v6  ;;  %v704_v44 = vrot.slane %v702_v18, 7 }
 0x10c   : > { %v1000_v51 = vrot.slane %v999_v17, 4 }
 0x10d   : > { %v1900_v5 = vpop.f32.mrf.mxu2  ;;  %v1620_v0 = vpop.f32.mrf.mxu1 }
 0x10e   : > { %v1976_v39 = vadd.f32 %v1900_v5, %v1618_v20  ;;  %v1621_v42 = vadd.f32 %v1620_v0, %v6273_v48  ;;  %v430_v20 = vld [vmem:[#allocation2 + $0x70] sm:$0x1]  ;;  %v707_v5 = vor.u32 %v705_v7, %v704_v44 }
 0x10f   : > { %v431_v48 = vsel %vm6030_vm5, 0, %v430_v20  ;;  %v2523_v22 = vpop.f32.mrf.mxu0  ;;  %v5414_v20 = vld [vmem:[#allocation2 + $0x60] sm:$0xff] }
 0x110   : > { %v6416_v12 = vadd.f32 %v2214_v58, %v1976_v39  ;;  %4657 = vmatmul.msk.bf16.gmra.mxu1 %vm1311_vm1, %v5353_v54  ;;  %432 = vst [vmem:[#allocation2 + $0x70] sm:$0x1] %v431_v48  ;;  %v995_v58 = vrot.slane %v994_v24, 4  ;;  %v708_v54 = vrot.slane %v704_v44, 4  ;;  %v715_v39 = vor.u32 %v713_v53, %v712_v61 }
 0x111   : > { %v6427_v27 = vadd.f32 %v2523_v22, %v6383_v55  ;;  %v1110_v15 = vld [vmem:[#allocation2 + $0x18c] sm:$0xf]  ;;  %v1001_v48 = vrot.slane %v702_v18, 4  ;;  %v1002_v44 = vrot.slane %v705_v7, 5  ;;  %v1005_v61 = vrot.slane %v713_v53, 5  ;;  %v5394_v22 = vld [vmem:[#allocation2 + $0x178] sm:$0xff] }
 0x112   : > { %4753 = vmatmul.msk.bf16.gmra.mxu2 %vm1311_vm1, %v5393_v41  ;;  %v997_v41 = vsel %vm6056_vm13, %v995_v58, %v996_v45  ;;  %v1111_v24 = vsel %vm6090_vm15, %v1000_v51, %v1110_v15  ;;  %v1007_v45 = vrot.slane %v710_v23, 4  ;;  %v5354_v58 = vld [vmem:[#allocation2 + $0x58] sm:$0xff]  ;;  %v5432_v51 = vld [vmem:[#allocation2 + $0xe0] sm:$0xff] }
 0x113   : > { %1109 = vst.msk [vmem:[#allocation2 + $0x188] sm:$0xf] %vm373_vm0, %v997_v41  ;;  %v1003_v7 = vor.u32 %v1002_v44, %v1001_v48 }
 0x114   : > { %1112 = vst [vmem:[#allocation2 + $0x18c] sm:$0xf] %v1111_v24  ;;  %4850 = vmatmul.msk.bf16.gmra.mxu3 %vm1311_vm1, %v5414_v20  ;;  %v1008_v53 = vor.u32 %v1007_v45, %v1005_v61  ;;  %v721_v24 = vshll.u32 %v5989_v46, 16 }
 0x115   : > { %v1903_v25 = vpop.f32.mrf.mxu2  ;;  %v1622_v0 = vpop.f32.mrf.mxu1 }
 0x116   : > { %v1977_v6 = vadd.f32 %v1903_v25, %v1621_v42  ;;  %v1623_v59 = vadd.f32 %v1622_v0, %v6291_v36  ;;  %v2219_v42 = vpop.f32.mrf.mxu3  ;;  %v716_v36 = vsel %vm6039_vm6, %v708_v54, %v715_v39  ;;  %v718_v25 = vshrl.u32 %v5989_v46, 16 }
 0x117   : > { %v836_v17 = vld [vmem:[#allocation2 + $0x70] sm:$0xf]  ;;  %839 = vst.msk [vmem:[#allocation2 + $0x74] sm:$0xf] %vm373_vm0, %v716_v36  ;;  %v2526_v39 = vpop.f32.mrf.mxu0  ;;  %v729_v36 = vshll.u32 %v5992_v49, 16  ;;  %v1009_v20 = vrot.slane %v1008_v53, 4 }
 0x118   : > { %v6429_v28 = vadd.f32 %v2217_v33, %v1977_v6  ;;  %v837_v55 = vsel %vm6068_vm14, %v707_v5, %v836_v17  ;;  %v726_v6 = vshrl.u32 %v5992_v49, 16  ;;  %v482_v5 = vld [vmem:[#allocation2 + $0x194] sm:$0x8]  ;;  %v6445_v18 = vadd.f32 %v2526_v39, %v6395_v35 }
 0x119   : > { %838 = vst [vmem:[#allocation2 + $0x70] sm:$0xf] %v837_v55  ;;  %v483_v23 = vsel %vm6047_vm11, 0, %v482_v5  ;;  %v720_v35 = vrot.slane %v718_v25, 7  ;;  %v1010_v53 = vrot.slane %v718_v25, 4 }
 0x11a   : > { %484 = vst [vmem:[#allocation2 + $0x194] sm:$0x8] %v483_v23  ;;  %4944 = vmatmul.msk.bf16.gmra.mxu0 %vm1311_vm1, %v5432_v51  ;;  %v728_v17 = vrot.slane %v726_v6, 7 }
 0x11b   : > { %v723_v44 = vor.u32 %v721_v24, %v720_v35  ;;  %v724_v45 = vrot.slane %v720_v35, 4 }
 0x11d   : > { %v1905_v33 = vpop.f32.mrf.mxu2  ;;  %v1625_v54 = vpop.f32.mrf.mxu1 }
 0x11e   : > { %v1978_v0 = vadd.f32 %v1905_v33, %v1623_v59  ;;  %v1626_v15 = vadd.f32 %v1625_v54, %v6311_v34  ;;  %v433_v59 = vld [vmem:[#allocation2 + $0x78] sm:$0x1]  ;;  %v2222_v55 = vpop.f32.mrf.mxu3  ;;  %v731_v33 = vor.u32 %v729_v36, %v728_v17  ;;  %v5355_v17 = vld [vmem:[#allocation2 + $0x60] sm:$0xff] }
 0x11f   : > { %v434_v34 = vsel %vm6030_vm5, 0, %v433_v59  ;;  %v1011_v59 = vrot.slane %v721_v24, 5 }
 0x120   : > { %v6450_v41 = vadd.f32 %v2219_v42, %v1978_v0  ;;  %4658 = vmatmul.msk.bf16.gmra.mxu1 %vm1311_vm1, %v5354_v58  ;;  %435 = vst [vmem:[#allocation2 + $0x78] sm:$0x1] %v434_v34  ;;  %v1004_v42 = vrot.slane %v1003_v7, 4  ;;  %v2528_v0 = vpop.f32.mrf.mxu0  ;;  %v5415_v7 = vld [vmem:[#allocation2 + $0x68] sm:$0xff]  ;;  %v1014_v34 = vrot.slane %v729_v36, 5 }
 0x121   : > { %v6461_v46 = vadd.f32 %v2528_v0, %v6416_v12  ;;  %v1114_v39 = vld [vmem:[#allocation2 + $0x194] sm:$0xf]  ;;  %v6490_v0 = vld [vmem:[%s5854_s9 + $0x78] sm:$0xf] }
 0x122   : > { %4754 = vmatmul.msk.bf16.gmra.mxu2 %vm1311_vm1, %v5394_v22  ;;  %v1006_v22 = vsel %vm6056_vm13, %v1004_v42, %v1005_v61  ;;  %v1115_v5 = vsel %vm6090_vm15, %v1009_v20, %v1114_v39  ;;  %v1016_v61 = vrot.slane %v726_v6, 4  ;;  %v1012_v6 = vor.u32 %v1011_v59, %v1010_v53  ;;  %879 = vst.msk [vmem:[#allocation2 + $0x110] sm:$0xf] %vm373_vm0, %v6490_v0 }
 0x123   : > { %1113 = vst.msk [vmem:[#allocation2 + $0x190] sm:$0xf] %vm373_vm0, %v1006_v22  ;;  %v737_v53 = vshll.u32 %v6490_v0, 16 }
 0x124   : > { %1116 = vst [vmem:[#allocation2 + $0x194] sm:$0xf] %v1115_v5  ;;  %4851 = vmatmul.msk.bf16.gmra.mxu3 %vm1311_vm1, %v5415_v7  ;;  %v1017_v24 = vor.u32 %v1016_v61, %v1014_v34  ;;  %v1013_v39 = vrot.slane %v1012_v6, 4  ;;  %v734_v5 = vshrl.u32 %v6490_v0, 16  ;;  %v5416_v6 = vld [vmem:[#allocation2 + $0x70] sm:$0xff] }
 0x125   : > { %v1908_v48 = vpop.f32.mrf.mxu2  ;;  %v1627_v51 = vpop.f32.mrf.mxu1 }
 0x126   : > { %v1979_v58 = vadd.f32 %v1908_v48, %v1626_v15  ;;  %v1628_v54 = vadd.f32 %v1627_v51, %v6327_v43  ;;  %v2224_v15 = vpop.f32.mrf.mxu3  ;;  %v732_v43 = vsel %vm6039_vm6, %v724_v45, %v731_v33  ;;  %v485_v51 = vld [vmem:[#allocation2 + $0x19c] sm:$0x8]  ;;  %v436_v33 = vld [vmem:[#allocation2 + $0x80] sm:$0x1]  ;;  %v1018_v22 = vrot.slane %v1017_v24, 4 }
 0x127   : > { %v840_v23 = vld [vmem:[#allocation2 + $0x78] sm:$0xf]  ;;  %843 = vst.msk [vmem:[#allocation2 + $0x7c] sm:$0xf] %vm373_vm0, %v732_v43  ;;  %v486_v25 = vsel %vm6047_vm11, 0, %v485_v51  ;;  %v736_v7 = vrot.slane %v734_v5, 7 }
 0x128   : > { %v6463_v49 = vadd.f32 %v2222_v55, %v1979_v58  ;;  %v841_v12 = vsel %vm6068_vm14, %v723_v44, %v840_v23  ;;  %v5433_v55 = vld [vmem:[#allocation2 + $0xe8] sm:$0xff]  ;;  %v2531_v48 = vpop.f32.mrf.mxu0  ;;  %v5395_v58 = vld [vmem:[#allocation2 + $0x180] sm:$0xff]  ;;  %487 = vst [vmem:[#allocation2 + $0x19c] sm:$0x8] %v486_v25 }
 0x129   : > { %842 = vst [vmem:[#allocation2 + $0x78] sm:$0xf] %v841_v12  ;;  %v6477_v44 = vadd.f32 %v2531_v48, %v6429_v28 }
 0x12a   : > { %4945 = vmatmul.msk.bf16.gmra.mxu0 %vm1311_vm1, %v5433_v55 }
 0x12d   : > { %v1910_v35 = vpop.f32.mrf.mxu2  ;;  %v1630_v20 = vpop.f32.mrf.mxu1 }
 0x12e   : > { %v1980_v42 = vadd.f32 %v1910_v35, %v1628_v54  ;;  %v1631_v45 = vadd.f32 %v1630_v20, %v6347_v16  ;;  %v437_v16 = vsel %vm6030_vm5, 0, %v436_v33  ;;  %v2227_v28 = vpop.f32.mrf.mxu3  ;;  %v6493_v54 = vld [vmem:[%s5854_s9 + $0x7c] sm:$0xf]  ;;  %v1015_v20 = vsel %vm6056_vm13, %v1013_v39, %v1014_v34  ;;  %v5356_v33 = vld [vmem:[#allocation2 + $0x68] sm:$0xff] }
 0x12f   : > { %438 = vst [vmem:[#allocation2 + $0x80] sm:$0x1] %v437_v16  ;;  %v742_v23 = vshrl.u32 %v6493_v54, 16  ;;  %v745_v55 = vshll.u32 %v6493_v54, 16  ;;  %v5434_v16 = vld [vmem:[#allocation2 + $0xf0] sm:$0xff] }
 0x130   : > { %v6482_v36 = vadd.f32 %v2224_v15, %v1980_v42  ;;  %4659 = vmatmul.msk.bf16.gmra.mxu1 %vm1311_vm1, %v5355_v17  ;;  %880 = vst.msk [vmem:[#allocation2 + $0x114] sm:$0xf] %vm373_vm0, %v6493_v54  ;;  %v2533_v12 = vpop.f32.mrf.mxu0  ;;  %v1118_v17 = vld [vmem:[#allocation2 + $0x19c] sm:$0xf] }
 0x131   : > { %v744_v59 = vrot.slane %v742_v23, 7  ;;  %v6508_v35 = vadd.f32 %v2533_v12, %v6450_v41  ;;  %v1119_v48 = vsel %vm6090_vm15, %v1018_v22, %v1118_v17  ;;  %1117 = vst.msk [vmem:[#allocation2 + $0x198] sm:$0xf] %vm373_vm0, %v1015_v20  ;;  %v5482_v12 = vld [vmem:[#allocation3 + $0xd8] sm:$0xff]  ;;  %v1025_v52 = vrot.slane %v742_v23, 4 }
 0x132   : > { %4755 = vmatmul.msk.bf16.gmra.mxu2 %vm1311_vm1, %v5395_v58  ;;  %v739_v58 = vor.u32 %v737_v53, %v736_v7  ;;  %1120 = vst [vmem:[#allocation2 + $0x19c] sm:$0xf] %v1119_v48  ;;  %v5496_v23 = vld [vmem:[#allocation2 + $0x108] sm:$0xff] }
 0x133   : > { %v747_v41 = vor.u32 %v745_v55, %v744_v59  ;;  %3145 = vmatpush.bf16.msra.mxu2 %v5482_v12  ;;  %v5502_v59 = vld [vmem:[#allocation3 + $0xf8] sm:$0xff]  ;;  %v5499_v12 = vld [vmem:[#allocation3 + $0xe0] sm:$0xff] }
 0x134   : > { %4852 = vmatmul.msk.bf16.gmra.mxu3 %vm1311_vm1, %v5416_v6 }
 0x135   : > { %v1913_v15 = vpop.f32.mrf.mxu2  ;;  %v1632_v43 = vpop.f32.mrf.mxu1  ;;  %3460 = vmatpush.bf16.msra.mxu3 %v5502_v59 }
 0x136   : > { %v1981_v30 = vadd.f32 %v1913_v15, %v1631_v45  ;;  %v1633_v61 = vadd.f32 %v1632_v43, %v6360_v29  ;;  %v740_v29 = vrot.slane %v736_v7, 4  ;;  %v844_v51 = vld [vmem:[#allocation2 + $0x80] sm:$0xf]  ;;  %v2229_v45 = vpop.f32.mrf.mxu3  ;;  %v5396_v15 = vld [vmem:[#allocation2 + $0x188] sm:$0xff] }
 0x137   : > { %v845_v25 = vsel %vm6068_vm14, %v739_v58, %v844_v51 }
 0x138   : > { %v6511_v42 = vadd.f32 %v2227_v28, %v1981_v30  ;;  %v748_v34 = vsel %vm6039_vm6, %v740_v29, %v747_v41  ;;  %846 = vst [vmem:[#allocation2 + $0x80] sm:$0xf] %v845_v25  ;;  %v2536_v22 = vpop.f32.mrf.mxu0  ;;  %v5501_v41 = vld [vmem:[#allocation3 + $0xf0] sm:$0xff]  ;;  %v5480_v25 = vld [vmem:[#allocation3 + $0xc8] sm:$0xff] }
 0x139   : > { %847 = vst.msk [vmem:[#allocation2 + $0x84] sm:$0xf] %vm373_vm0, %v748_v34  ;;  %v6529_v43 = vadd.f32 %v2536_v22, %v6463_v49  ;;  %v5481_v49 = vld [vmem:[#allocation3 + $0xd0] sm:$0xff]  ;;  %3461 = vmatpush.bf16.msra.mxu3 %v5501_v41  ;;  %v5417_v34 = vld [vmem:[#allocation2 + $0x78] sm:$0xff] }
 0x13a   : > { %4946 = vmatmul.msk.bf16.gmra.mxu0 %vm1311_vm1, %v5434_v16  ;;  %3146 = vmatpush.bf16.msra.mxu2 %v5481_v49 }
 0x13d   : > { %v1915_v24 = vpop.f32.mrf.mxu2  ;;  %v1635_v39 = vpop.f32.mrf.mxu1 }
 0x13e   : > { %v1982_v28 = vadd.f32 %v1915_v24, %v1633_v61  ;;  %v1636_v30 = vadd.f32 %v1635_v39, %v6377_v1  ;;  %v2232_v7 = vpop.f32.mrf.mxu3  ;;  %v5461_v1 = vld [vmem:[#allocation3 + $0xb0] sm:$0xff]  ;;  %3147 = vmatpush.bf16.msra.mxu2 %v5480_v25  ;;  %v5500_v24 = vld [vmem:[#allocation3 + $0xe8] sm:$0xff]  ;;  %v5479_v39 = vld [vmem:[#allocation3 + $0xc0] sm:$0xff] }
 0x13f   : > { %2831 = vmatpush.bf16.msra.mxu1 %v5461_v1  ;;  %3462 = vmatpush.bf16.msra.mxu3 %v5500_v24  ;;  %v5436_v24 = vld [vmem:[#allocation2 + $0x100] sm:$0xff] }
 0x140   : > { %v2296_v8 = vadd.f32 %v2229_v45, %v1982_v28  ;;  %4660 = vmatmul.msk.bf16.gmra.mxu1 %vm1311_vm1, %v5356_v33  ;;  %v2538_v48 = vpop.f32.mrf.mxu0  ;;  %v5460_v45 = vld [vmem:[#allocation3 + $0xa8] sm:$0xff]  ;;  %v5357_v33 = vld [vmem:[#allocation2 + $0x70] sm:$0xff] }
 0x141   : > { %v6537_v29 = vadd.f32 %v2538_v48, %v6482_v36  ;;  %v5435_v28 = vld [vmem:[#allocation2 + $0xf8] sm:$0xff] }
 0x142   : > { %4756 = vmatmul.msk.bf16.gmra.mxu2 %vm1311_vm1, %v5396_v15 }
 0x143   : > { %2832 = vmatpush.bf16.msra.mxu1 %v5460_v45  ;;  %3148 = vmatpush.bf16.msra.mxu2 %v5479_v39  ;;  %v5418_v45 = vld [vmem:[#allocation2 + $0x80] sm:$0xff] }
 0x144   : > { %4853 = vmatmul.msk.bf16.gmra.mxu3 %vm1311_vm1, %v5417_v34  ;;  %v5358_v34 = vld [vmem:[#allocation2 + $0x78] sm:$0xff] }
 0x145   : > { %v1918_v61 = vpop.f32.mrf.mxu2  ;;  %v1637_v20 = vpop.f32.mrf.mxu1  ;;  %3463 = vmatpush.bf16.msra.mxu3 %v5499_v12 }
 0x146   : > { %v1983_v17 = vadd.f32 %v1918_v61, %v1636_v30  ;;  %v1638_v58 = vadd.f32 %v1637_v20, %v6392_v40  ;;  %v2234_v6 = vpop.f32.mrf.mxu3  ;;  %v5459_v40 = vld [vmem:[#allocation3 + $0xa0] sm:$0xff]  ;;  %v5522_v61 = vld [vmem:[#allocation3 + $0x118] sm:$0xff] }
 0x147   : > { %v5397_v30 = vld [vmem:[#allocation2 + $0x190] sm:$0xff]  ;;  %2833 = vmatpush.bf16.msra.mxu1 %v5459_v40  ;;  %3775 = vmatpush.bf16.msra.mxu0 %v5522_v61  ;;  %v5398_v40 = vld [vmem:[#allocation2 + $0x198] sm:$0xff] }
 0x148   : > { %v2297_v51 = vadd.f32 %v2232_v7, %v1983_v17  ;;  %v2541_v15 = vpop.f32.mrf.mxu0  ;;  %v5520_v61 = vld [vmem:[#allocation3 + $0x108] sm:$0xff] }
 0x149   : > { %v6540_v19 = vadd.f32 %v2541_v15, %v6511_v42 }
 0x14a   : > { %4947 = vmatmul.msk.bf16.gmra.mxu0 %vm1311_vm1, %v5435_v28 }
 0x14d   : > { %v1920_v16 = vpop.f32.mrf.mxu2  ;;  %v1640_v22 = vpop.f32.mrf.mxu1 }
 0x14e   : > { %v1984_v36 = vadd.f32 %v1920_v16, %v1638_v58  ;;  %v2237_v59 = vpop.f32.mrf.mxu3  ;;  %v1641_v1 = vadd.f32 %v1640_v22, %v6205_v3  ;;  %v5521_v22 = vld [vmem:[#allocation3 + $0x110] sm:$0xff] }
 0x14f   : > { %3776 = vmatpush.bf16.msra.mxu0 %v5521_v22  ;;  %v5484_v22 = vld [vmem:[#allocation2 + $0xa8] sm:$0xff] }
 0x150   : > { %v2298_v7 = vadd.f32 %v2234_v6, %v1984_v36  ;;  %4661 = vmatmul.msk.bf16.gmra.mxu1 %vm1311_vm1, %v5357_v33  ;;  %v2543_v20 = vpop.f32.mrf.mxu0 }
 0x151   : > { %v6547_v48 = vadd.f32 %v2543_v20, %v2296_v8  ;;  %v5437_v20 = vld [vmem:[#allocation2 + $0x108] sm:$0xff] }
 0x152   : > { %4757 = vmatmul.msk.bf16.gmra.mxu2 %vm1311_vm1, %v5397_v30 }
 0x153   : > { %3777 = vmatpush.bf16.msra.mxu0 %v5520_v61  ;;  %v5444_v61 = vld [vmem:[#allocation2 + $0x130] sm:$0xff] }
 0x154   : > { %4854 = vmatmul.msk.bf16.gmra.mxu3 %vm1311_vm1, %v5418_v45  ;;  %v5519_v45 = vld [vmem:[#allocation3 + $0x100] sm:$0xff] }
 0x155   : > { %v1923_v42 = vpop.f32.mrf.mxu2  ;;  %v1642_v17 = vpop.f32.mrf.mxu1 }
 0x156   : > { %v1985_v49 = vadd.f32 %v1923_v42, %v1641_v1  ;;  %v2239_v41 = vpop.f32.mrf.mxu3  ;;  %v1643_v25 = vadd.f32 %v1642_v17, %v6221_v9  ;;  %v5483_v42 = vld [vmem:[#allocation2 + $0xa0] sm:$0xff] }
 0x157   : > { %3778 = vmatpush.bf16.msra.mxu0 %v5519_v45 }
 0x158   : > { %v2299_v58 = vadd.f32 %v2237_v59, %v1985_v49  ;;  %v2546_v28 = vpop.f32.mrf.mxu0 }
 0x159   : > { %v6550_v3 = vadd.f32 %v2546_v28, %v2297_v51 }
 0x15a   : > { %4948 = vmatmul.msk.bf16.gmra.mxu0 %vm1311_vm1, %v5436_v24 }
 0x15d   : > { %v1925_v6 = vpop.f32.mrf.mxu2  ;;  %v1645_v16 = vpop.f32.mrf.mxu1 }
 0x15e   : > { %v1986_v33 = vadd.f32 %v1925_v6, %v1643_v25  ;;  %v2242_v8 = vpop.f32.mrf.mxu3  ;;  %v1646_v9 = vadd.f32 %v1645_v16, %v6239_v47 }
 0x160   : > { %v2300_v39 = vadd.f32 %v2239_v41, %v1986_v33  ;;  %4662 = vmatmul.msk.bf16.gmra.mxu1 %vm1311_vm1, %v5358_v34  ;;  %v2548_v12 = vpop.f32.mrf.mxu0  ;;  %v5443_v41 = vld [vmem:[#allocation2 + $0x128] sm:$0xff]  ;;  %v5463_v34 = vld [vmem:[#allocation2 + $0x10] sm:$0xff] }
 0x161   : > { %v6557_v59 = vadd.f32 %v2548_v12, %v2298_v7  ;;  %v5438_v12 = vld [vmem:[#allocation2 + $0x110] sm:$0xff] }
 0x162   : > { %4758 = vmatmul.msk.bf16.gmra.mxu2 %vm1311_vm1, %v5398_v40 }
 0x164   : > { %5223 = vmatmul.msk.bf16.vlgmr.msra.gmra.mxu3 %vm1311_vm1, %v5483_v42 }
 0x165   : > { %v1928_v36 = vpop.f32.mrf.mxu2  ;;  %v1647_v30 = vpop.f32.mrf.mxu1 }
 0x166   : > { %v1987_v15 = vadd.f32 %v1928_v36, %v1646_v9  ;;  %v2244_v1 = vpop.f32.mrf.mxu3  ;;  %v1648_v49 = vadd.f32 %v1647_v30, %v6255_v63 }
 0x168   : > { %v2301_v51 = vadd.f32 %v2242_v8, %v1987_v15  ;;  %v2551_v6 = vpop.f32.mrf.mxu0 }
 0x169   : > { %v6560_v24 = vadd.f32 %v2551_v6, %v2299_v58 }
 0x16a   : > { %4949 = vmatmul.msk.bf16.gmra.mxu0 %vm1311_vm1, %v5437_v20 }
 0x16d   : > { %v1930_v17 = vpop.f32.mrf.mxu2  ;;  %v1650_v25 = vpop.f32.mrf.mxu1 }
 0x16e   : > { %v1988_v47 = vadd.f32 %v1930_v17, %v1648_v49  ;;  %v2247_v63 = vpop.f32.mrf.mxu3  ;;  %v1651_v33 = vadd.f32 %v1650_v25, %v6275_v4  ;;  %v5464_v17 = vld [vmem:[#allocation2 + $0x18] sm:$0xff] }
 0x170   : > { %v2302_v7 = vadd.f32 %v2244_v1, %v1988_v47  ;;  %5031 = vmatmul.msk.bf16.vlgmr.msra.gmra.mxu1 %vm1311_vm1, %v5443_v41  ;;  %v2553_v8 = vpop.f32.mrf.mxu0 }
 0x171   : > { %v6567_v9 = vadd.f32 %v2553_v8, %v2300_v39 }
 0x172   : > { %5127 = vmatmul.msk.bf16.vlgmr.msra.gmra.mxu2 %vm1311_vm1, %v5463_v34 }
 0x174   : > { %5224 = vmatmul.msk.bf16.gmra.mxu3 %vm1311_vm1, %v5484_v22 }
 0x175   : > { %v1933_v16 = vpop.f32.mrf.mxu2  ;;  %v1652_v40 = vpop.f32.mrf.mxu1 }
 0x176   : > { %v1989_v28 = vadd.f32 %v1933_v16, %v1651_v33  ;;  %v2249_v36 = vpop.f32.mrf.mxu3  ;;  %v1653_v15 = vadd.f32 %v1652_v40, %v6293_v14  ;;  %v5503_v40 = vld [vmem:[#allocation2 + $0x130] sm:$0xff] }
 0x178   : > { %v2303_v58 = vadd.f32 %v2247_v63, %v1989_v28  ;;  %v2556_v49 = vpop.f32.mrf.mxu0  ;;  %v5485_v63 = vld [vmem:[#allocation2 + $0xb0] sm:$0xff]  ;;  %v5445_v28 = vld [vmem:[#allocation2 + $0x138] sm:$0xff] }
 0x179   : > { %v6570_v20 = vadd.f32 %v2556_v49, %v2301_v51 }
 0x17a   : > { %4950 = vmatmul.msk.bf16.gmra.mxu0 %vm1311_vm1, %v5438_v12 }
 0x17d   : > { %v1935_v30 = vpop.f32.mrf.mxu2  ;;  %v1655_v42 = vpop.f32.mrf.mxu1 }
 0x17e   : > { %v1990_v1 = vadd.f32 %v1935_v30, %v1653_v15  ;;  %v2252_v39 = vpop.f32.mrf.mxu3  ;;  %v1656_v14 = vadd.f32 %v1655_v42, %v6313_v50  ;;  %v5465_v15 = vld [vmem:[#allocation2 + $0x20] sm:$0xff] }
 0x180   : > { %v2304_v4 = vadd.f32 %v2249_v36, %v1990_v1  ;;  %5032 = vmatmul.msk.bf16.gmra.mxu1 %vm1311_vm1, %v5444_v61  ;;  %v2558_v25 = vpop.f32.mrf.mxu0 }
 0x181   : > { %v6577_v6 = vadd.f32 %v2558_v25, %v2302_v7 }
 0x182   : > { %5128 = vmatmul.msk.bf16.gmra.mxu2 %vm1311_vm1, %v5464_v17 }
 0x184   : > { %5225 = vmatmul.msk.bf16.gmra.mxu3 %vm1311_vm1, %v5485_v63 }
 0x185   : > { %v1938_v41 = vpop.f32.mrf.mxu2  ;;  %v1657_v47 = vpop.f32.mrf.mxu1 }
 0x186   : > { %v1991_v45 = vadd.f32 %v1938_v41, %v1656_v14  ;;  %v2254_v34 = vpop.f32.mrf.mxu3  ;;  %v1658_v33 = vadd.f32 %v1657_v47, %v6329_v38  ;;  %v5504_v47 = vld [vmem:[#allocation2 + $0x138] sm:$0xff] }
 0x188   : > { %v2305_v51 = vadd.f32 %v2252_v39, %v1991_v45  ;;  %v2561_v22 = vpop.f32.mrf.mxu0  ;;  %v5486_v39 = vld [vmem:[#allocation2 + $0xb8] sm:$0xff]  ;;  %v5446_v45 = vld [vmem:[#allocation2 + $0x140] sm:$0xff] }
 0x189   : > { %v6580_v30 = vadd.f32 %v2561_v22, %v2303_v58 }
 0x18a   : > { %5319 = vmatmul.msk.bf16.vlgmr.msra.gmra.mxu0 %vm1311_vm1, %v5503_v40 }
 0x18d   : > { %v1940_v16 = vpop.f32.mrf.mxu2  ;;  %v1660_v36 = vpop.f32.mrf.mxu1 }
 0x18e   : > { %v1992_v8 = vadd.f32 %v1940_v16, %v1658_v33  ;;  %v2257_v7 = vpop.f32.mrf.mxu3  ;;  %v1661_v38 = vadd.f32 %v1660_v36, %v6217_v56  ;;  %v5466_v33 = vld [vmem:[#allocation2 + $0x28] sm:$0xff] }
 0x190   : > { %v2306_v50 = vadd.f32 %v2254_v34, %v1992_v8  ;;  %5033 = vmatmul.msk.bf16.gmra.mxu1 %vm1311_vm1, %v5445_v28  ;;  %v2563_v42 = vpop.f32.mrf.mxu0 }
 0x191   : > { %v6587_v49 = vadd.f32 %v2563_v42, %v2304_v4 }
 0x192   : > { %5129 = vmatmul.msk.bf16.gmra.mxu2 %vm1311_vm1, %v5465_v15 }
 0x194   : > { %5226 = vmatmul.msk.bf16.gmra.mxu3 %vm1311_vm1, %v5486_v39 }
 0x195   : > { %v1943_v12 = vpop.f32.mrf.mxu2  ;;  %v1662_v1 = vpop.f32.mrf.mxu1 }
 0x196   : > { %v1993_v61 = vadd.f32 %v1943_v12, %v1661_v38  ;;  %v2259_v17 = vpop.f32.mrf.mxu3  ;;  %v1663_v14 = vadd.f32 %v1662_v1, %v6233_v11  ;;  %v5505_v1 = vld [vmem:[#allocation2 + $0x140] sm:$0xff] }
 0x198   : > { %v2307_v58 = vadd.f32 %v2257_v7, %v1993_v61  ;;  %v2566_v63 = vpop.f32.mrf.mxu0  ;;  %v5487_v7 = vld [vmem:[#allocation2 + $0xc0] sm:$0xff]  ;;  %v5447_v61 = vld [vmem:[#allocation2 + $0x148] sm:$0xff] }
 0x199   : > { %v6590_v16 = vadd.f32 %v2566_v63, %v2305_v51 }
 0x19a   : > { %5320 = vmatmul.msk.bf16.gmra.mxu0 %vm1311_vm1, %v5504_v47 }
 0x19d   : > { %v1945_v41 = vpop.f32.mrf.mxu2  ;;  %v1665_v34 = vpop.f32.mrf.mxu1 }
 0x19e   : > { %v1994_v25 = vadd.f32 %v1945_v41, %v1663_v14  ;;  %v2262_v4 = vpop.f32.mrf.mxu3  ;;  %v1666_v11 = vadd.f32 %v1665_v34, %v6251_v10  ;;  %v5467_v14 = vld [vmem:[#allocation2 + $0x30] sm:$0xff] }
 0x1a0   : > { %v2308_v56 = vadd.f32 %v2259_v17, %v1994_v25  ;;  %5034 = vmatmul.msk.bf16.gmra.mxu1 %vm1311_vm1, %v5446_v45  ;;  %v2568_v36 = vpop.f32.mrf.mxu0 }
 0x1a1   : > { %v6597_v22 = vadd.f32 %v2568_v36, %v2306_v50 }
 0x1a2   : > { %5130 = vmatmul.msk.bf16.gmra.mxu2 %vm1311_vm1, %v5466_v33 }
 0x1a4   : > { %5227 = vmatmul.msk.bf16.gmra.mxu3 %vm1311_vm1, %v5487_v7 }
 0x1a5   : > { %v1948_v28 = vpop.f32.mrf.mxu2  ;;  %v1667_v8 = vpop.f32.mrf.mxu1 }
 0x1a6   : > { %v1995_v40 = vadd.f32 %v1948_v28, %v1666_v11  ;;  %v2264_v15 = vpop.f32.mrf.mxu3  ;;  %v1668_v38 = vadd.f32 %v1667_v8, %v6269_v31  ;;  %v5506_v8 = vld [vmem:[#allocation2 + $0x148] sm:$0xff] }
 0x1a8   : > { %v2309_v51 = vadd.f32 %v2262_v4, %v1995_v40  ;;  %v2571_v39 = vpop.f32.mrf.mxu0  ;;  %v5488_v4 = vld [vmem:[#allocation2 + $0xc8] sm:$0xff]  ;;  %v5448_v40 = vld [vmem:[#allocation2 + $0x150] sm:$0xff] }
 0x1a9   : > { %v6600_v41 = vadd.f32 %v2571_v39, %v2307_v58 }
 0x1aa   : > { %5321 = vmatmul.msk.bf16.gmra.mxu0 %vm1311_vm1, %v5505_v1 }
 0x1ad   : > { %v1950_v12 = vpop.f32.mrf.mxu2  ;;  %v1670_v17 = vpop.f32.mrf.mxu1 }
 0x1ae   : > { %v1996_v42 = vadd.f32 %v1950_v12, %v1668_v38  ;;  %v2267_v50 = vpop.f32.mrf.mxu3  ;;  %v1671_v31 = vadd.f32 %v1670_v17, %v6289_v57  ;;  %v5468_v38 = vld [vmem:[#allocation2 + $0x38] sm:$0xff] }
 0x1b0   : > { %v2310_v10 = vadd.f32 %v2264_v15, %v1996_v42  ;;  %5035 = vmatmul.msk.bf16.gmra.mxu1 %vm1311_vm1, %v5447_v61  ;;  %v2573_v34 = vpop.f32.mrf.mxu0 }
 0x1b1   : > { %v6607_v63 = vadd.f32 %v2573_v34, %v2308_v56 }
 0x1b2   : > { %5131 = vmatmul.msk.bf16.gmra.mxu2 %vm1311_vm1, %v5467_v14 }
 0x1b4   : > { %5228 = vmatmul.msk.bf16.gmra.mxu3 %vm1311_vm1, %v5488_v4 }
 0x1b5   : > { %v1953_v45 = vpop.f32.mrf.mxu2  ;;  %v1672_v25 = vpop.f32.mrf.mxu1 }
 0x1b6   : > { %v1997_v47 = vadd.f32 %v1953_v45, %v1671_v31  ;;  %v2269_v33 = vpop.f32.mrf.mxu3  ;;  %v1673_v11 = vadd.f32 %v1672_v25, %v6305_v37  ;;  %v5507_v25 = vld [vmem:[#allocation2 + $0x150] sm:$0xff] }
 0x1b8   : > { %v2311_v58 = vadd.f32 %v2267_v50, %v1997_v47  ;;  %v2576_v7 = vpop.f32.mrf.mxu0  ;;  %v5489_v50 = vld [vmem:[#allocation2 + $0xd0] sm:$0xff]  ;;  %v5449_v47 = vld [vmem:[#allocation2 + $0x158] sm:$0xff] }
 0x1b9   : > { %v6610_v12 = vadd.f32 %v2576_v7, %v2309_v51 }
 0x1ba   : > { %5322 = vmatmul.msk.bf16.gmra.mxu0 %vm1311_vm1, %v5506_v8 }
 0x1bd   : > { %v1955_v28 = vpop.f32.mrf.mxu2  ;;  %v1675_v15 = vpop.f32.mrf.mxu1 }
 0x1be   : > { %v1998_v36 = vadd.f32 %v1955_v28, %v1673_v11  ;;  %v2272_v56 = vpop.f32.mrf.mxu3  ;;  %v1676_v37 = vadd.f32 %v1675_v15, %v6325_v21  ;;  %v5469_v11 = vld [vmem:[#allocation2 + $0x40] sm:$0xff] }
 0x1c0   : > { %v2312_v57 = vadd.f32 %v2269_v33, %v1998_v36  ;;  %5036 = vmatmul.msk.bf16.gmra.mxu1 %vm1311_vm1, %v5448_v40  ;;  %v2578_v17 = vpop.f32.mrf.mxu0 }
 0x1c1   : > { %v6617_v39 = vadd.f32 %v2578_v17, %v2310_v10 }
 0x1c2   : > { %5132 = vmatmul.msk.bf16.gmra.mxu2 %vm1311_vm1, %v5468_v38 }
 0x1c3   : > { %7425 = vst [vmem:[#allocation15_spill] sm:$0xff] %v6617_v39 }
 0x1c4   : > { %5229 = vmatmul.msk.bf16.gmra.mxu3 %vm1311_vm1, %v5489_v50 }
 0x1c5   : > { %v1958_v61 = vpop.f32.mrf.mxu2  ;;  %v1677_v42 = vpop.f32.mrf.mxu1 }
 0x1c6   : > { %v1999_v1 = vadd.f32 %v1958_v61, %v1676_v37  ;;  %v2274_v14 = vpop.f32.mrf.mxu3  ;;  %v1678_v31 = vadd.f32 %v1677_v42, %v6343_v60  ;;  %v5508_v42 = vld [vmem:[#allocation2 + $0x158] sm:$0xff] }
 0x1c8   : > { %v2313_v51 = vadd.f32 %v2272_v56, %v1999_v1  ;;  %v2581_v4 = vpop.f32.mrf.mxu0  ;;  %v5490_v56 = vld [vmem:[#allocation2 + $0xd8] sm:$0xff]  ;;  %v5450_v1 = vld [vmem:[#allocation2 + $0x160] sm:$0xff] }
 0x1c9   : > { %v6620_v28 = vadd.f32 %v2581_v4, %v2311_v58 }
 0x1ca   : > { %5323 = vmatmul.msk.bf16.gmra.mxu0 %vm1311_vm1, %v5507_v25 }
 0x1cb   : > { %7426 = vst [vmem:[#allocation16_spill] sm:$0xff] %v6620_v28 }
 0x1cd   : > { %v1960_v45 = vpop.f32.mrf.mxu2  ;;  %v1680_v33 = vpop.f32.mrf.mxu1 }
 0x1ce   : > { %v2000_v34 = vadd.f32 %v1960_v45, %v1678_v31  ;;  %v2277_v10 = vpop.f32.mrf.mxu3  ;;  %v1681_v60 = vadd.f32 %v1680_v33, %v6266_v13  ;;  %v5470_v31 = vld [vmem:[#allocation2 + $0x48] sm:$0xff] }
 0x1d0   : > { %v2314_v21 = vadd.f32 %v2274_v14, %v2000_v34  ;;  %5037 = vmatmul.msk.bf16.gmra.mxu1 %vm1311_vm1, %v5449_v47  ;;  %v2583_v15 = vpop.f32.mrf.mxu0 }
 0x1d1   : > { %v6627_v7 = vadd.f32 %v2583_v15, %v2312_v57  ;;  %v5451_v15 = vld [vmem:[#allocation2 + $0x168] sm:$0xff] }
 0x1d2   : > { %5133 = vmatmul.msk.bf16.gmra.mxu2 %vm1311_vm1, %v5469_v11 }
 0x1d3   : > { %7427 = vst [vmem:[#allocation17_spill] sm:$0xff] %v6627_v7 }
 0x1d4   : > { %5230 = vmatmul.msk.bf16.gmra.mxu3 %vm1311_vm1, %v5490_v56 }
 0x1d5   : > { %v1963_v40 = vpop.f32.mrf.mxu2  ;;  %v1682_v36 = vpop.f32.mrf.mxu1 }
 0x1d6   : > { %v2001_v8 = vadd.f32 %v1963_v40, %v1681_v60  ;;  %v2279_v38 = vpop.f32.mrf.mxu3  ;;  %v1683_v37 = vadd.f32 %v1682_v36, %v6287_v26  ;;  %v7429_v26 = vld [vmem:[#allocation13_spill] sm:$0xff]  ;;  %v5491_v60 = vld [vmem:[#allocation2 + $0xe0] sm:$0xff] }
 0x1d7   : > { %v7431_v40 = vld [vmem:[#allocation14_spill] sm:$0xff] }
 0x1d8   : > { %v2315_v58 = vadd.f32 %v2277_v10, %v2001_v8  ;;  %v2586_v50 = vpop.f32.mrf.mxu0 }
 0x1d9   : > { %v6630_v45 = vadd.f32 %v2586_v50, %v2313_v51 }
 0x1da   : > { %5324 = vmatmul.msk.bf16.gmra.mxu0 %vm1311_vm1, %v5508_v42 }
 0x1db   : > { %7428 = vst [vmem:[#allocation18_spill] sm:$0xff] %v6630_v45 }
 0x1dd   : > { %v1965_v61 = vpop.f32.mrf.mxu2  ;;  %v1685_v14 = vpop.f32.mrf.mxu1 }
 0x1de   : > { %v2002_v17 = vadd.f32 %v1965_v61, %v1683_v37  ;;  %v2282_v57 = vpop.f32.mrf.mxu3  ;;  %v1686_v47 = vadd.f32 %v1685_v14, %v7429_v26 }
 0x1e0   : > { %v2316_v13 = vadd.f32 %v2279_v38, %v2002_v17  ;;  %5038 = vmatmul.msk.bf16.gmra.mxu1 %vm1311_vm1, %v5450_v1  ;;  %v2588_v4 = vpop.f32.mrf.mxu0  ;;  %v5509_v38 = vld [vmem:[#allocation2 + $0x160] sm:$0xff]  ;;  %v5471_v1 = vld [vmem:[#allocation2 + $0x50] sm:$0xff] }
 0x1e1   : > { %v6637_v11 = vadd.f32 %v2588_v4, %v2314_v21  ;;  %v5452_v4 = vld [vmem:[#allocation2 + $0x170] sm:$0xff] }
 0x1e2   : > { %5134 = vmatmul.msk.bf16.gmra.mxu2 %vm1311_vm1, %v5470_v31 }
 0x1e3   : > { %7430 = vst [vmem:[#allocation13_spill] sm:$0xff] %v6637_v11 }
 0x1e4   : > { %5231 = vmatmul.msk.bf16.gmra.mxu3 %vm1311_vm1, %v5491_v60 }
 0x1e5   : > { %v1968_v25 = vpop.f32.mrf.mxu2  ;;  %v1687_v33 = vpop.f32.mrf.mxu1 }
 0x1e6   : > { %v2003_v34 = vadd.f32 %v1968_v25, %v1686_v47  ;;  %v2284_v10 = vpop.f32.mrf.mxu3  ;;  %v1688_v8 = vadd.f32 %v1687_v33, %v7431_v40 }
 0x1e8   : > { %v2317_v51 = vadd.f32 %v2282_v57, %v2003_v34  ;;  %v2591_v37 = vpop.f32.mrf.mxu0  ;;  %v5492_v34 = vld [vmem:[#allocation2 + $0xe8] sm:$0xff] }
 0x1e9   : > { %v6640_v42 = vadd.f32 %v2591_v37, %v2315_v58 }
 0x1ea   : > { %5325 = vmatmul.msk.bf16.gmra.mxu0 %vm1311_vm1, %v5509_v38 }
 0x1eb   : > { %7432 = vst [vmem:[#allocation14_spill] sm:$0xff] %v6640_v42 }
 0x1ed   : > { %v1970_v36 = vpop.f32.mrf.mxu2  ;;  %v2835_v61 = vpop.f32.mrf.mxu1 }
 0x1ee   : > { %v2004_v56 = vadd.f32 %v1970_v36, %v1688_v8  ;;  %v2915_v17 = vadd.f32 %v2835_v61, %v6411_v2  ;;  %v3465_v14 = vpop.f32.mrf.mxu3  ;;  %v5472_v36 = vld [vmem:[#allocation2 + $0x58] sm:$0xff] }
 0x1f0   : > { %v2318_v21 = vadd.f32 %v2284_v10, %v2004_v56  ;;  %5039 = vmatmul.msk.bf16.gmra.mxu1 %vm1311_vm1, %v5451_v15  ;;  %v2593_v57 = vpop.f32.mrf.mxu0  ;;  %v5510_v10 = vld [vmem:[#allocation2 + $0x168] sm:$0xff] }
 0x1f1   : > { %v6647_v47 = vadd.f32 %v2593_v57, %v2316_v13  ;;  %v5453_v57 = vld [vmem:[#allocation2 + $0x178] sm:$0xff] }
 0x1f2   : > { %5135 = vmatmul.msk.bf16.gmra.mxu2 %vm1311_vm1, %v5471_v1 }
 0x1f3   : > { %7433 = vst [vmem:[#allocation19_spill] sm:$0xff] %v6647_v47 }
 0x1f4   : > { %5232 = vmatmul.msk.bf16.gmra.mxu3 %vm1311_vm1, %v5492_v34 }
 0x1f5   : > { %v3150_v50 = vpop.f32.mrf.mxu2  ;;  %v2837_v26 = vpop.f32.mrf.mxu1 }
 0x1f6   : > { %v3230_v31 = vadd.f32 %v3150_v50, %v2915_v17  ;;  %v2916_v58 = vadd.f32 %v2837_v26, %v6427_v27  ;;  %v3467_v2 = vpop.f32.mrf.mxu3  ;;  %v5493_v50 = vld [vmem:[#allocation2 + $0xf0] sm:$0xff] }
 0x1f7   : > { %v5511_v26 = vld [vmem:[#allocation2 + $0x170] sm:$0xff] }
 0x1f8   : > { %v3545_v25 = vadd.f32 %v3465_v14, %v3230_v31  ;;  %v2596_v40 = vpop.f32.mrf.mxu0 }
 0x1f9   : > { %v6650_v15 = vadd.f32 %v2596_v40, %v2317_v51 }
 0x1fa   : > { %5326 = vmatmul.msk.bf16.gmra.mxu0 %vm1311_vm1, %v5510_v10 }
 0x1fb   : > { %7434 = vst [vmem:[#allocation20_spill] sm:$0xff] %v6650_v15 }
 0x1fd   : > { %v3152_v33 = vpop.f32.mrf.mxu2  ;;  %v2840_v8 = vpop.f32.mrf.mxu1 }
 0x1fe   : > { %v3231_v60 = vadd.f32 %v3152_v33, %v2916_v58  ;;  %v2917_v38 = vadd.f32 %v2840_v8, %v6445_v18  ;;  %v3470_v27 = vpop.f32.mrf.mxu3  ;;  %v5473_v33 = vld [vmem:[#allocation2 + $0x60] sm:$0xff] }
 0x200   : > { %v3546_v13 = vadd.f32 %v3467_v2, %v3231_v60  ;;  %5040 = vmatmul.msk.bf16.gmra.mxu1 %vm1311_vm1, %v5452_v4  ;;  %v2598_v61 = vpop.f32.mrf.mxu0 }
 0x201   : > { %v6657_v17 = vadd.f32 %v2598_v61, %v2318_v21  ;;  %v5454_v61 = vld [vmem:[#allocation2 + $0x180] sm:$0xff] }
 0x202   : > { %5136 = vmatmul.msk.bf16.gmra.mxu2 %vm1311_vm1, %v5472_v36 }
 0x203   : > { %7435 = vst [vmem:[#allocation21_spill] sm:$0xff] %v6657_v17  ;;  %v5518_v17 = vld [vmem:[#allocation2 + $0x1a8] sm:$0xff] }
 0x204   : > { %5233 = vmatmul.msk.bf16.gmra.mxu3 %vm1311_vm1, %v5493_v50 }
 0x205   : > { %v3155_v56 = vpop.f32.mrf.mxu2  ;;  %v2842_v1 = vpop.f32.mrf.mxu1 }
 0x206   : > { %v3232_v37 = vadd.f32 %v3155_v56, %v2917_v38  ;;  %v2918_v51 = vadd.f32 %v2842_v1, %v6461_v46  ;;  %v3472_v18 = vpop.f32.mrf.mxu3  ;;  %v5494_v56 = vld [vmem:[#allocation2 + $0xf8] sm:$0xff] }
 0x207   : > { %v5512_v1 = vld [vmem:[#allocation2 + $0x178] sm:$0xff] }
 0x208   : > { %v3547_v14 = vadd.f32 %v3470_v27, %v3232_v37  ;;  %v3780_v34 = vpop.f32.mrf.mxu0 }
 0x209   : > { %v6661_v10 = vadd.f32 %v3780_v34, %v3545_v25 }
 0x20a   : > { %5327 = vmatmul.msk.bf16.gmra.mxu0 %vm1311_vm1, %v5511_v26 }
 0x20b   : > { %7436 = vst [vmem:[#allocation22_spill] sm:$0xff] %v6661_v10 }
 0x20d   : > { %v3157_v31 = vpop.f32.mrf.mxu2  ;;  %v2845_v2 = vpop.f32.mrf.mxu1 }
 0x20e   : > { %v3233_v58 = vadd.f32 %v3157_v31, %v2918_v51  ;;  %v2919_v4 = vadd.f32 %v2845_v2, %v6477_v44  ;;  %v3475_v46 = vpop.f32.mrf.mxu3  ;;  %v5474_v31 = vld [vmem:[#allocation2 + $0x68] sm:$0xff] }
 0x210   : > { %v3548_v21 = vadd.f32 %v3472_v18, %v3233_v58  ;;  %5041 = vmatmul.msk.bf16.gmra.mxu1 %vm1311_vm1, %v5453_v57  ;;  %v3782_v36 = vpop.f32.mrf.mxu0 }
 0x211   : > { %v6668_v27 = vadd.f32 %v3782_v36, %v3546_v13  ;;  %v5513_v36 = vld [vmem:[#allocation2 + $0x180] sm:$0xff] }
 0x212   : > { %5137 = vmatmul.msk.bf16.gmra.mxu2 %vm1311_vm1, %v5473_v33 }
 0x213   : > { %7437 = vst [vmem:[#allocation23_spill] sm:$0xff] %v6668_v27 }
 0x214   : > { %5234 = vmatmul.msk.bf16.gmra.mxu3 %vm1311_vm1, %v5494_v56 }
 0x215   : > { %v3160_v60 = vpop.f32.mrf.mxu2  ;;  %v2847_v8 = vpop.f32.mrf.mxu1 }
 0x216   : > { %v3234_v40 = vadd.f32 %v3160_v60, %v2919_v4  ;;  %v2920_v38 = vadd.f32 %v2847_v8, %v6508_v35  ;;  %v3477_v25 = vpop.f32.mrf.mxu3  ;;  %v5495_v60 = vld [vmem:[#allocation2 + $0x100] sm:$0xff]  ;;  %v5455_v8 = vld [vmem:[#allocation2 + $0x188] sm:$0xff] }
 0x218   : > { %v3549_v44 = vadd.f32 %v3475_v46, %v3234_v40  ;;  %v3785_v50 = vpop.f32.mrf.mxu0 }
 0x219   : > { %v6671_v26 = vadd.f32 %v3785_v50, %v3547_v14  ;;  %v1023_v50 = vrot.slane %v745_v55, 5 }
 0x21a   : > { %5328 = vmatmul.msk.bf16.gmra.mxu0 %vm1311_vm1, %v5512_v1 }
 0x21d   : > { %v3162_v37 = vpop.f32.mrf.mxu2  ;;  %v2850_v18 = vpop.f32.mrf.mxu1 }
 0x21e   : > { %v3235_v51 = vadd.f32 %v3162_v37, %v2920_v38  ;;  %v2921_v57 = vadd.f32 %v2850_v18, %v6529_v43  ;;  %v3480_v35 = vpop.f32.mrf.mxu3  ;;  %v5475_v37 = vld [vmem:[#allocation2 + $0x70] sm:$0xff]  ;;  %v1019_v18 = vrot.slane %v734_v5, 4 }
 0x220   : > { %v3550_v58 = vadd.f32 %v3477_v25, %v3235_v51  ;;  %5042 = vmatmul.msk.bf16.gmra.mxu1 %vm1311_vm1, %v5454_v61  ;;  %v3787_v33 = vpop.f32.mrf.mxu0  ;;  %v488_v61 = vld [vmem:[#allocation2 + $0x1a4] sm:$0x8] }
 0x221   : > { %v6678_v46 = vadd.f32 %v3787_v33, %v3548_v21 }
 0x222   : > { %5138 = vmatmul.msk.bf16.gmra.mxu2 %vm1311_vm1, %v5474_v31 }
 0x224   : > { %5235 = vmatmul.msk.bf16.gmra.mxu3 %vm1311_vm1, %v5495_v60  ;;  %v5514_v60 = vld [vmem:[#allocation2 + $0x188] sm:$0xff] }
 0x225   : > { %v3165_v13 = vpop.f32.mrf.mxu2  ;;  %v2852_v34 = vpop.f32.mrf.mxu1 }
 0x226   : > { %v3236_v2 = vadd.f32 %v3165_v13, %v2921_v57  ;;  %v2922_v4 = vadd.f32 %v2852_v34, %v6537_v29  ;;  %v3482_v14 = vpop.f32.mrf.mxu3  ;;  %v489_v29 = vsel %vm6047_vm11, 0, %v488_v61  ;;  %v1026_v57 = vor.u32 %v1025_v52, %v1023_v50  ;;  %v5457_v52 = vld [vmem:[#allocation2 + $0x198] sm:$0xff] }
 0x227   : > { %490 = vst [vmem:[#allocation2 + $0x1a4] sm:$0x8] %v489_v29 }
 0x228   : > { %v3551_v43 = vadd.f32 %v3480_v35, %v3236_v2  ;;  %v3790_v56 = vpop.f32.mrf.mxu0  ;;  %v1027_v33 = vrot.slane %v1026_v57, 4 }
 0x229   : > { %v6680_v1 = vadd.f32 %v3790_v56, %v3549_v44  ;;  %v1020_v44 = vrot.slane %v737_v53, 5 }
 0x22a   : > { %5329 = vmatmul.msk.bf16.gmra.mxu0 %vm1311_vm1, %v5513_v36 }
 0x22b   : > { %v1021_v31 = vor.u32 %v1020_v44, %v1019_v18  ;;  %v5497_v18 = vld [vmem:[#allocation2 + $0x110] sm:$0xff] }
 0x22d   : > { %v3167_v40 = vpop.f32.mrf.mxu2  ;;  %v2855_v25 = vpop.f32.mrf.mxu1  ;;  %v1022_v34 = vrot.slane %v1021_v31, 4  ;;  %v5515_v31 = vld [vmem:[#allocation2 + $0x190] sm:$0xff] }
 0x22e   : > { %v3237_v38 = vadd.f32 %v3167_v40, %v2922_v4  ;;  %v3485_v51 = vpop.f32.mrf.mxu3  ;;  %v1122_v5 = vld [vmem:[#allocation2 + $0x1a4] sm:$0xf] }
 0x22f   : > { %v1024_v0 = vsel %vm6056_vm13, %v1022_v34, %v1023_v50  ;;  %v1123_v53 = vsel %vm6090_vm15, %v1027_v33, %v1122_v5  ;;  %v5477_v34 = vld [vmem:[#allocation2 + $0x80] sm:$0xff]  ;;  %v5498_v5 = vld [vmem:[#allocation2 + $0x118] sm:$0xff] }
 0x230   : > { %v3552_v21 = vadd.f32 %v3482_v14, %v3237_v38  ;;  %5043 = vmatmul.msk.bf16.gmra.mxu1 %vm1311_vm1, %v5455_v8  ;;  %v3792_v2 = vpop.f32.mrf.mxu0  ;;  %1121 = vst.msk [vmem:[#allocation2 + $0x1a0] sm:$0xf] %vm373_vm0, %v1024_v0  ;;  %v5456_v14 = vld [vmem:[#allocation2 + $0x190] sm:$0xff]  ;;  %v5476_v8 = vld [vmem:[#allocation2 + $0x78] sm:$0xff] }
 0x231   : > { %v6698_v4 = vadd.f32 %v3792_v2, %v3550_v58  ;;  %1124 = vst [vmem:[#allocation2 + $0x1a4] sm:$0xf] %v1123_v53 }
 0x232   : > { %5139 = vmatmul.msk.bf16.gmra.mxu2 %vm1311_vm1, %v5475_v37  ;;  %v2923_v37 = vadd.f32 %v2855_v25, %v6540_v19 }
 0x234   : > { %5236 = vmatmul.msk.bf16.gmra.mxu3 %vm1311_vm1, %v5496_v23  ;;  %v5516_v23 = vld [vmem:[#allocation2 + $0x198] sm:$0xff] }
 0x235   : > { %v3170_v35 = vpop.f32.mrf.mxu2  ;;  %v6696_v13 = vpop.f32.mrf.mxu1 }
 0x236   : > { %v6705_v54 = vpop.f32.mrf.mxu3 }
 0x238   : > { %v3795_v58 = vpop.f32.mrf.mxu0  ;;  %v5458_v53 = vld [vmem:[#allocation2 + $0x1a0] sm:$0xff] }
 0x239   : > { %v6711_v36 = vadd.f32 %v3795_v58, %v3551_v43  ;;  %v3238_v43 = vadd.f32 %v3170_v35, %v2923_v37  ;;  %v5478_v58 = vld [vmem:[#allocation2 + $0x88] sm:$0xff] }
 0x23a   : > { %5330 = vmatmul.msk.bf16.gmra.mxu0 %vm1311_vm1, %v5514_v60 }
 0x23b   : > { %v3553_v44 = vadd.f32 %v3485_v51, %v3238_v43 }
 0x23d   : > { %v6707_v55 = vpop.f32.mrf.mxu2  ;;  %v6709_v40 = vpop.f32.mrf.mxu1 }
 0x23e   : > { %v6717_v62 = vpop.f32.mrf.mxu3 }
 0x240   : > { %5044 = vmatmul.msk.bf16.gmra.mxu1 %vm1311_vm1, %v5456_v14  ;;  %v3797_v56 = vpop.f32.mrf.mxu0 }
 0x241   : > { %v6724_v61 = vadd.f32 %v3797_v56, %v3552_v21 }
 0x242   : > { %5140 = vmatmul.msk.bf16.gmra.mxu2 %vm1311_vm1, %v5476_v8 }
 0x244   : > { %5237 = vmatmul.msk.bf16.gmra.mxu3 %vm1311_vm1, %v5497_v18 }
 0x245   : > { %v6719_v32 = vpop.f32.mrf.mxu2  ;;  %v6721_v38 = vpop.f32.mrf.mxu1 }
 0x246   : > { %v6726_v29 = vpop.f32.mrf.mxu3 }
 0x248   : > { %v3800_v2 = vpop.f32.mrf.mxu0 }
 0x249   : > { %v6730_v33 = vadd.f32 %v3800_v2, %v3553_v44 }
 0x24a   : > { %5331 = vmatmul.msk.bf16.gmra.mxu0 %vm1311_vm1, %v5515_v31 }
 0x24d   : > { %v6728_v50 = vpop.f32.mrf.mxu2  ;;  %v2865_v57 = vpop.f32.mrf.mxu1 }
 0x24e   : > { %v6736_v19 = vpop.f32.mrf.mxu3 }
 0x250   : > { %5045 = vmatmul.msk.bf16.gmra.mxu1 %vm1311_vm1, %v5457_v52  ;;  %v6738_v51 = vpop.f32.mrf.mxu0  ;;  %v5517_v52 = vld [vmem:[#allocation2 + $0x1a0] sm:$0xff] }
 0x252   : > { %5141 = vmatmul.msk.bf16.gmra.mxu2 %vm1311_vm1, %v5477_v34 }
 0x254   : > { %5238 = vmatmul.msk.bf16.gmra.mxu3 %vm1311_vm1, %v5498_v5 }
 0x255   : > { %v3180_v25 = vpop.f32.mrf.mxu2  ;;  %v2867_v21 = vpop.f32.mrf.mxu1 }
 0x256   : > { %v3497_v35 = vpop.f32.mrf.mxu3 }
 0x258   : > { %v6740_v60 = vpop.f32.mrf.mxu0 }
 0x25a   : > { %5332 = vmatmul.msk.bf16.gmra.mxu0 %vm1311_vm1, %v5516_v23 }
 0x25d   : > { %v3182_v0 = vpop.f32.mrf.mxu2  ;;  %v2870_v14 = vpop.f32.mrf.mxu1 }
 0x25e   : > { %v3500_v8 = vpop.f32.mrf.mxu3  ;;  %v2929_v10 = vadd.f32 %v2870_v14, %v6570_v20 }
 0x260   : > { %5046 = vmatmul.msk.bf16.gmra.mxu1 %vm1311_vm1, %v5458_v53  ;;  %v3807_v43 = vpop.f32.mrf.mxu0 }
 0x262   : > { %5142 = vmatmul.msk.bf16.gmra.mxu2 %vm1311_vm1, %v5478_v58 }
 0x265   : > { %v3185_v56 = vpop.f32.mrf.mxu2  ;;  %v2872_v37 = vpop.f32.mrf.mxu1 }
 0x266   : > { %v3502_v18 = vpop.f32.mrf.mxu3 }
 0x268   : > { %v3810_v2 = vpop.f32.mrf.mxu0 }
 0x26a   : > { %5333 = vmatmul.msk.bf16.gmra.mxu0 %vm1311_vm1, %v5517_v52 }
 0x26d   : > { %v3187_v44 = vpop.f32.mrf.mxu2  ;;  %v2875_v31 = vpop.f32.mrf.mxu1 }
 0x26e   : > { %v2931_v34 = vadd.f32 %v2875_v31, %v6580_v30  ;;  %v3505_v5 = vpop.f32.mrf.mxu3  ;;  %v2930_v30 = vadd.f32 %v2872_v37, %v6577_v6 }
 0x270   : > { %v3812_v23 = vpop.f32.mrf.mxu0  ;;  %v3245_v27 = vadd.f32 %v3187_v44, %v2930_v30 }
 0x272   : > { %v3560_v6 = vadd.f32 %v3502_v18, %v3245_v27 }
 0x275   : > { %v3190_v7 = vpop.f32.mrf.mxu2  ;;  %v2877_v45 = vpop.f32.mrf.mxu1 }
 0x276   : > { %v3246_v53 = vadd.f32 %v3190_v7, %v2931_v34  ;;  %v2932_v58 = vadd.f32 %v2877_v45, %v6587_v49  ;;  %v3507_v42 = vpop.f32.mrf.mxu3  ;;  %v2928_v7 = vadd.f32 %v2867_v21, %v6567_v9  ;;  %v3244_v34 = vadd.f32 %v3185_v56, %v2929_v10 }
 0x277   : > { %v2927_v45 = vadd.f32 %v2865_v57, %v6560_v24 }
 0x278   : > { %v3561_v11 = vadd.f32 %v3505_v5, %v3246_v53  ;;  %v3815_v39 = vpop.f32.mrf.mxu0  ;;  %v2926_v5 = vadd.f32 %v6721_v38, %v6557_v59  ;;  %v3559_v14 = vadd.f32 %v3500_v8, %v3244_v34  ;;  %v2924_v59 = vadd.f32 %v6696_v13, %v6547_v48 }
 0x279   : > { %v3242_v20 = vadd.f32 %v3180_v25, %v2927_v45 }
 0x27a   : > { %5334 = vmatmul.msk.bf16.gmra.mxu0 %vm1311_vm1, %v5518_v17  ;;  %v3241_v9 = vadd.f32 %v6728_v50, %v2926_v5  ;;  %v6762_v17 = vld [vmem:[#allocation5] ss:$0 sm:$0xff]  ;;  %v3874_v24 = vadd.f32 %v3815_v39, %v3559_v14  ;;  %v3239_v25 = vadd.f32 %v6707_v55, %v2924_v59 }
 0x27b   : > { %v6816_v45 = vadd.f32 %v6762_v17, %v6724_v61  ;;  %v6821_v5 = vadd.f32 %v6762_v17, %v6711_v36  ;;  %v6831_v14 = vadd.f32 %v6762_v17, %v6680_v1  ;;  %v7445_v1 = vld [vmem:[#allocation23_spill] sm:$0xff] }
 0x27c   : > { %v3556_v39 = vadd.f32 %v6726_v29, %v3241_v9  ;;  %v3554_v55 = vadd.f32 %v6705_v54, %v3239_v25  ;;  %v6844_v9 = vadd.f32 %v6762_v17, %v6671_v26 }
 0x27d   : > { %v3192_v47 = vpop.f32.mrf.mxu2  ;;  %v2880_v28 = vpop.f32.mrf.mxu1  ;;  %7439 = vst [vmem:[#allocation25_spill] sm:$0xff] %v6816_v45 }
 0x27e   : > { %v3247_v15 = vadd.f32 %v3192_v47, %v2932_v58  ;;  %v2933_v52 = vadd.f32 %v2880_v28, %v6590_v16  ;;  %v3510_v49 = vpop.f32.mrf.mxu3  ;;  %v3243_v47 = vadd.f32 %v3182_v0, %v2928_v7  ;;  %v2925_v16 = vadd.f32 %v6709_v40, %v6550_v3  ;;  %7440 = vst [vmem:[#allocation26_spill] sm:$0xff] %v6821_v5 }
 0x27f   : > { %v3557_v3 = vadd.f32 %v6736_v19, %v3242_v20  ;;  %v3871_v13 = vadd.f32 %v3807_v43, %v3556_v39  ;;  %v3869_v53 = vadd.f32 %v6738_v51, %v3554_v55  ;;  %7442 = vst [vmem:[#allocation28_spill] sm:$0xff] %v6831_v14 }
 0x280   : > { %v6752_v31 = vadd.f32 %v3507_v42, %v3247_v15  ;;  %v3817_v15 = vpop.f32.mrf.mxu0  ;;  %v3558_v10 = vadd.f32 %v3497_v35, %v3243_v47  ;;  %v3240_v38 = vadd.f32 %v6719_v32, %v2925_v16  ;;  %7444 = vst [vmem:[#allocation30_spill] sm:$0xff] %v6844_v9 }
 0x281   : > { %v3875_v21 = vadd.f32 %v3817_v15, %v3560_v6  ;;  %v3872_v35 = vadd.f32 %v3810_v2, %v3557_v3 }
 0x282   : > { %v3873_v40 = vadd.f32 %v3812_v23, %v3558_v10  ;;  %v3555_v48 = vadd.f32 %v6717_v62, %v3240_v38  ;;  %v6794_v23 = vadd.f32 %v6762_v17, %v3871_v13  ;;  %v7447_v10 = vld [vmem:[#allocation22_spill] sm:$0xff] }
 0x283   : > { %v6770_v50 = vadd.f32 %v6762_v17, %v3875_v21  ;;  %v6786_v44 = vadd.f32 %v6762_v17, %v3872_v35 }
 0x284   : > { %v6780_v32 = vadd.f32 %v6762_v17, %v3873_v40  ;;  %v3870_v18 = vadd.f32 %v6740_v60, %v3555_v48 }
 0x285   : > { %v3195_v37 = vpop.f32.mrf.mxu2  ;;  %v2882_v42 = vpop.f32.mrf.mxu1  ;;  %3928 = vmatpush.msrb.mxu1 %v6770_v50 }
 0x286   : > { %v3248_v28 = vadd.f32 %v3195_v37, %v2933_v52  ;;  %v2934_v57 = vadd.f32 %v2882_v42, %v6597_v22  ;;  %v3512_v0 = vpop.f32.mrf.mxu3  ;;  %v6775_v22 = vadd.f32 %v6762_v17, %v3874_v24  ;;  %v6798_v60 = vadd.f32 %v6762_v17, %v3870_v18 }
 0x287   : > { %v6807_v52 = vadd.f32 %v6762_v17, %v6730_v33  ;;  %v6854_v24 = vadd.f32 %v6762_v17, %v7447_v10 }
 0x288   : > { %v3563_v27 = vadd.f32 %v3510_v49, %v3248_v28  ;;  %3929 = vmatpush.msrb.mxu1 %v6775_v22  ;;  %v3820_v29 = vpop.f32.mrf.mxu0 }
 0x289   : > { %v6789_v62 = vadd.f32 %v3820_v29, %v3561_v11  ;;  %7438 = vst [vmem:[#allocation24_spill] sm:$0xff] %v6807_v52 }
 0x28a   : > { %3930 = vmatpush.msrb.mxu1 %v6780_v32  ;;  %7448 = vst [vmem:[#allocation22_spill] sm:$0xff] %v6854_v24 }
 0x28c   : > { %3931 = vmatpush.msrb.mxu1 %v6786_v44 }
 0x28d   : > { %v3197_v19 = vpop.f32.mrf.mxu2  ;;  %v2885_v56 = vpop.f32.mrf.mxu1 }
 0x28e   : > { %v3249_v8 = vadd.f32 %v3197_v19, %v2934_v57  ;;  %v2935_v2 = vadd.f32 %v2885_v56, %v6600_v41  ;;  %v3515_v54 = vpop.f32.mrf.mxu3  ;;  %3932 = vmatpush.msrb.mxu1 %v6794_v23  ;;  %v6802_v41 = vadd.f32 %v6762_v17, %v3869_v53  ;;  %v7449_v57 = vld [vmem:[#allocation15_spill] sm:$0xff] }
 0x290   : > { %v3564_v43 = vadd.f32 %v3512_v0, %v3249_v8  ;;  %3933 = vmatpush.msrb.mxu1 %v6798_v60  ;;  %v3822_v51 = vpop.f32.mrf.mxu0  ;;  %v7450_v0 = vld [vmem:[#allocation16_spill] sm:$0xff] }
 0x291   : > { %v6811_v34 = vadd.f32 %v3822_v51, %v6752_v31 }
 0x292   : > { %3934 = vmatpush.msrb.mxu1 %v6802_v41 }
 0x294   : > { %3935 = vmatpush.msrb.mxu1 %v6807_v52 }
 0x295   : > { %v3200_v11 = vpop.f32.mrf.mxu2  ;;  %v2887_v30 = vpop.f32.mrf.mxu1 }
 0x296   : > { %v3250_v58 = vadd.f32 %v3200_v11, %v2935_v2  ;;  %v2936_v7 = vadd.f32 %v2887_v30, %v6607_v63  ;;  %v3517_v47 = vpop.f32.mrf.mxu3  ;;  %3936 = vmatpush.msrb.mxu1 %v6816_v45  ;;  %v6826_v63 = vadd.f32 %v6762_v17, %v6698_v4  ;;  %v6839_v4 = vadd.f32 %v6762_v17, %v6678_v46 }
 0x298   : > { %v3565_v49 = vadd.f32 %v3515_v54, %v3250_v58  ;;  %7441 = vst [vmem:[#allocation27_spill] sm:$0xff] %v6826_v63  ;;  %3937 = vmatpush.msrb.mxu1 %v6821_v5  ;;  %v3825_v61 = vpop.f32.mrf.mxu0 }
 0x299   : > { %v6834_v36 = vadd.f32 %v3825_v61, %v3563_v27  ;;  %7443 = vst [vmem:[#allocation29_spill] sm:$0xff] %v6839_v4 }
 0x29a   : > { %3938 = vmatpush.msrb.mxu1 %v6826_v63  ;;  %v7456_v63 = vld [vmem:[#allocation18_spill] sm:$0xff] }
 0x29c   : > { %3939 = vmatpush.msrb.mxu1 %v6831_v14 }
 0x29d   : > { %v3202_v33 = vpop.f32.mrf.mxu2  ;;  %v2890_v20 = vpop.f32.mrf.mxu1 }
 0x29e   : > { %v3251_v31 = vadd.f32 %v3202_v33, %v2936_v7  ;;  %v2937_v6 = vadd.f32 %v2890_v20, %v6610_v12  ;;  %v3520_v16 = vpop.f32.mrf.mxu3  ;;  %3940 = vmatpush.msrb.mxu1 %v6839_v4  ;;  %v6849_v12 = vadd.f32 %v6762_v17, %v7445_v1 }
 0x2a0   : > { %v3566_v37 = vadd.f32 %v3517_v47, %v3251_v31  ;;  %7446 = vst [vmem:[#allocation23_spill] sm:$0xff] %v6849_v12  ;;  %3941 = vmatpush.msrb.mxu1 %v6844_v9  ;;  %v3827_v46 = vpop.f32.mrf.mxu0 }
 0x2a1   : > { %v6857_v26 = vadd.f32 %v3827_v46, %v3564_v43 }
 0x2a2   : > { %3942 = vmatpush.msrb.mxu1 %v6849_v12 }
 0x2a4   : > { %3943 = vmatpush.msrb.mxu1 %v6854_v24  ;;  %v7455_v24 = vld [vmem:[#allocation13_spill] sm:$0xff] }
 0x2a5   : > { %v3205_v28 = vpop.f32.mrf.mxu2  ;;  %v2892_v15 = vpop.f32.mrf.mxu1 }
 0x2a6   : > { %v3252_v42 = vadd.f32 %v3205_v28, %v2937_v6  ;;  %v2938_v21 = vadd.f32 %v2892_v15, %v7449_v57  ;;  %v3522_v27 = vpop.f32.mrf.mxu3 }
 0x2a8   : > { %v3567_v59 = vadd.f32 %v3520_v16, %v3252_v42  ;;  %v3830_v25 = vpop.f32.mrf.mxu0 }
 0x2a9   : > { %v6862_v35 = vadd.f32 %v3830_v25, %v3565_v49  ;;  %v7451_v25 = vld [vmem:[#allocation20_spill] sm:$0xff] }
 0x2ad   : > { %v3207_v38 = vpop.f32.mrf.mxu2  ;;  %v2895_v40 = vpop.f32.mrf.mxu1 }
 0x2ae   : > { %v3253_v3 = vadd.f32 %v3207_v38, %v2938_v21  ;;  %v2939_v39 = vadd.f32 %v2895_v40, %v7450_v0  ;;  %v3525_v19 = vpop.f32.mrf.mxu3 }
 0x2b0   : > { %v3568_v48 = vadd.f32 %v3522_v27, %v3253_v3  ;;  %v3832_v8 = vpop.f32.mrf.mxu0 }
 0x2b1   : > { %v6864_v56 = vadd.f32 %v3832_v8, %v3566_v37 }
 0x2b5   : > { %v3210_v13 = vpop.f32.mrf.mxu2  ;;  %v2897_v43 = vpop.f32.mrf.mxu1 }
 0x2b6   : > { %v3254_v55 = vadd.f32 %v3210_v13, %v2939_v39  ;;  %v6868_v54 = vpop.f32.mrf.mxu3  ;;  %v7452_v39 = vld [vmem:[#allocation21_spill] sm:$0xff]  ;;  %v7453_v13 = vld [vmem:[#allocation19_spill] sm:$0xff] }
 0x2b8   : > { %v3569_v29 = vadd.f32 %v3525_v19, %v3254_v55  ;;  %v3835_v18 = vpop.f32.mrf.mxu0 }
 0x2b9   : > { %v6866_v2 = vadd.f32 %v3835_v18, %v3567_v59  ;;  %v7454_v18 = vld [vmem:[#allocation14_spill] sm:$0xff] }
 0x2bd   : > { %v3212_v53 = vpop.f32.mrf.mxu2  ;;  %v2900_v30 = vpop.f32.mrf.mxu1 }
 0x2be   : > { %v3530_v47 = vpop.f32.mrf.mxu3  ;;  %v2941_v5 = vadd.f32 %v2900_v30, %v7456_v63  ;;  %v6890_v63 = vld [vmem:[%s7395_s3 + $0x38] sm:$0xff] }
 0x2bf   : > { %3987 = vmatpush.msrb.mxu3 %v6890_v63 }
 0x2c0   : > { %v3837_v11 = vpop.f32.mrf.mxu0 }
 0x2c1   : > { %v6870_v58 = vadd.f32 %v3837_v11, %v3568_v48 }
 0x2c5   : > { %v3215_v51 = vpop.f32.mrf.mxu2  ;;  %v2902_v33 = vpop.f32.mrf.mxu1 }
 0x2c6   : > { %v3532_v61 = vpop.f32.mrf.mxu3  ;;  %v2942_v12 = vadd.f32 %v2902_v33, %v7455_v24  ;;  %v5739_v24 = vmov 1.0  }
 0x2c7   : > { %3944 = vmatmul.f32.vlgmr.msrb.gmra.mxu1 %v5739_v24 }
 0x2c8   : > { %v3840_v7 = vpop.f32.mrf.mxu0 }
 0x2c9   : > { %v6872_v49 = vadd.f32 %v3840_v7, %v3569_v29 }
 0x2cd   : > { %v3217_v31 = vpop.f32.mrf.mxu2  ;;  %v2905_v6 = vpop.f32.mrf.mxu1 }
 0x2ce   : > { %v3535_v1 = vpop.f32.mrf.mxu3  ;;  %v2943_v11 = vadd.f32 %v2905_v6, %v7454_v18  ;;  %v3257_v52 = vadd.f32 %v3217_v31, %v2942_v12 }
 0x2d0   : > { %v6874_v20 = vpop.f32.mrf.mxu0 }
 0x2d5   : > { %v3220_v16 = vpop.f32.mrf.mxu2  ;;  %v2907_v42 = vpop.f32.mrf.mxu1 }
 0x2d6   : > { %v3537_v46 = vpop.f32.mrf.mxu3  ;;  %v2944_v19 = vadd.f32 %v2907_v42, %v7453_v13  ;;  %v3258_v9 = vadd.f32 %v3220_v16, %v2943_v11  ;;  %v6951_v16 = vadd.f32 %v6762_v17, %v6872_v49  ;;  %v6971_v49 = vadd.f32 %v6762_v17, %v6862_v35 }
 0x2d7   : > { %v6991_v35 = vadd.f32 %v6762_v17, %v6789_v62  ;;  %v4002_v62 = vld [vmem:[%s7396_s4 + $0x10] sm:$0xff] }
 0x2d8   : > { %v3845_v37 = vpop.f32.mrf.mxu0 }
 0x2dd   : > { %v3222_v15 = vpop.f32.mrf.mxu2  ;;  %v2910_v57 = vpop.f32.mrf.mxu1 }
 0x2de   : > { %v3540_v27 = vpop.f32.mrf.mxu3  ;;  %v2945_v0 = vadd.f32 %v2910_v57, %v7451_v25  ;;  %v3259_v7 = vadd.f32 %v3222_v15, %v2944_v19 }
 0x2e0   : > { %v3847_v28 = vpop.f32.mrf.mxu0  ;;  %v3574_v57 = vadd.f32 %v3537_v46, %v3259_v7  ;;  %v6966_v46 = vadd.f32 %v6762_v17, %v6864_v56  ;;  %v6986_v56 = vadd.f32 %v6762_v17, %v6811_v34  ;;  %v7005_v34 = vld [vmem:[%s7395_s3] sm:$0xff] }
 0x2e5   : > { %v3225_v21 = vpop.f32.mrf.mxu2  ;;  %v2912_v38 = vpop.f32.mrf.mxu1 }
 0x2e6   : > { %v2946_v48 = vadd.f32 %v2912_v38, %v7452_v39  ;;  %v3260_v55 = vadd.f32 %v3225_v21, %v2945_v0  ;;  %v3542_v29 = vpop.f32.mrf.mxu3  ;;  %v7457_v39 = vld [vmem:[#allocation17_spill] sm:$0xff]  ;;  %v3256_v21 = vadd.f32 %v3215_v51, %v2941_v5  ;;  %v3572_v5 = vadd.f32 %v3532_v61, %v3257_v52  ;;  %v6915_v52 = vld [vmem:[%s7395_s3 + $0x20] sm:$0xff] }
 0x2e7   : > { %v2940_v42 = vadd.f32 %v2897_v43, %v7457_v39 }
 0x2e8   : > { %v3850_v10 = vpop.f32.mrf.mxu0  ;;  %v3575_v4 = vadd.f32 %v3540_v27, %v3260_v55  ;;  %v3571_v12 = vadd.f32 %v3530_v47, %v3256_v21  ;;  %v3887_v43 = vadd.f32 %v3847_v28, %v3572_v5  ;;  %v6926_v47 = vld [vmem:[%s7395_s3 + $0x18] sm:$0xff]  ;;  %v6961_v28 = vadd.f32 %v6762_v17, %v6866_v2  ;;  %v4001_v27 = vld [vmem:[%s7396_s4 + $0x8] sm:$0xff] }
 0x2e9   : > { %v3255_v15 = vadd.f32 %v3212_v53, %v2940_v42  ;;  %v6981_v2 = vadd.f32 %v6762_v17, %v6834_v36  ;;  %v6999_v36 = vld [vmem:[%s7395_s3 + $0x8] sm:$0xff] }
 0x2ea   : > { %v3886_v51 = vadd.f32 %v3845_v37, %v3571_v12  ;;  %v6930_v61 = vadd.f32 %v6762_v17, %v3887_v43  ;;  %v7458_v12 = vld [vmem:[#allocation24_spill] sm:$0xff] }
 0x2eb   : > { %v3570_v30 = vadd.f32 %v6868_v54, %v3255_v15  ;;  %v6937_v54 = vld [vmem:[%s7395_s3 + $0x10] sm:$0xff] }
 0x2ec   : > { %v6940_v37 = vadd.f32 %v6762_v17, %v3886_v51  ;;  %v7459_v51 = vld [vmem:[#allocation25_spill] sm:$0xff] }
 0x2ed   : > { %v3227_v3 = vpop.f32.mrf.mxu2  ;;  %v3885_v31 = vadd.f32 %v6874_v20, %v3570_v30 }
 0x2ee   : > { %v3261_v8 = vadd.f32 %v3227_v3, %v2946_v48  ;;  %v3573_v3 = vadd.f32 %v3535_v1, %v3258_v9  ;;  %v6905_v9 = vld [vmem:[%s7395_s3 + $0x28] sm:$0xff]  ;;  %v6956_v1 = vadd.f32 %v6762_v17, %v6870_v58  ;;  %v6976_v58 = vadd.f32 %v6762_v17, %v6857_v26 }
 0x2ef   : > { %v6945_v20 = vadd.f32 %v6762_v17, %v3885_v31 }
 0x2f0   : > { %v3852_v59 = vpop.f32.mrf.mxu0  ;;  %v3576_v14 = vadd.f32 %v3542_v29, %v3261_v8 }
 0x2f1   : > { %v3889_v0 = vadd.f32 %v3852_v59, %v3574_v57 }
 0x2f3   : > { %v6908_v53 = vadd.f32 %v6762_v17, %v3889_v0 }
 0x2f8   : > { %v3855_v40 = vpop.f32.mrf.mxu0 }
 0x2f9   : > { %v3890_v25 = vadd.f32 %v3855_v40, %v3575_v4  ;;  %v4000_v40 = vld [vmem:[%s7396_s4] sm:$0xff] }
 0x2fb   : > { %v6898_v4 = vadd.f32 %v6762_v17, %v3890_v25 }
 0x300   : > { %v3857_v45 = vpop.f32.mrf.mxu0 }
 0x301   : > { %v3891_v38 = vadd.f32 %v3857_v45, %v3576_v14  ;;  %v6895_v45 = vld [vmem:[%s7395_s3 + $0x30] sm:$0xff]  ;;  %v3888_v14 = vadd.f32 %v3850_v10, %v3573_v3 }
 0x302   : > { %3988 = vmatpush.msrb.mxu3 %v6895_v45 }
 0x303   : > { %v6884_v6 = vadd.f32 %v6762_v17, %v3891_v38  ;;  %v6919_v33 = vadd.f32 %v6762_v17, %v3888_v14  ;;  %v4003_v17 = vld [vmem:[%s7396_s4 + $0x18] sm:$0xff] }
 0x304   : > { %3989 = vmatpush.msrb.mxu3 %v6905_v9  ;;  %4020 = vmatpush.msra.mxu1 %v4003_v17 }
 0x305   : > { %3948 = vmatpush.msrb.mxu2 %v6884_v6 }
 0x306   : > { %3990 = vmatpush.msrb.mxu3 %v6915_v52  ;;  %4021 = vmatpush.msra.mxu1 %v4002_v62 }
 0x307   : > { %3949 = vmatpush.msrb.mxu2 %v6898_v4 }
 0x308   : > { %3991 = vmatpush.msrb.mxu3 %v6926_v47  ;;  %4022 = vmatpush.msra.mxu1 %v4001_v27 }
 0x309   : > { %3950 = vmatpush.msrb.mxu2 %v6908_v53 }
 0x30a   : > { %3992 = vmatpush.msrb.mxu3 %v6937_v54  ;;  %4023 = vmatpush.msra.mxu1 %v4000_v40 }
 0x30b   : > { %3951 = vmatpush.msrb.mxu2 %v6919_v33 }
 0x30c   : > { %3993 = vmatpush.msrb.mxu3 %v6999_v36  ;;  %4183 = vmatpush.msrb.mxu1 %v4003_v17 }
 0x30d   : > { %3952 = vmatpush.msrb.mxu2 %v6930_v61 }
 0x30e   : > { %3994 = vmatpush.msrb.mxu3 %v7005_v34  ;;  %4184 = vmatpush.msrb.mxu1 %v4002_v62 }
 0x30f   : > { %3953 = vmatpush.msrb.mxu2 %v6940_v37 }
 0x310   : > { %4185 = vmatpush.msrb.mxu1 %v4001_v27 }
 0x311   : > { %3954 = vmatpush.msrb.mxu2 %v6945_v20 }
 0x312   : > { %4186 = vmatpush.msrb.mxu1 %v4000_v40  ;;  %v7462_v40 = vld [vmem:[#allocation28_spill] sm:$0xff] }
 0x313   : > { %3955 = vmatpush.msrb.mxu2 %v6951_v16 }
 0x315   : > { %3956 = vmatpush.msrb.mxu2 %v6956_v1 }
 0x317   : > { %3957 = vmatpush.msrb.mxu2 %v6961_v28 }
 0x319   : > { %3958 = vmatpush.msrb.mxu2 %v6966_v46 }
 0x31b   : > { %3959 = vmatpush.msrb.mxu2 %v6971_v49 }
 0x31d   : > { %3960 = vmatpush.msrb.mxu2 %v6976_v58 }
 0x31f   : > { %3961 = vmatpush.msrb.mxu2 %v6981_v2 }
 0x321   : > { %3962 = vmatpush.msrb.mxu2 %v6986_v56 }
 0x323   : > { %3963 = vmatpush.msrb.mxu2 %v6991_v35 }
 0x324   : > { %3964 = vmatmul.f32.vlgmr.msrb.gmra.mxu2 %v5739_v24 }
 0x344   : > { %v3945_v26 = vpop.f32.mrf.mxu1 }
 0x3a7   : > { %v3965_v10 = vpop.f32.mrf.mxu2 }
 0x3a8   : > { %v3966_v59 = vadd.f32 %v3965_v10, %v3945_v26  ;;  %v7461_v26 = vld [vmem:[#allocation27_spill] sm:$0xff] }
 0x3aa   : > { %5335 = vmatmul.msk.f32.vlgmr.msrb.gmra.mxu3 %vm1311_vm1, %v3966_v59 }
 0x42d   : > { %v3996_v48 = vpop.f32.mrf.mxu3 }
 0x42e   : > { %v3999_v13 = vmul.f32 0.001953125, %v3996_v48 }
 0x430   : > { %5336 = vmatmul.msk.f32.vlgmr.msra.gmra.mxu1 %vm4004_vm2, %v3999_v13 }
 0x4ad   : > { %v4025_v19 = vpop.f32.mrf.mxu1 }
 0x4ae   : > { %v7022_v55 = vperm.slane %v4025_v19, 0 }
 0x4b0   : > { %v7026_v8 = vsub.f32 %v6770_v50, %v7022_v55  ;;  %v7030_v29 = vsub.f32 %v6775_v22, %v7022_v55  ;;  %v7034_v18 = vsub.f32 %v6898_v4, %v7022_v55  ;;  %v7038_v11 = vsub.f32 %v6884_v6, %v7022_v55 }
 0x4b1   : > { %v7042_v7 = vsub.f32 %v6780_v32, %v7022_v55  ;;  %v7048_v57 = vsub.f32 %v6908_v53, %v7022_v55  ;;  %v7054_v25 = vsub.f32 %v6786_v44, %v7022_v55  ;;  %v7060_v32 = vsub.f32 %v6919_v33, %v7022_v55 }
 0x4b2   : > { %v4076_v50 = vmul.f32 %v7026_v8, %v7026_v8  ;;  %v4092_v22 = vmul.f32 %v7038_v11, %v7038_v11  ;;  %v4075_v38 = vmul.f32 %v7030_v29, %v7030_v29  ;;  %v4091_v39 = vmul.f32 %v7034_v18, %v7034_v18 }
 0x4b3   : > { %v7066_v42 = vsub.f32 %v6794_v23, %v7022_v55  ;;  %v4074_v44 = vmul.f32 %v7042_v7, %v7042_v7  ;;  %v7072_v21 = vsub.f32 %v6930_v61, %v7022_v55  ;;  %v4090_v3 = vmul.f32 %v7048_v57, %v7048_v57 }
 0x4b4   : > { %4093 = vmatpush.msra.mxu2 %v4076_v50  ;;  %4113 = vmatpush.msra.mxu3 %v4092_v22  ;;  %v7078_v0 = vsub.f32 %v6798_v60, %v7022_v55  ;;  %v4073_v23 = vmul.f32 %v7054_v25, %v7054_v25  ;;  %v7084_v6 = vsub.f32 %v6940_v37, %v7022_v55  ;;  %v7463_v50 = vld [vmem:[#allocation29_spill] sm:$0xff] }
 0x4b5   : > { %v4089_v15 = vmul.f32 %v7060_v32, %v7060_v32  ;;  %v7090_v5 = vsub.f32 %v6802_v41, %v7022_v55  ;;  %v4072_v60 = vmul.f32 %v7066_v42, %v7066_v42  ;;  %v7096_v14 = vsub.f32 %v6945_v20, %v7022_v55  ;;  %v7460_v20 = vld [vmem:[#allocation26_spill] sm:$0xff] }
 0x4b6   : > { %4094 = vmatpush.msra.mxu2 %v4075_v38  ;;  %4114 = vmatpush.msra.mxu3 %v4091_v39  ;;  %v4088_v4 = vmul.f32 %v7072_v21, %v7072_v21  ;;  %v7102_v43 = vsub.f32 %v7458_v12, %v7022_v55  ;;  %v4071_v41 = vmul.f32 %v7078_v0, %v7078_v0 }
 0x4b7   : > { %v7108_v53 = vsub.f32 %v6951_v16, %v7022_v55  ;;  %v4087_v30 = vmul.f32 %v7084_v6, %v7084_v6  ;;  %v7114_v33 = vsub.f32 %v7459_v51, %v7022_v55  ;;  %v4070_v31 = vmul.f32 %v7090_v5, %v7090_v5 }
 0x4b8   : > { %4095 = vmatpush.msra.mxu2 %v4074_v44  ;;  %4115 = vmatpush.msra.mxu3 %v4090_v3  ;;  %v7120_v61 = vsub.f32 %v6956_v1, %v7022_v55  ;;  %v4086_v37 = vmul.f32 %v7096_v14, %v7096_v14  ;;  %v7126_v16 = vsub.f32 %v7460_v20, %v7022_v55  ;;  %v7464_v44 = vld [vmem:[#allocation30_spill] sm:$0xff] }
 0x4b9   : > { %v4069_v17 = vmul.f32 %v7102_v43, %v7102_v43  ;;  %v7132_v62 = vsub.f32 %v6961_v28, %v7022_v55  ;;  %v4085_v1 = vmul.f32 %v7108_v53, %v7108_v53  ;;  %v7138_v10 = vsub.f32 %v7461_v26, %v7022_v55 }
 0x4ba   : > { %4096 = vmatpush.msra.mxu2 %v4073_v23  ;;  %4116 = vmatpush.msra.mxu3 %v4089_v15  ;;  %v4068_v59 = vmul.f32 %v7114_v33, %v7114_v33  ;;  %v7144_v27 = vsub.f32 %v6966_v46, %v7022_v55  ;;  %v4084_v28 = vmul.f32 %v7120_v61, %v7120_v61 }
 0x4bb   : > { %v7150_v48 = vsub.f32 %v7462_v40, %v7022_v55  ;;  %v4067_v13 = vmul.f32 %v7126_v16, %v7126_v16  ;;  %v7156_v19 = vsub.f32 %v6971_v49, %v7022_v55  ;;  %v4083_v46 = vmul.f32 %v7132_v62, %v7132_v62 }
 0x4bc   : > { %4097 = vmatpush.msra.mxu2 %v4072_v60  ;;  %4117 = vmatpush.msra.mxu3 %v4088_v4  ;;  %v7162_v22 = vsub.f32 %v7463_v50, %v7022_v55  ;;  %v4066_v38 = vmul.f32 %v7138_v10, %v7138_v10  ;;  %v7168_v39 = vsub.f32 %v6976_v58, %v7022_v55  ;;  %v7465_v60 = vld [vmem:[#allocation23_spill] sm:$0xff] }
 0x4bd   : > { %v4082_v49 = vmul.f32 %v7144_v27, %v7144_v27  ;;  %v7174_v3 = vsub.f32 %v7464_v44, %v7022_v55  ;;  %v4065_v23 = vmul.f32 %v7150_v48, %v7150_v48  ;;  %v7180_v15 = vsub.f32 %v6981_v2, %v7022_v55 }
 0x4be   : > { %4098 = vmatpush.msra.mxu2 %v4071_v41  ;;  %4118 = vmatpush.msra.mxu3 %v4087_v30  ;;  %v4081_v58 = vmul.f32 %v7156_v19, %v7156_v19  ;;  %v4030_v4 = vsub.f32 %v7465_v60, %v7022_v55  ;;  %v4064_v12 = vmul.f32 %v7162_v22, %v7162_v22  ;;  %v7466_v30 = vld [vmem:[#allocation22_spill] sm:$0xff] }
 0x4bf   : > { %v7190_v41 = vsub.f32 %v6986_v56, %v7022_v55  ;;  %v4080_v2 = vmul.f32 %v7168_v39, %v7168_v39  ;;  %v4029_v51 = vsub.f32 %v7466_v30, %v7022_v55  ;;  %v4079_v56 = vmul.f32 %v7180_v15, %v7180_v15 }
 0x4c0   : > { %4099 = vmatpush.msra.mxu2 %v4070_v31  ;;  %4119 = vmatpush.msra.mxu3 %v4086_v37  ;;  %v4063_v31 = vmul.f32 %v7174_v3, %v7174_v3  ;;  %v7200_v37 = vsub.f32 %v6991_v35, %v7022_v55  ;;  %v4062_v20 = vmul.f32 %v4030_v4, %v4030_v4 }
 0x4c2   : > { %4100 = vmatpush.msra.mxu2 %v4069_v17  ;;  %4120 = vmatpush.msra.mxu3 %v4085_v1  ;;  %v4078_v17 = vmul.f32 %v7190_v41, %v7190_v41  ;;  %v4061_v1 = vmul.f32 %v4029_v51, %v4029_v51  ;;  %v4077_v26 = vmul.f32 %v7200_v37, %v7200_v37 }
 0x4c4   : > { %4101 = vmatpush.msra.mxu2 %v4068_v59  ;;  %4121 = vmatpush.msra.mxu3 %v4084_v28 }
 0x4c6   : > { %4102 = vmatpush.msra.mxu2 %v4067_v13  ;;  %4122 = vmatpush.msra.mxu3 %v4083_v46  ;;  %v4191_v13 = vld [vmem:[#allocation7] sm:$0x1] }
 0x4c8   : > { %4103 = vmatpush.msra.mxu2 %v4066_v38  ;;  %4123 = vmatpush.msra.mxu3 %v4082_v49 }
 0x4ca   : > { %4104 = vmatpush.msra.mxu2 %v4065_v23  ;;  %4124 = vmatpush.msra.mxu3 %v4081_v58  ;;  %v7226_v23 = vld [vmem:[#allocation8] ss:$0 sm:$0xff] }
 0x4cc   : > { %4105 = vmatpush.msra.mxu2 %v4064_v12  ;;  %4125 = vmatpush.msra.mxu3 %v4080_v2 }
 0x4ce   : > { %4106 = vmatpush.msra.mxu2 %v4063_v31  ;;  %4126 = vmatpush.msra.mxu3 %v4079_v56 }
 0x4d0   : > { %4107 = vmatpush.msra.mxu2 %v4062_v20  ;;  %4127 = vmatpush.msra.mxu3 %v4078_v17 }
 0x4d2   : > { %4108 = vmatpush.msra.mxu2 %v4061_v1  ;;  %4128 = vmatpush.msra.mxu3 %v4077_v26 }
 0x4d3   : > { %4109 = vmatmul.f32.vlgmr.msra.gmra.mxu2 %v5739_v24  ;;  %4129 = vmatmul.f32.vlgmr.msra.gmra.mxu3 %v5739_v24 }
 0x4d4   : > { %4144 = vmatpush.msrb.mxu3 %v6890_v63 }
 0x4d6   : > { %4145 = vmatpush.msrb.mxu3 %v6895_v45 }
 0x4d8   : > { %4146 = vmatpush.msrb.mxu3 %v6905_v9 }
 0x4da   : > { %4147 = vmatpush.msrb.mxu3 %v6915_v52 }
 0x4dc   : > { %4148 = vmatpush.msrb.mxu3 %v6926_v47 }
 0x4de   : > { %4149 = vmatpush.msrb.mxu3 %v6937_v54 }
 0x4e0   : > { %4150 = vmatpush.msrb.mxu3 %v6999_v36 }
 0x4e2   : > { %4151 = vmatpush.msrb.mxu3 %v7005_v34 }
 0x556   : > { %v4110_v35 = vpop.f32.mrf.mxu2  ;;  %v4130_v55 = vpop.f32.mrf.mxu3 }
 0x557   : > { %v4131_v59 = vadd.f32 %v4130_v55, %v4110_v35 }
 0x559   : > { %5337 = vmatmul.msk.f32.vlgmr.msrb.gmra.mxu3 %vm1311_vm1, %v4131_v59 }
 0x5dc   : > { %v4153_v24 = vpop.f32.mrf.mxu3 }
 0x5dd   : > { %v4156_v63 = vmul.f32 0.001953125, %v4153_v24 }
 0x5df   : > { %v4157_v45 = vadd.f32 1e-05, %v4156_v63 }
 0x5e1   : > { %5590 = vrsqrt.f32 %v4157_v45  ;;  %vm4164_vm4 = vweird.f32 %v4157_v45 }
 0x5e7   : > { %v5591_v9 = vpop.eup %5590 }
 0x5e8   : > { %v4159_v28 = vmul.f32 %v5591_v9, %v4157_v45  ;;  %vm4165_vm3 = vweird.f32 %v5591_v9 }
 0x5e9   : > { %vm4166_vm5 = vmor %vm4164_vm4, %vm4165_vm3 }
 0x5ea   : > { %v4160_v52 = vmul.f32 %v5591_v9, %v4159_v28 }
 0x5ec   : > { %v4161_v40 = vmul.f32 0.5, %v4160_v52 }
 0x5ee   : > { %v4162_v47 = vsub.f32 1.5, %v4161_v40 }
 0x5f0   : > { %v4163_v54 = vmul.f32 %v5591_v9, %v4162_v47 }
 0x5f2   : > { %v4167_v36 = vsel %vm4166_vm5, %v5591_v9, %v4163_v54 }
 0x5f3   : > { %5338 = vmatmul.msk.f32.vlgmr.msrb.gmra.mxu1 %vm4004_vm2, %v4167_v36 }
 0x670   : > { %v4188_v34 = vpop.f32.mrf.mxu1 }
 0x671   : > { %v4192_v46 = vmul.f32 %v4191_v13, %v4188_v34 }
 0x673   : > { %v7220_v50 = vperm.slane %v4192_v46, 0 }
 0x675   : > { %v4194_v38 = vmul.f32 %v7220_v50, %v4029_v51  ;;  %v4195_v49 = vmul.f32 %v7220_v50, %v4030_v4  ;;  %v4196_v44 = vmul.f32 %v7220_v50, %v7174_v3  ;;  %v4197_v58 = vmul.f32 %v7220_v50, %v7162_v22 }
 0x676   : > { %v4198_v60 = vmul.f32 %v7220_v50, %v7150_v48  ;;  %v4199_v12 = vmul.f32 %v7220_v50, %v7138_v10  ;;  %v4200_v2 = vmul.f32 %v7220_v50, %v7126_v16  ;;  %v4201_v51 = vmul.f32 %v7220_v50, %v7114_v33 }
 0x677   : > { %v4230_v30 = vadd.f32 %v7226_v23, %v4194_v38  ;;  %v4231_v4 = vadd.f32 %v7226_v23, %v4195_v49  ;;  %v4232_v3 = vadd.f32 %v7226_v23, %v4196_v44  ;;  %v4233_v22 = vadd.f32 %v7226_v23, %v4197_v58 }
 0x678   : > { %v4202_v48 = vmul.f32 %v7220_v50, %v7102_v43  ;;  %v4234_v10 = vadd.f32 %v7226_v23, %v4198_v60  ;;  %v4203_v16 = vmul.f32 %v7220_v50, %v7090_v5  ;;  %v4204_v31 = vmul.f32 %v7220_v50, %v7078_v0 }
 0x679   : > { %v4235_v56 = vadd.f32 %v7226_v23, %v4199_v12  ;;  %v4236_v20 = vadd.f32 %v7226_v23, %v4200_v2  ;;  %v4262_v17 = vmax.f32 %v4230_v30, 0.0  ;;  %v4263_v33 = vmax.f32 %v4231_v4, 0.0 }
 0x67a   : > { %v4264_v1 = vmax.f32 %v4232_v3, 0.0  ;;  %v4205_v26 = vmul.f32 %v7220_v50, %v7066_v42  ;;  %v4237_v43 = vadd.f32 %v7226_v23, %v4201_v51  ;;  %v4265_v35 = vmax.f32 %v4233_v22, 0.0 }
 0x67b   : > { %v4206_v55 = vmul.f32 %v7220_v50, %v7054_v25  ;;  %v4207_v5 = vmul.f32 %v7220_v50, %v7042_v7  ;;  %v4238_v0 = vadd.f32 %v7226_v23, %v4202_v48  ;;  %v4266_v59 = vmax.f32 %v4234_v10, 0.0 }
 0x67c   : > { %v4208_v42 = vmul.f32 %v7220_v50, %v7030_v29  ;;  %v4239_v24 = vadd.f32 %v7226_v23, %v4203_v16  ;;  %v4240_v25 = vadd.f32 %v7226_v23, %v4204_v31  ;;  %v4267_v63 = vmax.f32 %v4235_v56, 0.0 }
 0x67d   : > { %v4268_v45 = vmax.f32 %v4236_v20, 0.0  ;;  %v4294_v7 = vpack.c.bf16 %v4262_v17, %v4262_v17  ;;  %v4295_v9 = vpack.c.bf16 %v4263_v33, %v4263_v33  ;;  %v4296_v28 = vpack.c.bf16 %v4264_v1, %v4264_v1 }
 0x67e   : > { %v4209_v52 = vmul.f32 %v7220_v50, %v7026_v8  ;;  %v4241_v40 = vadd.f32 %v7226_v23, %v4205_v26  ;;  %v4269_v47 = vmax.f32 %v4237_v43, 0.0  ;;  %v4297_v54 = vpack.c.bf16 %v4265_v35, %v4265_v35 }
 0x67f   : > { %v4210_v29 = vmul.f32 %v7220_v50, %v7200_v37  ;;  %v4242_v36 = vadd.f32 %v7226_v23, %v4206_v55  ;;  %v4270_v34 = vmax.f32 %v4238_v0, 0.0  ;;  %v4298_v13 = vpack.c.bf16 %v4266_v59, %v4266_v59  ;;  %4326 = vst.msk [vmem:[%s7264_s16] sm:$0xf] %vm373_vm0, %v4294_v7 }
 0x680   : > { %v4211_v46 = vmul.f32 %v7220_v50, %v7190_v41  ;;  %v4243_v8 = vadd.f32 %v7226_v23, %v4207_v5  ;;  %v4271_v38 = vmax.f32 %v4239_v24, 0.0  ;;  %v4299_v49 = vpack.c.bf16 %v4267_v63, %v4267_v63  ;;  %4327 = vst.msk [vmem:[%s7264_s16 + $0x4] sm:$0xf] %vm373_vm0, %v4295_v9 }
 0x681   : > { %v4212_v37 = vmul.f32 %v7220_v50, %v7180_v15  ;;  %v4244_v44 = vadd.f32 %v7226_v23, %v4208_v42  ;;  %v4272_v58 = vmax.f32 %v4240_v25, 0.0  ;;  %v4300_v60 = vpack.c.bf16 %v4268_v45, %v4268_v45  ;;  %4328 = vst.msk [vmem:[%s7264_s16 + $0x8] sm:$0xf] %vm373_vm0, %v4296_v28 }
 0x682   : > { %v4213_v41 = vmul.f32 %v7220_v50, %v7168_v39  ;;  %v4245_v12 = vadd.f32 %v7226_v23, %v4209_v52  ;;  %v4273_v2 = vmax.f32 %v4241_v40, 0.0  ;;  %v4301_v30 = vpack.c.bf16 %v4269_v47, %v4269_v47  ;;  %4329 = vst.msk [vmem:[%s7264_s16 + $0xc] sm:$0xf] %vm373_vm0, %v4297_v54 }
 0x683   : > { %v4214_v15 = vmul.f32 %v7220_v50, %v7156_v19  ;;  %v4246_v4 = vadd.f32 %v7226_v23, %v4210_v29  ;;  %v4274_v3 = vmax.f32 %v4242_v36, 0.0  ;;  %v4302_v51 = vpack.c.bf16 %v4270_v34, %v4270_v34  ;;  %4330 = vst.msk [vmem:[%s7264_s16 + $0x10] sm:$0xf] %vm373_vm0, %v4298_v13 }
 0x684   : > { %v4215_v39 = vmul.f32 %v7220_v50, %v7144_v27  ;;  %v4247_v22 = vadd.f32 %v7226_v23, %v4211_v46  ;;  %v4275_v48 = vmax.f32 %v4243_v8, 0.0  ;;  %v4303_v10 = vpack.c.bf16 %v4271_v38, %v4271_v38  ;;  %4331 = vst.msk [vmem:[%s7264_s16 + $0x14] sm:$0xf] %vm373_vm0, %v4299_v49 }
 0x685   : > { %v4216_v19 = vmul.f32 %v7220_v50, %v7132_v62  ;;  %v4248_v16 = vadd.f32 %v7226_v23, %v4212_v37  ;;  %v4276_v31 = vmax.f32 %v4244_v44, 0.0  ;;  %v4304_v56 = vpack.c.bf16 %v4272_v58, %v4272_v58  ;;  %4332 = vst.msk [vmem:[%s7264_s16 + $0x18] sm:$0xf] %vm373_vm0, %v4300_v60 }
 0x686   : > { %v4217_v27 = vmul.f32 %v7220_v50, %v7120_v61  ;;  %v4249_v20 = vadd.f32 %v7226_v23, %v4213_v41  ;;  %v4277_v17 = vmax.f32 %v4245_v12, 0.0  ;;  %v4305_v33 = vpack.c.bf16 %v4273_v2, %v4273_v2  ;;  %4333 = vst.msk [vmem:[%s7264_s16 + $0x1c] sm:$0xf] %vm373_vm0, %v4301_v30 }
 0x687   : > { %v4218_v62 = vmul.f32 %v7220_v50, %v7108_v53  ;;  %v4250_v1 = vadd.f32 %v7226_v23, %v4214_v15  ;;  %v4278_v26 = vmax.f32 %v4246_v4, 0.0  ;;  %v4306_v43 = vpack.c.bf16 %v4274_v3, %v4274_v3  ;;  %4334 = vst.msk [vmem:[%s7264_s16 + $0x20] sm:$0xf] %vm373_vm0, %v4302_v51 }
 0x688   : > { %v4219_v61 = vmul.f32 %v7220_v50, %v7096_v14  ;;  %v4251_v35 = vadd.f32 %v7226_v23, %v4215_v39  ;;  %v4279_v55 = vmax.f32 %v4247_v22, 0.0  ;;  %v4307_v5 = vpack.c.bf16 %v4275_v48, %v4275_v48  ;;  %4335 = vst.msk [vmem:[%s7264_s16 + $0x24] sm:$0xf] %vm373_vm0, %v4303_v10 }
 0x689   : > { %v4220_v53 = vmul.f32 %v7220_v50, %v7084_v6  ;;  %v4252_v0 = vadd.f32 %v7226_v23, %v4216_v19  ;;  %v4280_v59 = vmax.f32 %v4248_v16, 0.0  ;;  %v4308_v42 = vpack.c.bf16 %v4276_v31, %v4276_v31  ;;  %4336 = vst.msk [vmem:[%s7264_s16 + $0x28] sm:$0xf] %vm373_vm0, %v4304_v56 }
 0x68a   : > { %v4221_v14 = vmul.f32 %v7220_v50, %v7072_v21  ;;  %v4253_v24 = vadd.f32 %v7226_v23, %v4217_v27  ;;  %v4281_v25 = vmax.f32 %v4249_v20, 0.0  ;;  %v4309_v63 = vpack.c.bf16 %v4277_v17, %v4277_v17  ;;  %4337 = vst.msk [vmem:[%s7264_s16 + $0x2c] sm:$0xf] %vm373_vm0, %v4305_v33 }
 0x68b   : > { %v4222_v6 = vmul.f32 %v7220_v50, %v7060_v32  ;;  %v4254_v45 = vadd.f32 %v7226_v23, %v4218_v62  ;;  %v4282_v7 = vmax.f32 %v4250_v1, 0.0  ;;  %v4310_v9 = vpack.c.bf16 %v4278_v26, %v4278_v26  ;;  %4338 = vst.msk [vmem:[%s7264_s16 + $0x30] sm:$0xf] %vm373_vm0, %v4306_v43 }
 0x68c   : > { %v4223_v21 = vmul.f32 %v7220_v50, %v7048_v57  ;;  %v4255_v28 = vadd.f32 %v7226_v23, %v4219_v61  ;;  %v4283_v52 = vmax.f32 %v4251_v35, 0.0  ;;  %v4311_v40 = vpack.c.bf16 %v4279_v55, %v4279_v55  ;;  %4339 = vst.msk [vmem:[%s7264_s16 + $0x34] sm:$0xf] %vm373_vm0, %v4307_v5 }
 0x68d   : > { %v4224_v32 = vmul.f32 %v7220_v50, %v7034_v18  ;;  %v4256_v47 = vadd.f32 %v7226_v23, %v4220_v53  ;;  %v4284_v54 = vmax.f32 %v4252_v0, 0.0  ;;  %v4312_v29 = vpack.c.bf16 %v4280_v59, %v4280_v59  ;;  %4340 = vst.msk [vmem:[%s7264_s16 + $0x38] sm:$0xf] %vm373_vm0, %v4308_v42 }
 0x68e   : > { %v4225_v57 = vmul.f32 %v7220_v50, %v7038_v11  ;;  %v4257_v36 = vadd.f32 %v7226_v23, %v4221_v14  ;;  %v4285_v34 = vmax.f32 %v4253_v24, 0.0  ;;  %v4313_v13 = vpack.c.bf16 %v4281_v25, %v4281_v25  ;;  %4341 = vst.msk [vmem:[%s7264_s16 + $0x3c] sm:$0xf] %vm373_vm0, %v4309_v63 }
 0x68f   : > { %v4258_v18 = vadd.f32 %v7226_v23, %v4222_v6  ;;  %v4286_v46 = vmax.f32 %v4254_v45, 0.0  ;;  %v4314_v8 = vpack.c.bf16 %v4282_v7, %v4282_v7  ;;  %4342 = vst.msk [vmem:[%s7264_s16 + $0x40] sm:$0xf] %vm373_vm0, %v4310_v9  ;;  %v4259_v38 = vadd.f32 %v7226_v23, %v4223_v21 }
 0x690   : > { %v4287_v49 = vmax.f32 %v4255_v28, 0.0  ;;  %v4315_v11 = vpack.c.bf16 %v4283_v52, %v4283_v52  ;;  %4343 = vst.msk [vmem:[%s7264_s16 + $0x44] sm:$0xf] %vm373_vm0, %v4311_v40  ;;  %v4260_v50 = vadd.f32 %v7226_v23, %v4224_v32  ;;  %v4288_v37 = vmax.f32 %v4256_v47, 0.0 }
 0x691   : > { %v4316_v44 = vpack.c.bf16 %v4284_v54, %v4284_v54  ;;  %4344 = vst.msk [vmem:[%s7264_s16 + $0x48] sm:$0xf] %vm373_vm0, %v4312_v29  ;;  %v4261_v58 = vadd.f32 %v7226_v23, %v4225_v57  ;;  %v4289_v60 = vmax.f32 %v4257_v36, 0.0  ;;  %v4317_v41 = vpack.c.bf16 %v4285_v34, %v4285_v34 }
 0x692   : > { %4345 = vst.msk [vmem:[%s7264_s16 + $0x4c] sm:$0xf] %vm373_vm0, %v4313_v13  ;;  %v4290_v12 = vmax.f32 %v4258_v18, 0.0  ;;  %v4318_v2 = vpack.c.bf16 %v4286_v46, %v4286_v46  ;;  %v4291_v30 = vmax.f32 %v4259_v38, 0.0  ;;  %v4319_v15 = vpack.c.bf16 %v4287_v49, %v4287_v49 }
 0x693   : > { %4346 = vst.msk [vmem:[%s7264_s16 + $0x50] sm:$0xf] %vm373_vm0, %v4314_v8  ;;  %v4292_v4 = vmax.f32 %v4260_v50, 0.0  ;;  %v4320_v23 = vpack.c.bf16 %v4288_v37, %v4288_v37  ;;  %v4293_v3 = vmax.f32 %v4261_v58, 0.0  ;;  %v4321_v51 = vpack.c.bf16 %v4289_v60, %v4289_v60 }
 0x694   : > { %4347 = vst.msk [vmem:[%s7264_s16 + $0x54] sm:$0xf] %vm373_vm0, %v4315_v11  ;;  %v4322_v39 = vpack.c.bf16 %v4290_v12, %v4290_v12  ;;  %v4323_v22 = vpack.c.bf16 %v4291_v30, %v4291_v30 }
 0x695   : > { %4348 = vst.msk [vmem:[%s7264_s16 + $0x58] sm:$0xf] %vm373_vm0, %v4316_v44  ;;  %v4324_v48 = vpack.c.bf16 %v4292_v4, %v4292_v4  ;;  %v4325_v10 = vpack.c.bf16 %v4293_v3, %v4293_v3 }
 0x696   : > { %4349 = vst.msk [vmem:[%s7264_s16 + $0x5c] sm:$0xf] %vm373_vm0, %v4317_v41 }
 0x697   : > { %4350 = vst.msk [vmem:[%s7264_s16 + $0x60] sm:$0xf] %vm373_vm0, %v4318_v2 }
 0x698   : > { %4351 = vst.msk [vmem:[%s7264_s16 + $0x64] sm:$0xf] %vm373_vm0, %v4319_v15 }
 0x699   : > { %4352 = vst.msk [vmem:[%s7264_s16 + $0x68] sm:$0xf] %vm373_vm0, %v4320_v23 }
 0x69a   : > { %4353 = vst.msk [vmem:[%s7264_s16 + $0x6c] sm:$0xf] %vm373_vm0, %v4321_v51 }
 0x69b   : > { %4354 = vst.msk [vmem:[%s7264_s16 + $0x70] sm:$0xf] %vm373_vm0, %v4322_v39 }
 0x69c   : > { %4355 = vst.msk [vmem:[%s7264_s16 + $0x74] sm:$0xf] %vm373_vm0, %v4323_v22 }
 0x69d   : > { %4356 = vst.msk [vmem:[%s7264_s16 + $0x78] sm:$0xf] %vm373_vm0, %v4324_v48 }
 0x69e   : > { %4357 = vst.msk [vmem:[%s7264_s16 + $0x7c] sm:$0xf] %vm373_vm0, %v4325_v10 }
 0x69f PF: > { %s20_s24 = sadd.s32 1, %s5730_s24  }
 0x6a0   : > { %p17_p7 = scmp.ge.s32.totalorder %s20_s24, 4  }
 0x6a2   :  { %19 = sbr.rel (!%p17_p7) target bundleno = 3 (0x3), region = 112 }
 0x6a7   :  { %4379 = vsyncpa [#allocation4], 1 }
 0x6a8   :  { %4381 = vsyncpa [#allocation4 + $0x1], 1 }
 0x6a9   :  { %4382 = vsyncpa [#allocation6], 1 }
 0x6aa   :  { %4383 = vsyncpa [#allocation9], 1 }

// kernel: regression_model_forward.9
= control target key start
LH: loop header
LB: loop body
LE: loop exit
PB: predicated region body
PF: predicated region fallthrough
CT: control target
= control target key end

     0   :  { %s5018_s12 = smov 0   ;;  %s6101_s0 = inlined_call_operand.vmem [shape: bf16[2,16,16,64], index: 0, kind: input, shape index: {}]   ;;  %s6102_s1 = inlined_call_operand.vmem [shape: bf16[9,64,128], index: 1, kind: input, shape index: {}]   ;;  %s6103_s2 = inlined_call_operand.vmem [shape: f32[1,128], index: 2, kind: input, shape index: {}]   ;;  %s6104_s3 = inlined_call_operand.vmem [shape: f32[2,16,16,128], index: 3, kind: output, shape index: {}]  }
   0x1 LB: > { %s3846_s13 = sadd.s32 4294967295, %s4995_s12   ;;  %p3850_p0 = scmp.ge.s32.totalorder %s4995_s12, 1  ;;  %s4995_s12 = sphi %s5018_s12, %s13_s12  }
   0x2   : > { %p137_p1 = scmp.lt.s32.totalorder %s4995_s12, 3 }
   0x4   : > { %p138_p2 = pnand %p3850_p0, %p137_p1 }
   0x6   : > { %141 = sbr.rel (%p138_p2) target bundleno = 739 (0x2e3), region = 32 }
   0xb   : > { %v4826_v0 = vld [vmem:[%s6102_s1 + $0x38] sm:$0xff]  ;;  %p161_p3 = scmp.lt.s32.totalorder %s3846_s13, 1  ;;  %vm204_vm0 = vcmask 519168   ;;  %v4825_v1 = vld [vmem:[%s6102_s1 + $0x30] sm:$0xff]  ;;  %v4997_v2 = vmov 0   ;;  %v4824_v3 = vld [vmem:[%s6102_s1 + $0x28] sm:$0xff] }
   0xc   : > { %4967 = vmatpush.bf16.msra.mxu1 %v4826_v0  ;;  %4968 = vmatpush.bf16.msra.mxu2 %v4826_v0  ;;  %207 = vst.msk [vmem:[#allocation2 + $0x90] sm:$0xf] %vm204_vm0, %v4997_v2  ;;  %v4823_v8 = vld [vmem:[%s6102_s1 + $0x20] sm:$0xff]  ;;  %v4846_v11 = vld [vmem:[%s6102_s1 + $0x58] sm:$0xff]  ;;  %vm1142_vm1 = vcmask 523264   ;;  %v4845_v17 = vld [vmem:[%s6102_s1 + $0x50] sm:$0xff] }
   0xd   : > { %s6134_s13 = smov (!%p161_p3, %s3846_s13), 1  ;;  %4969 = vmatpush.bf16.msra.mxu3 %v4826_v0  ;;  %1195 = vmatpush.bf16.msra.mxu0 %v4826_v0  ;;  %208 = vst.msk [vmem:[#allocation2 + $0x94] sm:$0xf] %vm204_vm0, %v4997_v2  ;;  %v4866_v12 = vld [vmem:[%s6102_s1 + $0x78] sm:$0xff]  ;;  %v4865_v18 = vld [vmem:[%s6102_s1 + $0x70] sm:$0xff]  ;;  %v4844_v26 = vld [vmem:[%s6102_s1 + $0x48] sm:$0xff] }
   0xe   : > { %s4785_s18 = sshll.u32 %s6134_s13, 7  ;;  %205 = vst.msk [vmem:[#allocation2] sm:$0xf] %vm204_vm0, %v4997_v2  ;;  %v4806_v14 = vld [vmem:[%s6102_s1 + $0x18] sm:$0xff]  ;;  %v4805_v20 = vld [vmem:[%s6102_s1 + $0x10] sm:$0xff]  ;;  %v4864_v31 = vld [vmem:[%s6102_s1 + $0x68] sm:$0xff] }
   0xf   : > { %s5047_s23 = scalar_lea.vmem %s6101_s0, %s4785_s18  ;;  %206 = vst.msk [vmem:[#allocation2 + $0x4] sm:$0xf] %vm204_vm0, %v4997_v2  ;;  %v4886_v16 = vld [vmem:[%s6102_s1 + $0x98] sm:$0xff]  ;;  %v4885_v21 = vld [vmem:[%s6102_s1 + $0x90] sm:$0xff]  ;;  %v4804_v33 = vld [vmem:[%s6102_s1 + $0x8] sm:$0xff]  ;;  %vm219_vm2 = vcmask 516096  }
  0x10   : > { %4970 = vmatpush.bf16.msra.mxu1 %v4825_v1  ;;  %4971 = vmatpush.bf16.msra.mxu2 %v4825_v1  ;;  %v5052_v4 = vld [vmem:[%s5047_s23 + $0x18] sm:$0xf]  ;;  %v5055_v5 = vld [vmem:[%s5047_s23 + $0x1c] sm:$0xf]  ;;  %209 = vst.msk [vmem:[#allocation2 + $0x120] sm:$0xf] %vm204_vm0, %v4997_v2 }
  0x11   : > { %v5058_v6 = vld [vmem:[%s5047_s23 + $0x38] sm:$0xf]  ;;  %4972 = vmatpush.bf16.msra.mxu3 %v4825_v1  ;;  %1196 = vmatpush.bf16.msra.mxu0 %v4825_v1  ;;  %686 = vst.msk [vmem:[#allocation2 + $0xb0] sm:$0xf] %vm204_vm0, %v5052_v4  ;;  %v5065_v7 = vld [vmem:[%s5047_s23 + $0x3c] sm:$0xf] }
  0x12   : > { %687 = vst.msk [vmem:[#allocation2 + $0xb4] sm:$0xf] %vm204_vm0, %v5055_v5  ;;  %v5075_v9 = vld [vmem:[%s5047_s23 + $0x58] sm:$0xf]  ;;  %v5078_v10 = vld [vmem:[%s5047_s23 + $0x5c] sm:$0xf] }
  0x13   : > { %694 = vst.msk [vmem:[#allocation2 + $0xd0] sm:$0xf] %vm204_vm0, %v5058_v6  ;;  %v5124_v23 = vld [vmem:[%s5047_s23 + $0x20] sm:$0xf]  ;;  %v5129_v24 = vld [vmem:[%s5047_s23 + $0x24] sm:$0xf] }
  0x14   : > { %4973 = vmatpush.bf16.msra.mxu1 %v4824_v3  ;;  %4974 = vmatpush.bf16.msra.mxu2 %v4824_v3  ;;  %695 = vst.msk [vmem:[#allocation2 + $0xd4] sm:$0xf] %vm204_vm0, %v5065_v7  ;;  %v4807_v13 = vld [vmem:[#allocation2 + $0x90] sm:$0xff]  ;;  %v5135_v25 = vld [vmem:[%s5047_s23 + $0x40] sm:$0xf]  ;;  %v4884_v34 = vld [vmem:[%s6102_s1 + $0x88] sm:$0xff] }
  0x15   : > { %4975 = vmatpush.bf16.msra.mxu3 %v4824_v3  ;;  %1197 = vmatpush.bf16.msra.mxu0 %v4824_v3  ;;  %702 = vst.msk [vmem:[#allocation2 + $0xf0] sm:$0xf] %vm204_vm0, %v5075_v9  ;;  %v5143_v27 = vld [vmem:[%s5047_s23 + $0x44] sm:$0xf]  ;;  %v5148_v28 = vld [vmem:[%s5047_s23 + $0x60] sm:$0xf] }
  0x16   : > { %703 = vst.msk [vmem:[#allocation2 + $0xf4] sm:$0xf] %vm204_vm0, %v5078_v10  ;;  %v5153_v29 = vld [vmem:[%s5047_s23 + $0x64] sm:$0xf]  ;;  %v5158_v30 = vld [vmem:[%s5047_s23] sm:$0xf] }
  0x17   : > { %210 = vst.msk [vmem:[#allocation2 + $0x124] sm:$0xf] %vm204_vm0, %v4997_v2  ;;  %v5168_v32 = vld [vmem:[%s5047_s23 + $0x4] sm:$0xf]  ;;  %v5181_v36 = vld [vmem:[%s5047_s23 + $0x28] sm:$0xf] }
  0x18   : > { %4976 = vmatpush.bf16.msra.mxu1 %v4823_v8  ;;  %4977 = vmatpush.bf16.msra.mxu2 %v4823_v8  ;;  %212 = vst.msk [vmem:[#allocation2 + $0x88] sm:$0xf] %vm204_vm0, %v4997_v2  ;;  %v5184_v37 = vld [vmem:[%s5047_s23 + $0x2c] sm:$0xf]  ;;  %v5193_v40 = vld [vmem:[%s5047_s23 + $0x48] sm:$0xf] }
  0x19   : > { %4978 = vmatpush.bf16.msra.mxu3 %v4823_v8  ;;  %1198 = vmatpush.bf16.msra.mxu0 %v4823_v8  ;;  %v4811_v15 = vld [vmem:[#allocation2 + $0xb0] sm:$0xff]  ;;  %213 = vst.msk [vmem:[#allocation2 + $0x8c] sm:$0xf] %vm204_vm0, %v4997_v2  ;;  %v5196_v42 = vld [vmem:[%s5047_s23 + $0x4c] sm:$0xf]  ;;  %v4843_v46 = vld [vmem:[%s6102_s1 + $0x40] sm:$0xff] }
  0x1a   : > { %214 = vst.msk [vmem:[#allocation2 + $0x118] sm:$0xf] %vm204_vm0, %v4997_v2  ;;  %v5202_v43 = vld [vmem:[%s5047_s23 + $0x68] sm:$0xf]  ;;  %v5208_v44 = vld [vmem:[%s5047_s23 + $0x6c] sm:$0xf] }
  0x1b   : > { %3947 = vmatmul.msk.bf16.vlgmr.msra.gmra.mxu1 %vm1142_vm1, %v4811_v15  ;;  %v4815_v19 = vld [vmem:[#allocation2 + $0xd0] sm:$0xff]  ;;  %215 = vst.msk [vmem:[#allocation2 + $0x11c] sm:$0xf] %vm204_vm0, %v4997_v2  ;;  %v5213_v45 = vld [vmem:[%s5047_s23 + $0x8] sm:$0xf]  ;;  %v4863_v48 = vld [vmem:[%s6102_s1 + $0x60] sm:$0xff] }
  0x1c   : > { %1719 = vmatpush.bf16.msrb.mxu2 %v4846_v11  ;;  %3943 = vmatmul.msk.bf16.vlgmr.msra.gmra.mxu0 %vm1142_vm1, %v4807_v13  ;;  %216 = vst.msk [vmem:[#allocation2 + $0x1a8] sm:$0xf] %vm204_vm0, %v4997_v2  ;;  %v5221_v47 = vld [vmem:[%s5047_s23 + $0xc] sm:$0xf]  ;;  %v4803_v50 = vld [vmem:[%s6102_s1] sm:$0xff]  ;;  %v325_v59 = vshrl.u32 %v5158_v30, 16 }
  0x1d   : > { %2033 = vmatpush.bf16.msrb.mxu3 %v4866_v12  ;;  %1436 = vmatpush.bf16.msrb.mxu1 %v4806_v14  ;;  %v4819_v22 = vld [vmem:[#allocation2 + $0xf0] sm:$0xff]  ;;  %217 = vst.msk [vmem:[#allocation2 + $0x1ac] sm:$0xf] %vm204_vm0, %v4997_v2  ;;  %v4883_v55 = vld [vmem:[%s6102_s1 + $0x80] sm:$0xff]  ;;  %v328_v60 = vshll.u32 %v5158_v30, 16  ;;  %v333_v61 = vshrl.u32 %v5168_v32, 16 }
  0x1e   : > { %3951 = vmatmul.msk.bf16.vlgmr.msra.gmra.mxu2 %vm1142_vm1, %v4815_v19  ;;  %2347 = vmatpush.bf16.msrb.mxu0 %v4886_v16  ;;  %688 = vst.msk [vmem:[#allocation2 + $0xb8] sm:$0xf] %vm204_vm0, %v5124_v23  ;;  %v5234_v51 = vld [vmem:[%s5047_s23 + $0x30] sm:$0xf]  ;;  %v5237_v52 = vld [vmem:[%s5047_s23 + $0x34] sm:$0xf] }
  0x1f   : > { %3955 = vmatmul.msk.bf16.vlgmr.msra.gmra.mxu3 %vm1142_vm1, %v4819_v22  ;;  %689 = vst.msk [vmem:[#allocation2 + $0xbc] sm:$0xf] %vm204_vm0, %v5129_v24  ;;  %v5245_v54 = vld [vmem:[%s5047_s23 + $0x50] sm:$0xf]  ;;  %v5251_v57 = vld [vmem:[%s5047_s23 + $0x54] sm:$0xf] }
  0x20   : > { %1720 = vmatpush.bf16.msrb.mxu2 %v4845_v17  ;;  %696 = vst.msk [vmem:[#allocation2 + $0xd8] sm:$0xf] %vm204_vm0, %v5135_v25  ;;  %v5262_v62 = vld [vmem:[%s5047_s23 + $0x70] sm:$0xf]  ;;  %v5266_v63 = vld [vmem:[%s5047_s23 + $0x74] sm:$0xf] }
  0x21   : > { %2034 = vmatpush.bf16.msrb.mxu3 %v4865_v18  ;;  %1437 = vmatpush.bf16.msrb.mxu1 %v4805_v20  ;;  %697 = vst.msk [vmem:[#allocation2 + $0xdc] sm:$0xf] %vm204_vm0, %v5143_v27  ;;  %v715_v0 = vrot.slane %v325_v59, 4  ;;  %v716_v1 = vrot.slane %v328_v60, 5  ;;  %v349_v2 = vshrl.u32 %v5221_v47, 16  ;;  %v4926_v3 = vld [vmem:[%s6102_s1 + $0xd8] sm:$0xff] }
  0x22   : > { %2348 = vmatpush.bf16.msrb.mxu0 %v4885_v21  ;;  %704 = vst.msk [vmem:[#allocation2 + $0xf8] sm:$0xf] %vm204_vm0, %v5148_v28  ;;  %v336_v8 = vshll.u32 %v5168_v32, 16  ;;  %v327_v11 = vrot.slane %v325_v59, 7  ;;  %v335_v12 = vrot.slane %v333_v61, 7  ;;  %v341_v13 = vshrl.u32 %v5213_v45, 16 }
  0x23   : > { %705 = vst.msk [vmem:[#allocation2 + $0xfc] sm:$0xf] %vm204_vm0, %v5153_v29  ;;  %v5280_v14 = vld [vmem:[%s5047_s23 + $0x10] sm:$0xf]  ;;  %v4946_v15 = vld [vmem:[%s6102_s1 + $0xf8] sm:$0xff]  ;;  %v351_v18 = vrot.slane %v349_v2, 7  ;;  %v717_v21 = vor.u32 %v716_v1, %v715_v0 }
  0x24   : > { %1721 = vmatpush.bf16.msrb.mxu2 %v4844_v26  ;;  %680 = vst.msk [vmem:[#allocation2 + $0x98] sm:$0xf] %vm204_vm0, %v5158_v30  ;;  %v5286_v16 = vld [vmem:[%s5047_s23 + $0x14] sm:$0xf]  ;;  %v4906_v17 = vld [vmem:[%s6102_s1 + $0xb8] sm:$0xff]  ;;  %v352_v19 = vshll.u32 %v5221_v47, 16  ;;  %v338_v30 = vor.u32 %v336_v8, %v335_v12  ;;  %v330_v59 = vor.u32 %v328_v60, %v327_v11 }
  0x25   : > { %2035 = vmatpush.bf16.msrb.mxu3 %v4864_v31  ;;  %681 = vst.msk [vmem:[#allocation2 + $0x9c] sm:$0xf] %vm204_vm0, %v5168_v32  ;;  %1438 = vmatpush.bf16.msrb.mxu1 %v4804_v33  ;;  %v4966_v20 = vld [vmem:[%s6102_s1 + $0x118] sm:$0xff]  ;;  %v5299_v22 = vrot.slane %v333_v61, 4  ;;  %vm220_vm3 = vsmask.f32 256 }
  0x26   : > { %v4812_v35 = vld [vmem:[#allocation2 + $0xb8] sm:$0xff]  ;;  %2349 = vmatpush.bf16.msrb.mxu0 %v4884_v34  ;;  %690 = vst.msk [vmem:[#allocation2 + $0xc0] sm:$0xf] %vm204_vm0, %v5181_v36  ;;  %v331_v26 = vrot.slane %v327_v11, 4  ;;  %v343_v31 = vrot.slane %v341_v13, 7  ;;  %v344_v32 = vshll.u32 %v5213_v45, 16  ;;  %vm5306_vm4 = vmand %vm219_vm2, %vm220_vm3 }
  0x27   : > { %691 = vst.msk [vmem:[#allocation2 + $0xc4] sm:$0xf] %vm204_vm0, %v5184_v37  ;;  %vm322_vm5 = vsmask.f32 4368  ;;  %vm271_vm6 = vcmask 519171   ;;  %v724_v12 = vrot.slane %v341_v13, 4 }
  0x28   : > { %v4816_v38 = vld [vmem:[#allocation2 + $0xd8] sm:$0xff]  ;;  %698 = vst.msk [vmem:[#allocation2 + $0xe0] sm:$0xf] %vm204_vm0, %v5193_v40  ;;  %1722 = vmatpush.bf16.msrb.mxu2 %v4843_v46  ;;  %vm5317_vm7 = vmor %vm220_vm3, %vm322_vm5  ;;  %vm613_vm8 = vsmask.f32 7938  ;;  %v730_v13 = vrot.slane %v349_v2, 4 }
  0x29   : > { %699 = vst.msk [vmem:[#allocation2 + $0xe4] sm:$0xf] %vm204_vm0, %v5196_v42  ;;  %2036 = vmatpush.bf16.msrb.mxu3 %v4863_v48  ;;  %1439 = vmatpush.bf16.msrb.mxu1 %v4803_v50  ;;  %v274_v48 = vld [vmem:[#allocation2 + $0x12c] sm:$0x8]  ;;  %vm272_vm9 = vsmask.f32 7950  ;;  %vm5347_vm14 = vmand %vm204_vm0, %vm613_vm8 }
  0x2a   : > { %v4820_v39 = vld [vmem:[#allocation2 + $0xf8] sm:$0xff]  ;;  %706 = vst.msk [vmem:[#allocation2 + $0x100] sm:$0xf] %vm204_vm0, %v5202_v43  ;;  %2350 = vmatpush.bf16.msrb.mxu0 %v4883_v55  ;;  %vm712_vm10 = vsmask.f32 3328  ;;  %v719_v55 = vrot.slane %v336_v8, 5  ;;  %vm5326_vm12 = vmand %vm271_vm6, %vm272_vm9 }
  0x2b   : > { %3948 = vmatmul.msk.bf16.gmra.mxu1 %vm1142_vm1, %v4812_v35  ;;  %707 = vst.msk [vmem:[#allocation2 + $0x104] sm:$0xf] %vm204_vm0, %v5208_v44  ;;  %v222_v35 = vld [vmem:[#allocation2 + $0x8] sm:$0x1]  ;;  %vm713_vm11 = vsmask.f32 7440  ;;  %vm5374_vm15 = vmand %vm204_vm0, %vm712_vm10 }
  0x2c   : > { %v4808_v41 = vld [vmem:[#allocation2 + $0x98] sm:$0xff]  ;;  %682 = vst.msk [vmem:[#allocation2 + $0xa0] sm:$0xf] %vm204_vm0, %v5213_v45  ;;  %2976 = vmatpush.bf16.msra.mxu2 %v4926_v3  ;;  %v223_v46 = vsel %vm5306_vm4, 0, %v222_v35  ;;  %v718_v45 = vrot.slane %v717_v21, 4  ;;  %v275_v60 = vsel %vm5326_vm12, 0, %v274_v48  ;;  %vm5337_vm13 = vmor %vm712_vm10, %vm713_vm11  ;;  %v722_v21 = vor.u32 %v5299_v22, %v719_v55 }
  0x2d   : > { %3944 = vmatmul.msk.bf16.gmra.mxu0 %vm1142_vm1, %v4808_v41  ;;  %683 = vst.msk [vmem:[#allocation2 + $0xa4] sm:$0xf] %vm204_vm0, %v5221_v47  ;;  %3291 = vmatpush.bf16.msra.mxu3 %v4946_v15  ;;  %v365_v41 = vshrl.u32 %v5286_v16, 16  ;;  %v277_v3 = vld [vmem:[#allocation2 + $0x134] sm:$0x8]  ;;  %v725_v15 = vrot.slane %v344_v32, 5  ;;  %v346_v48 = vor.u32 %v344_v32, %v343_v31 }
  0x2e   : > { %3952 = vmatmul.msk.bf16.gmra.mxu2 %vm1142_vm1, %v4816_v38  ;;  %v4813_v49 = vld [vmem:[#allocation2 + $0xc0] sm:$0xff]  ;;  %692 = vst.msk [vmem:[#allocation2 + $0xc8] sm:$0xf] %vm204_vm0, %v5234_v51  ;;  %2661 = vmatpush.bf16.msra.mxu1 %v4906_v17  ;;  %v368_v35 = vshll.u32 %v5286_v16, 16  ;;  %v728_v22 = vrot.slane %v352_v19, 5 }
  0x2f   : > { %3956 = vmatmul.msk.bf16.gmra.mxu3 %vm1142_vm1, %v4820_v39  ;;  %693 = vst.msk [vmem:[#allocation2 + $0xcc] sm:$0xf] %vm204_vm0, %v5237_v52  ;;  %3606 = vmatpush.bf16.msra.mxu0 %v4966_v20  ;;  %v357_v39 = vshrl.u32 %v5280_v14, 16  ;;  %v720_v20 = vsel %vm5337_vm13, %v718_v45, %v719_v55  ;;  %v367_v2 = vrot.slane %v365_v41, 7 }
  0x30   : > { %v4817_v53 = vld [vmem:[#allocation2 + $0xe0] sm:$0xff]  ;;  %700 = vst.msk [vmem:[#allocation2 + $0xe8] sm:$0xf] %vm204_vm0, %v5245_v54  ;;  %v731_v55 = vor.u32 %v730_v13, %v728_v22 }
  0x31   : > { %701 = vst.msk [vmem:[#allocation2 + $0xec] sm:$0xf] %vm204_vm0, %v5251_v57  ;;  %v4827_v13 = vld [vmem:[#allocation2 + $0x120] sm:$0xff] }
  0x32   : > { %v4821_v56 = vld [vmem:[#allocation2 + $0x100] sm:$0xff]  ;;  %708 = vst.msk [vmem:[#allocation2 + $0x108] sm:$0xf] %vm204_vm0, %v5262_v62 }
  0x33   : > { %709 = vst.msk [vmem:[#allocation2 + $0x10c] sm:$0xf] %vm204_vm0, %v5266_v63  ;;  %v4880_v50 = vld [vmem:[#allocation2 + $0x100] sm:$0xff] }
  0x34   : > { %v4809_v58 = vld [vmem:[#allocation2 + $0xa0] sm:$0xff]  ;;  %684 = vst.msk [vmem:[#allocation2 + $0xa8] sm:$0xf] %vm204_vm0, %v5280_v14 }
  0x35   : > { %685 = vst.msk [vmem:[#allocation2 + $0xac] sm:$0xf] %vm204_vm0, %v5286_v16 }
  0x36   : > { %v4814_v33 = vld [vmem:[#allocation2 + $0xc8] sm:$0xff]  ;;  %224 = vst [vmem:[#allocation2 + $0x8] sm:$0x1] %v223_v46 }
  0x37   : > { %276 = vst [vmem:[#allocation2 + $0x12c] sm:$0x8] %v275_v60  ;;  %v4787_v60 = vld [vmem:[#allocation2] sm:$0xff] }
  0x38   : > { %v4818_v38 = vld [vmem:[#allocation2 + $0xe8] sm:$0xff]  ;;  %891 = vst.msk [vmem:[#allocation2 + $0x128] sm:$0xf] %vm204_vm0, %v720_v20 }
  0x3a   : > { %v4822_v61 = vld [vmem:[#allocation2 + $0x108] sm:$0xff] }
  0x3b   : > { %3949 = vmatmul.msk.bf16.gmra.mxu1 %vm1142_vm1, %v4813_v49  ;;  %v354_v49 = vor.u32 %v352_v19, %v351_v18 }
  0x3c   : > { %v4810_v8 = vld [vmem:[#allocation2 + $0xa8] sm:$0xff] }
  0x3d   : > { %3945 = vmatmul.msk.bf16.gmra.mxu0 %vm1142_vm1, %v4809_v58  ;;  %v347_v58 = vrot.slane %v343_v31, 4 }
  0x3e   : > { %3953 = vmatmul.msk.bf16.gmra.mxu2 %vm1142_vm1, %v4817_v53  ;;  %v339_v53 = vsel %vm5317_vm7, %v331_v26, %v338_v30  ;;  %v278_v26 = vsel %vm5326_vm12, 0, %v277_v3  ;;  %v228_v30 = vld [vmem:[#allocation2 + $0x18] sm:$0x1] }
  0x3f   : > { %3957 = vmatmul.msk.bf16.gmra.mxu3 %vm1142_vm1, %v4821_v56  ;;  %v225_v56 = vld [vmem:[#allocation2 + $0x10] sm:$0x1]  ;;  %618 = vst.msk [vmem:[#allocation2 + $0xc] sm:$0xf] %vm204_vm0, %v339_v53  ;;  %v355_v17 = vsel %vm5317_vm7, %v347_v58, %v354_v49  ;;  %v229_v46 = vsel %vm5306_vm4, 0, %v228_v30  ;;  %v723_v49 = vrot.slane %v722_v21, 4  ;;  %v726_v53 = vor.u32 %v725_v15, %v724_v12 }
  0x40   : > { %v226_v1 = vsel %vm5306_vm4, 0, %v225_v56  ;;  %622 = vst.msk [vmem:[#allocation2 + $0x14] sm:$0xf] %vm204_vm0, %v355_v17  ;;  %v360_v56 = vshll.u32 %v5280_v14, 16  ;;  %v370_v58 = vor.u32 %v368_v35, %v367_v2  ;;  %v381_v30 = vshrl.u32 %v5055_v5, 16 }
  0x41   : > { %227 = vst [vmem:[#allocation2 + $0x10] sm:$0x1] %v226_v1  ;;  %v727_v31 = vrot.slane %v726_v53, 4  ;;  %v732_v1 = vrot.slane %v731_v55, 4  ;;  %v739_v55 = vrot.slane %v365_v41, 4 }
  0x42   : > { %279 = vst [vmem:[#allocation2 + $0x134] sm:$0x8] %v278_v26  ;;  %v373_v26 = vshrl.u32 %v5052_v4, 16  ;;  %v734_v53 = vrot.slane %v360_v56, 5 }
  0x43   : > { %230 = vst [vmem:[#allocation2 + $0x18] sm:$0x1] %v229_v46  ;;  %v729_v12 = vsel %vm5337_vm13, %v727_v31, %v728_v22  ;;  %v231_v22 = vld [vmem:[#allocation2 + $0x20] sm:$0x1]  ;;  %v4867_v46 = vld [vmem:[#allocation2 + $0x98] sm:$0xff]  ;;  %v376_v31 = vshll.u32 %v5052_v4, 16 }
  0x44   : > { %896 = vst.msk [vmem:[#allocation2 + $0x130] sm:$0xf] %vm204_vm0, %v729_v12 }
  0x48   : > { %v619_v19 = vld [vmem:[#allocation2 + $0x10] sm:$0xf] }
  0x49   : > { %v897_v17 = vld [vmem:[#allocation2 + $0x134] sm:$0xf] }
  0x4a   : > { %v898_v20 = vsel %vm5374_vm15, %v732_v1, %v897_v17  ;;  %v623_v21 = vld [vmem:[#allocation2 + $0x18] sm:$0xf]  ;;  %v389_v17 = vshrl.u32 %v5124_v23, 16 }
  0x4b   : > { %3950 = vmatmul.msk.bf16.gmra.mxu1 %vm1142_vm1, %v4814_v33  ;;  %v359_v33 = vrot.slane %v357_v39, 7  ;;  %899 = vst [vmem:[#allocation2 + $0x134] sm:$0xf] %v898_v20 }
  0x4d   : > { %3946 = vmatmul.msk.bf16.gmra.mxu0 %vm1142_vm1, %v4810_v8  ;;  %v363_v32 = vrot.slane %v359_v33, 4  ;;  %v362_v8 = vor.u32 %v360_v56, %v359_v33 }
  0x4e   : > { %3954 = vmatmul.msk.bf16.gmra.mxu2 %vm1142_vm1, %v4818_v38  ;;  %v615_v38 = vld [vmem:[#allocation2 + $0x8] sm:$0xf] }
  0x4f   : > { %3958 = vmatmul.msk.bf16.gmra.mxu3 %vm1142_vm1, %v4822_v61  ;;  %v616_v45 = vsel %vm5347_vm14, %v330_v59, %v615_v38  ;;  %v893_v61 = vld [vmem:[#allocation2 + $0x12c] sm:$0xf]  ;;  %v620_v59 = vsel %vm5347_vm14, %v346_v48, %v619_v19  ;;  %v371_v15 = vsel %vm5317_vm7, %v363_v32, %v370_v58  ;;  %v624_v2 = vsel %vm5347_vm14, %v362_v8, %v623_v21  ;;  %v280_v38 = vld [vmem:[#allocation2 + $0x13c] sm:$0x8]  ;;  %v283_v21 = vld [vmem:[#allocation2 + $0x144] sm:$0x8] }
  0x50   : > { %617 = vst [vmem:[#allocation2 + $0x8] sm:$0xf] %v616_v45  ;;  %v894_v3 = vsel %vm5374_vm15, %v723_v49, %v893_v61  ;;  %v281_v48 = vsel %vm5326_vm12, 0, %v280_v38  ;;  %v232_v45 = vsel %vm5306_vm4, 0, %v231_v22  ;;  %v733_v49 = vrot.slane %v357_v39, 4 }
  0x51   : > { %621 = vst [vmem:[#allocation2 + $0x10] sm:$0xf] %v620_v59  ;;  %v375_v19 = vrot.slane %v373_v26, 7  ;;  %v383_v32 = vrot.slane %v381_v30, 7  ;;  %v384_v58 = vshll.u32 %v5055_v5, 16  ;;  %v737_v61 = vrot.slane %v368_v35, 5 }
  0x52   : > { %895 = vst [vmem:[#allocation2 + $0x12c] sm:$0xf] %v894_v3  ;;  %v735_v59 = vor.u32 %v734_v53, %v733_v49  ;;  %v284_v38 = vsel %vm5326_vm12, 0, %v283_v21  ;;  %v391_v49 = vrot.slane %v389_v17, 7  ;;  %v392_v53 = vshll.u32 %v5124_v23, 16 }
  0x53   : > { %626 = vst.msk [vmem:[#allocation2 + $0x1c] sm:$0xf] %vm204_vm0, %v371_v15  ;;  %v740_v14 = vor.u32 %v739_v55, %v737_v61  ;;  %v378_v39 = vor.u32 %v376_v31, %v375_v19  ;;  %v379_v16 = vrot.slane %v375_v19, 4  ;;  %v386_v41 = vor.u32 %v384_v58, %v383_v32 }
  0x54   : > { %625 = vst [vmem:[#allocation2 + $0x18] sm:$0xf] %v624_v2  ;;  %v736_v56 = vrot.slane %v735_v59, 4  ;;  %v4868_v2 = vld [vmem:[#allocation2 + $0xa0] sm:$0xff]  ;;  %v400_v19 = vshll.u32 %v5129_v24, 16  ;;  %v746_v32 = vrot.slane %v384_v58, 5 }
  0x55   : > { %282 = vst [vmem:[#allocation2 + $0x13c] sm:$0x8] %v281_v48  ;;  %v741_v1 = vrot.slane %v740_v14, 4  ;;  %v387_v5 = vsel %vm5317_vm7, %v379_v16, %v386_v41  ;;  %v743_v48 = vrot.slane %v376_v31, 5  ;;  %v394_v14 = vor.u32 %v392_v53, %v391_v49 }
  0x56   : > { %233 = vst [vmem:[#allocation2 + $0x20] sm:$0x1] %v232_v45  ;;  %v738_v4 = vsel %vm5337_vm13, %v736_v56, %v737_v61  ;;  %v748_v45 = vrot.slane %v381_v30, 4  ;;  %v395_v31 = vrot.slane %v391_v49, 4  ;;  %v751_v21 = vrot.slane %v389_v17, 4  ;;  %v4945_v17 = vld [vmem:[%s6102_s1 + $0xf0] sm:$0xff] }
  0x57   : > { %v4847_v33 = vld [vmem:[#allocation2 + $0x8] sm:$0xff]  ;;  %900 = vst.msk [vmem:[#allocation2 + $0x138] sm:$0xf] %vm204_vm0, %v738_v4  ;;  %v405_v4 = vshrl.u32 %v5181_v36, 16  ;;  %v755_v49 = vrot.slane %v400_v19, 5  ;;  %3292 = vmatpush.bf16.msra.mxu3 %v4945_v17 }
  0x58   : > { %v4788_v15 = vld [vmem:[#allocation2 + $0x8] sm:$0xff]  ;;  %630 = vst.msk [vmem:[#allocation2 + $0x24] sm:$0xf] %vm204_vm0, %v387_v5  ;;  %v4848_v20 = vld [vmem:[#allocation2 + $0x10] sm:$0xff]  ;;  %v749_v59 = vor.u32 %v748_v45, %v746_v32 }
  0x59   : > { %285 = vst [vmem:[#allocation2 + $0x144] sm:$0x8] %v284_v38  ;;  %v4789_v16 = vld [vmem:[#allocation2 + $0x10] sm:$0xff]  ;;  %v407_v38 = vrot.slane %v405_v4, 7 }
  0x5a   : > { %v4925_v45 = vld [vmem:[%s6102_s1 + $0xd0] sm:$0xff] }
  0x5b   : > { %4039 = vmatmul.msk.bf16.vlgmr.msrb.gmra.mxu1 %vm1142_vm1, %v4787_v60  ;;  %v4828_v60 = vld [vmem:[#allocation2 + $0x128] sm:$0xff]  ;;  %v4849_v5 = vld [vmem:[#allocation2 + $0x18] sm:$0xff]  ;;  %2977 = vmatpush.bf16.msra.mxu2 %v4925_v45 }
  0x5c   : > { %v901_v3 = vld [vmem:[#allocation2 + $0x13c] sm:$0xf] }
  0x5d   : > { %4351 = vmatmul.msk.bf16.vlgmr.msrb.gmra.mxu0 %vm1142_vm1, %v4867_v46  ;;  %v902_v12 = vsel %vm5374_vm15, %v741_v1, %v901_v3  ;;  %v627_v35 = vld [vmem:[#allocation2 + $0x20] sm:$0xf]  ;;  %v742_v46 = vrot.slane %v373_v26, 4  ;;  %v750_v26 = vrot.slane %v749_v59, 4  ;;  %v4829_v3 = vld [vmem:[#allocation2 + $0x130] sm:$0xff] }
  0x5e   : > { %4143 = vmatmul.msk.bf16.vlgmr.msrb.gmra.mxu2 %vm1142_vm1, %v4827_v13  ;;  %v628_v8 = vsel %vm5347_vm14, %v378_v39, %v627_v35  ;;  %903 = vst [vmem:[#allocation2 + $0x13c] sm:$0xf] %v902_v12  ;;  %v397_v13 = vshrl.u32 %v5129_v24, 16  ;;  %v413_v12 = vshrl.u32 %v5184_v37, 16  ;;  %v286_v35 = vld [vmem:[#allocation2 + $0x14c] sm:$0x8] }
  0x5f   : > { %4247 = vmatmul.msk.bf16.vlgmr.msrb.gmra.mxu3 %vm1142_vm1, %v4847_v33  ;;  %629 = vst [vmem:[#allocation2 + $0x20] sm:$0xf] %v628_v8  ;;  %v234_v33 = vld [vmem:[#allocation2 + $0x28] sm:$0x1]  ;;  %v744_v61 = vor.u32 %v743_v48, %v742_v46  ;;  %v416_v48 = vshll.u32 %v5184_v37, 16  ;;  %v4905_v37 = vld [vmem:[%s6102_s1 + $0xb0] sm:$0xff] }
  0x60   : > { %v235_v22 = vsel %vm5306_vm4, 0, %v234_v33  ;;  %v399_v55 = vrot.slane %v397_v13, 7  ;;  %v905_v56 = vld [vmem:[#allocation2 + $0x144] sm:$0xf]  ;;  %v4869_v8 = vld [vmem:[#allocation2 + $0xa8] sm:$0xff]  ;;  %v752_v33 = vrot.slane %v392_v53, 5  ;;  %2662 = vmatpush.bf16.msra.mxu1 %v4905_v37 }
  0x61   : > { %236 = vst [vmem:[#allocation2 + $0x28] sm:$0x1] %v235_v22  ;;  %v745_v39 = vrot.slane %v744_v61, 4  ;;  %v906_v1 = vsel %vm5374_vm15, %v750_v26, %v905_v56  ;;  %v408_v22 = vshll.u32 %v5181_v36, 16  ;;  %v415_v46 = vrot.slane %v413_v12, 7  ;;  %v4790_v56 = vld [vmem:[#allocation2 + $0x18] sm:$0xff] }
  0x62   : > { %v402_v30 = vor.u32 %v400_v19, %v399_v55  ;;  %907 = vst [vmem:[#allocation2 + $0x144] sm:$0xf] %v906_v1  ;;  %v4965_v55 = vld [vmem:[%s6102_s1 + $0x110] sm:$0xff]  ;;  %v411_v61 = vrot.slane %v407_v38, 4 }
  0x63   : > { %v747_v23 = vsel %vm5337_vm13, %v745_v39, %v746_v32  ;;  %v410_v53 = vor.u32 %v408_v22, %v407_v38  ;;  %v418_v59 = vor.u32 %v416_v48, %v415_v46  ;;  %3607 = vmatpush.bf16.msra.mxu0 %v4965_v55  ;;  %v432_v38 = vshll.u32 %v5237_v52, 16 }
  0x64   : > { %v403_v24 = vsel %vm5317_vm7, %v395_v31, %v402_v30  ;;  %904 = vst.msk [vmem:[#allocation2 + $0x140] sm:$0xf] %vm204_vm0, %v747_v23  ;;  %v764_v46 = vrot.slane %v416_v48, 5 }
  0x65   : > { %634 = vst.msk [vmem:[#allocation2 + $0x2c] sm:$0xf] %vm204_vm0, %v403_v24  ;;  %v419_v31 = vsel %vm5317_vm7, %v411_v61, %v418_v59  ;;  %v4830_v1 = vld [vmem:[#allocation2 + $0x138] sm:$0xff]  ;;  %v421_v24 = vshrl.u32 %v5234_v51, 16  ;;  %v437_v59 = vshrl.u32 %v5058_v6, 16 }
  0x66   : > { %638 = vst.msk [vmem:[#allocation2 + $0x34] sm:$0xf] %vm204_vm0, %v419_v31  ;;  %v4791_v37 = vld [vmem:[#allocation2 + $0x20] sm:$0xff] }
  0x67   : > { %v243_v31 = vld [vmem:[#allocation2 + $0x40] sm:$0x1] }
  0x68   : > { %v631_v58 = vld [vmem:[#allocation2 + $0x28] sm:$0xf] }
  0x69   : > { %v632_v41 = vsel %vm5347_vm14, %v394_v14, %v631_v58  ;;  %v429_v58 = vshrl.u32 %v5237_v52, 16 }
  0x6a   : > { %633 = vst [vmem:[#allocation2 + $0x28] sm:$0xf] %v632_v41  ;;  %v289_v41 = vld [vmem:[#allocation2 + $0x154] sm:$0x8] }
  0x6b   : > { %4040 = vmatmul.msk.bf16.gmra.mxu1 %vm1142_vm1, %v4788_v15  ;;  %v237_v15 = vld [vmem:[#allocation2 + $0x30] sm:$0x1] }
  0x6d   : > { %4352 = vmatmul.msk.bf16.gmra.mxu0 %vm1142_vm1, %v4868_v2  ;;  %v757_v2 = vrot.slane %v397_v13, 4  ;;  %v753_v13 = vor.u32 %v752_v33, %v751_v21  ;;  %v423_v21 = vrot.slane %v421_v24, 7  ;;  %v424_v33 = vshll.u32 %v5234_v51, 16 }
  0x6e   : > { %4144 = vmatmul.msk.bf16.gmra.mxu2 %vm1142_vm1, %v4828_v60  ;;  %v287_v60 = vsel %vm5326_vm12, 0, %v286_v35  ;;  %v290_v35 = vsel %vm5326_vm12, 0, %v289_v41  ;;  %v775_v41 = vrot.slane %v429_v58, 4 }
  0x6f   : > { %4248 = vmatmul.msk.bf16.gmra.mxu3 %vm1142_vm1, %v4848_v20  ;;  %v238_v20 = vsel %vm5306_vm4, 0, %v237_v15  ;;  %288 = vst [vmem:[#allocation2 + $0x14c] sm:$0x8] %v287_v60  ;;  %v758_v36 = vor.u32 %v757_v2, %v755_v49  ;;  %v754_v19 = vrot.slane %v753_v13, 4  ;;  %v761_v60 = vrot.slane %v408_v22, 5 }
  0x70   : > { %239 = vst [vmem:[#allocation2 + $0x30] sm:$0x1] %v238_v20  ;;  %v766_v20 = vrot.slane %v413_v12, 4  ;;  %v431_v2 = vrot.slane %v429_v58, 7  ;;  %v426_v17 = vor.u32 %v424_v33, %v423_v21  ;;  %v427_v22 = vrot.slane %v423_v21, 4 }
  0x71   : > { %v759_v32 = vrot.slane %v758_v36, 4  ;;  %v756_v39 = vsel %vm5337_vm13, %v754_v19, %v755_v49  ;;  %291 = vst [vmem:[#allocation2 + $0x154] sm:$0x8] %v290_v35 }
  0x72   : > { %908 = vst.msk [vmem:[#allocation2 + $0x148] sm:$0xf] %vm204_vm0, %v756_v39  ;;  %v767_v49 = vor.u32 %v766_v20, %v764_v46  ;;  %v434_v12 = vor.u32 %v432_v38, %v431_v2  ;;  %v4851_v39 = vld [vmem:[#allocation2 + $0x28] sm:$0xff]  ;;  %v773_v20 = vrot.slane %v432_v38, 5 }
  0x74   : > { %v435_v52 = vsel %vm5317_vm7, %v427_v22, %v434_v12  ;;  %v776_v21 = vor.u32 %v775_v41, %v773_v20  ;;  %v4792_v22 = vld [vmem:[#allocation2 + $0x28] sm:$0xff] }
  0x75   : > { %642 = vst.msk [vmem:[#allocation2 + $0x3c] sm:$0xf] %vm204_vm0, %v435_v52 }
  0x76   : > { %v909_v14 = vld [vmem:[#allocation2 + $0x14c] sm:$0xf] }
  0x77   : > { %v910_v26 = vsel %vm5374_vm15, %v759_v32, %v909_v14  ;;  %v635_v30 = vld [vmem:[#allocation2 + $0x30] sm:$0xf]  ;;  %v4831_v32 = vld [vmem:[#allocation2 + $0x140] sm:$0xff]  ;;  %v445_v14 = vshrl.u32 %v5065_v7, 16 }
  0x78   : > { %v636_v23 = vsel %vm5347_vm14, %v410_v53, %v635_v30  ;;  %911 = vst [vmem:[#allocation2 + $0x14c] sm:$0xf] %v910_v26  ;;  %v913_v36 = vld [vmem:[#allocation2 + $0x154] sm:$0xf]  ;;  %v292_v26 = vld [vmem:[#allocation2 + $0x15c] sm:$0x8] }
  0x79   : > { %637 = vst [vmem:[#allocation2 + $0x30] sm:$0xf] %v636_v23  ;;  %v4871_v30 = vld [vmem:[#allocation2 + $0xb8] sm:$0xff]  ;;  %v244_v23 = vsel %vm5306_vm4, 0, %v243_v31  ;;  %v447_v35 = vrot.slane %v445_v14, 7 }
  0x7a   : > { %245 = vst [vmem:[#allocation2 + $0x40] sm:$0x1] %v244_v23  ;;  %v4872_v23 = vld [vmem:[#allocation2 + $0xc0] sm:$0xff] }
  0x7b   : > { %4041 = vmatmul.msk.bf16.gmra.mxu1 %vm1142_vm1, %v4789_v16  ;;  %v4850_v16 = vld [vmem:[#allocation2 + $0x20] sm:$0xff] }
  0x7d   : > { %4353 = vmatmul.msk.bf16.gmra.mxu0 %vm1142_vm1, %v4869_v8  ;;  %v760_v8 = vrot.slane %v405_v4, 4  ;;  %v768_v4 = vrot.slane %v767_v49, 4 }
  0x7e   : > { %4145 = vmatmul.msk.bf16.gmra.mxu2 %vm1142_vm1, %v4829_v3  ;;  %v240_v3 = vld [vmem:[#allocation2 + $0x38] sm:$0x1] }
  0x7f   : > { %4249 = vmatmul.msk.bf16.gmra.mxu3 %vm1142_vm1, %v4849_v5  ;;  %v4870_v5 = vld [vmem:[#allocation2 + $0xb0] sm:$0xff]  ;;  %v241_v15 = vsel %vm5306_vm4, 0, %v240_v3  ;;  %v762_v45 = vor.u32 %v761_v60, %v760_v8  ;;  %v914_v53 = vsel %vm5374_vm15, %v768_v4, %v913_v36  ;;  %v439_v3 = vrot.slane %v437_v59, 7 }
  0x80   : > { %242 = vst [vmem:[#allocation2 + $0x38] sm:$0x1] %v241_v15  ;;  %v448_v15 = vshll.u32 %v5065_v7, 16  ;;  %v4852_v31 = vld [vmem:[#allocation2 + $0x30] sm:$0xff] }
  0x81   : > { %v763_v13 = vrot.slane %v762_v45, 4  ;;  %915 = vst [vmem:[#allocation2 + $0x154] sm:$0xf] %v914_v53  ;;  %v443_v45 = vrot.slane %v439_v3, 4  ;;  %v643_v4 = vld [vmem:[#allocation2 + $0x40] sm:$0xf] }
  0x82   : > { %v450_v7 = vor.u32 %v448_v15, %v447_v35  ;;  %v4832_v53 = vld [vmem:[#allocation2 + $0x148] sm:$0xff]  ;;  %v782_v52 = vrot.slane %v448_v15, 5 }
  0x83   : > { %v765_v51 = vsel %vm5337_vm13, %v763_v13, %v764_v46  ;;  %v777_v46 = vrot.slane %v776_v21, 4 }
  0x84   : > { %912 = vst.msk [vmem:[#allocation2 + $0x150] sm:$0xf] %vm204_vm0, %v765_v51  ;;  %v451_v13 = vsel %vm5317_vm7, %v443_v45, %v450_v7 }
  0x85   : > { %646 = vst.msk [vmem:[#allocation2 + $0x44] sm:$0xf] %vm204_vm0, %v451_v13 }
  0x87   : > { %v639_v48 = vld [vmem:[#allocation2 + $0x38] sm:$0xf] }
  0x88   : > { %v640_v55 = vsel %vm5347_vm14, %v426_v17, %v639_v48  ;;  %v784_v48 = vrot.slane %v445_v14, 4 }
  0x89   : > { %641 = vst [vmem:[#allocation2 + $0x38] sm:$0xf] %v640_v55  ;;  %v461_v55 = vshrl.u32 %v5143_v27, 16 }
  0x8b   : > { %4042 = vmatmul.msk.bf16.gmra.mxu1 %vm1142_vm1, %v4790_v56  ;;  %v293_v56 = vsel %vm5326_vm12, 0, %v292_v26 }
  0x8c   : > { %294 = vst [vmem:[#allocation2 + $0x15c] sm:$0x8] %v293_v56  ;;  %v246_v56 = vld [vmem:[#allocation2 + $0x48] sm:$0x1] }
  0x8d   : > { %4354 = vmatmul.msk.bf16.gmra.mxu0 %vm1142_vm1, %v4870_v5  ;;  %v440_v5 = vshll.u32 %v5058_v6, 16 }
  0x8e   : > { %4146 = vmatmul.msk.bf16.gmra.mxu2 %vm1142_vm1, %v4830_v1  ;;  %v769_v1 = vrot.slane %v421_v24, 4 }
  0x8f   : > { %4250 = vmatmul.msk.bf16.gmra.mxu3 %vm1142_vm1, %v4850_v16  ;;  %v770_v16 = vrot.slane %v424_v33, 5  ;;  %v442_v58 = vor.u32 %v440_v5, %v439_v3  ;;  %v779_v26 = vrot.slane %v440_v5, 5  ;;  %v464_v3 = vshll.u32 %v5143_v27, 16 }
  0x90   : > { %v456_v5 = vshll.u32 %v5135_v25, 16 }
  0x91   : > { %v771_v24 = vor.u32 %v770_v16, %v769_v1  ;;  %v644_v12 = vsel %vm5347_vm14, %v442_v58, %v643_v4  ;;  %v247_v1 = vsel %vm5306_vm4, 0, %v246_v56  ;;  %v785_v16 = vor.u32 %v784_v48, %v782_v52  ;;  %v4793_v4 = vld [vmem:[#allocation2 + $0x30] sm:$0xff] }
  0x92   : > { %645 = vst [vmem:[#allocation2 + $0x40] sm:$0xf] %v644_v12  ;;  %v4833_v48 = vld [vmem:[#allocation2 + $0x150] sm:$0xff] }
  0x93   : > { %v772_v6 = vrot.slane %v771_v24, 4  ;;  %v917_v49 = vld [vmem:[#allocation2 + $0x15c] sm:$0xf]  ;;  %248 = vst [vmem:[#allocation2 + $0x48] sm:$0x1] %v247_v1  ;;  %v786_v21 = vrot.slane %v785_v16, 4 }
  0x94   : > { %v918_v38 = vsel %vm5374_vm15, %v777_v46, %v917_v49  ;;  %v298_v1 = vld [vmem:[#allocation2 + $0x16c] sm:$0x8]  ;;  %v249_v16 = vld [vmem:[#allocation2 + $0x50] sm:$0x1] }
  0x95   : > { %v774_v17 = vsel %vm5337_vm13, %v772_v6, %v773_v20  ;;  %919 = vst [vmem:[#allocation2 + $0x15c] sm:$0xf] %v918_v38 }
  0x96   : > { %916 = vst.msk [vmem:[#allocation2 + $0x158] sm:$0xf] %vm204_vm0, %v774_v17 }
  0x98   : > { %v5495_v19 = vpop.f32.mrf.mxu1 }
  0x99   : > { %v5497_v61 = vpop.f32.mrf.mxu0 }
  0x9a   : > { %v647_v13 = vld [vmem:[#allocation2 + $0x48] sm:$0xf] }
  0x9b   : > { %4043 = vmatmul.msk.bf16.gmra.mxu1 %vm1142_vm1, %v4791_v37  ;;  %v453_v37 = vshrl.u32 %v5135_v25, 16 }
  0x9d   : > { %4355 = vmatmul.msk.bf16.gmra.mxu0 %vm1142_vm1, %v4871_v30  ;;  %v295_v30 = vld [vmem:[#allocation2 + $0x164] sm:$0x8]  ;;  %v455_v41 = vrot.slane %v453_v37, 7 }
  0x9e   : > { %4147 = vmatmul.msk.bf16.gmra.mxu2 %vm1142_vm1, %v4831_v32  ;;  %v778_v32 = vrot.slane %v437_v59, 4  ;;  %v296_v14 = vsel %vm5326_vm12, 0, %v295_v30  ;;  %v463_v59 = vrot.slane %v461_v55, 7  ;;  %v787_v30 = vrot.slane %v453_v37, 4 }
  0x9f   : > { %4251 = vmatmul.msk.bf16.gmra.mxu3 %vm1142_vm1, %v4851_v39  ;;  %297 = vst [vmem:[#allocation2 + $0x164] sm:$0x8] %v296_v14  ;;  %v459_v58 = vrot.slane %v455_v41, 4  ;;  %v458_v46 = vor.u32 %v456_v5, %v455_v41  ;;  %v4853_v14 = vld [vmem:[#allocation2 + $0x38] sm:$0xff]  ;;  %v4873_v41 = vld [vmem:[#allocation2 + $0xc8] sm:$0xff] }
  0xa0   : > { %v5513_v60 = vpop.f32.mrf.mxu1  ;;  %v780_v15 = vor.u32 %v779_v26, %v778_v32  ;;  %v466_v6 = vor.u32 %v464_v3, %v463_v59  ;;  %v793_v32 = vrot.slane %v461_v55, 4  ;;  %v469_v26 = vshrl.u32 %v5193_v40, 16 }
  0xa1   : > { %v5511_v8 = vpop.f32.mrf.mxu2  ;;  %v5518_v2 = vpop.f32.mrf.mxu0  ;;  %v299_v55 = vsel %vm5326_vm12, 0, %v298_v1  ;;  %v250_v59 = vsel %vm5306_vm4, 0, %v249_v16 }
  0xa2   : > { %v5516_v33 = vpop.f32.mrf.mxu3  ;;  %v781_v45 = vrot.slane %v780_v15, 4  ;;  %v467_v38 = vsel %vm5317_vm7, %v459_v58, %v466_v6  ;;  %v471_v15 = vrot.slane %v469_v26, 7  ;;  %300 = vst [vmem:[#allocation2 + $0x16c] sm:$0x8] %v299_v55 }
  0xa3   : > { %6117 = vst [vmem:[#allocation3_spill] sm:$0xff] %v5516_v33 }
  0xa4   : > { %v783_v25 = vsel %vm5337_vm13, %v781_v45, %v782_v52  ;;  %v791_v52 = vrot.slane %v464_v3, 5  ;;  %650 = vst.msk [vmem:[#allocation2 + $0x4c] sm:$0xf] %vm204_vm0, %v467_v38 }
  0xa5   : > { %920 = vst.msk [vmem:[#allocation2 + $0x160] sm:$0xf] %vm204_vm0, %v783_v25 }
  0xa6   : > { %v921_v7 = vld [vmem:[#allocation2 + $0x164] sm:$0xf]  ;;  %v794_v3 = vor.u32 %v793_v32, %v791_v52  ;;  %251 = vst [vmem:[#allocation2 + $0x50] sm:$0x1] %v250_v59 }
  0xa7   : > { %v922_v17 = vsel %vm5374_vm15, %v786_v21, %v921_v7  ;;  %v480_v21 = vshll.u32 %v5196_v42, 16  ;;  %v4924_v7 = vld [vmem:[%s6102_s1 + $0xc8] sm:$0xff] }
  0xa8   : > { %v5531_v51 = vpop.f32.mrf.mxu1  ;;  %923 = vst [vmem:[#allocation2 + $0x164] sm:$0xf] %v922_v17  ;;  %v795_v25 = vrot.slane %v794_v3, 4  ;;  %2978 = vmatpush.bf16.msra.mxu2 %v4924_v7  ;;  %v493_v7 = vshrl.u32 %v5251_v57, 16 }
  0xa9   : > { %v5529_v36 = vpop.f32.mrf.mxu2 }
  0xaa   : > { %v5536_v39 = vpop.f32.mrf.mxu3  ;;  %v5545_v35 = vpop.f32.mrf.mxu0 }
  0xab   : > { %6118 = vst [vmem:[#allocation4_spill] sm:$0xff] %v5536_v39  ;;  %4044 = vmatmul.msk.bf16.gmra.mxu1 %vm1142_vm1, %v4792_v22  ;;  %v648_v22 = vsel %vm5347_vm14, %v458_v46, %v647_v13 }
  0xac   : > { %649 = vst [vmem:[#allocation2 + $0x48] sm:$0xf] %v648_v22 }
  0xad   : > { %4356 = vmatmul.msk.bf16.gmra.mxu0 %vm1142_vm1, %v4872_v23  ;;  %v788_v23 = vrot.slane %v456_v5, 5  ;;  %v472_v5 = vshll.u32 %v5193_v40, 16  ;;  %v475_v40 = vrot.slane %v471_v15, 4  ;;  %v651_v16 = vld [vmem:[#allocation2 + $0x50] sm:$0xf] }
  0xae   : > { %4148 = vmatmul.msk.bf16.gmra.mxu2 %vm1142_vm1, %v4832_v53 }
  0xaf   : > { %4252 = vmatmul.msk.bf16.gmra.mxu3 %vm1142_vm1, %v4852_v31  ;;  %v477_v31 = vshrl.u32 %v5196_v42, 16  ;;  %v789_v6 = vor.u32 %v788_v23, %v787_v30  ;;  %v4944_v42 = vld [vmem:[%s6102_s1 + $0xe8] sm:$0xff]  ;;  %v474_v38 = vor.u32 %v472_v5, %v471_v15  ;;  %v800_v15 = vrot.slane %v480_v21, 5 }
  0xb0   : > { %v5551_v24 = vpop.f32.mrf.mxu1  ;;  %3293 = vmatpush.bf16.msra.mxu3 %v4944_v42  ;;  %v4964_v30 = vld [vmem:[%s6102_s1 + $0x108] sm:$0xff]  ;;  %v796_v42 = vrot.slane %v469_v26, 4  ;;  %v495_v26 = vrot.slane %v493_v7, 7 }
  0xb1   : > { %v5549_v20 = vpop.f32.mrf.mxu2  ;;  %v479_v37 = vrot.slane %v477_v31, 7  ;;  %v790_v22 = vrot.slane %v789_v6, 4  ;;  %v652_v55 = vsel %vm5347_vm14, %v474_v38, %v651_v16  ;;  %3608 = vmatpush.bf16.msra.mxu0 %v4964_v30  ;;  %v485_v6 = vshrl.u32 %v5245_v54, 16  ;;  %v301_v38 = vld [vmem:[#allocation2 + $0x174] sm:$0x8] }
  0xb2   : > { %v5554_v27 = vpop.f32.mrf.mxu3  ;;  %v5556_v49 = vpop.f32.mrf.mxu0  ;;  %653 = vst [vmem:[#allocation2 + $0x50] sm:$0xf] %v652_v55 }
  0xb3   : > { %6119 = vst [vmem:[#allocation5_spill] sm:$0xff] %v5554_v27  ;;  %v482_v17 = vor.u32 %v480_v21, %v479_v37  ;;  %v792_v23 = vsel %vm5337_vm13, %v790_v22, %v791_v52  ;;  %v4834_v52 = vld [vmem:[#allocation2 + $0x158] sm:$0xff]  ;;  %v802_v37 = vrot.slane %v477_v31, 4  ;;  %v4874_v22 = vld [vmem:[#allocation2 + $0xd0] sm:$0xff]  ;;  %v302_v31 = vsel %vm5326_vm12, 0, %v301_v38 }
  0xb4   : > { %924 = vst.msk [vmem:[#allocation2 + $0x168] sm:$0xf] %vm204_vm0, %v792_v23  ;;  %v487_v30 = vrot.slane %v485_v6, 7  ;;  %v496_v23 = vshll.u32 %v5251_v57, 16 }
  0xb5   : > { %v483_v1 = vsel %vm5317_vm7, %v475_v40, %v482_v17  ;;  %v797_v40 = vrot.slane %v472_v5, 5  ;;  %v4854_v17 = vld [vmem:[#allocation2 + $0x40] sm:$0xff]  ;;  %303 = vst [vmem:[#allocation2 + $0x174] sm:$0x8] %v302_v31  ;;  %v488_v5 = vshll.u32 %v5245_v54, 16 }
  0xb6   : > { %654 = vst.msk [vmem:[#allocation2 + $0x54] sm:$0xf] %vm204_vm0, %v483_v1 }
  0xb7   : > { %v798_v1 = vor.u32 %v797_v40, %v796_v42  ;;  %v490_v38 = vor.u32 %v488_v5, %v487_v30 }
  0xb8   : > { %v5569_v53 = vpop.f32.mrf.mxu1 }
  0xb9   : > { %v5567_v12 = vpop.f32.mrf.mxu2 }
  0xba   : > { %v5574_v56 = vpop.f32.mrf.mxu3  ;;  %v5583_v58 = vpop.f32.mrf.mxu0 }
  0xbb   : > { %6120 = vst [vmem:[#allocation6_spill] sm:$0xff] %v5574_v56  ;;  %4045 = vmatmul.msk.bf16.gmra.mxu1 %vm1142_vm1, %v4793_v4  ;;  %v4904_v4 = vld [vmem:[%s6102_s1 + $0xa8] sm:$0xff] }
  0xbc   : > { %2663 = vmatpush.bf16.msra.mxu1 %v4904_v4  ;;  %v252_v4 = vld [vmem:[#allocation2 + $0x58] sm:$0x1]  ;;  %v929_v31 = vld [vmem:[#allocation2 + $0x174] sm:$0xf] }
  0xbd   : > { %4357 = vmatmul.msk.bf16.gmra.mxu0 %vm1142_vm1, %v4873_v41  ;;  %v4794_v41 = vld [vmem:[#allocation2 + $0x38] sm:$0xff]  ;;  %v253_v21 = vsel %vm5306_vm4, 0, %v252_v4  ;;  %v799_v4 = vrot.slane %v798_v1, 4  ;;  %v501_v1 = vshrl.u32 %v5075_v9, 16 }
  0xbe   : > { %4149 = vmatmul.msk.bf16.gmra.mxu2 %vm1142_vm1, %v4833_v48  ;;  %v925_v48 = vld [vmem:[#allocation2 + $0x16c] sm:$0xf]  ;;  %254 = vst [vmem:[#allocation2 + $0x58] sm:$0x1] %v253_v21 }
  0xbf   : > { %4253 = vmatmul.msk.bf16.gmra.mxu3 %vm1142_vm1, %v4853_v14  ;;  %v926_v14 = vsel %vm5374_vm15, %v795_v25, %v925_v48  ;;  %v803_v48 = vor.u32 %v802_v37, %v800_v15  ;;  %v498_v37 = vor.u32 %v496_v23, %v495_v26  ;;  %v801_v54 = vsel %vm5337_vm13, %v799_v4, %v800_v15  ;;  %v4835_v15 = vld [vmem:[#allocation2 + $0x160] sm:$0xff] }
  0xc0   : > { %v5589_v45 = vpop.f32.mrf.mxu1  ;;  %927 = vst [vmem:[#allocation2 + $0x16c] sm:$0xf] %v926_v14  ;;  %v805_v4 = vrot.slane %v485_v6, 4  ;;  %v512_v6 = vshll.u32 %v5078_v10, 16 }
  0xc1   : > { %v5587_v46 = vpop.f32.mrf.mxu2  ;;  %v804_v55 = vrot.slane %v803_v48, 4  ;;  %928 = vst.msk [vmem:[#allocation2 + $0x170] sm:$0xf] %vm204_vm0, %v801_v54  ;;  %v4855_v54 = vld [vmem:[#allocation2 + $0x48] sm:$0xff] }
  0xc2   : > { %v5598_v13 = vpop.f32.mrf.mxu3  ;;  %v5603_v32 = vpop.f32.mrf.mxu0 }
  0xc3   : > { %6121 = vst [vmem:[#allocation7_spill] sm:$0xff] %v5598_v13  ;;  %v930_v42 = vsel %vm5374_vm15, %v804_v55, %v929_v31  ;;  %v509_v55 = vshrl.u32 %v5078_v10, 16 }
  0xc4   : > { %931 = vst [vmem:[#allocation2 + $0x174] sm:$0xf] %v930_v42  ;;  %v304_v42 = vld [vmem:[#allocation2 + $0x17c] sm:$0x8] }
  0xc8   : > { %v5619_v3 = vpop.f32.mrf.mxu1 }
  0xc9   : > { %v5617_v59 = vpop.f32.mrf.mxu2 }
  0xca   : > { %v5624_v25 = vpop.f32.mrf.mxu3  ;;  %v5633_v14 = vpop.f32.mrf.mxu0 }
  0xcb   : > { %6122 = vst [vmem:[#allocation8_spill] sm:$0xff] %v5624_v25  ;;  %4046 = vmatmul.msk.bf16.gmra.mxu1 %vm1142_vm1, %v4794_v41 }
  0xcd   : > { %4358 = vmatmul.msk.bf16.gmra.mxu0 %vm1142_vm1, %v4874_v22  ;;  %v4795_v22 = vld [vmem:[#allocation2 + $0x40] sm:$0xff] }
  0xce   : > { %4150 = vmatmul.msk.bf16.gmra.mxu2 %vm1142_vm1, %v4834_v52  ;;  %v491_v52 = vrot.slane %v487_v30, 4 }
  0xcf   : > { %4254 = vmatmul.msk.bf16.gmra.mxu3 %vm1142_vm1, %v4854_v17  ;;  %v655_v17 = vld [vmem:[#allocation2 + $0x58] sm:$0xf] }
  0xd0   : > { %v5639_v41 = vpop.f32.mrf.mxu1  ;;  %v499_v40 = vsel %vm5317_vm7, %v491_v52, %v498_v37  ;;  %v656_v21 = vsel %vm5347_vm14, %v490_v38, %v655_v17  ;;  %v809_v52 = vrot.slane %v496_v23, 5  ;;  %v811_v37 = vrot.slane %v493_v7, 4  ;;  %v255_v17 = vld [vmem:[#allocation2 + $0x60] sm:$0x1] }
  0xd1   : > { %v5637_v16 = vpop.f32.mrf.mxu2  ;;  %657 = vst [vmem:[#allocation2 + $0x58] sm:$0xf] %v656_v21  ;;  %v806_v38 = vrot.slane %v488_v5, 5  ;;  %v305_v21 = vsel %vm5326_vm12, 0, %v304_v42  ;;  %v256_v7 = vsel %vm5306_vm4, 0, %v255_v17  ;;  %v503_v23 = vrot.slane %v501_v1, 7 }
  0xd2   : > { %v5642_v57 = vpop.f32.mrf.mxu3  ;;  %v5644_v25 = vpop.f32.mrf.mxu0  ;;  %658 = vst.msk [vmem:[#allocation2 + $0x5c] sm:$0xf] %vm204_vm0, %v499_v40  ;;  %v511_v40 = vrot.slane %v509_v55, 7  ;;  %v504_v5 = vshll.u32 %v5075_v9, 16 }
  0xd3   : > { %6123 = vst [vmem:[#allocation9_spill] sm:$0xff] %v5642_v57  ;;  %v507_v13 = vrot.slane %v503_v23, 4 }
  0xd4   : > { %306 = vst [vmem:[#allocation2 + $0x17c] sm:$0x8] %v305_v21  ;;  %v514_v56 = vor.u32 %v512_v6, %v511_v40  ;;  %v506_v10 = vor.u32 %v504_v5, %v503_v23  ;;  %v818_v40 = vrot.slane %v512_v6, 5  ;;  %v307_v6 = vld [vmem:[#allocation2 + $0x184] sm:$0x8] }
  0xd5   : > { %257 = vst [vmem:[#allocation2 + $0x60] sm:$0x1] %v256_v7 }
  0xd8   : > { %v1441_v30 = vpop.f32.mrf.mxu1 }
  0xd9   : > { %v5655_v48 = vpop.f32.mrf.mxu2  ;;  %v1442_v26 = vadd.f32 %v1441_v30, %v5497_v61  ;;  %v4875_v61 = vld [vmem:[#allocation2 + $0xd8] sm:$0xff]  ;;  %v812_v30 = vor.u32 %v811_v37, %v809_v52 }
  0xda   : > { %v5661_v31 = vpop.f32.mrf.mxu3 }
  0xdb   : > { %6124 = vst [vmem:[#allocation10_spill] sm:$0xff] %v5661_v31  ;;  %4047 = vmatmul.msk.bf16.gmra.mxu1 %vm1142_vm1, %v4795_v22  ;;  %v2352_v31 = vpop.f32.mrf.mxu0  ;;  %v807_v22 = vor.u32 %v806_v38, %v805_v4  ;;  %v813_v27 = vrot.slane %v812_v30, 4  ;;  %v933_v33 = vld [vmem:[#allocation2 + $0x17c] sm:$0xf] }
  0xdd   : > { %4359 = vmatmul.msk.bf16.gmra.mxu0 %vm1142_vm1, %v4875_v61  ;;  %v808_v21 = vrot.slane %v807_v22, 4  ;;  %v934_v38 = vsel %vm5374_vm15, %v813_v27, %v933_v33  ;;  %v4836_v27 = vld [vmem:[#allocation2 + $0x168] sm:$0xff]  ;;  %v815_v22 = vrot.slane %v504_v5, 5 }
  0xde   : > { %4151 = vmatmul.msk.bf16.gmra.mxu2 %vm1142_vm1, %v4835_v15  ;;  %935 = vst [vmem:[#allocation2 + $0x17c] sm:$0xf] %v934_v38 }
  0xdf   : > { %4255 = vmatmul.msk.bf16.gmra.mxu3 %vm1142_vm1, %v4855_v54  ;;  %v810_v4 = vsel %vm5337_vm13, %v808_v21, %v809_v52  ;;  %v659_v54 = vld [vmem:[#allocation2 + $0x60] sm:$0xf]  ;;  %v820_v52 = vrot.slane %v509_v55, 4  ;;  %v258_v55 = vld [vmem:[#allocation2 + $0x68] sm:$0x1] }
  0xe0   : > { %v1443_v57 = vpop.f32.mrf.mxu1  ;;  %932 = vst.msk [vmem:[#allocation2 + $0x178] sm:$0xf] %vm204_vm0, %v810_v4  ;;  %v660_v61 = vsel %vm5347_vm14, %v506_v10, %v659_v54  ;;  %v308_v10 = vsel %vm5326_vm12, 0, %v307_v6  ;;  %v528_v4 = vshll.u32 %v5153_v29, 16 }
  0xe1   : > { %v1724_v15 = vpop.f32.mrf.mxu2  ;;  %v1444_v17 = vadd.f32 %v1443_v57, %v5518_v2  ;;  %v4796_v57 = vld [vmem:[#allocation2 + $0x48] sm:$0xff]  ;;  %661 = vst [vmem:[#allocation2 + $0x60] sm:$0xf] %v660_v61 }
  0xe2   : > { %v1804_v42 = vadd.f32 %v1724_v15, %v1442_v26  ;;  %v2038_v37 = vpop.f32.mrf.mxu3  ;;  %v515_v26 = vsel %vm5317_vm7, %v507_v13, %v514_v56  ;;  %v517_v56 = vshrl.u32 %v5148_v28, 16  ;;  %v814_v13 = vrot.slane %v501_v1, 4  ;;  %309 = vst [vmem:[#allocation2 + $0x184] sm:$0x8] %v308_v10 }
  0xe3   : > { %v2354_v9 = vpop.f32.mrf.mxu0  ;;  %662 = vst.msk [vmem:[#allocation2 + $0x64] sm:$0xf] %vm204_vm0, %v515_v26  ;;  %v520_v26 = vshll.u32 %v5148_v28, 16 }
  0xe4   : > { %v2118_v39 = vadd.f32 %v2038_v37, %v1804_v42  ;;  %v4856_v42 = vld [vmem:[#allocation2 + $0x50] sm:$0xff]  ;;  %v259_v37 = vsel %vm5306_vm4, 0, %v258_v55  ;;  %v519_v21 = vrot.slane %v517_v56, 7  ;;  %v816_v54 = vor.u32 %v815_v22, %v814_v13 }
  0xe5   : > { %260 = vst [vmem:[#allocation2 + $0x68] sm:$0x1] %v259_v37  ;;  %v4797_v55 = vld [vmem:[#allocation2 + $0x50] sm:$0xff]  ;;  %v827_v37 = vrot.slane %v528_v4, 5 }
  0xe6   : > { %v5680_v2 = vadd.f32 %v2352_v31, %v2118_v39  ;;  %v525_v39 = vshrl.u32 %v5153_v29, 16 }
  0xe8   : > { %v1446_v23 = vpop.f32.mrf.mxu1  ;;  %v527_v1 = vrot.slane %v525_v39, 7 }
  0xe9   : > { %v1726_v7 = vpop.f32.mrf.mxu2  ;;  %v1447_v33 = vadd.f32 %v1446_v23, %v5545_v35  ;;  %v4876_v35 = vld [vmem:[#allocation2 + $0xe0] sm:$0xff] }
  0xea   : > { %v1805_v30 = vadd.f32 %v1726_v7, %v1444_v17  ;;  %v2040_v31 = vpop.f32.mrf.mxu3  ;;  %v821_v17 = vor.u32 %v820_v52, %v818_v40  ;;  %v530_v29 = vor.u32 %v528_v4, %v527_v1  ;;  %v937_v6 = vld [vmem:[#allocation2 + $0x184] sm:$0xf]  ;;  %v310_v4 = vld [vmem:[#allocation2 + $0x18c] sm:$0x8] }
  0xeb   : > { %4048 = vmatmul.msk.bf16.gmra.mxu1 %vm1142_vm1, %v4796_v57  ;;  %v2357_v38 = vpop.f32.mrf.mxu0 }
  0xec   : > { %v2119_v15 = vadd.f32 %v2040_v31, %v1805_v30  ;;  %v822_v52 = vrot.slane %v821_v17, 4  ;;  %v523_v30 = vrot.slane %v519_v21, 4 }
  0xed   : > { %4360 = vmatmul.msk.bf16.gmra.mxu0 %vm1142_vm1, %v4876_v35 }
  0xee   : > { %4152 = vmatmul.msk.bf16.gmra.mxu2 %vm1142_vm1, %v4836_v27  ;;  %v5696_v5 = vadd.f32 %v2354_v9, %v2119_v15  ;;  %v522_v27 = vor.u32 %v520_v26, %v519_v21  ;;  %v817_v15 = vrot.slane %v816_v54, 4  ;;  %v938_v22 = vsel %vm5374_vm15, %v822_v52, %v937_v6  ;;  %v4837_v54 = vld [vmem:[#allocation2 + $0x170] sm:$0xff] }
  0xef   : > { %4256 = vmatmul.msk.bf16.gmra.mxu3 %vm1142_vm1, %v4856_v42  ;;  %v663_v42 = vld [vmem:[#allocation2 + $0x68] sm:$0xf]  ;;  %939 = vst [vmem:[#allocation2 + $0x184] sm:$0xf] %v938_v22  ;;  %v824_v52 = vrot.slane %v520_v26, 5  ;;  %v544_v26 = vshll.u32 %v5208_v44, 16 }
  0xf0   : > { %v1448_v61 = vpop.f32.mrf.mxu1  ;;  %v819_v13 = vsel %vm5337_vm13, %v817_v15, %v818_v40  ;;  %v664_v17 = vsel %vm5347_vm14, %v522_v27, %v663_v42  ;;  %v829_v40 = vrot.slane %v525_v39, 4  ;;  %v261_v39 = vld [vmem:[#allocation2 + $0x70] sm:$0x1]  ;;  %v311_v27 = vsel %vm5326_vm12, 0, %v310_v4 }
  0xf1   : > { %v1729_v57 = vpop.f32.mrf.mxu2  ;;  %v1449_v23 = vadd.f32 %v1448_v61, %v5556_v49  ;;  %936 = vst.msk [vmem:[#allocation2 + $0x180] sm:$0xf] %vm204_vm0, %v819_v13  ;;  %v823_v61 = vrot.slane %v517_v56, 4  ;;  %v536_v13 = vshll.u32 %v5202_v43, 16 }
  0xf2   : > { %v1806_v7 = vadd.f32 %v1729_v57, %v1447_v33  ;;  %v2043_v31 = vpop.f32.mrf.mxu3  ;;  %v531_v33 = vsel %vm5317_vm7, %v523_v30, %v530_v29  ;;  %665 = vst [vmem:[#allocation2 + $0x68] sm:$0xf] %v664_v17  ;;  %v533_v57 = vshrl.u32 %v5202_v43, 16  ;;  %v4857_v29 = vld [vmem:[#allocation2 + $0x58] sm:$0xff] }
  0xf3   : > { %v2359_v28 = vpop.f32.mrf.mxu0  ;;  %666 = vst.msk [vmem:[#allocation2 + $0x6c] sm:$0xf] %vm204_vm0, %v531_v33  ;;  %v825_v22 = vor.u32 %v824_v52, %v823_v61 }
  0xf4   : > { %v2120_v9 = vadd.f32 %v2043_v31, %v1806_v7  ;;  %v262_v31 = vsel %vm5306_vm4, 0, %v261_v39  ;;  %v535_v56 = vrot.slane %v533_v57, 7  ;;  %312 = vst [vmem:[#allocation2 + $0x18c] sm:$0x8] %v311_v27  ;;  %v4798_v27 = vld [vmem:[#allocation2 + $0x58] sm:$0xff] }
  0xf5   : > { %263 = vst [vmem:[#allocation2 + $0x70] sm:$0x1] %v262_v31  ;;  %v826_v52 = vrot.slane %v825_v22, 4 }
  0xf6   : > { %v5708_v49 = vadd.f32 %v2357_v38, %v2120_v9  ;;  %v541_v38 = vshrl.u32 %v5208_v44, 16 }
  0xf8   : > { %v1451_v10 = vpop.f32.mrf.mxu1  ;;  %v543_v9 = vrot.slane %v541_v38, 7  ;;  %v838_v22 = vrot.slane %v541_v38, 4  ;;  %v4858_v38 = vld [vmem:[#allocation2 + $0x60] sm:$0xff] }
  0xf9   : > { %v1731_v35 = vpop.f32.mrf.mxu2  ;;  %v1452_v1 = vadd.f32 %v1451_v10, %v5583_v58  ;;  %v4877_v58 = vld [vmem:[#allocation2 + $0xe8] sm:$0xff]  ;;  %v539_v10 = vrot.slane %v535_v56, 4 }
  0xfa   : > { %v1807_v21 = vadd.f32 %v1731_v35, %v1449_v23  ;;  %v2045_v7 = vpop.f32.mrf.mxu3  ;;  %v830_v23 = vor.u32 %v829_v40, %v827_v37  ;;  %v546_v40 = vor.u32 %v544_v26, %v543_v9 }
  0xfb   : > { %4049 = vmatmul.msk.bf16.gmra.mxu1 %vm1142_vm1, %v4797_v55  ;;  %v2362_v15 = vpop.f32.mrf.mxu0  ;;  %v4923_v55 = vld [vmem:[%s6102_s1 + $0xc0] sm:$0xff] }
  0xfc   : > { %v2121_v30 = vadd.f32 %v2045_v7, %v1807_v21  ;;  %v831_v35 = vrot.slane %v830_v23, 4  ;;  %2979 = vmatpush.bf16.msra.mxu2 %v4923_v55  ;;  %v538_v21 = vor.u32 %v536_v13, %v535_v56  ;;  %v4903_v7 = vld [vmem:[%s6102_s1 + $0xa0] sm:$0xff]  ;;  %v547_v39 = vsel %vm5317_vm7, %v539_v10, %v546_v40  ;;  %v667_v23 = vld [vmem:[#allocation2 + $0x70] sm:$0xf]  ;;  %v4838_v55 = vld [vmem:[#allocation2 + $0x178] sm:$0xff] }
  0xfd   : > { %4361 = vmatmul.msk.bf16.gmra.mxu0 %vm1142_vm1, %v4877_v58  ;;  %2664 = vmatpush.bf16.msra.mxu1 %v4903_v7  ;;  %670 = vst.msk [vmem:[#allocation2 + $0x74] sm:$0xf] %vm204_vm0, %v547_v39  ;;  %v833_v10 = vrot.slane %v536_v13, 5  ;;  %v264_v40 = vld [vmem:[#allocation2 + $0x78] sm:$0x1]  ;;  %v560_v7 = vshll.u32 %v5266_v63, 16 }
  0xfe   : > { %4153 = vmatmul.msk.bf16.gmra.mxu2 %vm1142_vm1, %v4837_v54  ;;  %v5726_v6 = vadd.f32 %v2359_v28, %v2121_v30  ;;  %v4943_v28 = vld [vmem:[%s6102_s1 + $0xe0] sm:$0xff]  ;;  %v668_v31 = vsel %vm5347_vm14, %v538_v21, %v667_v23  ;;  %v4878_v21 = vld [vmem:[#allocation2 + $0xf0] sm:$0xff] }
  0xff   : > { %4257 = vmatmul.msk.bf16.gmra.mxu3 %vm1142_vm1, %v4857_v29  ;;  %v828_v29 = vsel %vm5337_vm13, %v826_v52, %v827_v37  ;;  %v836_v37 = vrot.slane %v544_v26, 5  ;;  %669 = vst [vmem:[#allocation2 + $0x70] sm:$0xf] %v668_v31 }
 0x100   : > { %v1453_v42 = vpop.f32.mrf.mxu1  ;;  %3294 = vmatpush.bf16.msra.mxu3 %v4943_v28  ;;  %940 = vst.msk [vmem:[#allocation2 + $0x188] sm:$0xf] %vm204_vm0, %v828_v29  ;;  %v832_v28 = vrot.slane %v533_v57, 4 }
 0x101   : > { %v1734_v33 = vpop.f32.mrf.mxu2  ;;  %v1454_v44 = vadd.f32 %v1453_v42, %v5603_v32  ;;  %v4963_v32 = vld [vmem:[%s6102_s1 + $0x100] sm:$0xff] }
 0x102   : > { %v1808_v17 = vadd.f32 %v1734_v33, %v1452_v1  ;;  %v2048_v54 = vpop.f32.mrf.mxu3  ;;  %v941_v1 = vld [vmem:[#allocation2 + $0x18c] sm:$0xf]  ;;  %3609 = vmatpush.bf16.msra.mxu0 %v4963_v32  ;;  %v834_v32 = vor.u32 %v833_v10, %v832_v28  ;;  %v4799_v10 = vld [vmem:[#allocation2 + $0x60] sm:$0xff] }
 0x103   : > { %v2364_v30 = vpop.f32.mrf.mxu0  ;;  %v942_v4 = vsel %vm5374_vm15, %v831_v35, %v941_v1  ;;  %v552_v1 = vshll.u32 %v5262_v62, 16 }
 0x104   : > { %v2122_v61 = vadd.f32 %v2048_v54, %v1808_v17  ;;  %943 = vst [vmem:[#allocation2 + $0x18c] sm:$0xf] %v942_v4  ;;  %v557_v17 = vshrl.u32 %v5266_v63, 16 }
 0x106   : > { %v5750_v58 = vadd.f32 %v2362_v15, %v2122_v61  ;;  %v549_v15 = vshrl.u32 %v5262_v62, 16  ;;  %v265_v61 = vsel %vm5306_vm4, 0, %v264_v40  ;;  %v559_v57 = vrot.slane %v557_v17, 7 }
 0x107   : > { %266 = vst [vmem:[#allocation2 + $0x78] sm:$0x1] %v265_v61  ;;  %v845_v40 = vrot.slane %v560_v7, 5 }
 0x108   : > { %v1456_v9 = vpop.f32.mrf.mxu1  ;;  %v551_v43 = vrot.slane %v549_v15, 7  ;;  %v562_v63 = vor.u32 %v560_v7, %v559_v57 }
 0x109   : > { %v1736_v56 = vpop.f32.mrf.mxu2  ;;  %v1457_v42 = vadd.f32 %v1456_v9, %v5633_v14  ;;  %v839_v14 = vor.u32 %v838_v22, %v836_v37  ;;  %v835_v22 = vrot.slane %v834_v32, 4  ;;  %v316_v32 = vld [vmem:[#allocation2 + $0x19c] sm:$0x8] }
 0x10a   : > { %v1809_v33 = vadd.f32 %v1736_v56, %v1454_v44  ;;  %v2050_v35 = vpop.f32.mrf.mxu3  ;;  %v313_v44 = vld [vmem:[#allocation2 + $0x194] sm:$0x8]  ;;  %v555_v31 = vrot.slane %v551_v43, 4  ;;  %v554_v56 = vor.u32 %v552_v1, %v551_v43  ;;  %v842_v43 = vrot.slane %v552_v1, 5 }
 0x10b   : > { %4050 = vmatmul.msk.bf16.gmra.mxu1 %vm1142_vm1, %v4798_v27  ;;  %v314_v54 = vsel %vm5326_vm12, 0, %v313_v44  ;;  %v2367_v52 = vpop.f32.mrf.mxu0  ;;  %v840_v27 = vrot.slane %v839_v14, 4  ;;  %v317_v7 = vsel %vm5326_vm12, 0, %v316_v32 }
 0x10c   : > { %v2123_v26 = vadd.f32 %v2050_v35, %v1809_v33  ;;  %315 = vst [vmem:[#allocation2 + $0x194] sm:$0x8] %v314_v54  ;;  %v841_v54 = vrot.slane %v549_v15, 4 }
 0x10d   : > { %4362 = vmatmul.msk.bf16.gmra.mxu0 %vm1142_vm1, %v4878_v21  ;;  %v4839_v21 = vld [vmem:[#allocation2 + $0x180] sm:$0xff]  ;;  %318 = vst [vmem:[#allocation2 + $0x19c] sm:$0x8] %v317_v7  ;;  %v4840_v7 = vld [vmem:[#allocation2 + $0x188] sm:$0xff] }
 0x10e   : > { %4154 = vmatmul.msk.bf16.gmra.mxu2 %vm1142_vm1, %v4838_v55  ;;  %v5768_v13 = vadd.f32 %v2364_v30, %v2123_v26  ;;  %v837_v55 = vsel %vm5337_vm13, %v835_v22, %v836_v37  ;;  %v671_v35 = vld [vmem:[#allocation2 + $0x78] sm:$0xf]  ;;  %v847_v37 = vrot.slane %v557_v17, 4 }
 0x10f   : > { %4258 = vmatmul.msk.bf16.gmra.mxu3 %vm1142_vm1, %v4858_v38  ;;  %944 = vst.msk [vmem:[#allocation2 + $0x190] sm:$0xf] %vm204_vm0, %v837_v55  ;;  %v672_v26 = vsel %vm5347_vm14, %v554_v56, %v671_v35  ;;  %v4879_v17 = vld [vmem:[#allocation2 + $0xf8] sm:$0xff] }
 0x110   : > { %v1458_v4 = vpop.f32.mrf.mxu1  ;;  %673 = vst [vmem:[#allocation2 + $0x78] sm:$0xf] %v672_v26 }
 0x111   : > { %v1739_v29 = vpop.f32.mrf.mxu2  ;;  %v1459_v23 = vadd.f32 %v1458_v4, %v5644_v25  ;;  %v848_v4 = vor.u32 %v847_v37, %v845_v40 }
 0x112   : > { %v1810_v39 = vadd.f32 %v1739_v29, %v1457_v42  ;;  %v2053_v9 = vpop.f32.mrf.mxu3  ;;  %v563_v42 = vsel %vm5317_vm7, %v555_v31, %v562_v63  ;;  %v267_v29 = vld [vmem:[#allocation2 + $0x80] sm:$0x1]  ;;  %v5799_v31 = vld [vmem:[%s5047_s23 + $0x7c] sm:$0xf]  ;;  %v843_v63 = vor.u32 %v842_v43, %v841_v54 }
 0x113   : > { %v945_v33 = vld [vmem:[#allocation2 + $0x194] sm:$0xf]  ;;  %v2369_v62 = vpop.f32.mrf.mxu0  ;;  %674 = vst.msk [vmem:[#allocation2 + $0x7c] sm:$0xf] %vm204_vm0, %v563_v42  ;;  %v268_v15 = vsel %vm5306_vm4, 0, %v267_v29  ;;  %v573_v34 = vshrl.u32 %v5799_v31, 16 }
 0x114   : > { %v2124_v30 = vadd.f32 %v2053_v9, %v1810_v39  ;;  %v946_v28 = vsel %vm5374_vm15, %v840_v27, %v945_v33  ;;  %v5796_v27 = vld [vmem:[%s5047_s23 + $0x78] sm:$0xf]  ;;  %269 = vst [vmem:[#allocation2 + $0x80] sm:$0x1] %v268_v15  ;;  %v849_v22 = vrot.slane %v848_v4, 4  ;;  %s4786_s23 = sshll.u32 %s6134_s13, 8 }
 0x115   : > { %947 = vst [vmem:[#allocation2 + $0x194] sm:$0xf] %v946_v28  ;;  %v575_v55 = vrot.slane %v573_v34, 7  ;;  %v576_v28 = vshll.u32 %v5799_v31, 16  ;;  %s5958_s21 = scalar_lea.vmem %s6104_s3, %s4786_s23 }
 0x116   : > { %v5780_v25 = vadd.f32 %v2367_v52, %v2124_v30  ;;  %v4859_v52 = vld [vmem:[#allocation2 + $0x68] sm:$0xff]  ;;  %v565_v30 = vshrl.u32 %v5796_v27, 16  ;;  %710 = vst.msk [vmem:[#allocation2 + $0x110] sm:$0xf] %vm204_vm0, %v5796_v27 }
 0x117   : > { %711 = vst.msk [vmem:[#allocation2 + $0x114] sm:$0xf] %vm204_vm0, %v5799_v31  ;;  %v578_v37 = vor.u32 %v576_v28, %v575_v55 }
 0x118   : > { %v1461_v44 = vpop.f32.mrf.mxu1 }
 0x119   : > { %v1741_v38 = vpop.f32.mrf.mxu2  ;;  %v1462_v1 = vadd.f32 %v1461_v44, %v5495_v19  ;;  %v567_v19 = vrot.slane %v565_v30, 7  ;;  %v949_v44 = vld [vmem:[#allocation2 + $0x19c] sm:$0xf] }
 0x11a   : > { %v1811_v14 = vadd.f32 %v1741_v38, %v1459_v23  ;;  %v2055_v61 = vpop.f32.mrf.mxu3  ;;  %v950_v54 = vsel %vm5374_vm15, %v849_v22, %v949_v44 }
 0x11b   : > { %4051 = vmatmul.msk.bf16.gmra.mxu1 %vm1142_vm1, %v4799_v10  ;;  %v2372_v39 = vpop.f32.mrf.mxu0  ;;  %v844_v10 = vrot.slane %v843_v63, 4  ;;  %v571_v38 = vrot.slane %v567_v19, 4  ;;  %v675_v32 = vld [vmem:[#allocation2 + $0x80] sm:$0xf]  ;;  %951 = vst [vmem:[#allocation2 + $0x19c] sm:$0xf] %v950_v54 }
 0x11c   : > { %v2125_v57 = vadd.f32 %v2055_v61, %v1811_v14  ;;  %v4881_v54 = vld [vmem:[#allocation2 + $0x108] sm:$0xff]  ;;  %v4959_v11 = vld [vmem:[#allocation2 + $0x190] sm:$0xff] }
 0x11d   : > { %4363 = vmatmul.msk.bf16.gmra.mxu0 %vm1142_vm1, %v4879_v17 }
 0x11e   : > { %4155 = vmatmul.msk.bf16.gmra.mxu2 %vm1142_vm1, %v4839_v21  ;;  %v5792_v23 = vadd.f32 %v2369_v62, %v2125_v57  ;;  %v568_v62 = vshll.u32 %v5796_v27, 16  ;;  %v846_v21 = vsel %vm5337_vm13, %v844_v10, %v845_v40  ;;  %v4800_v57 = vld [vmem:[#allocation2 + $0x68] sm:$0xff]  ;;  %v4801_v10 = vld [vmem:[#allocation2 + $0x70] sm:$0xff] }
 0x11f   : > { %4259 = vmatmul.msk.bf16.gmra.mxu3 %vm1142_vm1, %v4859_v52  ;;  %948 = vst.msk [vmem:[#allocation2 + $0x198] sm:$0xf] %vm204_vm0, %v846_v21  ;;  %v579_v52 = vsel %vm5317_vm7, %v571_v38, %v578_v37  ;;  %v4841_v37 = vld [vmem:[#allocation2 + $0x190] sm:$0xff]  ;;  %v4861_v21 = vld [vmem:[#allocation2 + $0x78] sm:$0xff] }
 0x120   : > { %v1463_v9 = vpop.f32.mrf.mxu1  ;;  %v570_v26 = vor.u32 %v568_v62, %v567_v19  ;;  %678 = vst.msk [vmem:[#allocation2 + $0x84] sm:$0xf] %vm204_vm0, %v579_v52 }
 0x121   : > { %v1744_v56 = vpop.f32.mrf.mxu2  ;;  %v1464_v43 = vadd.f32 %v1463_v9, %v5513_v60 }
 0x122   : > { %v1812_v33 = vadd.f32 %v1744_v56, %v1462_v1  ;;  %v2058_v42 = vpop.f32.mrf.mxu3  ;;  %v676_v40 = vsel %vm5347_vm14, %v570_v26, %v675_v32 }
 0x123   : > { %v2374_v14 = vpop.f32.mrf.mxu0  ;;  %677 = vst [vmem:[#allocation2 + $0x80] sm:$0xf] %v676_v40 }
 0x124   : > { %v2126_v35 = vadd.f32 %v2058_v42, %v1812_v33 }
 0x126   : > { %v5823_v61 = vadd.f32 %v2372_v39, %v2126_v35  ;;  %v4860_v39 = vld [vmem:[#allocation2 + $0x70] sm:$0xff] }
 0x128   : > { %v1466_v4 = vpop.f32.mrf.mxu1 }
 0x129   : > { %v1746_v29 = vpop.f32.mrf.mxu2  ;;  %v1467_v56 = vadd.f32 %v1466_v4, %v5531_v51 }
 0x12a   : > { %v1813_v17 = vadd.f32 %v1746_v29, %v1464_v43  ;;  %v2060_v15 = vpop.f32.mrf.mxu3 }
 0x12b   : > { %4052 = vmatmul.msk.bf16.gmra.mxu1 %vm1142_vm1, %v4800_v57  ;;  %v2377_v1 = vpop.f32.mrf.mxu0 }
 0x12c   : > { %v2127_v60 = vadd.f32 %v2060_v15, %v1813_v17 }
 0x12d   : > { %4364 = vmatmul.msk.bf16.gmra.mxu0 %vm1142_vm1, %v4880_v50 }
 0x12e   : > { %4156 = vmatmul.msk.bf16.gmra.mxu2 %vm1142_vm1, %v4840_v7  ;;  %v5834_v63 = vadd.f32 %v2374_v14, %v2127_v60  ;;  %v4802_v60 = vld [vmem:[#allocation2 + $0x78] sm:$0xff] }
 0x12f   : > { %4260 = vmatmul.msk.bf16.gmra.mxu3 %vm1142_vm1, %v4860_v39 }
 0x130   : > { %v1468_v9 = vpop.f32.mrf.mxu1 }
 0x131   : > { %v1749_v18 = vpop.f32.mrf.mxu2  ;;  %v1469_v35 = vadd.f32 %v1468_v9, %v5551_v24  ;;  %v4862_v9 = vld [vmem:[#allocation2 + $0x80] sm:$0xff] }
 0x132   : > { %v1814_v22 = vadd.f32 %v1749_v18, %v1467_v56  ;;  %v2063_v33 = vpop.f32.mrf.mxu3  ;;  %v4842_v56 = vld [vmem:[#allocation2 + $0x198] sm:$0xff] }
 0x133   : > { %v2379_v55 = vpop.f32.mrf.mxu0 }
 0x134   : > { %v2128_v19 = vadd.f32 %v2063_v33, %v1814_v22  ;;  %v4882_v22 = vld [vmem:[#allocation2 + $0x110] sm:$0xff] }
 0x136   : > { %v5839_v42 = vadd.f32 %v2377_v1, %v2128_v19 }
 0x138   : > { %v1471_v38 = vpop.f32.mrf.mxu1 }
 0x139   : > { %v1751_v26 = vpop.f32.mrf.mxu2  ;;  %v1472_v52 = vadd.f32 %v1471_v38, %v5569_v53 }
 0x13a   : > { %v1815_v44 = vadd.f32 %v1751_v26, %v1469_v35  ;;  %v2065_v51 = vpop.f32.mrf.mxu3 }
 0x13b   : > { %4053 = vmatmul.msk.bf16.gmra.mxu1 %vm1142_vm1, %v4801_v10  ;;  %v2382_v43 = vpop.f32.mrf.mxu0 }
 0x13c   : > { %v2129_v14 = vadd.f32 %v2065_v51, %v1815_v44 }
 0x13d   : > { %4365 = vmatmul.msk.bf16.gmra.mxu0 %vm1142_vm1, %v4881_v54 }
 0x13e   : > { %4157 = vmatmul.msk.bf16.gmra.mxu2 %vm1142_vm1, %v4841_v37  ;;  %v5844_v57 = vadd.f32 %v2379_v55, %v2129_v14  ;;  %v4887_v14 = vld [vmem:[#allocation2 + $0x128] sm:$0xff] }
 0x13f   : > { %4261 = vmatmul.msk.bf16.gmra.mxu3 %vm1142_vm1, %v4861_v21 }
 0x140   : > { %v1473_v32 = vpop.f32.mrf.mxu1 }
 0x141   : > { %v1754_v24 = vpop.f32.mrf.mxu2  ;;  %v1474_v15 = vadd.f32 %v1473_v32, %v5589_v45  ;;  %v4927_v32 = vld [vmem:[#allocation2 + $0xa0] sm:$0xff] }
 0x142   : > { %v1816_v29 = vadd.f32 %v1754_v24, %v1472_v52  ;;  %v2068_v4 = vpop.f32.mrf.mxu3  ;;  %v4907_v52 = vld [vmem:[#allocation2 + $0x10] sm:$0xff] }
 0x143   : > { %v2384_v17 = vpop.f32.mrf.mxu0 }
 0x144   : > { %v2130_v40 = vadd.f32 %v2068_v4, %v1816_v29  ;;  %v4947_v29 = vld [vmem:[#allocation2 + $0x130] sm:$0xff] }
 0x146   : > { %v5849_v7 = vadd.f32 %v2382_v43, %v2130_v40 }
 0x148   : > { %v1476_v50 = vpop.f32.mrf.mxu1 }
 0x149   : > { %v1756_v39 = vpop.f32.mrf.mxu2  ;;  %v1477_v55 = vadd.f32 %v1476_v50, %v5619_v3 }
 0x14a   : > { %v1817_v1 = vadd.f32 %v1756_v39, %v1474_v15  ;;  %v2070_v53 = vpop.f32.mrf.mxu3 }
 0x14b   : > { %4054 = vmatmul.msk.bf16.gmra.mxu1 %vm1142_vm1, %v4802_v60  ;;  %v2387_v33 = vpop.f32.mrf.mxu0 }
 0x14c   : > { %v2131_v18 = vadd.f32 %v2070_v53, %v1817_v1 }
 0x14d   : > { %4366 = vmatmul.msk.bf16.gmra.mxu0 %vm1142_vm1, %v4882_v22 }
 0x14e   : > { %4158 = vmatmul.msk.bf16.gmra.mxu2 %vm1142_vm1, %v4842_v56  ;;  %v5854_v19 = vadd.f32 %v2384_v17, %v2131_v18  ;;  %v4888_v18 = vld [vmem:[#allocation2 + $0x130] sm:$0xff] }
 0x14f   : > { %4262 = vmatmul.msk.bf16.gmra.mxu3 %vm1142_vm1, %v4862_v9 }
 0x150   : > { %v1478_v35 = vpop.f32.mrf.mxu1 }
 0x151   : > { %v1759_v45 = vpop.f32.mrf.mxu2  ;;  %v1479_v51 = vadd.f32 %v1478_v35, %v5639_v41  ;;  %v4928_v35 = vld [vmem:[#allocation2 + $0xa8] sm:$0xff] }
 0x152   : > { %v1818_v10 = vadd.f32 %v1759_v45, %v1477_v55  ;;  %v2073_v26 = vpop.f32.mrf.mxu3  ;;  %v4908_v55 = vld [vmem:[#allocation2 + $0x18] sm:$0xff] }
 0x153   : > { %v2389_v44 = vpop.f32.mrf.mxu0 }
 0x154   : > { %v2132_v38 = vadd.f32 %v2073_v26, %v1818_v10  ;;  %v4948_v10 = vld [vmem:[#allocation2 + $0x138] sm:$0xff] }
 0x156   : > { %v5859_v37 = vadd.f32 %v2387_v33, %v2132_v38 }
 0x158   : > { %v1481_v54 = vpop.f32.mrf.mxu1 }
 0x159   : > { %v1761_v21 = vpop.f32.mrf.mxu2  ;;  %v1482_v17 = vadd.f32 %v1481_v54, %v5511_v8 }
 0x15a   : > { %v1819_v43 = vadd.f32 %v1761_v21, %v1479_v51  ;;  %v2075_v3 = vpop.f32.mrf.mxu3 }
 0x15b   : > { %4455 = vmatmul.msk.bf16.vlgmr.msra.gmra.mxu1 %vm1142_vm1, %v4887_v14  ;;  %v2392_v4 = vpop.f32.mrf.mxu0 }
 0x15c   : > { %v2133_v24 = vadd.f32 %v2075_v3, %v1819_v43 }
 0x15d   : > { %4767 = vmatmul.msk.bf16.vlgmr.msra.gmra.mxu0 %vm1142_vm1, %v4947_v29 }
 0x15e   : > { %4559 = vmatmul.msk.bf16.vlgmr.msra.gmra.mxu2 %vm1142_vm1, %v4907_v52  ;;  %v5864_v40 = vadd.f32 %v2389_v44, %v2133_v24  ;;  %v4889_v24 = vld [vmem:[#allocation2 + $0x138] sm:$0xff] }
 0x15f   : > { %4663 = vmatmul.msk.bf16.vlgmr.msra.gmra.mxu3 %vm1142_vm1, %v4927_v32 }
 0x160   : > { %v1483_v15 = vpop.f32.mrf.mxu1 }
 0x161   : > { %v1764_v41 = vpop.f32.mrf.mxu2  ;;  %v1484_v53 = vadd.f32 %v1483_v15, %v5529_v36  ;;  %v4929_v15 = vld [vmem:[#allocation2 + $0xb0] sm:$0xff] }
 0x162   : > { %v1820_v60 = vadd.f32 %v1764_v41, %v1482_v17  ;;  %v2078_v39 = vpop.f32.mrf.mxu3  ;;  %v4909_v17 = vld [vmem:[#allocation2 + $0x20] sm:$0xff] }
 0x163   : > { %v2394_v1 = vpop.f32.mrf.mxu0 }
 0x164   : > { %v2134_v50 = vadd.f32 %v2078_v39, %v1820_v60  ;;  %v4949_v60 = vld [vmem:[#allocation2 + $0x140] sm:$0xff] }
 0x166   : > { %v5869_v56 = vadd.f32 %v2392_v4, %v2134_v50 }
 0x168   : > { %v1486_v22 = vpop.f32.mrf.mxu1 }
 0x169   : > { %v1766_v9 = vpop.f32.mrf.mxu2  ;;  %v1487_v44 = vadd.f32 %v1486_v22, %v5549_v20 }
 0x16a   : > { %v1821_v33 = vadd.f32 %v1766_v9, %v1484_v53  ;;  %v2080_v8 = vpop.f32.mrf.mxu3 }
 0x16b   : > { %4456 = vmatmul.msk.bf16.gmra.mxu1 %vm1142_vm1, %v4888_v18  ;;  %v2397_v26 = vpop.f32.mrf.mxu0 }
 0x16c   : > { %v2135_v45 = vadd.f32 %v2080_v8, %v1821_v33 }
 0x16d   : > { %4768 = vmatmul.msk.bf16.gmra.mxu0 %vm1142_vm1, %v4948_v10 }
 0x16e   : > { %4560 = vmatmul.msk.bf16.gmra.mxu2 %vm1142_vm1, %v4908_v55  ;;  %v5874_v38 = vadd.f32 %v2394_v1, %v2135_v45  ;;  %v4890_v45 = vld [vmem:[#allocation2 + $0x140] sm:$0xff] }
 0x16f   : > { %4664 = vmatmul.msk.bf16.gmra.mxu3 %vm1142_vm1, %v4928_v35 }
 0x170   : > { %v1488_v51 = vpop.f32.mrf.mxu1 }
 0x171   : > { %v1769_v36 = vpop.f32.mrf.mxu2  ;;  %v1489_v3 = vadd.f32 %v1488_v51, %v5567_v12  ;;  %v4930_v51 = vld [vmem:[#allocation2 + $0xb8] sm:$0xff] }
 0x172   : > { %v1822_v14 = vadd.f32 %v1769_v36, %v1487_v44  ;;  %v2083_v21 = vpop.f32.mrf.mxu3  ;;  %v4910_v44 = vld [vmem:[#allocation2 + $0x28] sm:$0xff] }
 0x173   : > { %v2399_v43 = vpop.f32.mrf.mxu0 }
 0x174   : > { %v2136_v54 = vadd.f32 %v2083_v21, %v1822_v14  ;;  %v4950_v14 = vld [vmem:[#allocation2 + $0x148] sm:$0xff] }
 0x176   : > { %v5879_v52 = vadd.f32 %v2397_v26, %v2136_v54 }
 0x178   : > { %v1491_v29 = vpop.f32.mrf.mxu1 }
 0x179   : > { %v1771_v32 = vpop.f32.mrf.mxu2  ;;  %v1492_v1 = vadd.f32 %v1491_v29, %v5587_v46 }
 0x17a   : > { %v1823_v4 = vadd.f32 %v1771_v32, %v1489_v3  ;;  %v2085_v20 = vpop.f32.mrf.mxu3 }
 0x17b   : > { %4457 = vmatmul.msk.bf16.gmra.mxu1 %vm1142_vm1, %v4889_v24  ;;  %v2402_v39 = vpop.f32.mrf.mxu0 }
 0x17c   : > { %v2137_v41 = vadd.f32 %v2085_v20, %v1823_v4 }
 0x17d   : > { %4769 = vmatmul.msk.bf16.gmra.mxu0 %vm1142_vm1, %v4949_v60 }
 0x17e   : > { %4561 = vmatmul.msk.bf16.gmra.mxu2 %vm1142_vm1, %v4909_v17  ;;  %v5884_v50 = vadd.f32 %v2399_v43, %v2137_v41  ;;  %v4891_v41 = vld [vmem:[#allocation2 + $0x148] sm:$0xff] }
 0x17f   : > { %4665 = vmatmul.msk.bf16.gmra.mxu3 %vm1142_vm1, %v4929_v15 }
 0x180   : > { %v1493_v53 = vpop.f32.mrf.mxu1 }
 0x181   : > { %v1774_v12 = vpop.f32.mrf.mxu2  ;;  %v1494_v8 = vadd.f32 %v1493_v53, %v5617_v59  ;;  %v4931_v53 = vld [vmem:[#allocation2 + $0xc0] sm:$0xff] }
 0x182   : > { %v1824_v18 = vadd.f32 %v1774_v12, %v1492_v1  ;;  %v2088_v9 = vpop.f32.mrf.mxu3  ;;  %v4911_v1 = vld [vmem:[#allocation2 + $0x30] sm:$0xff] }
 0x183   : > { %v2404_v33 = vpop.f32.mrf.mxu0 }
 0x184   : > { %v2138_v22 = vadd.f32 %v2088_v9, %v1824_v18  ;;  %v4951_v18 = vld [vmem:[#allocation2 + $0x150] sm:$0xff] }
 0x186   : > { %v5889_v55 = vadd.f32 %v2402_v39, %v2138_v22 }
 0x188   : > { %v1496_v10 = vpop.f32.mrf.mxu1 }
 0x189   : > { %v1776_v35 = vpop.f32.mrf.mxu2  ;;  %v1497_v43 = vadd.f32 %v1496_v10, %v5637_v16 }
 0x18a   : > { %v1825_v26 = vadd.f32 %v1776_v35, %v1494_v8  ;;  %v2090_v46 = vpop.f32.mrf.mxu3 }
 0x18b   : > { %4458 = vmatmul.msk.bf16.gmra.mxu1 %vm1142_vm1, %v4890_v45  ;;  %v2407_v21 = vpop.f32.mrf.mxu0 }
 0x18c   : > { %v2139_v36 = vadd.f32 %v2090_v46, %v1825_v26 }
 0x18d   : > { %4770 = vmatmul.msk.bf16.gmra.mxu0 %vm1142_vm1, %v4950_v14  ;;  %v4892_v14 = vld [vmem:[#allocation2 + $0x150] sm:$0xff] }
 0x18e   : > { %4562 = vmatmul.msk.bf16.gmra.mxu2 %vm1142_vm1, %v4910_v44  ;;  %v5894_v54 = vadd.f32 %v2404_v33, %v2139_v36  ;;  %v6125_v33 = vld [vmem:[#allocation3_spill] sm:$0xff]  ;;  %v6126_v36 = vld [vmem:[#allocation4_spill] sm:$0xff] }
 0x18f   : > { %4666 = vmatmul.msk.bf16.gmra.mxu3 %vm1142_vm1, %v4930_v51 }
 0x190   : > { %v1498_v3 = vpop.f32.mrf.mxu1 }
 0x191   : > { %v1779_v59 = vpop.f32.mrf.mxu2  ;;  %v1499_v20 = vadd.f32 %v1498_v3, %v5655_v48  ;;  %v4912_v3 = vld [vmem:[#allocation2 + $0x38] sm:$0xff] }
 0x192   : > { %v1826_v24 = vadd.f32 %v1779_v59, %v1497_v43  ;;  %v2093_v32 = vpop.f32.mrf.mxu3 }
 0x193   : > { %v2409_v4 = vpop.f32.mrf.mxu0 }
 0x194   : > { %v2140_v29 = vadd.f32 %v2093_v32, %v1826_v24 }
 0x196   : > { %v5899_v17 = vadd.f32 %v2407_v21, %v2140_v29  ;;  %v4932_v29 = vld [vmem:[#allocation2 + $0xc8] sm:$0xff] }
 0x198   : > { %v1501_v60 = vpop.f32.mrf.mxu1 }
 0x199   : > { %v1781_v15 = vpop.f32.mrf.mxu2  ;;  %v1502_v8 = vadd.f32 %v1501_v60, %v6125_v33  ;;  %v6128_v33 = vld [vmem:[#allocation6_spill] sm:$0xff] }
 0x19a   : > { %v1827_v39 = vadd.f32 %v1781_v15, %v1499_v20  ;;  %v2095_v16 = vpop.f32.mrf.mxu3  ;;  %v6127_v15 = vld [vmem:[#allocation5_spill] sm:$0xff] }
 0x19b   : > { %4459 = vmatmul.msk.bf16.gmra.mxu1 %vm1142_vm1, %v4891_v41  ;;  %v2412_v9 = vpop.f32.mrf.mxu0 }
 0x19c   : > { %v2141_v12 = vadd.f32 %v2095_v16, %v1827_v39 }
 0x19d   : > { %4771 = vmatmul.msk.bf16.gmra.mxu0 %vm1142_vm1, %v4951_v18 }
 0x19e   : > { %4563 = vmatmul.msk.bf16.gmra.mxu2 %vm1142_vm1, %v4911_v1  ;;  %v5904_v22 = vadd.f32 %v2409_v4, %v2141_v12  ;;  %v4952_v4 = vld [vmem:[#allocation2 + $0x158] sm:$0xff] }
 0x19f   : > { %4667 = vmatmul.msk.bf16.gmra.mxu3 %vm1142_vm1, %v4931_v53 }
 0x1a0   : > { %v1503_v45 = vpop.f32.mrf.mxu1 }
 0x1a1   : > { %v1784_v48 = vpop.f32.mrf.mxu2  ;;  %v1504_v51 = vadd.f32 %v1503_v45, %v6126_v36 }
 0x1a2   : > { %v1828_v35 = vadd.f32 %v1784_v48, %v1502_v8  ;;  %v2098_v10 = vpop.f32.mrf.mxu3  ;;  %v4893_v48 = vld [vmem:[#allocation2 + $0x158] sm:$0xff] }
 0x1a3   : > { %v2414_v44 = vpop.f32.mrf.mxu0 }
 0x1a4   : > { %v2142_v26 = vadd.f32 %v2098_v10, %v1828_v35 }
 0x1a6   : > { %v5909_v46 = vadd.f32 %v2412_v9, %v2142_v26  ;;  %v4913_v26 = vld [vmem:[#allocation2 + $0x40] sm:$0xff] }
 0x1a8   : > { %v1506_v43 = vpop.f32.mrf.mxu1 }
 0x1a9   : > { %v1786_v21 = vpop.f32.mrf.mxu2  ;;  %v1507_v60 = vadd.f32 %v1506_v43, %v6127_v15 }
 0x1aa   : > { %v1829_v59 = vadd.f32 %v1786_v21, %v1504_v51  ;;  %v2100_v24 = vpop.f32.mrf.mxu3  ;;  %v4933_v51 = vld [vmem:[#allocation2 + $0xd0] sm:$0xff] }
 0x1ab   : > { %4460 = vmatmul.msk.bf16.gmra.mxu1 %vm1142_vm1, %v4892_v14  ;;  %v2417_v20 = vpop.f32.mrf.mxu0  ;;  %v4953_v14 = vld [vmem:[#allocation2 + $0x160] sm:$0xff] }
 0x1ac   : > { %v2143_v32 = vadd.f32 %v2100_v24, %v1829_v59  ;;  %v6129_v59 = vld [vmem:[#allocation7_spill] sm:$0xff] }
 0x1ad   : > { %4772 = vmatmul.msk.bf16.gmra.mxu0 %vm1142_vm1, %v4952_v4 }
 0x1ae   : > { %4564 = vmatmul.msk.bf16.gmra.mxu2 %vm1142_vm1, %v4912_v3  ;;  %v5914_v41 = vadd.f32 %v2414_v44, %v2143_v32 }
 0x1af   : > { %4668 = vmatmul.msk.bf16.gmra.mxu3 %vm1142_vm1, %v4932_v29 }
 0x1b0   : > { %v1508_v1 = vpop.f32.mrf.mxu1 }
 0x1b1   : > { %v1789_v39 = vpop.f32.mrf.mxu2  ;;  %v1509_v8 = vadd.f32 %v1508_v1, %v6128_v33  ;;  %v4914_v33 = vld [vmem:[#allocation2 + $0x48] sm:$0xff] }
 0x1b2   : > { %v1830_v16 = vadd.f32 %v1789_v39, %v1507_v60  ;;  %v2103_v12 = vpop.f32.mrf.mxu3  ;;  %v6130_v39 = vld [vmem:[#allocation8_spill] sm:$0xff] }
 0x1b3   : > { %v2419_v18 = vpop.f32.mrf.mxu0 }
 0x1b4   : > { %v2144_v53 = vadd.f32 %v2103_v12, %v1830_v16  ;;  %v4894_v16 = vld [vmem:[#allocation2 + $0x160] sm:$0xff] }
 0x1b6   : > { %v5919_v9 = vadd.f32 %v2417_v20, %v2144_v53 }
 0x1b8   : > { %v1511_v35 = vpop.f32.mrf.mxu1 }
 0x1b9   : > { %v1791_v45 = vpop.f32.mrf.mxu2  ;;  %v1512_v3 = vadd.f32 %v1511_v35, %v6129_v59  ;;  %v4954_v35 = vld [vmem:[#allocation2 + $0x168] sm:$0xff] }
 0x1ba   : > { %v1831_v10 = vadd.f32 %v1791_v45, %v1509_v8  ;;  %v2105_v44 = vpop.f32.mrf.mxu3  ;;  %v4934_v45 = vld [vmem:[#allocation2 + $0xd8] sm:$0xff] }
 0x1bb   : > { %4461 = vmatmul.msk.bf16.gmra.mxu1 %vm1142_vm1, %v4893_v48  ;;  %v2422_v21 = vpop.f32.mrf.mxu0 }
 0x1bc   : > { %v2145_v36 = vadd.f32 %v2105_v44, %v1831_v10  ;;  %v6131_v44 = vld [vmem:[#allocation9_spill] sm:$0xff] }
 0x1bd   : > { %4773 = vmatmul.msk.bf16.gmra.mxu0 %vm1142_vm1, %v4953_v14 }
 0x1be   : > { %4565 = vmatmul.msk.bf16.gmra.mxu2 %vm1142_vm1, %v4913_v26  ;;  %v5924_v43 = vadd.f32 %v2419_v18, %v2145_v36 }
 0x1bf   : > { %4669 = vmatmul.msk.bf16.gmra.mxu3 %vm1142_vm1, %v4933_v51 }
 0x1c0   : > { %v1513_v32 = vpop.f32.mrf.mxu1 }
 0x1c1   : > { %v1794_v24 = vpop.f32.mrf.mxu2  ;;  %v1514_v1 = vadd.f32 %v1513_v32, %v6130_v39 }
 0x1c2   : > { %v1832_v29 = vadd.f32 %v1794_v24, %v1512_v3  ;;  %v2108_v4 = vpop.f32.mrf.mxu3 }
 0x1c3   : > { %v2424_v15 = vpop.f32.mrf.mxu0 }
 0x1c4   : > { %v2146_v20 = vadd.f32 %v2108_v4, %v1832_v29  ;;  %v6132_v29 = vld [vmem:[#allocation10_spill] sm:$0xff] }
 0x1c6   : > { %v5929_v60 = vadd.f32 %v2422_v21, %v2146_v20  ;;  %v4895_v20 = vld [vmem:[#allocation2 + $0x168] sm:$0xff] }
 0x1c8   : > { %v1516_v53 = vpop.f32.mrf.mxu1 }
 0x1c9   : > { %v1796_v12 = vpop.f32.mrf.mxu2  ;;  %v1517_v36 = vadd.f32 %v1516_v53, %v6131_v44 }
 0x1ca   : > { %v1833_v18 = vadd.f32 %v1796_v12, %v1514_v1  ;;  %v2110_v8 = vpop.f32.mrf.mxu3 }
 0x1cb   : > { %4462 = vmatmul.msk.bf16.gmra.mxu1 %vm1142_vm1, %v4894_v16  ;;  %v2427_v10 = vpop.f32.mrf.mxu0  ;;  %v4915_v16 = vld [vmem:[#allocation2 + $0x50] sm:$0xff] }
 0x1cc   : > { %v2147_v48 = vadd.f32 %v2110_v8, %v1833_v18  ;;  %v4935_v18 = vld [vmem:[#allocation2 + $0xe0] sm:$0xff] }
 0x1cd   : > { %4774 = vmatmul.msk.bf16.gmra.mxu0 %vm1142_vm1, %v4954_v35 }
 0x1ce   : > { %4566 = vmatmul.msk.bf16.gmra.mxu2 %vm1142_vm1, %v4914_v33  ;;  %v5934_v26 = vadd.f32 %v2424_v15, %v2147_v48  ;;  %v4955_v33 = vld [vmem:[#allocation2 + $0x170] sm:$0xff] }
 0x1cf   : > { %4670 = vmatmul.msk.bf16.gmra.mxu3 %vm1142_vm1, %v4934_v45 }
 0x1d0   : > { %v1518_v14 = vpop.f32.mrf.mxu1 }
 0x1d1   : > { %v1799_v51 = vpop.f32.mrf.mxu2  ;;  %v1519_v4 = vadd.f32 %v1518_v14, %v6132_v29  ;;  %v5953_v14 = vld [vmem:[%s6103_s2] ss:$0 sm:$0xff] }
 0x1d2   : > { %v1834_v21 = vadd.f32 %v1799_v51, %v1517_v36  ;;  %v2113_v59 = vpop.f32.mrf.mxu3 }
 0x1d3   : > { %v2429_v24 = vpop.f32.mrf.mxu0 }
 0x1d4   : > { %v2148_v3 = vadd.f32 %v2113_v59, %v1834_v21 }
 0x1d6   : > { %v5939_v32 = vadd.f32 %v2427_v10, %v2148_v3  ;;  %v4896_v3 = vld [vmem:[#allocation2 + $0x170] sm:$0xff] }
 0x1d8   : > { %v2666_v15 = vpop.f32.mrf.mxu1 }
 0x1d9   : > { %v1801_v39 = vpop.f32.mrf.mxu2  ;;  %v2746_v45 = vadd.f32 %v2666_v15, %v5680_v2 }
 0x1da   : > { %v1835_v1 = vadd.f32 %v1801_v39, %v1519_v4  ;;  %v2115_v12 = vpop.f32.mrf.mxu3  ;;  %v4916_v39 = vld [vmem:[#allocation2 + $0x58] sm:$0xff] }
 0x1db   : > { %4463 = vmatmul.msk.bf16.gmra.mxu1 %vm1142_vm1, %v4895_v20  ;;  %v3611_v8 = vpop.f32.mrf.mxu0 }
 0x1dc   : > { %v2149_v53 = vadd.f32 %v2115_v12, %v1835_v1  ;;  %v4956_v12 = vld [vmem:[#allocation2 + $0x178] sm:$0xff] }
 0x1dd   : > { %4775 = vmatmul.msk.bf16.gmra.mxu0 %vm1142_vm1, %v4955_v33 }
 0x1de   : > { %4567 = vmatmul.msk.bf16.gmra.mxu2 %vm1142_vm1, %v4915_v16  ;;  %v5944_v48 = vadd.f32 %v2429_v24, %v2149_v53  ;;  %v4936_v16 = vld [vmem:[#allocation2 + $0xe8] sm:$0xff] }
 0x1df   : > { %4671 = vmatmul.msk.bf16.gmra.mxu3 %vm1142_vm1, %v4935_v18 }
 0x1e0   : > { %v2668_v10 = vpop.f32.mrf.mxu1 }
 0x1e1   : > { %v2981_v35 = vpop.f32.mrf.mxu2  ;;  %v2747_v2 = vadd.f32 %v2668_v10, %v5696_v5 }
 0x1e2   : > { %v3061_v44 = vadd.f32 %v2981_v35, %v2746_v45  ;;  %v3296_v36 = vpop.f32.mrf.mxu3 }
 0x1e3   : > { %v3613_v59 = vpop.f32.mrf.mxu0 }
 0x1e4   : > { %v3376_v51 = vadd.f32 %v3296_v36, %v3061_v44 }
 0x1e6   : > { %v3691_v21 = vadd.f32 %v3611_v8, %v3376_v51 }
 0x1e8   : > { %v3727_v24 = vadd.f32 %v5953_v14, %v3691_v21  ;;  %v2671_v4 = vpop.f32.mrf.mxu1 }
 0x1e9   : > { %v2983_v29 = vpop.f32.mrf.mxu2  ;;  %v2748_v5 = vadd.f32 %v2671_v4, %v5708_v49 }
 0x1ea   : > { %v3062_v20 = vadd.f32 %v2983_v29, %v2747_v2  ;;  %3759 = vst [vmem:[%s5958_s21] sm:$0xff] %v3727_v24  ;;  %v3298_v15 = vpop.f32.mrf.mxu3  ;;  %v4917_v29 = vld [vmem:[#allocation2 + $0x60] sm:$0xff] }
 0x1eb   : > { %4464 = vmatmul.msk.bf16.gmra.mxu1 %vm1142_vm1, %v4896_v3  ;;  %v3616_v18 = vpop.f32.mrf.mxu0 }
 0x1ec   : > { %v3377_v1 = vadd.f32 %v3298_v15, %v3062_v20  ;;  %v4957_v15 = vld [vmem:[#allocation2 + $0x180] sm:$0xff] }
 0x1ed   : > { %4776 = vmatmul.msk.bf16.gmra.mxu0 %vm1142_vm1, %v4956_v12 }
 0x1ee   : > { %4568 = vmatmul.msk.bf16.gmra.mxu2 %vm1142_vm1, %v4916_v39  ;;  %v3692_v53 = vadd.f32 %v3613_v59, %v3377_v1  ;;  %v4897_v59 = vld [vmem:[#allocation2 + $0x178] sm:$0xff]  ;;  %v4937_v39 = vld [vmem:[#allocation2 + $0xf0] sm:$0xff] }
 0x1ef   : > { %4672 = vmatmul.msk.bf16.gmra.mxu3 %vm1142_vm1, %v4936_v16 }
 0x1f0   : > { %v3728_v33 = vadd.f32 %v5953_v14, %v3692_v53  ;;  %v2673_v45 = vpop.f32.mrf.mxu1 }
 0x1f1   : > { %v2986_v8 = vpop.f32.mrf.mxu2  ;;  %v2749_v21 = vadd.f32 %v2673_v45, %v5726_v6 }
 0x1f2   : > { %v3063_v35 = vadd.f32 %v2986_v8, %v2748_v5  ;;  %3760 = vst [vmem:[%s5958_s21 + $0x8] sm:$0xff] %v3728_v33  ;;  %v3301_v10 = vpop.f32.mrf.mxu3 }
 0x1f3   : > { %v3618_v51 = vpop.f32.mrf.mxu0 }
 0x1f4   : > { %v3378_v44 = vadd.f32 %v3301_v10, %v3063_v35 }
 0x1f6   : > { %v3693_v36 = vadd.f32 %v3616_v18, %v3378_v44  ;;  %v4898_v44 = vld [vmem:[#allocation2 + $0x180] sm:$0xff] }
 0x1f8   : > { %v3729_v49 = vadd.f32 %v5953_v14, %v3693_v36  ;;  %v2676_v3 = vpop.f32.mrf.mxu1 }
 0x1f9   : > { %v2988_v2 = vpop.f32.mrf.mxu2  ;;  %v2750_v6 = vadd.f32 %v2676_v3, %v5750_v58  ;;  %v4938_v3 = vld [vmem:[#allocation2 + $0xf8] sm:$0xff] }
 0x1fa   : > { %v3064_v24 = vadd.f32 %v2988_v2, %v2749_v21  ;;  %3761 = vst [vmem:[%s5958_s21 + $0x10] sm:$0xff] %v3729_v49  ;;  %v3303_v4 = vpop.f32.mrf.mxu3 }
 0x1fb   : > { %4465 = vmatmul.msk.bf16.gmra.mxu1 %vm1142_vm1, %v4897_v59  ;;  %v3621_v16 = vpop.f32.mrf.mxu0  ;;  %v4918_v59 = vld [vmem:[#allocation2 + $0x68] sm:$0xff] }
 0x1fc   : > { %v3379_v20 = vadd.f32 %v3303_v4, %v3064_v24  ;;  %v4958_v24 = vld [vmem:[#allocation2 + $0x188] sm:$0xff] }
 0x1fd   : > { %4777 = vmatmul.msk.bf16.gmra.mxu0 %vm1142_vm1, %v4957_v15 }
 0x1fe   : > { %4569 = vmatmul.msk.bf16.gmra.mxu2 %vm1142_vm1, %v4917_v29  ;;  %v3694_v1 = vadd.f32 %v3618_v51, %v3379_v20  ;;  %v319_v20 = vld [vmem:[#allocation2 + $0x1a4] sm:$0x8] }
 0x1ff   : > { %4673 = vmatmul.msk.bf16.gmra.mxu3 %vm1142_vm1, %v4937_v39 }
 0x200   : > { %v3730_v12 = vadd.f32 %v5953_v14, %v3694_v1  ;;  %v2678_v18 = vpop.f32.mrf.mxu1 }
 0x201   : > { %v2991_v53 = vpop.f32.mrf.mxu2  ;;  %v2751_v10 = vadd.f32 %v2678_v18, %v5768_v13  ;;  %v856_v18 = vrot.slane %v573_v34, 4 }
 0x202   : > { %v3065_v5 = vadd.f32 %v2991_v53, %v2750_v6  ;;  %3762 = vst [vmem:[%s5958_s21 + $0x18] sm:$0xff] %v3730_v12  ;;  %v3306_v33 = vpop.f32.mrf.mxu3  ;;  %v850_v12 = vrot.slane %v565_v30, 4  ;;  %v854_v53 = vrot.slane %v576_v28, 5 }
 0x203   : > { %v3623_v35 = vpop.f32.mrf.mxu0 }
 0x204   : > { %v3380_v8 = vadd.f32 %v3306_v33, %v3065_v5 }
 0x206   : > { %v3695_v45 = vadd.f32 %v3621_v16, %v3380_v8  ;;  %v320_v16 = vsel %vm5326_vm12, 0, %v319_v20  ;;  %v857_v8 = vor.u32 %v856_v18, %v854_v53  ;;  %v4920_v18 = vld [vmem:[#allocation2 + $0x78] sm:$0xff] }
 0x207   : > { %321 = vst [vmem:[#allocation2 + $0x1a4] sm:$0x8] %v320_v16 }
 0x208   : > { %v3731_v58 = vadd.f32 %v5953_v14, %v3695_v45  ;;  %v2681_v51 = vpop.f32.mrf.mxu1 }
 0x209   : > { %v2993_v36 = vpop.f32.mrf.mxu2  ;;  %v2752_v13 = vadd.f32 %v2681_v51, %v5780_v25  ;;  %v851_v25 = vrot.slane %v568_v62, 5  ;;  %v4919_v51 = vld [vmem:[#allocation2 + $0x70] sm:$0xff] }
 0x20a   : > { %v3066_v21 = vadd.f32 %v2993_v36, %v2751_v10  ;;  %3763 = vst [vmem:[%s5958_s21 + $0x20] sm:$0xff] %v3731_v58  ;;  %v3308_v49 = vpop.f32.mrf.mxu3  ;;  %v4899_v58 = vld [vmem:[#allocation2 + $0x188] sm:$0xff] }
 0x20b   : > { %4466 = vmatmul.msk.bf16.gmra.mxu1 %vm1142_vm1, %v4898_v44  ;;  %v3626_v4 = vpop.f32.mrf.mxu0  ;;  %v852_v33 = vor.u32 %v851_v25, %v850_v12  ;;  %v858_v44 = vrot.slane %v857_v8, 4  ;;  %v4960_v8 = vld [vmem:[#allocation2 + $0x198] sm:$0xff] }
 0x20c   : > { %v3381_v2 = vadd.f32 %v3308_v49, %v3066_v21  ;;  %v4939_v49 = vld [vmem:[#allocation2 + $0x100] sm:$0xff] }
 0x20d   : > { %4778 = vmatmul.msk.bf16.gmra.mxu0 %vm1142_vm1, %v4958_v24  ;;  %v853_v10 = vrot.slane %v852_v33, 4  ;;  %v4940_v33 = vld [vmem:[#allocation2 + $0x108] sm:$0xff] }
 0x20e   : > { %4570 = vmatmul.msk.bf16.gmra.mxu2 %vm1142_vm1, %v4918_v59  ;;  %v3696_v29 = vadd.f32 %v3623_v35, %v3381_v2  ;;  %v953_v34 = vld [vmem:[#allocation2 + $0x1a4] sm:$0xf] }
 0x20f   : > { %4674 = vmatmul.msk.bf16.gmra.mxu3 %vm1142_vm1, %v4938_v3  ;;  %v855_v31 = vsel %vm5337_vm13, %v853_v10, %v854_v53  ;;  %v954_v21 = vsel %vm5374_vm15, %v858_v44, %v953_v34 }
 0x210   : > { %v3732_v39 = vadd.f32 %v5953_v14, %v3696_v29  ;;  %v2683_v1 = vpop.f32.mrf.mxu1  ;;  %952 = vst.msk [vmem:[#allocation2 + $0x1a0] sm:$0xf] %vm204_vm0, %v855_v31 }
 0x211   : > { %v2996_v15 = vpop.f32.mrf.mxu2  ;;  %v2753_v30 = vadd.f32 %v2683_v1, %v5792_v23  ;;  %955 = vst [vmem:[#allocation2 + $0x1a4] sm:$0xf] %v954_v21 }
 0x212   : > { %v3067_v6 = vadd.f32 %v2996_v15, %v2752_v13  ;;  %3764 = vst [vmem:[%s5958_s21 + $0x28] sm:$0xff] %v3732_v39  ;;  %v3311_v5 = vpop.f32.mrf.mxu3 }
 0x213   : > { %v3628_v35 = vpop.f32.mrf.mxu0 }
 0x214   : > { %v3382_v0 = vadd.f32 %v3311_v5, %v3067_v6  ;;  %v4900_v6 = vld [vmem:[#allocation2 + $0x190] sm:$0xff] }
 0x216   : > { %v3697_v45 = vadd.f32 %v3626_v4, %v3382_v0 }
 0x218   : > { %v3733_v27 = vadd.f32 %v5953_v14, %v3697_v45  ;;  %v2686_v36 = vpop.f32.mrf.mxu1 }
 0x219   : > { %v2998_v62 = vpop.f32.mrf.mxu2  ;;  %v2754_v24 = vadd.f32 %v2686_v36, %v5823_v61 }
 0x21a   : > { %v3068_v28 = vadd.f32 %v2998_v62, %v2753_v30  ;;  %3765 = vst [vmem:[%s5958_s21 + $0x30] sm:$0xff] %v3733_v27  ;;  %v3313_v59 = vpop.f32.mrf.mxu3 }
 0x21b   : > { %4467 = vmatmul.msk.bf16.gmra.mxu1 %vm1142_vm1, %v4899_v58  ;;  %v3631_v3 = vpop.f32.mrf.mxu0 }
 0x21c   : > { %v3383_v23 = vadd.f32 %v3313_v59, %v3068_v28  ;;  %v4901_v28 = vld [vmem:[#allocation2 + $0x198] sm:$0xff] }
 0x21d   : > { %4779 = vmatmul.msk.bf16.gmra.mxu0 %vm1142_vm1, %v4959_v11 }
 0x21e   : > { %4571 = vmatmul.msk.bf16.gmra.mxu2 %vm1142_vm1, %v4919_v51  ;;  %v3698_v2 = vadd.f32 %v3628_v35, %v3383_v23  ;;  %v4921_v23 = vld [vmem:[#allocation2 + $0x80] sm:$0xff] }
 0x21f   : > { %4675 = vmatmul.msk.bf16.gmra.mxu3 %vm1142_vm1, %v4939_v49 }
 0x220   : > { %v3734_v29 = vadd.f32 %v5953_v14, %v3698_v2  ;;  %v2688_v4 = vpop.f32.mrf.mxu1  ;;  %v4941_v2 = vld [vmem:[#allocation2 + $0x110] sm:$0xff] }
 0x221   : > { %v3001_v47 = vpop.f32.mrf.mxu2  ;;  %v2755_v16 = vadd.f32 %v2688_v4, %v5834_v63 }
 0x222   : > { %v3069_v13 = vadd.f32 %v3001_v47, %v2754_v24  ;;  %3766 = vst [vmem:[%s5958_s21 + $0x38] sm:$0xff] %v3734_v29  ;;  %v3316_v20 = vpop.f32.mrf.mxu3 }
 0x223   : > { %v3633_v1 = vpop.f32.mrf.mxu0 }
 0x224   : > { %v3384_v39 = vadd.f32 %v3316_v20, %v3069_v13 }
 0x226   : > { %v3699_v15 = vadd.f32 %v3631_v3, %v3384_v39  ;;  %v4961_v3 = vld [vmem:[#allocation2 + $0x1a0] sm:$0xff] }
 0x228   : > { %v3735_v61 = vadd.f32 %v5953_v14, %v3699_v15  ;;  %v2691_v25 = vpop.f32.mrf.mxu1 }
 0x229   : > { %v3003_v12 = vpop.f32.mrf.mxu2  ;;  %v2756_v63 = vadd.f32 %v2691_v25, %v5839_v42 }
 0x22a   : > { %v3070_v53 = vadd.f32 %v3003_v12, %v2755_v16  ;;  %3767 = vst [vmem:[%s5958_s21 + $0x40] sm:$0xff] %v3735_v61  ;;  %v3318_v5 = vpop.f32.mrf.mxu3  ;;  %v4902_v61 = vld [vmem:[#allocation2 + $0x1a0] sm:$0xff] }
 0x22b   : > { %4468 = vmatmul.msk.bf16.gmra.mxu1 %vm1142_vm1, %v4900_v6  ;;  %v3636_v35 = vpop.f32.mrf.mxu0 }
 0x22c   : > { %v3385_v0 = vadd.f32 %v3318_v5, %v3070_v53 }
 0x22d   : > { %4780 = vmatmul.msk.bf16.gmra.mxu0 %vm1142_vm1, %v4960_v8  ;;  %v4962_v8 = vld [vmem:[#allocation2 + $0x1a8] sm:$0xff] }
 0x22e   : > { %4572 = vmatmul.msk.bf16.gmra.mxu2 %vm1142_vm1, %v4920_v18  ;;  %v3700_v45 = vadd.f32 %v3633_v1, %v3385_v0  ;;  %v4922_v18 = vld [vmem:[#allocation2 + $0x88] sm:$0xff] }
 0x22f   : > { %4676 = vmatmul.msk.bf16.gmra.mxu3 %vm1142_vm1, %v4940_v33  ;;  %v4942_v33 = vld [vmem:[#allocation2 + $0x118] sm:$0xff] }
 0x230   : > { %v3736_v10 = vadd.f32 %v5953_v14, %v3700_v45  ;;  %v2693_v30 = vpop.f32.mrf.mxu1 }
 0x231   : > { %v3006_v44 = vpop.f32.mrf.mxu2  ;;  %v2757_v34 = vadd.f32 %v2693_v30, %v5844_v57 }
 0x232   : > { %v3071_v58 = vadd.f32 %v3006_v44, %v2756_v63  ;;  %3768 = vst [vmem:[%s5958_s21 + $0x48] sm:$0xff] %v3736_v10  ;;  %v3321_v27 = vpop.f32.mrf.mxu3 }
 0x233   : > { %v3638_v31 = vpop.f32.mrf.mxu0 }
 0x234   : > { %v3386_v62 = vadd.f32 %v3321_v27, %v3071_v58 }
 0x236   : > { %v3701_v36 = vadd.f32 %v3636_v35, %v3386_v62 }
 0x238   : > { %v3737_v42 = vadd.f32 %v5953_v14, %v3701_v36  ;;  %v2696_v21 = vpop.f32.mrf.mxu1 }
 0x239   : > { %v3008_v51 = vpop.f32.mrf.mxu2  ;;  %v2758_v57 = vadd.f32 %v2696_v21, %v5849_v7 }
 0x23a   : > { %v3072_v59 = vadd.f32 %v3008_v51, %v2757_v34  ;;  %3769 = vst [vmem:[%s5958_s21 + $0x50] sm:$0xff] %v3737_v42  ;;  %v3323_v49 = vpop.f32.mrf.mxu3 }
 0x23b   : > { %4469 = vmatmul.msk.bf16.gmra.mxu1 %vm1142_vm1, %v4901_v28  ;;  %v3641_v29 = vpop.f32.mrf.mxu0 }
 0x23c   : > { %v3387_v11 = vadd.f32 %v3323_v49, %v3072_v59 }
 0x23d   : > { %4781 = vmatmul.msk.bf16.gmra.mxu0 %vm1142_vm1, %v4961_v3 }
 0x23e   : > { %4573 = vmatmul.msk.bf16.gmra.mxu2 %vm1142_vm1, %v4921_v23  ;;  %v3702_v24 = vadd.f32 %v3638_v31, %v3387_v11 }
 0x23f   : > { %4677 = vmatmul.msk.bf16.gmra.mxu3 %vm1142_vm1, %v4941_v2 }
 0x240   : > { %v3738_v47 = vadd.f32 %v5953_v14, %v3702_v24  ;;  %v2698_v13 = vpop.f32.mrf.mxu1 }
 0x241   : > { %v3011_v4 = vpop.f32.mrf.mxu2  ;;  %v2759_v6 = vadd.f32 %v2698_v13, %v5854_v19 }
 0x242   : > { %v3073_v20 = vadd.f32 %v3011_v4, %v2758_v57  ;;  %3770 = vst [vmem:[%s5958_s21 + $0x58] sm:$0xff] %v3738_v47  ;;  %v3326_v39 = vpop.f32.mrf.mxu3 }
 0x243   : > { %v3643_v16 = vpop.f32.mrf.mxu0 }
 0x244   : > { %v3388_v15 = vadd.f32 %v3326_v39, %v3073_v20 }
 0x246   : > { %v3703_v1 = vadd.f32 %v3641_v29, %v3388_v15 }
 0x248   : > { %v3739_v7 = vadd.f32 %v5953_v14, %v3703_v1  ;;  %v2701_v25 = vpop.f32.mrf.mxu1 }
 0x249   : > { %v3013_v12 = vpop.f32.mrf.mxu2  ;;  %v2760_v19 = vadd.f32 %v2701_v25, %v5859_v37 }
 0x24a   : > { %v3074_v53 = vadd.f32 %v3013_v12, %v2759_v6  ;;  %3771 = vst [vmem:[%s5958_s21 + $0x60] sm:$0xff] %v3739_v7  ;;  %v3328_v5 = vpop.f32.mrf.mxu3 }
 0x24b   : > { %4470 = vmatmul.msk.bf16.gmra.mxu1 %vm1142_vm1, %v4902_v61  ;;  %v3646_v35 = vpop.f32.mrf.mxu0 }
 0x24c   : > { %v3389_v0 = vadd.f32 %v3328_v5, %v3074_v53 }
 0x24d   : > { %4782 = vmatmul.msk.bf16.gmra.mxu0 %vm1142_vm1, %v4962_v8 }
 0x24e   : > { %4574 = vmatmul.msk.bf16.gmra.mxu2 %vm1142_vm1, %v4922_v18  ;;  %v3704_v45 = vadd.f32 %v3643_v16, %v3389_v0 }
 0x24f   : > { %4678 = vmatmul.msk.bf16.gmra.mxu3 %vm1142_vm1, %v4942_v33 }
 0x250   : > { %v3740_v63 = vadd.f32 %v5953_v14, %v3704_v45  ;;  %v2703_v44 = vpop.f32.mrf.mxu1 }
 0x251   : > { %v3016_v10 = vpop.f32.mrf.mxu2  ;;  %v2761_v31 = vadd.f32 %v2703_v44, %v5864_v40 }
 0x252   : > { %v3075_v30 = vadd.f32 %v3016_v10, %v2760_v19  ;;  %3772 = vst [vmem:[%s5958_s21 + $0x68] sm:$0xff] %v3740_v63  ;;  %v3331_v58 = vpop.f32.mrf.mxu3 }
 0x253   : > { %v3648_v36 = vpop.f32.mrf.mxu0 }
 0x254   : > { %v3390_v27 = vadd.f32 %v3331_v58, %v3075_v30 }
 0x256   : > { %v3705_v62 = vadd.f32 %v3646_v35, %v3390_v27 }
 0x258   : > { %v3741_v37 = vadd.f32 %v5953_v14, %v3705_v62  ;;  %v2706_v28 = vpop.f32.mrf.mxu1 }
 0x259   : > { %v3018_v34 = vpop.f32.mrf.mxu2  ;;  %v2762_v49 = vadd.f32 %v2706_v28, %v5869_v56 }
 0x25a   : > { %v3076_v42 = vadd.f32 %v3018_v34, %v2761_v31  ;;  %3773 = vst [vmem:[%s5958_s21 + $0x70] sm:$0xff] %v3741_v37  ;;  %v3333_v51 = vpop.f32.mrf.mxu3 }
 0x25b   : > { %v3651_v23 = vpop.f32.mrf.mxu0 }
 0x25c   : > { %v3391_v21 = vadd.f32 %v3333_v51, %v3076_v42 }
 0x25e   : > { %v3706_v59 = vadd.f32 %v3648_v36, %v3391_v21 }
 0x260   : > { %v3742_v11 = vadd.f32 %v5953_v14, %v3706_v59  ;;  %v2708_v3 = vpop.f32.mrf.mxu1 }
 0x261   : > { %v3021_v2 = vpop.f32.mrf.mxu2  ;;  %v2763_v4 = vadd.f32 %v2708_v3, %v5874_v38 }
 0x262   : > { %v3077_v24 = vadd.f32 %v3021_v2, %v2762_v49  ;;  %3774 = vst [vmem:[%s5958_s21 + $0x78] sm:$0xff] %v3742_v11  ;;  %v3336_v40 = vpop.f32.mrf.mxu3 }
 0x263   : > { %v3653_v47 = vpop.f32.mrf.mxu0 }
 0x264   : > { %v3392_v29 = vadd.f32 %v3336_v40, %v3077_v24 }
 0x266   : > { %v3707_v57 = vadd.f32 %v3651_v23, %v3392_v29 }
 0x268   : > { %v3743_v13 = vadd.f32 %v5953_v14, %v3707_v57  ;;  %v2711_v39 = vpop.f32.mrf.mxu1 }
 0x269   : > { %v3023_v20 = vpop.f32.mrf.mxu2  ;;  %v2764_v61 = vadd.f32 %v2711_v39, %v5879_v52 }
 0x26a   : > { %v3078_v15 = vadd.f32 %v3023_v20, %v2763_v4  ;;  %3775 = vst [vmem:[%s5958_s21 + $0x80] sm:$0xff] %v3743_v13  ;;  %v3338_v56 = vpop.f32.mrf.mxu3 }
 0x26b   : > { %v3656_v6 = vpop.f32.mrf.mxu0 }
 0x26c   : > { %v3393_v1 = vadd.f32 %v3338_v56, %v3078_v15 }
 0x26e   : > { %v3708_v16 = vadd.f32 %v3653_v47, %v3393_v1 }
 0x270   : > { %v3744_v7 = vadd.f32 %v5953_v14, %v3708_v16  ;;  %v2713_v25 = vpop.f32.mrf.mxu1 }
 0x271   : > { %v3026_v12 = vpop.f32.mrf.mxu2  ;;  %v2765_v33 = vadd.f32 %v2713_v25, %v5884_v50 }
 0x272   : > { %v3079_v53 = vadd.f32 %v3026_v12, %v2764_v61  ;;  %3776 = vst [vmem:[%s5958_s21 + $0x88] sm:$0xff] %v3744_v7  ;;  %v3341_v38 = vpop.f32.mrf.mxu3 }
 0x273   : > { %v3658_v0 = vpop.f32.mrf.mxu0 }
 0x274   : > { %v3394_v18 = vadd.f32 %v3341_v38, %v3079_v53 }
 0x276   : > { %v3709_v5 = vadd.f32 %v3656_v6, %v3394_v18 }
 0x278   : > { %v3745_v8 = vadd.f32 %v5953_v14, %v3709_v5  ;;  %v2716_v35 = vpop.f32.mrf.mxu1 }
 0x279   : > { %v3028_v45 = vpop.f32.mrf.mxu2  ;;  %v2766_v30 = vadd.f32 %v2716_v35, %v5889_v55 }
 0x27a   : > { %v3080_v19 = vadd.f32 %v3028_v45, %v2765_v33  ;;  %3777 = vst [vmem:[%s5958_s21 + $0x90] sm:$0xff] %v3745_v8  ;;  %v3343_v52 = vpop.f32.mrf.mxu3 }
 0x27b   : > { %v3661_v44 = vpop.f32.mrf.mxu0 }
 0x27c   : > { %v3395_v63 = vadd.f32 %v3343_v52, %v3080_v19 }
 0x27e   : > { %v3710_v10 = vadd.f32 %v3658_v0, %v3395_v63 }
 0x280   : > { %v3746_v58 = vadd.f32 %v5953_v14, %v3710_v10  ;;  %v2718_v62 = vpop.f32.mrf.mxu1 }
 0x281   : > { %v3031_v27 = vpop.f32.mrf.mxu2  ;;  %v2767_v28 = vadd.f32 %v2718_v62, %v5894_v54 }
 0x282   : > { %v3081_v36 = vadd.f32 %v3031_v27, %v2766_v30  ;;  %3778 = vst [vmem:[%s5958_s21 + $0x98] sm:$0xff] %v3746_v58  ;;  %v3346_v50 = vpop.f32.mrf.mxu3 }
 0x283   : > { %v3663_v34 = vpop.f32.mrf.mxu0 }
 0x284   : > { %v3396_v31 = vadd.f32 %v3346_v50, %v3081_v36 }
 0x286   : > { %v3711_v37 = vadd.f32 %v3661_v44, %v3396_v31 }
 0x288   : > { %v3747_v42 = vadd.f32 %v5953_v14, %v3711_v37  ;;  %v2721_v21 = vpop.f32.mrf.mxu1 }
 0x289   : > { %v3033_v51 = vpop.f32.mrf.mxu2  ;;  %v2768_v2 = vadd.f32 %v2721_v21, %v5899_v17 }
 0x28a   : > { %v3082_v59 = vadd.f32 %v3033_v51, %v2767_v28  ;;  %3779 = vst [vmem:[%s5958_s21 + $0xa0] sm:$0xff] %v3747_v42  ;;  %v3348_v55 = vpop.f32.mrf.mxu3 }
 0x28b   : > { %v3666_v11 = vpop.f32.mrf.mxu0 }
 0x28c   : > { %v3397_v23 = vadd.f32 %v3348_v55, %v3082_v59 }
 0x28e   : > { %v3712_v49 = vadd.f32 %v3663_v34, %v3397_v23 }
 0x290   : > { %v3748_v3 = vadd.f32 %v5953_v14, %v3712_v49  ;;  %v2723_v40 = vpop.f32.mrf.mxu1 }
 0x291   : > { %v3036_v24 = vpop.f32.mrf.mxu2  ;;  %v2769_v13 = vadd.f32 %v2723_v40, %v5904_v22 }
 0x292   : > { %v3083_v29 = vadd.f32 %v3036_v24, %v2768_v2  ;;  %3780 = vst [vmem:[%s5958_s21 + $0xa8] sm:$0xff] %v3748_v3  ;;  %v3351_v54 = vpop.f32.mrf.mxu3 }
 0x293   : > { %v3668_v4 = vpop.f32.mrf.mxu0 }
 0x294   : > { %v3398_v57 = vadd.f32 %v3351_v54, %v3083_v29 }
 0x296   : > { %v3713_v47 = vadd.f32 %v3666_v11, %v3398_v57 }
 0x298   : > { %v3749_v20 = vadd.f32 %v5953_v14, %v3713_v47  ;;  %v2726_v15 = vpop.f32.mrf.mxu1 }
 0x299   : > { %v3038_v39 = vpop.f32.mrf.mxu2  ;;  %v2770_v61 = vadd.f32 %v2726_v15, %v5909_v46 }
 0x29a   : > { %v3084_v56 = vadd.f32 %v3038_v39, %v2769_v13  ;;  %3781 = vst [vmem:[%s5958_s21 + $0xb0] sm:$0xff] %v3749_v20  ;;  %v3353_v17 = vpop.f32.mrf.mxu3 }
 0x29b   : > { %v3671_v6 = vpop.f32.mrf.mxu0 }
 0x29c   : > { %v3399_v1 = vadd.f32 %v3353_v17, %v3084_v56 }
 0x29e   : > { %v3714_v16 = vadd.f32 %v3668_v4, %v3399_v1 }
 0x2a0   : > { %v3750_v7 = vadd.f32 %v5953_v14, %v3714_v16  ;;  %v2728_v25 = vpop.f32.mrf.mxu1 }
 0x2a1   : > { %v3041_v12 = vpop.f32.mrf.mxu2  ;;  %v2771_v0 = vadd.f32 %v2728_v25, %v5914_v41 }
 0x2a2   : > { %v3085_v53 = vadd.f32 %v3041_v12, %v2770_v61  ;;  %3782 = vst [vmem:[%s5958_s21 + $0xb8] sm:$0xff] %v3750_v7  ;;  %v3356_v22 = vpop.f32.mrf.mxu3 }
 0x2a3   : > { %v3673_v5 = vpop.f32.mrf.mxu0 }
 0x2a4   : > { %v3400_v38 = vadd.f32 %v3356_v22, %v3085_v53 }
 0x2a6   : > { %v3715_v18 = vadd.f32 %v3671_v6, %v3400_v38 }
 0x2a8   : > { %v3751_v33 = vadd.f32 %v5953_v14, %v3715_v18  ;;  %v2731_v45 = vpop.f32.mrf.mxu1 }
 0x2a9   : > { %v3043_v8 = vpop.f32.mrf.mxu2  ;;  %v2772_v10 = vadd.f32 %v2731_v45, %v5919_v9 }
 0x2aa   : > { %v3086_v35 = vadd.f32 %v3043_v8, %v2771_v0  ;;  %3783 = vst [vmem:[%s5958_s21 + $0xc0] sm:$0xff] %v3751_v33  ;;  %v3358_v46 = vpop.f32.mrf.mxu3 }
 0x2ab   : > { %v3676_v63 = vpop.f32.mrf.mxu0 }
 0x2ac   : > { %v3401_v19 = vadd.f32 %v3358_v46, %v3086_v35 }
 0x2ae   : > { %v3716_v52 = vadd.f32 %v3673_v5, %v3401_v19 }
 0x2b0   : > { %v3752_v44 = vadd.f32 %v5953_v14, %v3716_v52  ;;  %v2733_v58 = vpop.f32.mrf.mxu1 }
 0x2b1   : > { %v3046_v30 = vpop.f32.mrf.mxu2  ;;  %v2773_v31 = vadd.f32 %v2733_v58, %v5924_v43 }
 0x2b2   : > { %v3087_v27 = vadd.f32 %v3046_v30, %v2772_v10  ;;  %3784 = vst [vmem:[%s5958_s21 + $0xc8] sm:$0xff] %v3752_v44  ;;  %v3361_v41 = vpop.f32.mrf.mxu3 }
 0x2b3   : > { %v3678_v50 = vpop.f32.mrf.mxu0 }
 0x2b4   : > { %v3402_v62 = vadd.f32 %v3361_v41, %v3087_v27 }
 0x2b6   : > { %v3717_v36 = vadd.f32 %v3676_v63, %v3402_v62 }
 0x2b8   : > { %v3753_v37 = vadd.f32 %v5953_v14, %v3717_v36  ;;  %v2736_v28 = vpop.f32.mrf.mxu1 }
 0x2b9   : > { %v3048_v34 = vpop.f32.mrf.mxu2  ;;  %v2774_v59 = vadd.f32 %v2736_v28, %v5929_v60 }
 0x2ba   : > { %v3088_v42 = vadd.f32 %v3048_v34, %v2773_v31  ;;  %3785 = vst [vmem:[%s5958_s21 + $0xd0] sm:$0xff] %v3753_v37  ;;  %v3363_v9 = vpop.f32.mrf.mxu3 }
 0x2bb   : > { %v3681_v55 = vpop.f32.mrf.mxu0 }
 0x2bc   : > { %v3403_v51 = vadd.f32 %v3363_v9, %v3088_v42 }
 0x2be   : > { %v3718_v21 = vadd.f32 %v3678_v50, %v3403_v51 }
 0x2c0   : > { %v3754_v23 = vadd.f32 %v5953_v14, %v3718_v21  ;;  %v2738_v11 = vpop.f32.mrf.mxu1 }
 0x2c1   : > { %v3051_v49 = vpop.f32.mrf.mxu2  ;;  %v2775_v40 = vadd.f32 %v2738_v11, %v5934_v26 }
 0x2c2   : > { %v3089_v2 = vadd.f32 %v3051_v49, %v2774_v59  ;;  %3786 = vst [vmem:[%s5958_s21 + $0xd8] sm:$0xff] %v3754_v23  ;;  %v3366_v43 = vpop.f32.mrf.mxu3 }
 0x2c3   : > { %v3683_v57 = vpop.f32.mrf.mxu0 }
 0x2c4   : > { %v3404_v3 = vadd.f32 %v3366_v43, %v3089_v2 }
 0x2c6   : > { %v3719_v24 = vadd.f32 %v3681_v55, %v3404_v3 }
 0x2c8   : > { %v3755_v29 = vadd.f32 %v5953_v14, %v3719_v24  ;;  %v2741_v60 = vpop.f32.mrf.mxu1 }
 0x2c9   : > { %v3053_v54 = vpop.f32.mrf.mxu2  ;;  %v2776_v39 = vadd.f32 %v2741_v60, %v5939_v32 }
 0x2ca   : > { %v3090_v47 = vadd.f32 %v3053_v54, %v2775_v40  ;;  %3787 = vst [vmem:[%s5958_s21 + $0xe0] sm:$0xff] %v3755_v29  ;;  %v3368_v4 = vpop.f32.mrf.mxu3 }
 0x2cb   : > { %v3686_v26 = vpop.f32.mrf.mxu0 }
 0x2cc   : > { %v3405_v13 = vadd.f32 %v3368_v4, %v3090_v47 }
 0x2ce   : > { %v3720_v20 = vadd.f32 %v3683_v57, %v3405_v13 }
 0x2d0   : > { %v3756_v15 = vadd.f32 %v5953_v14, %v3720_v20  ;;  %v2743_v6 = vpop.f32.mrf.mxu1 }
 0x2d1   : > { %v3056_v56 = vpop.f32.mrf.mxu2  ;;  %v2777_v7 = vadd.f32 %v2743_v6, %v5944_v48 }
 0x2d2   : > { %v3091_v17 = vadd.f32 %v3056_v56, %v2776_v39  ;;  %3788 = vst [vmem:[%s5958_s21 + $0xe8] sm:$0xff] %v3756_v15  ;;  %v3371_v1 = vpop.f32.mrf.mxu3 }
 0x2d3   : > { %v3688_v38 = vpop.f32.mrf.mxu0 }
 0x2d4   : > { %v3406_v16 = vadd.f32 %v3371_v1, %v3091_v17 }
 0x2d6   : > { %v3721_v61 = vadd.f32 %v3686_v26, %v3406_v16 }
 0x2d8   : > { %v3757_v12 = vadd.f32 %v5953_v14, %v3721_v61 }
 0x2d9   : > { %v3058_v25 = vpop.f32.mrf.mxu2 }
 0x2da   : > { %v3092_v53 = vadd.f32 %v3058_v25, %v2777_v7  ;;  %3789 = vst [vmem:[%s5958_s21 + $0xf0] sm:$0xff] %v3757_v12  ;;  %v3373_v22 = vpop.f32.mrf.mxu3 }
 0x2dc   : > { %v3407_v32 = vadd.f32 %v3373_v22, %v3092_v53 }
 0x2de   : > { %v3722_v18 = vadd.f32 %v3688_v38, %v3407_v32 }
 0x2e0   : > { %v3758_v5 = vadd.f32 %v5953_v14, %v3722_v18 }
 0x2e2   : > { %3790 = vst [vmem:[%s5958_s21 + $0xf8] sm:$0xff] %v3758_v5 }
 0x2e3 PF: > { %s13_s12 = sadd.s32 1, %s4995_s12  }
 0x2e4   : > { %p10_p4 = scmp.ge.s32.totalorder %s13_s12, 4  }
 0x2e6   :  { %12 = sbr.rel (!%p10_p4) target bundleno = 1 (0x1), region = 79 }

</bundles_post_ra>
